<compile_context>
chip_gen: v7x
topology: tpu7x:2x2x1
jax: 0.10.0
libtpu: 0.0.40
codegen_flags: <defaults>
</compile_context>

<pallas_src>
import functools
import math

import jax
import jax.numpy as jnp
from jax.experimental import pallas as pl
from jax.experimental.pallas import tpu as pltpu


# --------------------------- in-kernel helpers -------------------------------

def _mm(a, w_bf16):
    """bf16 x bf16 matmul with f32 accumulation (MXU)."""
    return jnp.dot(a.astype(jnp.bfloat16), w_bf16, preferred_element_type=jnp.float32)


def _ln(x, g, b, eps=1e-5):
    """LayerNorm over the last axis, f32 math (PyTorch default eps)."""
    mu = jnp.mean(x, axis=-1, keepdims=True)
    xc = x - mu
    var = jnp.mean(xc * xc, axis=-1, keepdims=True)
    return xc * jax.lax.rsqrt(var + eps) * g + b


def _erf(x):
    """erf via Abramowitz & Stegun 7.1.26 (|err| <= 1.5e-7); only exp/mul/add/where."""
    a1, a2, a3, a4, a5 = 0.254829592, -0.284496736, 1.421413741, -1.453152027, 1.061405429
    p = 0.3275911
    sgn = jnp.where(x >= 0.0, 1.0, -1.0)
    ax = jnp.abs(x)
    t = 1.0 / (1.0 + p * ax)
    poly = ((((a5 * t + a4) * t + a3) * t + a2) * t + a1) * t
    return sgn * (1.0 - poly * jnp.exp(-ax * ax))


def _gelu(x):
    """Exact-style (erf) GELU matching nn.GELU default."""
    return 0.5 * x * (1.0 + _erf(x * (1.0 / math.sqrt(2.0))))


def _attention(qkv, *, heads, B, S, D, key_valid):
    """Multi-head attention on the batch-flattened qkv (B*S, 3D) -> (B*S, D) f32.

    Per-head slices are lane-tile aligned (Dh is a multiple of 128), per-batch row slices are
    sublane aligned (S is a multiple of 8). Padded key positions (>= key_valid) are masked.
    """
    Dh = D // heads
    scale = 1.0 / math.sqrt(Dh)
    if key_valid < S:
        col = jax.lax.broadcasted_iota(jnp.int32, (S, S), 1)
        score_bias = jnp.where(col < key_valid, 0.0, -1e30).astype(jnp.float32)
    else:
        score_bias = None

    batch_rows = []
    for b in range(B):                                   # static unroll (B small)
        r0 = b * S
        head_out = []
        for h in range(heads):                           # static unroll, aligned slices
            c0 = h * Dh
            qh = qkv[r0:r0 + S, c0:c0 + Dh].astype(jnp.bfloat16)
            kh = qkv[r0:r0 + S, D + c0:D + c0 + Dh].astype(jnp.bfloat16)
            vh = qkv[r0:r0 + S, 2 * D + c0:2 * D + c0 + Dh].astype(jnp.bfloat16)
            s = jax.lax.dot_general(qh, kh, (((1,), (1,)), ((), ())),
                                    preferred_element_type=jnp.float32) * scale
            if score_bias is not None:
                s = s + score_bias
            m = jnp.max(s, axis=-1, keepdims=True)
            p = jnp.exp(s - m)
            inv = pl.reciprocal(jnp.sum(p, axis=-1, keepdims=True), approx=True)
            p = (p * inv).astype(jnp.bfloat16)
            head_out.append(jax.lax.dot_general(p, vh, (((1,), (0,)), ((), ())),
                                                preferred_element_type=jnp.float32))
        batch_rows.append(head_out[0] if heads == 1 else jnp.concatenate(head_out, axis=-1))
    return batch_rows[0] if B == 1 else jnp.concatenate(batch_rows, axis=0)


def _encoder_block(x, wqkv, wo, w1, w2, sp, *, heads, B, S, D, F, pre_norm, key_valid):
    """One encoder layer on the batch-flattened activations x: (B*S, D) f32.

    sp packs the small per-layer params (rows): 0 bqkv | 1 b1 | 2 bo | 3 b2 |
    4 ln1_g | 5 ln1_b | 6 ln2_g | 7 ln2_b.
    """
    bqkv = sp[0:1, :3 * D]
    b1 = sp[1:2, :F]
    bo = sp[2:3, :D]
    b2 = sp[3:4, :D]
    ln1g, ln1b = sp[4:5, :D], sp[5:6, :D]
    ln2g, ln2b = sp[6:7, :D], sp[7:8, :D]

    h = _ln(x, ln1g, ln1b) if pre_norm else x
    qkv = _mm(h, wqkv) + bqkv                              # fused Q|K|V projection
    ctx = _attention(qkv, heads=heads, B=B, S=S, D=D, key_valid=key_valid)
    attn_out = _mm(ctx, wo) + bo

    if pre_norm:                                           # ViT: pre-norm, GELU MLP
        x = x + attn_out
        h = _ln(x, ln2g, ln2b)
        h = _gelu(_mm(h, w1) + b1)
        return x + _mm(h, w2) + b2
    else:                                                  # text: post-norm, ReLU FF
        x = _ln(x + attn_out, ln1g, ln1b)
        h = jnp.maximum(_mm(x, w1) + b1, 0.0)
        return _ln(x + _mm(h, w2) + b2, ln2g, ln2b)


# --------------------------- tower kernels (one pallas_call each) ------------

def _vision_tower_kernel(patches_ref, pw_ref, pb_ref, place_ref, poscls_ref,
                         wqkv_ref, wo_ref, w1_ref, w2_ref, small_ref,
                         pool_ref, projw_ref, projb_ref,
                         out_ref, acts_ref, *, heads, B, S, D, F, depth, key_valid):
    l = pl.program_id(0)

    @pl.when(l == 0)                                       # embed: patches -> tokens in VMEM
    def _():
        tok = _mm(patches_ref[...], pw_ref[...]) + pb_ref[...]            # (B*P, D)
        acts_ref[...] = (jnp.dot(place_ref[...], tok.astype(jnp.bfloat16),
                                 preferred_element_type=jnp.float32)      # scatter + pad
                         + poscls_ref[...])                               # CLS + pos fused

    x = _encoder_block(acts_ref[...], wqkv_ref[0], wo_ref[0], w1_ref[0], w2_ref[0],
                       small_ref[0], heads=heads, B=B, S=S, D=D, F=F,
                       pre_norm=True, key_valid=key_valid)
    acts_ref[...] = x

    @pl.when(l == depth - 1)                               # masked mean-pool + projection
    def _():
        pooled = jnp.dot(pool_ref[...], x.astype(jnp.bfloat16),
                         preferred_element_type=jnp.float32)              # (B, D)
        out_ref[...] = _mm(pooled, projw_ref[...]) + projb_ref[...]


def _text_tower_kernel(x0_ref, wqkv_ref, wo_ref, w1_ref, w2_ref, small_ref,
                       pool_ref, projw_ref, projb_ref,
                       out_ref, acts_ref, *, heads, B, S, D, F, depth):
    l = pl.program_id(0)

    @pl.when(l == 0)
    def _():
        acts_ref[...] = x0_ref[...]

    x = _encoder_block(acts_ref[...], wqkv_ref[0], wo_ref[0], w1_ref[0], w2_ref[0],
                       small_ref[0], heads=heads, B=B, S=S, D=D, F=F,
                       pre_norm=False, key_valid=S)
    acts_ref[...] = x

    @pl.when(l == depth - 1)
    def _():
        pooled = jnp.dot(pool_ref[...], x.astype(jnp.bfloat16),
                         preferred_element_type=jnp.float32)
        out_ref[...] = _mm(pooled, projw_ref[...]) + projb_ref[...]


# --------------------------- pallas_call plumbing ----------------------------

def _rep_spec(arr):
    """Whole array, same block for every layer step (DMA'd once)."""
    zeros = (0,) * arr.ndim
    return pl.BlockSpec(arr.shape, lambda l, _z=zeros: _z)


def _layer_spec(arr):
    """Stacked per-layer weights: one layer slice per grid step (auto double-buffered)."""
    ztail = (0,) * (arr.ndim - 1)
    return pl.BlockSpec((1,) + arr.shape[1:], lambda l, _z=ztail: (l,) + _z)


_TOWER_PARAMS = pltpu.CompilerParams(
    dimension_semantics=("arbitrary",),          # layers are sequential (scratch carries state)
    vmem_limit_bytes=32 * 1024 * 1024,           # safe on v5e/v6e/v7x; toy sizes use far less
)


def _round_up(x, m):
    return (x + m - 1) // m * m


def _pool_matrix(B, S, start, count):
    """(B, B*S) bf16 masked-mean matrix: 1/count on positions [start, start+count) of row b."""
    cols = jnp.arange(B * S)
    b_of, p_of = cols // S, cols % S
    valid = (p_of >= start) & (p_of < start + count)
    mat = jnp.where((b_of[None, :] == jnp.arange(B)[:, None]) & valid[None, :],
                    1.0 / count, 0.0)
    return mat.astype(jnp.bfloat16)


def vision_tower(images, vp, vcfg, proj_dim):
    B, C, H, W = images.shape
    ps, D = vcfg["patch"], vcfg["emb"]
    F = D * vcfg["mlp_ratio"]
    depth, heads = vcfg["depth"], vcfg["heads"]
    nh, nw = H // ps, W // ps
    P = nh * nw
    S = _round_up(P + 1, 8)                                # pad CLS+patches to full sublanes

    # TODO(synk): patchify (NCHW reshape/transpose) stays in plain JAX; at real image sizes it
    # should be folded into the embed kernel's DMA via a per-patch index_map.
    patches = (images.reshape(B, C, nh, ps, nw, ps)
                     .transpose(0, 2, 4, 1, 3, 5)
                     .reshape(B * P, C * ps * ps))

    # Tiny embed-time constants (aligned-MXU scatter of patch tokens + CLS/pos, masked pool).
    seq0 = vp["pos"].at[0].add(vp["cls"][0])               # (P+1, D): row0 = pos0 + cls
    if S > P + 1:
        seq0 = jnp.concatenate([seq0, jnp.zeros((S - (P + 1), D), jnp.float32)], axis=0)
    pos_cls = jnp.tile(seq0, (B, 1))                       # (B*S, D)
    cols = jnp.arange(B * P)
    rows = (cols // P) * S + (cols % P) + 1
    place = (jnp.zeros((B * S, B * P), jnp.float32)
             .at[rows, cols].set(1.0).astype(jnp.bfloat16))
    pool = _pool_matrix(B, S, 1, P)                        # mean over patch tokens, drop CLS

    kernel = functools.partial(_vision_tower_kernel, heads=heads, B=B, S=S, D=D, F=F,
                               depth=depth, key_valid=P + 1)
    inputs = (patches, vp["patch_w"], vp["patch_b"], place, pos_cls,
              vp["wqkv"], vp["wo"], vp["w1"], vp["w2"], vp["small"],
              pool, vp["proj_w"], vp["proj_b"])
    in_specs = [_rep_spec(patches), _rep_spec(vp["patch_w"]), _rep_spec(vp["patch_b"]),
                _rep_spec(place), _rep_spec(pos_cls),
                _layer_spec(vp["wqkv"]), _layer_spec(vp["wo"]),
                _layer_spec(vp["w1"]), _layer_spec(vp["w2"]), _layer_spec(vp["small"]),
                _rep_spec(pool), _rep_spec(vp["proj_w"]), _rep_spec(vp["proj_b"])]

    return pl.pallas_call(
        kernel,
        grid=(depth,),
        out_shape=jax.ShapeDtypeStruct((B, proj_dim), jnp.float32),
        in_specs=in_specs,
        out_specs=pl.BlockSpec((B, proj_dim), lambda l: (0, 0)),
        scratch_shapes=[pltpu.VMEM((B * S, D), jnp.float32)],   # resident activations
        compiler_params=_TOWER_PARAMS,
    )(*inputs)


def text_tower(texts, tp, tcfg, proj_dim):
    B, S = texts.shape
    D = tcfg["emb"]
    F = D * tcfg["ffn_ratio"]
    depth, heads = tcfg["depth"], tcfg["heads"]

    # TODO(synk): token-embedding lookup is a data-dependent gather; it stays in plain JAX.
    x0 = (jnp.take(tp["tok_emb"], texts, axis=0)
          + tp["pos_emb"][:S][None, :, :]).reshape(B * S, D).astype(jnp.float32)
    pool = _pool_matrix(B, S, 0, S)                        # mean over the full sequence

    kernel = functools.partial(_text_tower_kernel, heads=heads, B=B, S=S, D=D, F=F,
                               depth=depth)
    inputs = (x0, tp["wqkv"], tp["wo"], tp["w1"], tp["w2"], tp["small"],
              pool, tp["proj_w"], tp["proj_b"])
    in_specs = [_rep_spec(x0),
                _layer_spec(tp["wqkv"]), _layer_spec(tp["wo"]),
                _layer_spec(tp["w1"]), _layer_spec(tp["w2"]), _layer_spec(tp["small"]),
                _rep_spec(pool), _rep_spec(tp["proj_w"]), _rep_spec(tp["proj_b"])]

    return pl.pallas_call(
        kernel,
        grid=(depth,),
        out_shape=jax.ShapeDtypeStruct((B, proj_dim), jnp.float32),
        in_specs=in_specs,
        out_specs=pl.BlockSpec((B, proj_dim), lambda l: (0, 0)),
        scratch_shapes=[pltpu.VMEM((B * S, D), jnp.float32)],
        compiler_params=_TOWER_PARAMS,
    )(*inputs)


def clip_forward(images, texts, params, cfg):
    img_emb = vision_tower(images, params["vision"], cfg["vision"], cfg["proj"])
    txt_emb = text_tower(texts, params["text"], cfg["text"], cfg["proj"])
    return img_emb, txt_emb


# --------------------------- deterministic parameter init --------------------

def _dense(key, fin, fout):
    kw, kb = jax.random.split(key)
    w = (jax.random.normal(kw, (fin, fout), jnp.float32) * 0.02).astype(jnp.bfloat16)
    b = jax.random.normal(kb, (fout,), jnp.float32) * 0.02
    return w, b


def _init_tower_blocks(key, depth, D, ratio):
    """Stacked per-layer weights + one packed small-param array (biases / LN gains / betas)."""
    F = D * ratio
    maxw = max(3 * D, F, D)
    wqkv, wo, w1, w2, small = [], [], [], [], []
    for kd in jax.random.split(key, depth):
        k1, k2, k3, k4 = jax.random.split(kd, 4)
        wq, bq = _dense(k1, D, 3 * D)
        wo_, bo_ = _dense(k2, D, D)
        w1_, b1_ = _dense(k3, D, F)
        w2_, b2_ = _dense(k4, F, D)
        sp = jnp.zeros((8, maxw), jnp.float32)
        sp = sp.at[0, :3 * D].set(bq)
        sp = sp.at[1, :F].set(b1_)
        sp = sp.at[2, :D].set(bo_)
        sp = sp.at[3, :D].set(b2_)
        sp = sp.at[4, :D].set(1.0)      # ln1 gamma
        sp = sp.at[6, :D].set(1.0)      # ln2 gamma   (betas stay 0)
        wqkv.append(wq); wo.append(wo_); w1.append(w1_); w2.append(w2_); small.append(sp)
    return dict(wqkv=jnp.stack(wqkv), wo=jnp.stack(wo), w1=jnp.stack(w1),
                w2=jnp.stack(w2), small=jnp.stack(small))


def init_clip_params(key, cfg):
    vcfg, tcfg, proj = cfg["vision"], cfg["text"], cfg["proj"]
    kv, kt, kvp, ktp = jax.random.split(key, 4)

    D = vcfg["emb"]
    ps, C = vcfg["patch"], vcfg["in_ch"]
    P = (vcfg["img"] // ps) ** 2
    kv1, kv2, kv3, kv4 = jax.random.split(kv, 4)
    pw, pb = _dense(kv1, C * ps * ps, D)
    vpw, vpb = _dense(kvp, D, proj)
    vision = dict(
        patch_w=pw, patch_b=pb[None, :],
        cls=jax.random.normal(kv2, (1, D), jnp.float32) * 0.02,
        pos=jax.random.normal(kv3, (P + 1, D), jnp.float32) * 0.02,
        proj_w=vpw, proj_b=vpb[None, :],
        **_init_tower_blocks(kv4, vcfg["depth"], D, vcfg["mlp_ratio"]),
    )

    Dt = tcfg["emb"]
    kt1, kt2, kt3 = jax.random.split(kt, 3)
    tpw, tpb = _dense(ktp, Dt, proj)
    text = dict(
        tok_emb=jax.random.normal(kt1, (tcfg["vocab"], Dt), jnp.float32) * 0.02,
        pos_emb=jax.random.normal(kt2, (tcfg["max_len"], Dt), jnp.float32) * 0.02,
        proj_w=tpw, proj_b=tpb[None, :],
        **_init_tower_blocks(kt3, tcfg["depth"], Dt, tcfg["ffn_ratio"]),
    )
    return dict(vision=vision, text=text)


# --------------------------- main ---------------------------------------------

if __name__ == "__main__":
    # Small-shape configuration consistent with the module structure (patchified ViT with CLS
    # token, transformer text encoder, linear projections). emb chosen as 256 with 2 heads so
    # every matmul K/N is a multiple of 256 and per-head slices are 128-lane aligned.
    cfg = dict(
        vision=dict(img=32, patch=16, in_ch=3, emb=256, depth=2, heads=2, mlp_ratio=4),
        text=dict(vocab=120, emb=256, depth=2, heads=2, ffn_ratio=4, max_len=16),
        proj=256,
    )
    key = jax.random.PRNGKey(0)
    kp, ki, kt = jax.random.split(key, 3)

    params = init_clip_params(kp, cfg)
    images = jax.random.normal(ki, (2, 3, 32, 32), jnp.float32)           # NCHW like PyTorch
    texts = jax.random.randint(kt, (2, 8), 0, cfg["text"]["vocab"], dtype=jnp.int32)

    fwd = jax.jit(lambda im, tx, prm: clip_forward(im, tx, prm, cfg))
    img_emb, txt_emb = fwd(images, texts, params)
    jax.block_until_ready((img_emb, txt_emb))

    assert img_emb.shape == (2, cfg["proj"]), img_emb.shape
    assert txt_emb.shape == (2, cfg["proj"]), txt_emb.shape
    assert bool(jnp.all(jnp.isfinite(img_emb))) and bool(jnp.all(jnp.isfinite(txt_emb)))
    print("KERNEL_OK")
</pallas_src>

<mosaic_0001>
module attributes {stable_mosaic.version = 11 : i64} {
  func.func @_text_tower_kernel(%arg0: i32, %arg1: memref<16x256xf32, #tpu.memory_space<vmem>>, %arg2: memref<1x256x768xbf16, #tpu.memory_space<vmem>>, %arg3: memref<1x256x256xbf16, #tpu.memory_space<vmem>>, %arg4: memref<1x256x1024xbf16, #tpu.memory_space<vmem>>, %arg5: memref<1x1024x256xbf16, #tpu.memory_space<vmem>>, %arg6: memref<1x8x1024xf32, #tpu.memory_space<vmem>>, %arg7: memref<2x16xbf16, #tpu.memory_space<vmem>>, %arg8: memref<256x256xbf16, #tpu.memory_space<vmem>>, %arg9: memref<1x256xf32, #tpu.memory_space<vmem>>, %arg10: memref<2x256xf32, #tpu.memory_space<vmem>>, %arg11: memref<16x256xf32, #tpu.memory_space<vmem>>) attributes {dimension_semantics = [#tpu.dimension_semantics<arbitrary>], iteration_bounds = array<i64: 2>, scalar_prefetch = 0 : i64, scratch_operands = 1 : i64, tpu.core_type = #tpu.core_type<tc>, window_params = [{pipeline_mode = #tpu.pipeline_mode<synchronous>, transform_indices = @transform_0, window_bounds = array<i64: 16, 256>}, {transform_indices = @transform_1, window_bounds = array<i64: 1, 256, 768>}, {transform_indices = @transform_2, window_bounds = array<i64: 1, 256, 256>}, {transform_indices = @transform_3, window_bounds = array<i64: 1, 256, 1024>}, {transform_indices = @transform_4, window_bounds = array<i64: 1, 1024, 256>}, {transform_indices = @transform_5, window_bounds = array<i64: 1, 8, 1024>}, {pipeline_mode = #tpu.pipeline_mode<synchronous>, transform_indices = @transform_6, window_bounds = array<i64: 2, 16>}, {pipeline_mode = #tpu.pipeline_mode<synchronous>, transform_indices = @transform_7, window_bounds = array<i64: 256, 256>}, {pipeline_mode = #tpu.pipeline_mode<synchronous>, transform_indices = @transform_8, window_bounds = array<i64: 1, 256>}, {pipeline_mode = #tpu.pipeline_mode<synchronous>, transform_indices = @transform_9, window_bounds = array<i64: 2, 256>}]} {
    %c0_i32 = arith.constant 0 : i32
    %0 = arith.cmpi eq, %arg0, %c0_i32 : i32
    %1 = arith.extui %0 : i1 to i32
    %c0_i32_0 = arith.constant 0 : i32
    %2 = arith.cmpi ne, %1, %c0_i32_0 : i32
    scf.if %2 {
      %c0_54 = arith.constant 0 : index
      %c0_55 = arith.constant 0 : index
      %173 = vector.load %arg1[%c0_54, %c0_55] : memref<16x256xf32, #tpu.memory_space<vmem>>, vector<16x256xf32>
      %c0_56 = arith.constant 0 : index
      %c0_57 = arith.constant 0 : index
      %174 = vector.load %arg11[%c0_56, %c0_57] : memref<16x256xf32, #tpu.memory_space<vmem>>, vector<16x256xf32>
      tpu.vector_store %arg11[%c0_56, %c0_57], %173 {strides = array<i32>} : memref<16x256xf32, #tpu.memory_space<vmem>>, vector<16x256xf32>,
    } else {
    }
    %c0 = arith.constant 0 : index
    %c0_1 = arith.constant 0 : index
    %3 = vector.load %arg11[%c0, %c0_1] : memref<16x256xf32, #tpu.memory_space<vmem>>, vector<16x256xf32>
    %c0_2 = arith.constant 0 : index
    %c0_3 = arith.constant 0 : index
    %c0_4 = arith.constant 0 : index
    %4 = vector.load %arg2[%c0_2, %c0_3, %c0_4] : memref<1x256x768xbf16, #tpu.memory_space<vmem>>, vector<1x256x768xbf16>
    %5 = vector.shape_cast %4 : vector<1x256x768xbf16> to vector<256x768xbf16>
    %c0_5 = arith.constant 0 : index
    %c0_6 = arith.constant 0 : index
    %c0_7 = arith.constant 0 : index
    %6 = vector.load %arg3[%c0_5, %c0_6, %c0_7] : memref<1x256x256xbf16, #tpu.memory_space<vmem>>, vector<1x256x256xbf16>
    %7 = vector.shape_cast %6 : vector<1x256x256xbf16> to vector<256x256xbf16>
    %c0_8 = arith.constant 0 : index
    %c0_9 = arith.constant 0 : index
    %c0_10 = arith.constant 0 : index
    %8 = vector.load %arg4[%c0_8, %c0_9, %c0_10] : memref<1x256x1024xbf16, #tpu.memory_space<vmem>>, vector<1x256x1024xbf16>
    %9 = vector.shape_cast %8 : vector<1x256x1024xbf16> to vector<256x1024xbf16>
    %c0_11 = arith.constant 0 : index
    %c0_12 = arith.constant 0 : index
    %c0_13 = arith.constant 0 : index
    %10 = vector.load %arg5[%c0_11, %c0_12, %c0_13] : memref<1x1024x256xbf16, #tpu.memory_space<vmem>>, vector<1x1024x256xbf16>
    %11 = vector.shape_cast %10 : vector<1x1024x256xbf16> to vector<1024x256xbf16>
    %c0_14 = arith.constant 0 : index
    %c0_15 = arith.constant 0 : index
    %c0_16 = arith.constant 0 : index
    %12 = vector.load %arg6[%c0_14, %c0_15, %c0_16] : memref<1x8x1024xf32, #tpu.memory_space<vmem>>, vector<1x8x1024xf32>
    %13 = vector.shape_cast %12 : vector<1x8x1024xf32> to vector<8x1024xf32>
    %14 = vector.extract_strided_slice %13 {offsets = [0, 0], sizes = [1, 768], strides = [1, 1]} : vector<8x1024xf32> to vector<1x768xf32>
    %15 = vector.extract_strided_slice %13 {offsets = [1, 0], sizes = [1, 1024], strides = [1, 1]} : vector<8x1024xf32> to vector<1x1024xf32>
    %16 = vector.extract_strided_slice %13 {offsets = [2, 0], sizes = [1, 256], strides = [1, 1]} : vector<8x1024xf32> to vector<1x256xf32>
    %17 = vector.extract_strided_slice %13 {offsets = [3, 0], sizes = [1, 256], strides = [1, 1]} : vector<8x1024xf32> to vector<1x256xf32>
    %18 = vector.extract_strided_slice %13 {offsets = [4, 0], sizes = [1, 256], strides = [1, 1]} : vector<8x1024xf32> to vector<1x256xf32>
    %19 = vector.extract_strided_slice %13 {offsets = [5, 0], sizes = [1, 256], strides = [1, 1]} : vector<8x1024xf32> to vector<1x256xf32>
    %20 = vector.extract_strided_slice %13 {offsets = [6, 0], sizes = [1, 256], strides = [1, 1]} : vector<8x1024xf32> to vector<1x256xf32>
    %21 = vector.extract_strided_slice %13 {offsets = [7, 0], sizes = [1, 256], strides = [1, 1]} : vector<8x1024xf32> to vector<1x256xf32>
    %22 = arith.truncf %3 : vector<16x256xf32> to vector<16x256xbf16>
    %cst = arith.constant dense<0.000000e+00> : vector<16x768xf32>
    %23 = tpu.matmul %22, %5, %cst {dimension_numbers = #tpu.dot_dimension_numbers<[1], [0], [0], [1], [0, 0, 1, 1], [], []>} : vector<16x256xbf16>, vector<256x768xbf16>, vector<16x768xf32> -> vector<16x768xf32>
    %24 = vector.broadcast %14 : vector<1x768xf32> to vector<16x768xf32>
    %25 = arith.addf %23, %24 : vector<16x768xf32>
    %26 = vector.extract_strided_slice %25 {offsets = [0, 0], sizes = [8, 128], strides = [1, 1]} : vector<16x768xf32> to vector<8x128xf32>
    %27 = arith.truncf %26 : vector<8x128xf32> to vector<8x128xbf16>
    %28 = vector.extract_strided_slice %25 {offsets = [0, 256], sizes = [8, 128], strides = [1, 1]} : vector<16x768xf32> to vector<8x128xf32>
    %29 = arith.truncf %28 : vector<8x128xf32> to vector<8x128xbf16>
    %30 = vector.extract_strided_slice %25 {offsets = [0, 512], sizes = [8, 128], strides = [1, 1]} : vector<16x768xf32> to vector<8x128xf32>
    %31 = arith.truncf %30 : vector<8x128xf32> to vector<8x128xbf16>
    %cst_17 = arith.constant dense<0.000000e+00> : vector<8x8xf32>
    %32 = tpu.matmul %27, %29, %cst_17 {dimension_numbers = #tpu.dot_dimension_numbers<[1], [1], [0], [0], [0, 0, 1, 0], [], []>} : vector<8x128xbf16>, vector<8x128xbf16>, vector<8x8xf32> -> vector<8x8xf32>
    %cst_18 = arith.constant 0.0883883461 : f32
    %33 = vector.broadcast %cst_18 : f32 to vector<8x8xf32>
    %34 = arith.mulf %32, %33 : vector<8x8xf32>
    %cst_19 = arith.constant dense<0xFF800000> : vector<8xf32>
    %35 = vector.multi_reduction <maximumf>, %34, %cst_19 [1] : vector<8x8xf32> to vector<8xf32>
    %36 = vector.shape_cast %35 : vector<8xf32> to vector<8x1xf32>
    %37 = vector.broadcast %36 : vector<8x1xf32> to vector<8x8xf32>
    %38 = arith.subf %34, %37 : vector<8x8xf32>
    %39 = math.exp %38 : vector<8x8xf32>
    %cst_20 = arith.constant dense<0.000000e+00> : vector<8xf32>
    %40 = vector.multi_reduction <add>, %39, %cst_20 [1] : vector<8x8xf32> to vector<8xf32>
    %41 = vector.shape_cast %40 : vector<8xf32> to vector<8x1xf32>
    %42 = tpu.reciprocal %41 {approx = true} : vector<8x1xf32> -> vector<8x1xf32>
    %43 = vector.broadcast %42 : vector<8x1xf32> to vector<8x8xf32>
    %44 = arith.mulf %39, %43 : vector<8x8xf32>
    %45 = arith.truncf %44 : vector<8x8xf32> to vector<8x8xbf16>
    %cst_21 = arith.constant dense<0.000000e+00> : vector<8x128xf32>
    %46 = tpu.matmul %45, %31, %cst_21 {dimension_numbers = #tpu.dot_dimension_numbers<[1], [0], [0], [1], [0, 0, 1, 1], [], []>} : vector<8x8xbf16>, vector<8x128xbf16>, vector<8x128xf32> -> vector<8x128xf32>
    %47 = vector.extract_strided_slice %25 {offsets = [0, 128], sizes = [8, 128], strides = [1, 1]} : vector<16x768xf32> to vector<8x128xf32>
    %48 = arith.truncf %47 : vector<8x128xf32> to vector<8x128xbf16>
    %49 = vector.extract_strided_slice %25 {offsets = [0, 384], sizes = [8, 128], strides = [1, 1]} : vector<16x768xf32> to vector<8x128xf32>
    %50 = arith.truncf %49 : vector<8x128xf32> to vector<8x128xbf16>
    %51 = vector.extract_strided_slice %25 {offsets = [0, 640], sizes = [8, 128], strides = [1, 1]} : vector<16x768xf32> to vector<8x128xf32>
    %52 = arith.truncf %51 : vector<8x128xf32> to vector<8x128xbf16>
    %cst_22 = arith.constant dense<0.000000e+00> : vector<8x8xf32>
    %53 = tpu.matmul %48, %50, %cst_22 {dimension_numbers = #tpu.dot_dimension_numbers<[1], [1], [0], [0], [0, 0, 1, 0], [], []>} : vector<8x128xbf16>, vector<8x128xbf16>, vector<8x8xf32> -> vector<8x8xf32>
    %cst_23 = arith.constant 0.0883883461 : f32
    %54 = vector.broadcast %cst_23 : f32 to vector<8x8xf32>
    %55 = arith.mulf %53, %54 : vector<8x8xf32>
    %cst_24 = arith.constant dense<0xFF800000> : vector<8xf32>
    %56 = vector.multi_reduction <maximumf>, %55, %cst_24 [1] : vector<8x8xf32> to vector<8xf32>
    %57 = vector.shape_cast %56 : vector<8xf32> to vector<8x1xf32>
    %58 = vector.broadcast %57 : vector<8x1xf32> to vector<8x8xf32>
    %59 = arith.subf %55, %58 : vector<8x8xf32>
    %60 = math.exp %59 : vector<8x8xf32>
    %cst_25 = arith.constant dense<0.000000e+00> : vector<8xf32>
    %61 = vector.multi_reduction <add>, %60, %cst_25 [1] : vector<8x8xf32> to vector<8xf32>
    %62 = vector.shape_cast %61 : vector<8xf32> to vector<8x1xf32>
    %63 = tpu.reciprocal %62 {approx = true} : vector<8x1xf32> -> vector<8x1xf32>
    %64 = vector.broadcast %63 : vector<8x1xf32> to vector<8x8xf32>
    %65 = arith.mulf %60, %64 : vector<8x8xf32>
    %66 = arith.truncf %65 : vector<8x8xf32> to vector<8x8xbf16>
    %cst_26 = arith.constant dense<0.000000e+00> : vector<8x128xf32>
    %67 = tpu.matmul %66, %52, %cst_26 {dimension_numbers = #tpu.dot_dimension_numbers<[1], [0], [0], [1], [0, 0, 1, 1], [], []>} : vector<8x8xbf16>, vector<8x128xbf16>, vector<8x128xf32> -> vector<8x128xf32>
    %68 = tpu.concatenate %46, %67 in 1 : vector<8x128xf32>, vector<8x128xf32> -> vector<8x256xf32>
    %69 = vector.extract_strided_slice %25 {offsets = [8, 0], sizes = [8, 128], strides = [1, 1]} : vector<16x768xf32> to vector<8x128xf32>
    %70 = arith.truncf %69 : vector<8x128xf32> to vector<8x128xbf16>
    %71 = vector.extract_strided_slice %25 {offsets = [8, 256], sizes = [8, 128], strides = [1, 1]} : vector<16x768xf32> to vector<8x128xf32>
    %72 = arith.truncf %71 : vector<8x128xf32> to vector<8x128xbf16>
    %73 = vector.extract_strided_slice %25 {offsets = [8, 512], sizes = [8, 128], strides = [1, 1]} : vector<16x768xf32> to vector<8x128xf32>
    %74 = arith.truncf %73 : vector<8x128xf32> to vector<8x128xbf16>
    %cst_27 = arith.constant dense<0.000000e+00> : vector<8x8xf32>
    %75 = tpu.matmul %70, %72, %cst_27 {dimension_numbers = #tpu.dot_dimension_numbers<[1], [1], [0], [0], [0, 0, 1, 0], [], []>} : vector<8x128xbf16>, vector<8x128xbf16>, vector<8x8xf32> -> vector<8x8xf32>
    %cst_28 = arith.constant 0.0883883461 : f32
    %76 = vector.broadcast %cst_28 : f32 to vector<8x8xf32>
    %77 = arith.mulf %75, %76 : vector<8x8xf32>
    %cst_29 = arith.constant dense<0xFF800000> : vector<8xf32>
    %78 = vector.multi_reduction <maximumf>, %77, %cst_29 [1] : vector<8x8xf32> to vector<8xf32>
    %79 = vector.shape_cast %78 : vector<8xf32> to vector<8x1xf32>
    %80 = vector.broadcast %79 : vector<8x1xf32> to vector<8x8xf32>
    %81 = arith.subf %77, %80 : vector<8x8xf32>
    %82 = math.exp %81 : vector<8x8xf32>
    %cst_30 = arith.constant dense<0.000000e+00> : vector<8xf32>
    %83 = vector.multi_reduction <add>, %82, %cst_30 [1] : vector<8x8xf32> to vector<8xf32>
    %84 = vector.shape_cast %83 : vector<8xf32> to vector<8x1xf32>
    %85 = tpu.reciprocal %84 {approx = true} : vector<8x1xf32> -> vector<8x1xf32>
    %86 = vector.broadcast %85 : vector<8x1xf32> to vector<8x8xf32>
    %87 = arith.mulf %82, %86 : vector<8x8xf32>
    %88 = arith.truncf %87 : vector<8x8xf32> to vector<8x8xbf16>
    %cst_31 = arith.constant dense<0.000000e+00> : vector<8x128xf32>
    %89 = tpu.matmul %88, %74, %cst_31 {dimension_numbers = #tpu.dot_dimension_numbers<[1], [0], [0], [1], [0, 0, 1, 1], [], []>} : vector<8x8xbf16>, vector<8x128xbf16>, vector<8x128xf32> -> vector<8x128xf32>
    %90 = vector.extract_strided_slice %25 {offsets = [8, 128], sizes = [8, 128], strides = [1, 1]} : vector<16x768xf32> to vector<8x128xf32>
    %91 = arith.truncf %90 : vector<8x128xf32> to vector<8x128xbf16>
    %92 = vector.extract_strided_slice %25 {offsets = [8, 384], sizes = [8, 128], strides = [1, 1]} : vector<16x768xf32> to vector<8x128xf32>
    %93 = arith.truncf %92 : vector<8x128xf32> to vector<8x128xbf16>
    %94 = vector.extract_strided_slice %25 {offsets = [8, 640], sizes = [8, 128], strides = [1, 1]} : vector<16x768xf32> to vector<8x128xf32>
    %95 = arith.truncf %94 : vector<8x128xf32> to vector<8x128xbf16>
    %cst_32 = arith.constant dense<0.000000e+00> : vector<8x8xf32>
    %96 = tpu.matmul %91, %93, %cst_32 {dimension_numbers = #tpu.dot_dimension_numbers<[1], [1], [0], [0], [0, 0, 1, 0], [], []>} : vector<8x128xbf16>, vector<8x128xbf16>, vector<8x8xf32> -> vector<8x8xf32>
    %cst_33 = arith.constant 0.0883883461 : f32
    %97 = vector.broadcast %cst_33 : f32 to vector<8x8xf32>
    %98 = arith.mulf %96, %97 : vector<8x8xf32>
    %cst_34 = arith.constant dense<0xFF800000> : vector<8xf32>
    %99 = vector.multi_reduction <maximumf>, %98, %cst_34 [1] : vector<8x8xf32> to vector<8xf32>
    %100 = vector.shape_cast %99 : vector<8xf32> to vector<8x1xf32>
    %101 = vector.broadcast %100 : vector<8x1xf32> to vector<8x8xf32>
    %102 = arith.subf %98, %101 : vector<8x8xf32>
    %103 = math.exp %102 : vector<8x8xf32>
    %cst_35 = arith.constant dense<0.000000e+00> : vector<8xf32>
    %104 = vector.multi_reduction <add>, %103, %cst_35 [1] : vector<8x8xf32> to vector<8xf32>
    %105 = vector.shape_cast %104 : vector<8xf32> to vector<8x1xf32>
    %106 = tpu.reciprocal %105 {approx = true} : vector<8x1xf32> -> vector<8x1xf32>
    %107 = vector.broadcast %106 : vector<8x1xf32> to vector<8x8xf32>
    %108 = arith.mulf %103, %107 : vector<8x8xf32>
    %109 = arith.truncf %108 : vector<8x8xf32> to vector<8x8xbf16>
    %cst_36 = arith.constant dense<0.000000e+00> : vector<8x128xf32>
    %110 = tpu.matmul %109, %95, %cst_36 {dimension_numbers = #tpu.dot_dimension_numbers<[1], [0], [0], [1], [0, 0, 1, 1], [], []>} : vector<8x8xbf16>, vector<8x128xbf16>, vector<8x128xf32> -> vector<8x128xf32>
    %111 = tpu.concatenate %89, %110 in 1 : vector<8x128xf32>, vector<8x128xf32> -> vector<8x256xf32>
    %112 = tpu.concatenate %68, %111 in 0 : vector<8x256xf32>, vector<8x256xf32> -> vector<16x256xf32>
    %113 = arith.truncf %112 : vector<16x256xf32> to vector<16x256xbf16>
    %cst_37 = arith.constant dense<0.000000e+00> : vector<16x256xf32>
    %114 = tpu.matmul %113, %7, %cst_37 {dimension_numbers = #tpu.dot_dimension_numbers<[1], [0], [0], [1], [0, 0, 1, 1], [], []>} : vector<16x256xbf16>, vector<256x256xbf16>, vector<16x256xf32> -> vector<16x256xf32>
    %115 = vector.broadcast %16 : vector<1x256xf32> to vector<16x256xf32>
    %116 = arith.addf %114, %115 : vector<16x256xf32>
    %117 = arith.addf %3, %116 : vector<16x256xf32>
    %cst_38 = arith.constant dense<0.000000e+00> : vector<16xf32>
    %118 = vector.multi_reduction <add>, %117, %cst_38 [1] : vector<16x256xf32> to vector<16xf32>
    %119 = vector.shape_cast %118 : vector<16xf32> to vector<16x1xf32>
    %cst_39 = arith.constant 2.560000e+02 : f32
    %120 = vector.broadcast %cst_39 : f32 to vector<16x1xf32>
    %121 = arith.divf %119, %120 : vector<16x1xf32>
    %122 = vector.broadcast %121 : vector<16x1xf32> to vector<16x256xf32>
    %123 = arith.subf %117, %122 : vector<16x256xf32>
    %124 = arith.mulf %123, %123 : vector<16x256xf32>
    %cst_40 = arith.constant dense<0.000000e+00> : vector<16xf32>
    %125 = vector.multi_reduction <add>, %124, %cst_40 [1] : vector<16x256xf32> to vector<16xf32>
    %126 = vector.shape_cast %125 : vector<16xf32> to vector<16x1xf32>
    %cst_41 = arith.constant 2.560000e+02 : f32
    %127 = vector.broadcast %cst_41 : f32 to vector<16x1xf32>
    %128 = arith.divf %126, %127 : vector<16x1xf32>
    %cst_42 = arith.constant 9.99999974E-6 : f32
    %129 = vector.broadcast %cst_42 : f32 to vector<16x1xf32>
    %130 = arith.addf %128, %129 : vector<16x1xf32>
    %131 = math.rsqrt %130 : vector<16x1xf32>
    %132 = vector.broadcast %131 : vector<16x1xf32> to vector<16x256xf32>
    %133 = arith.mulf %123, %132 : vector<16x256xf32>
    %134 = vector.broadcast %18 : vector<1x256xf32> to vector<16x256xf32>
    %135 = arith.mulf %133, %134 : vector<16x256xf32>
    %136 = vector.broadcast %19 : vector<1x256xf32> to vector<16x256xf32>
    %137 = arith.addf %135, %136 : vector<16x256xf32>
    %138 = arith.truncf %137 : vector<16x256xf32> to vector<16x256xbf16>
    %cst_43 = arith.constant dense<0.000000e+00> : vector<16x1024xf32>
    %139 = tpu.matmul %138, %9, %cst_43 {dimension_numbers = #tpu.dot_dimension_numbers<[1], [0], [0], [1], [0, 0, 1, 1], [], []>} : vector<16x256xbf16>, vector<256x1024xbf16>, vector<16x1024xf32> -> vector<16x1024xf32>
    %140 = vector.broadcast %15 : vector<1x1024xf32> to vector<16x1024xf32>
    %141 = arith.addf %139, %140 : vector<16x1024xf32>
    %cst_44 = arith.constant 0.000000e+00 : f32
    %142 = vector.broadcast %cst_44 : f32 to vector<16x1024xf32>
    %143 = arith.maximumf %141, %142 : vector<16x1024xf32>
    %144 = arith.truncf %143 : vector<16x1024xf32> to vector<16x1024xbf16>
    %cst_45 = arith.constant dense<0.000000e+00> : vector<16x256xf32>
    %145 = tpu.matmul %144, %11, %cst_45 {dimension_numbers = #tpu.dot_dimension_numbers<[1], [0], [0], [1], [0, 0, 1, 1], [], []>} : vector<16x1024xbf16>, vector<1024x256xbf16>, vector<16x256xf32> -> vector<16x256xf32>
    %146 = arith.addf %137, %145 : vector<16x256xf32>
    %147 = vector.broadcast %17 : vector<1x256xf32> to vector<16x256xf32>
    %148 = arith.addf %146, %147 : vector<16x256xf32>
    %cst_46 = arith.constant dense<0.000000e+00> : vector<16xf32>
    %149 = vector.multi_reduction <add>, %148, %cst_46 [1] : vector<16x256xf32> to vector<16xf32>
    %150 = vector.shape_cast %149 : vector<16xf32> to vector<16x1xf32>
    %cst_47 = arith.constant 2.560000e+02 : f32
    %151 = vector.broadcast %cst_47 : f32 to vector<16x1xf32>
    %152 = arith.divf %150, %151 : vector<16x1xf32>
    %153 = vector.broadcast %152 : vector<16x1xf32> to vector<16x256xf32>
    %154 = arith.subf %148, %153 : vector<16x256xf32>
    %155 = arith.mulf %154, %154 : vector<16x256xf32>
    %cst_48 = arith.constant dense<0.000000e+00> : vector<16xf32>
    %156 = vector.multi_reduction <add>, %155, %cst_48 [1] : vector<16x256xf32> to vector<16xf32>
    %157 = vector.shape_cast %156 : vector<16xf32> to vector<16x1xf32>
    %cst_49 = arith.constant 2.560000e+02 : f32
    %158 = vector.broadcast %cst_49 : f32 to vector<16x1xf32>
    %159 = arith.divf %157, %158 : vector<16x1xf32>
    %cst_50 = arith.constant 9.99999974E-6 : f32
    %160 = vector.broadcast %cst_50 : f32 to vector<16x1xf32>
    %161 = arith.addf %159, %160 : vector<16x1xf32>
    %162 = math.rsqrt %161 : vector<16x1xf32>
    %163 = vector.broadcast %162 : vector<16x1xf32> to vector<16x256xf32>
    %164 = arith.mulf %154, %163 : vector<16x256xf32>
    %165 = vector.broadcast %20 : vector<1x256xf32> to vector<16x256xf32>
    %166 = arith.mulf %164, %165 : vector<16x256xf32>
    %167 = vector.broadcast %21 : vector<1x256xf32> to vector<16x256xf32>
    %168 = arith.addf %166, %167 : vector<16x256xf32>
    %c0_51 = arith.constant 0 : index
    %c0_52 = arith.constant 0 : index
    %169 = vector.load %arg11[%c0_51, %c0_52] : memref<16x256xf32, #tpu.memory_space<vmem>>, vector<16x256xf32>
    tpu.vector_store %arg11[%c0_51, %c0_52], %168 {strides = array<i32>} : memref<16x256xf32, #tpu.memory_space<vmem>>, vector<16x256xf32>,
    %c1_i32 = arith.constant 1 : i32
    %170 = arith.cmpi eq, %arg0, %c1_i32 : i32
    %171 = arith.extui %170 : i1 to i32
    %c0_i32_53 = arith.constant 0 : i32
    %172 = arith.cmpi ne, %171, %c0_i32_53 : i32
    scf.if %172 {
      %c0_54 = arith.constant 0 : index
      %c0_55 = arith.constant 0 : index
      %173 = vector.load %arg7[%c0_54, %c0_55] : memref<2x16xbf16, #tpu.memory_space<vmem>>, vector<2x16xbf16>
      %174 = arith.truncf %168 : vector<16x256xf32> to vector<16x256xbf16>
      %cst_56 = arith.constant dense<0.000000e+00> : vector<2x256xf32>
      %175 = tpu.matmul %173, %174, %cst_56 {dimension_numbers = #tpu.dot_dimension_numbers<[1], [0], [0], [1], [0, 0, 1, 1], [], []>} : vector<2x16xbf16>, vector<16x256xbf16>, vector<2x256xf32> -> vector<2x256xf32>
      %c0_57 = arith.constant 0 : index
      %c0_58 = arith.constant 0 : index
      %176 = vector.load %arg8[%c0_57, %c0_58] : memref<256x256xbf16, #tpu.memory_space<vmem>>, vector<256x256xbf16>
      %177 = arith.truncf %175 : vector<2x256xf32> to vector<2x256xbf16>
      %cst_59 = arith.constant dense<0.000000e+00> : vector<2x256xf32>
      %178 = tpu.matmul %177, %176, %cst_59 {dimension_numbers = #tpu.dot_dimension_numbers<[1], [0], [0], [1], [0, 0, 1, 1], [], []>} : vector<2x256xbf16>, vector<256x256xbf16>, vector<2x256xf32> -> vector<2x256xf32>
      %c0_60 = arith.constant 0 : index
      %c0_61 = arith.constant 0 : index
      %179 = vector.load %arg9[%c0_60, %c0_61] : memref<1x256xf32, #tpu.memory_space<vmem>>, vector<1x256xf32>
      %180 = vector.broadcast %179 : vector<1x256xf32> to vector<2x256xf32>
      %181 = arith.addf %178, %180 : vector<2x256xf32>
      %c0_62 = arith.constant 0 : index
      %c0_63 = arith.constant 0 : index
      %182 = vector.load %arg10[%c0_62, %c0_63] : memref<2x256xf32, #tpu.memory_space<vmem>>, vector<2x256xf32>
      tpu.vector_store %arg10[%c0_62, %c0_63], %181 {strides = array<i32>} : memref<2x256xf32, #tpu.memory_space<vmem>>, vector<2x256xf32>,
    } else {
    }
    return
  }
  func.func @transform_0(%arg0: i32) -> (i32, i32) {
    %c0_i32 = arith.constant 0 : i32
    %c0_i32_0 = arith.constant 0 : i32
    %c0_i32_1 = arith.constant 0 : i32
    return %c0_i32, %c0_i32_0 : i32, i32
  }
  func.func @transform_1(%arg0: i32) -> (i32, i32, i32) {
    %c0_i32 = arith.constant 0 : i32
    %c0_i32_0 = arith.constant 0 : i32
    %c0_i32_1 = arith.constant 0 : i32
    return %arg0, %c0_i32, %c0_i32_0 : i32, i32, i32
  }
  func.func @transform_2(%arg0: i32) -> (i32, i32, i32) {
    %c0_i32 = arith.constant 0 : i32
    %c0_i32_0 = arith.constant 0 : i32
    %c0_i32_1 = arith.constant 0 : i32
    return %arg0, %c0_i32, %c0_i32_0 : i32, i32, i32
  }
  func.func @transform_3(%arg0: i32) -> (i32, i32, i32) {
    %c0_i32 = arith.constant 0 : i32
    %c0_i32_0 = arith.constant 0 : i32
    %c0_i32_1 = arith.constant 0 : i32
    return %arg0, %c0_i32, %c0_i32_0 : i32, i32, i32
  }
  func.func @transform_4(%arg0: i32) -> (i32, i32, i32) {
    %c0_i32 = arith.constant 0 : i32
    %c0_i32_0 = arith.constant 0 : i32
    %c0_i32_1 = arith.constant 0 : i32
    return %arg0, %c0_i32, %c0_i32_0 : i32, i32, i32
  }
  func.func @transform_5(%arg0: i32) -> (i32, i32, i32) {
    %c0_i32 = arith.constant 0 : i32
    %c0_i32_0 = arith.constant 0 : i32
    %c0_i32_1 = arith.constant 0 : i32
    return %arg0, %c0_i32, %c0_i32_0 : i32, i32, i32
  }
  func.func @transform_6(%arg0: i32) -> (i32, i32) {
    %c0_i32 = arith.constant 0 : i32
    %c0_i32_0 = arith.constant 0 : i32
    %c0_i32_1 = arith.constant 0 : i32
    return %c0_i32, %c0_i32_0 : i32, i32
  }
  func.func @transform_7(%arg0: i32) -> (i32, i32) {
    %c0_i32 = arith.constant 0 : i32
    %c0_i32_0 = arith.constant 0 : i32
    %c0_i32_1 = arith.constant 0 : i32
    return %c0_i32, %c0_i32_0 : i32, i32
  }
  func.func @transform_8(%arg0: i32) -> (i32, i32) {
    %c0_i32 = arith.constant 0 : i32
    %c0_i32_0 = arith.constant 0 : i32
    %c0_i32_1 = arith.constant 0 : i32
    return %c0_i32, %c0_i32_0 : i32, i32
  }
  func.func @transform_9(%arg0: i32) -> (i32, i32) {
    %c0_i32 = arith.constant 0 : i32
    %c0_i32_0 = arith.constant 0 : i32
    %c0_i32_1 = arith.constant 0 : i32
    return %c0_i32, %c0_i32_0 : i32, i32
  }
}

module attributes {stable_mosaic.version = 11 : i64} {
  func.func @_vision_tower_kernel(%arg0: i32, %arg1: memref<8x768xf32, #tpu.memory_space<vmem>>, %arg2: memref<768x256xbf16, #tpu.memory_space<vmem>>, %arg3: memref<1x256xf32, #tpu.memory_space<vmem>>, %arg4: memref<16x8xbf16, #tpu.memory_space<vmem>>, %arg5: memref<16x256xf32, #tpu.memory_space<vmem>>, %arg6: memref<1x256x768xbf16, #tpu.memory_space<vmem>>, %arg7: memref<1x256x256xbf16, #tpu.memory_space<vmem>>, %arg8: memref<1x256x1024xbf16, #tpu.memory_space<vmem>>, %arg9: memref<1x1024x256xbf16, #tpu.memory_space<vmem>>, %arg10: memref<1x8x1024xf32, #tpu.memory_space<vmem>>, %arg11: memref<2x16xbf16, #tpu.memory_space<vmem>>, %arg12: memref<256x256xbf16, #tpu.memory_space<vmem>>, %arg13: memref<1x256xf32, #tpu.memory_space<vmem>>, %arg14: memref<2x256xf32, #tpu.memory_space<vmem>>, %arg15: memref<16x256xf32, #tpu.memory_space<vmem>>) attributes {dimension_semantics = [#tpu.dimension_semantics<arbitrary>], iteration_bounds = array<i64: 2>, scalar_prefetch = 0 : i64, scratch_operands = 1 : i64, tpu.core_type = #tpu.core_type<tc>, window_params = [{pipeline_mode = #tpu.pipeline_mode<synchronous>, transform_indices = @transform_0, window_bounds = array<i64: 8, 768>}, {pipeline_mode = #tpu.pipeline_mode<synchronous>, transform_indices = @transform_1, window_bounds = array<i64: 768, 256>}, {pipeline_mode = #tpu.pipeline_mode<synchronous>, transform_indices = @transform_2, window_bounds = array<i64: 1, 256>}, {pipeline_mode = #tpu.pipeline_mode<synchronous>, transform_indices = @transform_3, window_bounds = array<i64: 16, 8>}, {pipeline_mode = #tpu.pipeline_mode<synchronous>, transform_indices = @transform_4, window_bounds = array<i64: 16, 256>}, {transform_indices = @transform_5, window_bounds = array<i64: 1, 256, 768>}, {transform_indices = @transform_6, window_bounds = array<i64: 1, 256, 256>}, {transform_indices = @transform_7, window_bounds = array<i64: 1, 256, 1024>}, {transform_indices = @transform_8, window_bounds = array<i64: 1, 1024, 256>}, {transform_indices = @transform_9, window_bounds = array<i64: 1, 8, 1024>}, {pipeline_mode = #tpu.pipeline_mode<synchronous>, transform_indices = @transform_10, window_bounds = array<i64: 2, 16>}, {pipeline_mode = #tpu.pipeline_mode<synchronous>, transform_indices = @transform_11, window_bounds = array<i64: 256, 256>}, {pipeline_mode = #tpu.pipeline_mode<synchronous>, transform_indices = @transform_12, window_bounds = array<i64: 1, 256>}, {pipeline_mode = #tpu.pipeline_mode<synchronous>, transform_indices = @transform_13, window_bounds = array<i64: 2, 256>}]} {
    %c0_i32 = arith.constant 0 : i32
    %0 = arith.cmpi eq, %arg0, %c0_i32 : i32
    %1 = arith.extui %0 : i1 to i32
    %c0_i32_0 = arith.constant 0 : i32
    %2 = arith.cmpi ne, %1, %c0_i32_0 : i32
    scf.if %2 {
      %c0_71 = arith.constant 0 : index
      %c0_72 = arith.constant 0 : index
      %222 = vector.load %arg1[%c0_71, %c0_72] : memref<8x768xf32, #tpu.memory_space<vmem>>, vector<8x768xf32>
      %c0_73 = arith.constant 0 : index
      %c0_74 = arith.constant 0 : index
      %223 = vector.load %arg2[%c0_73, %c0_74] : memref<768x256xbf16, #tpu.memory_space<vmem>>, vector<768x256xbf16>
      %224 = arith.truncf %222 : vector<8x768xf32> to vector<8x768xbf16>
      %cst_75 = arith.constant dense<0.000000e+00> : vector<8x256xf32>
      %225 = tpu.matmul %224, %223, %cst_75 {dimension_numbers = #tpu.dot_dimension_numbers<[1], [0], [0], [1], [0, 0, 1, 1], [], []>} : vector<8x768xbf16>, vector<768x256xbf16>, vector<8x256xf32> -> vector<8x256xf32>
      %c0_76 = arith.constant 0 : index
      %c0_77 = arith.constant 0 : index
      %226 = vector.load %arg3[%c0_76, %c0_77] : memref<1x256xf32, #tpu.memory_space<vmem>>, vector<1x256xf32>
      %227 = vector.broadcast %226 : vector<1x256xf32> to vector<8x256xf32>
      %228 = arith.addf %225, %227 : vector<8x256xf32>
      %c0_78 = arith.constant 0 : index
      %c0_79 = arith.constant 0 : index
      %229 = vector.load %arg4[%c0_78, %c0_79] : memref<16x8xbf16, #tpu.memory_space<vmem>>, vector<16x8xbf16>
      %230 = arith.truncf %228 : vector<8x256xf32> to vector<8x256xbf16>
      %cst_80 = arith.constant dense<0.000000e+00> : vector<16x256xf32>
      %231 = tpu.matmul %229, %230, %cst_80 {dimension_numbers = #tpu.dot_dimension_numbers<[1], [0], [0], [1], [0, 0, 1, 1], [], []>} : vector<16x8xbf16>, vector<8x256xbf16>, vector<16x256xf32> -> vector<16x256xf32>
      %c0_81 = arith.constant 0 : index
      %c0_82 = arith.constant 0 : index
      %232 = vector.load %arg5[%c0_81, %c0_82] : memref<16x256xf32, #tpu.memory_space<vmem>>, vector<16x256xf32>
      %233 = arith.addf %231, %232 : vector<16x256xf32>
      %c0_83 = arith.constant 0 : index
      %c0_84 = arith.constant 0 : index
      %234 = vector.load %arg15[%c0_83, %c0_84] : memref<16x256xf32, #tpu.memory_space<vmem>>, vector<16x256xf32>
      tpu.vector_store %arg15[%c0_83, %c0_84], %233 {strides = array<i32>} : memref<16x256xf32, #tpu.memory_space<vmem>>, vector<16x256xf32>,
    } else {
    }
    %c0 = arith.constant 0 : index
    %c0_1 = arith.constant 0 : index
    %3 = vector.load %arg15[%c0, %c0_1] : memref<16x256xf32, #tpu.memory_space<vmem>>, vector<16x256xf32>
    %c0_2 = arith.constant 0 : index
    %c0_3 = arith.constant 0 : index
    %c0_4 = arith.constant 0 : index
    %4 = vector.load %arg6[%c0_2, %c0_3, %c0_4] : memref<1x256x768xbf16, #tpu.memory_space<vmem>>, vector<1x256x768xbf16>
    %5 = vector.shape_cast %4 : vector<1x256x768xbf16> to vector<256x768xbf16>
    %c0_5 = arith.constant 0 : index
    %c0_6 = arith.constant 0 : index
    %c0_7 = arith.constant 0 : index
    %6 = vector.load %arg7[%c0_5, %c0_6, %c0_7] : memref<1x256x256xbf16, #tpu.memory_space<vmem>>, vector<1x256x256xbf16>
    %7 = vector.shape_cast %6 : vector<1x256x256xbf16> to vector<256x256xbf16>
    %c0_8 = arith.constant 0 : index
    %c0_9 = arith.constant 0 : index
    %c0_10 = arith.constant 0 : index
    %8 = vector.load %arg8[%c0_8, %c0_9, %c0_10] : memref<1x256x1024xbf16, #tpu.memory_space<vmem>>, vector<1x256x1024xbf16>
    %9 = vector.shape_cast %8 : vector<1x256x1024xbf16> to vector<256x1024xbf16>
    %c0_11 = arith.constant 0 : index
    %c0_12 = arith.constant 0 : index
    %c0_13 = arith.constant 0 : index
    %10 = vector.load %arg9[%c0_11, %c0_12, %c0_13] : memref<1x1024x256xbf16, #tpu.memory_space<vmem>>, vector<1x1024x256xbf16>
    %11 = vector.shape_cast %10 : vector<1x1024x256xbf16> to vector<1024x256xbf16>
    %c0_14 = arith.constant 0 : index
    %c0_15 = arith.constant 0 : index
    %c0_16 = arith.constant 0 : index
    %12 = vector.load %arg10[%c0_14, %c0_15, %c0_16] : memref<1x8x1024xf32, #tpu.memory_space<vmem>>, vector<1x8x1024xf32>
    %13 = vector.shape_cast %12 : vector<1x8x1024xf32> to vector<8x1024xf32>
    %14 = vector.extract_strided_slice %13 {offsets = [0, 0], sizes = [1, 768], strides = [1, 1]} : vector<8x1024xf32> to vector<1x768xf32>
    %15 = vector.extract_strided_slice %13 {offsets = [1, 0], sizes = [1, 1024], strides = [1, 1]} : vector<8x1024xf32> to vector<1x1024xf32>
    %16 = vector.extract_strided_slice %13 {offsets = [2, 0], sizes = [1, 256], strides = [1, 1]} : vector<8x1024xf32> to vector<1x256xf32>
    %17 = vector.extract_strided_slice %13 {offsets = [3, 0], sizes = [1, 256], strides = [1, 1]} : vector<8x1024xf32> to vector<1x256xf32>
    %18 = vector.extract_strided_slice %13 {offsets = [4, 0], sizes = [1, 256], strides = [1, 1]} : vector<8x1024xf32> to vector<1x256xf32>
    %19 = vector.extract_strided_slice %13 {offsets = [5, 0], sizes = [1, 256], strides = [1, 1]} : vector<8x1024xf32> to vector<1x256xf32>
    %20 = vector.extract_strided_slice %13 {offsets = [6, 0], sizes = [1, 256], strides = [1, 1]} : vector<8x1024xf32> to vector<1x256xf32>
    %21 = vector.extract_strided_slice %13 {offsets = [7, 0], sizes = [1, 256], strides = [1, 1]} : vector<8x1024xf32> to vector<1x256xf32>
    %cst = arith.constant dense<0.000000e+00> : vector<16xf32>
    %22 = vector.multi_reduction <add>, %3, %cst [1] : vector<16x256xf32> to vector<16xf32>
    %23 = vector.shape_cast %22 : vector<16xf32> to vector<16x1xf32>
    %cst_17 = arith.constant 2.560000e+02 : f32
    %24 = vector.broadcast %cst_17 : f32 to vector<16x1xf32>
    %25 = arith.divf %23, %24 : vector<16x1xf32>
    %26 = vector.broadcast %25 : vector<16x1xf32> to vector<16x256xf32>
    %27 = arith.subf %3, %26 : vector<16x256xf32>
    %28 = arith.mulf %27, %27 : vector<16x256xf32>
    %cst_18 = arith.constant dense<0.000000e+00> : vector<16xf32>
    %29 = vector.multi_reduction <add>, %28, %cst_18 [1] : vector<16x256xf32> to vector<16xf32>
    %30 = vector.shape_cast %29 : vector<16xf32> to vector<16x1xf32>
    %cst_19 = arith.constant 2.560000e+02 : f32
    %31 = vector.broadcast %cst_19 : f32 to vector<16x1xf32>
    %32 = arith.divf %30, %31 : vector<16x1xf32>
    %cst_20 = arith.constant 9.99999974E-6 : f32
    %33 = vector.broadcast %cst_20 : f32 to vector<16x1xf32>
    %34 = arith.addf %32, %33 : vector<16x1xf32>
    %35 = math.rsqrt %34 : vector<16x1xf32>
    %36 = vector.broadcast %35 : vector<16x1xf32> to vector<16x256xf32>
    %37 = arith.mulf %27, %36 : vector<16x256xf32>
    %38 = vector.broadcast %18 : vector<1x256xf32> to vector<16x256xf32>
    %39 = arith.mulf %37, %38 : vector<16x256xf32>
    %40 = vector.broadcast %19 : vector<1x256xf32> to vector<16x256xf32>
    %41 = arith.addf %39, %40 : vector<16x256xf32>
    %42 = arith.truncf %41 : vector<16x256xf32> to vector<16x256xbf16>
    %cst_21 = arith.constant dense<0.000000e+00> : vector<16x768xf32>
    %43 = tpu.matmul %42, %5, %cst_21 {dimension_numbers = #tpu.dot_dimension_numbers<[1], [0], [0], [1], [0, 0, 1, 1], [], []>} : vector<16x256xbf16>, vector<256x768xbf16>, vector<16x768xf32> -> vector<16x768xf32>
    %44 = vector.broadcast %14 : vector<1x768xf32> to vector<16x768xf32>
    %45 = arith.addf %43, %44 : vector<16x768xf32>
    %46 = tpu.iota {dimensions = array<i32: 1>} : vector<8x8xi32>
    %c5_i32 = arith.constant 5 : i32
    %47 = vector.broadcast %c5_i32 : i32 to vector<8x8xi32>
    %48 = arith.cmpi slt, %46, %47 : vector<8x8xi32>
    %cst_22 = arith.constant 0.000000e+00 : f32
    %cst_23 = arith.constant -1.000000e+30 : f32
    %49 = vector.broadcast %cst_22 : f32 to vector<8x8xf32>
    %50 = vector.broadcast %cst_23 : f32 to vector<8x8xf32>
    %51 = arith.select %48, %49, %50 : vector<8x8xi1>, vector<8x8xf32>
    %52 = vector.extract_strided_slice %45 {offsets = [0, 0], sizes = [8, 128], strides = [1, 1]} : vector<16x768xf32> to vector<8x128xf32>
    %53 = arith.truncf %52 : vector<8x128xf32> to vector<8x128xbf16>
    %54 = vector.extract_strided_slice %45 {offsets = [0, 256], sizes = [8, 128], strides = [1, 1]} : vector<16x768xf32> to vector<8x128xf32>
    %55 = arith.truncf %54 : vector<8x128xf32> to vector<8x128xbf16>
    %56 = vector.extract_strided_slice %45 {offsets = [0, 512], sizes = [8, 128], strides = [1, 1]} : vector<16x768xf32> to vector<8x128xf32>
    %57 = arith.truncf %56 : vector<8x128xf32> to vector<8x128xbf16>
    %cst_24 = arith.constant dense<0.000000e+00> : vector<8x8xf32>
    %58 = tpu.matmul %53, %55, %cst_24 {dimension_numbers = #tpu.dot_dimension_numbers<[1], [1], [0], [0], [0, 0, 1, 0], [], []>} : vector<8x128xbf16>, vector<8x128xbf16>, vector<8x8xf32> -> vector<8x8xf32>
    %cst_25 = arith.constant 0.0883883461 : f32
    %59 = vector.broadcast %cst_25 : f32 to vector<8x8xf32>
    %60 = arith.mulf %58, %59 : vector<8x8xf32>
    %61 = arith.addf %60, %51 : vector<8x8xf32>
    %cst_26 = arith.constant dense<0xFF800000> : vector<8xf32>
    %62 = vector.multi_reduction <maximumf>, %61, %cst_26 [1] : vector<8x8xf32> to vector<8xf32>
    %63 = vector.shape_cast %62 : vector<8xf32> to vector<8x1xf32>
    %64 = vector.broadcast %63 : vector<8x1xf32> to vector<8x8xf32>
    %65 = arith.subf %61, %64 : vector<8x8xf32>
    %66 = math.exp %65 : vector<8x8xf32>
    %cst_27 = arith.constant dense<0.000000e+00> : vector<8xf32>
    %67 = vector.multi_reduction <add>, %66, %cst_27 [1] : vector<8x8xf32> to vector<8xf32>
    %68 = vector.shape_cast %67 : vector<8xf32> to vector<8x1xf32>
    %69 = tpu.reciprocal %68 {approx = true} : vector<8x1xf32> -> vector<8x1xf32>
    %70 = vector.broadcast %69 : vector<8x1xf32> to vector<8x8xf32>
    %71 = arith.mulf %66, %70 : vector<8x8xf32>
    %72 = arith.truncf %71 : vector<8x8xf32> to vector<8x8xbf16>
    %cst_28 = arith.constant dense<0.000000e+00> : vector<8x128xf32>
    %73 = tpu.matmul %72, %57, %cst_28 {dimension_numbers = #tpu.dot_dimension_numbers<[1], [0], [0], [1], [0, 0, 1, 1], [], []>} : vector<8x8xbf16>, vector<8x128xbf16>, vector<8x128xf32> -> vector<8x128xf32>
    %74 = vector.extract_strided_slice %45 {offsets = [0, 128], sizes = [8, 128], strides = [1, 1]} : vector<16x768xf32> to vector<8x128xf32>
    %75 = arith.truncf %74 : vector<8x128xf32> to vector<8x128xbf16>
    %76 = vector.extract_strided_slice %45 {offsets = [0, 384], sizes = [8, 128], strides = [1, 1]} : vector<16x768xf32> to vector<8x128xf32>
    %77 = arith.truncf %76 : vector<8x128xf32> to vector<8x128xbf16>
    %78 = vector.extract_strided_slice %45 {offsets = [0, 640], sizes = [8, 128], strides = [1, 1]} : vector<16x768xf32> to vector<8x128xf32>
    %79 = arith.truncf %78 : vector<8x128xf32> to vector<8x128xbf16>
    %cst_29 = arith.constant dense<0.000000e+00> : vector<8x8xf32>
    %80 = tpu.matmul %75, %77, %cst_29 {dimension_numbers = #tpu.dot_dimension_numbers<[1], [1], [0], [0], [0, 0, 1, 0], [], []>} : vector<8x128xbf16>, vector<8x128xbf16>, vector<8x8xf32> -> vector<8x8xf32>
    %cst_30 = arith.constant 0.0883883461 : f32
    %81 = vector.broadcast %cst_30 : f32 to vector<8x8xf32>
    %82 = arith.mulf %80, %81 : vector<8x8xf32>
    %83 = arith.addf %82, %51 : vector<8x8xf32>
    %cst_31 = arith.constant dense<0xFF800000> : vector<8xf32>
    %84 = vector.multi_reduction <maximumf>, %83, %cst_31 [1] : vector<8x8xf32> to vector<8xf32>
    %85 = vector.shape_cast %84 : vector<8xf32> to vector<8x1xf32>
    %86 = vector.broadcast %85 : vector<8x1xf32> to vector<8x8xf32>
    %87 = arith.subf %83, %86 : vector<8x8xf32>
    %88 = math.exp %87 : vector<8x8xf32>
    %cst_32 = arith.constant dense<0.000000e+00> : vector<8xf32>
    %89 = vector.multi_reduction <add>, %88, %cst_32 [1] : vector<8x8xf32> to vector<8xf32>
    %90 = vector.shape_cast %89 : vector<8xf32> to vector<8x1xf32>
    %91 = tpu.reciprocal %90 {approx = true} : vector<8x1xf32> -> vector<8x1xf32>
    %92 = vector.broadcast %91 : vector<8x1xf32> to vector<8x8xf32>
    %93 = arith.mulf %88, %92 : vector<8x8xf32>
    %94 = arith.truncf %93 : vector<8x8xf32> to vector<8x8xbf16>
    %cst_33 = arith.constant dense<0.000000e+00> : vector<8x128xf32>
    %95 = tpu.matmul %94, %79, %cst_33 {dimension_numbers = #tpu.dot_dimension_numbers<[1], [0], [0], [1], [0, 0, 1, 1], [], []>} : vector<8x8xbf16>, vector<8x128xbf16>, vector<8x128xf32> -> vector<8x128xf32>
    %96 = tpu.concatenate %73, %95 in 1 : vector<8x128xf32>, vector<8x128xf32> -> vector<8x256xf32>
    %97 = vector.extract_strided_slice %45 {offsets = [8, 0], sizes = [8, 128], strides = [1, 1]} : vector<16x768xf32> to vector<8x128xf32>
    %98 = arith.truncf %97 : vector<8x128xf32> to vector<8x128xbf16>
    %99 = vector.extract_strided_slice %45 {offsets = [8, 256], sizes = [8, 128], strides = [1, 1]} : vector<16x768xf32> to vector<8x128xf32>
    %100 = arith.truncf %99 : vector<8x128xf32> to vector<8x128xbf16>
    %101 = vector.extract_strided_slice %45 {offsets = [8, 512], sizes = [8, 128], strides = [1, 1]} : vector<16x768xf32> to vector<8x128xf32>
    %102 = arith.truncf %101 : vector<8x128xf32> to vector<8x128xbf16>
    %cst_34 = arith.constant dense<0.000000e+00> : vector<8x8xf32>
    %103 = tpu.matmul %98, %100, %cst_34 {dimension_numbers = #tpu.dot_dimension_numbers<[1], [1], [0], [0], [0, 0, 1, 0], [], []>} : vector<8x128xbf16>, vector<8x128xbf16>, vector<8x8xf32> -> vector<8x8xf32>
    %cst_35 = arith.constant 0.0883883461 : f32
    %104 = vector.broadcast %cst_35 : f32 to vector<8x8xf32>
    %105 = arith.mulf %103, %104 : vector<8x8xf32>
    %106 = arith.addf %105, %51 : vector<8x8xf32>
    %cst_36 = arith.constant dense<0xFF800000> : vector<8xf32>
    %107 = vector.multi_reduction <maximumf>, %106, %cst_36 [1] : vector<8x8xf32> to vector<8xf32>
    %108 = vector.shape_cast %107 : vector<8xf32> to vector<8x1xf32>
    %109 = vector.broadcast %108 : vector<8x1xf32> to vector<8x8xf32>
    %110 = arith.subf %106, %109 : vector<8x8xf32>
    %111 = math.exp %110 : vector<8x8xf32>
    %cst_37 = arith.constant dense<0.000000e+00> : vector<8xf32>
    %112 = vector.multi_reduction <add>, %111, %cst_37 [1] : vector<8x8xf32> to vector<8xf32>
    %113 = vector.shape_cast %112 : vector<8xf32> to vector<8x1xf32>
    %114 = tpu.reciprocal %113 {approx = true} : vector<8x1xf32> -> vector<8x1xf32>
    %115 = vector.broadcast %114 : vector<8x1xf32> to vector<8x8xf32>
    %116 = arith.mulf %111, %115 : vector<8x8xf32>
    %117 = arith.truncf %116 : vector<8x8xf32> to vector<8x8xbf16>
    %cst_38 = arith.constant dense<0.000000e+00> : vector<8x128xf32>
    %118 = tpu.matmul %117, %102, %cst_38 {dimension_numbers = #tpu.dot_dimension_numbers<[1], [0], [0], [1], [0, 0, 1, 1], [], []>} : vector<8x8xbf16>, vector<8x128xbf16>, vector<8x128xf32> -> vector<8x128xf32>
    %119 = vector.extract_strided_slice %45 {offsets = [8, 128], sizes = [8, 128], strides = [1, 1]} : vector<16x768xf32> to vector<8x128xf32>
    %120 = arith.truncf %119 : vector<8x128xf32> to vector<8x128xbf16>
    %121 = vector.extract_strided_slice %45 {offsets = [8, 384], sizes = [8, 128], strides = [1, 1]} : vector<16x768xf32> to vector<8x128xf32>
    %122 = arith.truncf %121 : vector<8x128xf32> to vector<8x128xbf16>
    %123 = vector.extract_strided_slice %45 {offsets = [8, 640], sizes = [8, 128], strides = [1, 1]} : vector<16x768xf32> to vector<8x128xf32>
    %124 = arith.truncf %123 : vector<8x128xf32> to vector<8x128xbf16>
    %cst_39 = arith.constant dense<0.000000e+00> : vector<8x8xf32>
    %125 = tpu.matmul %120, %122, %cst_39 {dimension_numbers = #tpu.dot_dimension_numbers<[1], [1], [0], [0], [0, 0, 1, 0], [], []>} : vector<8x128xbf16>, vector<8x128xbf16>, vector<8x8xf32> -> vector<8x8xf32>
    %cst_40 = arith.constant 0.0883883461 : f32
    %126 = vector.broadcast %cst_40 : f32 to vector<8x8xf32>
    %127 = arith.mulf %125, %126 : vector<8x8xf32>
    %128 = arith.addf %127, %51 : vector<8x8xf32>
    %cst_41 = arith.constant dense<0xFF800000> : vector<8xf32>
    %129 = vector.multi_reduction <maximumf>, %128, %cst_41 [1] : vector<8x8xf32> to vector<8xf32>
    %130 = vector.shape_cast %129 : vector<8xf32> to vector<8x1xf32>
    %131 = vector.broadcast %130 : vector<8x1xf32> to vector<8x8xf32>
    %132 = arith.subf %128, %131 : vector<8x8xf32>
    %133 = math.exp %132 : vector<8x8xf32>
    %cst_42 = arith.constant dense<0.000000e+00> : vector<8xf32>
    %134 = vector.multi_reduction <add>, %133, %cst_42 [1] : vector<8x8xf32> to vector<8xf32>
    %135 = vector.shape_cast %134 : vector<8xf32> to vector<8x1xf32>
    %136 = tpu.reciprocal %135 {approx = true} : vector<8x1xf32> -> vector<8x1xf32>
    %137 = vector.broadcast %136 : vector<8x1xf32> to vector<8x8xf32>
    %138 = arith.mulf %133, %137 : vector<8x8xf32>
    %139 = arith.truncf %138 : vector<8x8xf32> to vector<8x8xbf16>
    %cst_43 = arith.constant dense<0.000000e+00> : vector<8x128xf32>
    %140 = tpu.matmul %139, %124, %cst_43 {dimension_numbers = #tpu.dot_dimension_numbers<[1], [0], [0], [1], [0, 0, 1, 1], [], []>} : vector<8x8xbf16>, vector<8x128xbf16>, vector<8x128xf32> -> vector<8x128xf32>
    %141 = tpu.concatenate %118, %140 in 1 : vector<8x128xf32>, vector<8x128xf32> -> vector<8x256xf32>
    %142 = tpu.concatenate %96, %141 in 0 : vector<8x256xf32>, vector<8x256xf32> -> vector<16x256xf32>
    %143 = arith.truncf %142 : vector<16x256xf32> to vector<16x256xbf16>
    %cst_44 = arith.constant dense<0.000000e+00> : vector<16x256xf32>
    %144 = tpu.matmul %143, %7, %cst_44 {dimension_numbers = #tpu.dot_dimension_numbers<[1], [0], [0], [1], [0, 0, 1, 1], [], []>} : vector<16x256xbf16>, vector<256x256xbf16>, vector<16x256xf32> -> vector<16x256xf32>
    %145 = vector.broadcast %16 : vector<1x256xf32> to vector<16x256xf32>
    %146 = arith.addf %144, %145 : vector<16x256xf32>
    %147 = arith.addf %3, %146 : vector<16x256xf32>
    %cst_45 = arith.constant dense<0.000000e+00> : vector<16xf32>
    %148 = vector.multi_reduction <add>, %147, %cst_45 [1] : vector<16x256xf32> to vector<16xf32>
    %149 = vector.shape_cast %148 : vector<16xf32> to vector<16x1xf32>
    %cst_46 = arith.constant 2.560000e+02 : f32
    %150 = vector.broadcast %cst_46 : f32 to vector<16x1xf32>
    %151 = arith.divf %149, %150 : vector<16x1xf32>
    %152 = vector.broadcast %151 : vector<16x1xf32> to vector<16x256xf32>
    %153 = arith.subf %147, %152 : vector<16x256xf32>
    %154 = arith.mulf %153, %153 : vector<16x256xf32>
    %cst_47 = arith.constant dense<0.000000e+00> : vector<16xf32>
    %155 = vector.multi_reduction <add>, %154, %cst_47 [1] : vector<16x256xf32> to vector<16xf32>
    %156 = vector.shape_cast %155 : vector<16xf32> to vector<16x1xf32>
    %cst_48 = arith.constant 2.560000e+02 : f32
    %157 = vector.broadcast %cst_48 : f32 to vector<16x1xf32>
    %158 = arith.divf %156, %157 : vector<16x1xf32>
    %cst_49 = arith.constant 9.99999974E-6 : f32
    %159 = vector.broadcast %cst_49 : f32 to vector<16x1xf32>
    %160 = arith.addf %158, %159 : vector<16x1xf32>
    %161 = math.rsqrt %160 : vector<16x1xf32>
    %162 = vector.broadcast %161 : vector<16x1xf32> to vector<16x256xf32>
    %163 = arith.mulf %153, %162 : vector<16x256xf32>
    %164 = vector.broadcast %20 : vector<1x256xf32> to vector<16x256xf32>
    %165 = arith.mulf %163, %164 : vector<16x256xf32>
    %166 = vector.broadcast %21 : vector<1x256xf32> to vector<16x256xf32>
    %167 = arith.addf %165, %166 : vector<16x256xf32>
    %168 = arith.truncf %167 : vector<16x256xf32> to vector<16x256xbf16>
    %cst_50 = arith.constant dense<0.000000e+00> : vector<16x1024xf32>
    %169 = tpu.matmul %168, %9, %cst_50 {dimension_numbers = #tpu.dot_dimension_numbers<[1], [0], [0], [1], [0, 0, 1, 1], [], []>} : vector<16x256xbf16>, vector<256x1024xbf16>, vector<16x1024xf32> -> vector<16x1024xf32>
    %170 = vector.broadcast %15 : vector<1x1024xf32> to vector<16x1024xf32>
    %171 = arith.addf %169, %170 : vector<16x1024xf32>
    %cst_51 = arith.constant 5.000000e-01 : f32
    %172 = vector.broadcast %cst_51 : f32 to vector<16x1024xf32>
    %173 = arith.mulf %172, %171 : vector<16x1024xf32>
    %cst_52 = arith.constant 0.707106769 : f32
    %174 = vector.broadcast %cst_52 : f32 to vector<16x1024xf32>
    %175 = arith.mulf %171, %174 : vector<16x1024xf32>
    %cst_53 = arith.constant 0.000000e+00 : f32
    %176 = vector.broadcast %cst_53 : f32 to vector<16x1024xf32>
    %177 = arith.cmpf oge, %175, %176 : vector<16x1024xf32>
    %cst_54 = arith.constant 1.000000e+00 : f32
    %cst_55 = arith.constant -1.000000e+00 : f32
    %178 = vector.broadcast %cst_54 : f32 to vector<16x1024xf32>
    %179 = vector.broadcast %cst_55 : f32 to vector<16x1024xf32>
    %180 = arith.select %177, %178, %179 : vector<16x1024xi1>, vector<16x1024xf32>
    %181 = math.absf %175 : vector<16x1024xf32>
    %cst_56 = arith.constant 0.327591091 : f32
    %182 = vector.broadcast %cst_56 : f32 to vector<16x1024xf32>
    %183 = arith.mulf %182, %181 : vector<16x1024xf32>
    %cst_57 = arith.constant 1.000000e+00 : f32
    %184 = vector.broadcast %cst_57 : f32 to vector<16x1024xf32>
    %185 = arith.addf %184, %183 : vector<16x1024xf32>
    %cst_58 = arith.constant 1.000000e+00 : f32
    %186 = vector.broadcast %cst_58 : f32 to vector<16x1024xf32>
    %187 = arith.divf %186, %185 : vector<16x1024xf32>
    %cst_59 = arith.constant 1.06140542 : f32
    %188 = vector.broadcast %cst_59 : f32 to vector<16x1024xf32>
    %189 = arith.mulf %188, %187 : vector<16x1024xf32>
    %cst_60 = arith.constant -1.45315206 : f32
    %190 = vector.broadcast %cst_60 : f32 to vector<16x1024xf32>
    %191 = arith.addf %189, %190 : vector<16x1024xf32>
    %192 = arith.mulf %191, %187 : vector<16x1024xf32>
    %cst_61 = arith.constant 1.42141378 : f32
    %193 = vector.broadcast %cst_61 : f32 to vector<16x1024xf32>
    %194 = arith.addf %192, %193 : vector<16x1024xf32>
    %195 = arith.mulf %194, %187 : vector<16x1024xf32>
    %cst_62 = arith.constant -0.284496725 : f32
    %196 = vector.broadcast %cst_62 : f32 to vector<16x1024xf32>
    %197 = arith.addf %195, %196 : vector<16x1024xf32>
    %198 = arith.mulf %197, %187 : vector<16x1024xf32>
    %cst_63 = arith.constant 0.254829586 : f32
    %199 = vector.broadcast %cst_63 : f32 to vector<16x1024xf32>
    %200 = arith.addf %198, %199 : vector<16x1024xf32>
    %201 = arith.mulf %200, %187 : vector<16x1024xf32>
    %cst_64 = arith.constant 0.000000e+00 : f32
    %202 = vector.broadcast %cst_64 : f32 to vector<16x1024xf32>
    %203 = arith.subf %202, %181 : vector<16x1024xf32>
    %204 = arith.mulf %203, %181 : vector<16x1024xf32>
    %205 = math.exp %204 : vector<16x1024xf32>
    %206 = arith.mulf %201, %205 : vector<16x1024xf32>
    %cst_65 = arith.constant 1.000000e+00 : f32
    %207 = vector.broadcast %cst_65 : f32 to vector<16x1024xf32>
    %208 = arith.subf %207, %206 : vector<16x1024xf32>
    %209 = arith.mulf %180, %208 : vector<16x1024xf32>
    %cst_66 = arith.constant 1.000000e+00 : f32
    %210 = vector.broadcast %cst_66 : f32 to vector<16x1024xf32>
    %211 = arith.addf %210, %209 : vector<16x1024xf32>
    %212 = arith.mulf %173, %211 : vector<16x1024xf32>
    %213 = arith.truncf %212 : vector<16x1024xf32> to vector<16x1024xbf16>
    %cst_67 = arith.constant dense<0.000000e+00> : vector<16x256xf32>
    %214 = tpu.matmul %213, %11, %cst_67 {dimension_numbers = #tpu.dot_dimension_numbers<[1], [0], [0], [1], [0, 0, 1, 1], [], []>} : vector<16x1024xbf16>, vector<1024x256xbf16>, vector<16x256xf32> -> vector<16x256xf32>
    %215 = arith.addf %147, %214 : vector<16x256xf32>
    %216 = vector.broadcast %17 : vector<1x256xf32> to vector<16x256xf32>
    %217 = arith.addf %215, %216 : vector<16x256xf32>
    %c0_68 = arith.constant 0 : index
    %c0_69 = arith.constant 0 : index
    %218 = vector.load %arg15[%c0_68, %c0_69] : memref<16x256xf32, #tpu.memory_space<vmem>>, vector<16x256xf32>
    tpu.vector_store %arg15[%c0_68, %c0_69], %217 {strides = array<i32>} : memref<16x256xf32, #tpu.memory_space<vmem>>, vector<16x256xf32>,
    %c1_i32 = arith.constant 1 : i32
    %219 = arith.cmpi eq, %arg0, %c1_i32 : i32
    %220 = arith.extui %219 : i1 to i32
    %c0_i32_70 = arith.constant 0 : i32
    %221 = arith.cmpi ne, %220, %c0_i32_70 : i32
    scf.if %221 {
      %c0_71 = arith.constant 0 : index
      %c0_72 = arith.constant 0 : index
      %222 = vector.load %arg11[%c0_71, %c0_72] : memref<2x16xbf16, #tpu.memory_space<vmem>>, vector<2x16xbf16>
      %223 = arith.truncf %217 : vector<16x256xf32> to vector<16x256xbf16>
      %cst_73 = arith.constant dense<0.000000e+00> : vector<2x256xf32>
      %224 = tpu.matmul %222, %223, %cst_73 {dimension_numbers = #tpu.dot_dimension_numbers<[1], [0], [0], [1], [0, 0, 1, 1], [], []>} : vector<2x16xbf16>, vector<16x256xbf16>, vector<2x256xf32> -> vector<2x256xf32>
      %c0_74 = arith.constant 0 : index
      %c0_75 = arith.constant 0 : index
      %225 = vector.load %arg12[%c0_74, %c0_75] : memref<256x256xbf16, #tpu.memory_space<vmem>>, vector<256x256xbf16>
      %226 = arith.truncf %224 : vector<2x256xf32> to vector<2x256xbf16>
      %cst_76 = arith.constant dense<0.000000e+00> : vector<2x256xf32>
      %227 = tpu.matmul %226, %225, %cst_76 {dimension_numbers = #tpu.dot_dimension_numbers<[1], [0], [0], [1], [0, 0, 1, 1], [], []>} : vector<2x256xbf16>, vector<256x256xbf16>, vector<2x256xf32> -> vector<2x256xf32>
      %c0_77 = arith.constant 0 : index
      %c0_78 = arith.constant 0 : index
      %228 = vector.load %arg13[%c0_77, %c0_78] : memref<1x256xf32, #tpu.memory_space<vmem>>, vector<1x256xf32>
      %229 = vector.broadcast %228 : vector<1x256xf32> to vector<2x256xf32>
      %230 = arith.addf %227, %229 : vector<2x256xf32>
      %c0_79 = arith.constant 0 : index
      %c0_80 = arith.constant 0 : index
      %231 = vector.load %arg14[%c0_79, %c0_80] : memref<2x256xf32, #tpu.memory_space<vmem>>, vector<2x256xf32>
      tpu.vector_store %arg14[%c0_79, %c0_80], %230 {strides = array<i32>} : memref<2x256xf32, #tpu.memory_space<vmem>>, vector<2x256xf32>,
    } else {
    }
    return
  }
  func.func @transform_0(%arg0: i32) -> (i32, i32) {
    %c0_i32 = arith.constant 0 : i32
    %c0_i32_0 = arith.constant 0 : i32
    %c0_i32_1 = arith.constant 0 : i32
    return %c0_i32, %c0_i32_0 : i32, i32
  }
  func.func @transform_1(%arg0: i32) -> (i32, i32) {
    %c0_i32 = arith.constant 0 : i32
    %c0_i32_0 = arith.constant 0 : i32
    %c0_i32_1 = arith.constant 0 : i32
    return %c0_i32, %c0_i32_0 : i32, i32
  }
  func.func @transform_2(%arg0: i32) -> (i32, i32) {
    %c0_i32 = arith.constant 0 : i32
    %c0_i32_0 = arith.constant 0 : i32
    %c0_i32_1 = arith.constant 0 : i32
    return %c0_i32, %c0_i32_0 : i32, i32
  }
  func.func @transform_3(%arg0: i32) -> (i32, i32) {
    %c0_i32 = arith.constant 0 : i32
    %c0_i32_0 = arith.constant 0 : i32
    %c0_i32_1 = arith.constant 0 : i32
    return %c0_i32, %c0_i32_0 : i32, i32
  }
  func.func @transform_4(%arg0: i32) -> (i32, i32) {
    %c0_i32 = arith.constant 0 : i32
    %c0_i32_0 = arith.constant 0 : i32
    %c0_i32_1 = arith.constant 0 : i32
    return %c0_i32, %c0_i32_0 : i32, i32
  }
  func.func @transform_5(%arg0: i32) -> (i32, i32, i32) {
    %c0_i32 = arith.constant 0 : i32
    %c0_i32_0 = arith.constant 0 : i32
    %c0_i32_1 = arith.constant 0 : i32
    return %arg0, %c0_i32, %c0_i32_0 : i32, i32, i32
  }
  func.func @transform_6(%arg0: i32) -> (i32, i32, i32) {
    %c0_i32 = arith.constant 0 : i32
    %c0_i32_0 = arith.constant 0 : i32
    %c0_i32_1 = arith.constant 0 : i32
    return %arg0, %c0_i32, %c0_i32_0 : i32, i32, i32
  }
  func.func @transform_7(%arg0: i32) -> (i32, i32, i32) {
    %c0_i32 = arith.constant 0 : i32
    %c0_i32_0 = arith.constant 0 : i32
    %c0_i32_1 = arith.constant 0 : i32
    return %arg0, %c0_i32, %c0_i32_0 : i32, i32, i32
  }
  func.func @transform_8(%arg0: i32) -> (i32, i32, i32) {
    %c0_i32 = arith.constant 0 : i32
    %c0_i32_0 = arith.constant 0 : i32
    %c0_i32_1 = arith.constant 0 : i32
    return %arg0, %c0_i32, %c0_i32_0 : i32, i32, i32
  }
  func.func @transform_9(%arg0: i32) -> (i32, i32, i32) {
    %c0_i32 = arith.constant 0 : i32
    %c0_i32_0 = arith.constant 0 : i32
    %c0_i32_1 = arith.constant 0 : i32
    return %arg0, %c0_i32, %c0_i32_0 : i32, i32, i32
  }
  func.func @transform_10(%arg0: i32) -> (i32, i32) {
    %c0_i32 = arith.constant 0 : i32
    %c0_i32_0 = arith.constant 0 : i32
    %c0_i32_1 = arith.constant 0 : i32
    return %c0_i32, %c0_i32_0 : i32, i32
  }
  func.func @transform_11(%arg0: i32) -> (i32, i32) {
    %c0_i32 = arith.constant 0 : i32
    %c0_i32_0 = arith.constant 0 : i32
    %c0_i32_1 = arith.constant 0 : i32
    return %c0_i32, %c0_i32_0 : i32, i32
  }
  func.func @transform_12(%arg0: i32) -> (i32, i32) {
    %c0_i32 = arith.constant 0 : i32
    %c0_i32_0 = arith.constant 0 : i32
    %c0_i32_1 = arith.constant 0 : i32
    return %c0_i32, %c0_i32_0 : i32, i32
  }
  func.func @transform_13(%arg0: i32) -> (i32, i32) {
    %c0_i32 = arith.constant 0 : i32
    %c0_i32_0 = arith.constant 0 : i32
    %c0_i32_1 = arith.constant 0 : i32
    return %c0_i32, %c0_i32_0 : i32, i32
  }
}

</mosaic_0001>

<bundles_post_ra>
// kernel: _lambda_.3
= control target key start
LH: loop header
LB: loop body
LE: loop exit
PB: predicated region body
PF: predicated region fallthrough
CT: control target
= control target key end

     0   :  { %14 = vsyncpa [#allocation4], 0  ;;  %s5388_s30 = smov 0   ;;  %s6162_s0 = inlined_call_operand.vmem [shape: f32[16,256], index: 0, kind: input, shape index: {}]   ;;  %s6163_s1 = inlined_call_operand.vmem [shape: bf16[2,256,768], index: 1, kind: input, shape index: {}]   ;;  %s6164_s2 = inlined_call_operand.vmem [shape: bf16[2,256,256], index: 2, kind: input, shape index: {}]   ;;  %s6165_s3 = inlined_call_operand.vmem [shape: bf16[2,256,1024], index: 3, kind: input, shape index: {}]   ;;  %s6166_s4 = inlined_call_operand.vmem [shape: bf16[2,1024,256], index: 4, kind: input, shape index: {}]   ;;  %s6167_s5 = inlined_call_operand.vmem [shape: f32[2,8,1024], index: 5, kind: input, shape index: {}]   ;;  %s6168_s6 = inlined_call_operand.vmem [shape: bf16[2,16], index: 6, kind: input, shape index: {}]   ;;  %s6169_s7 = inlined_call_operand.vmem [shape: bf16[256,256], index: 7, kind: input, shape index: {}]   ;;  %s6170_s8 = inlined_call_operand.vmem [shape: f32[1,256], index: 8, kind: input, shape index: {}]   ;;  %s6171_s9 = inlined_call_operand.hbm [shape: f32[2,256], index: 9, kind: output, shape index: {}]  }
   0x1 LB: > { %s5394_s10 = sadd.s32 4294967295, %s5332_s30   ;;  %p4293_p0 = scmp.ge.s32.totalorder %s5332_s30, 1  ;;  %s5332_s30 = sphi %s5388_s30, %s20_s30  }
   0x2   : > { %p323_p1 = scmp.lt.s32.totalorder %s5332_s30, 3 }
   0x4   : > { %p324_p2 = pnand %p4293_p0, %p323_p1 }
   0x5   : > { %p374_p3 = scmp.lt.s32.totalorder (!%p324_p2), %s5394_s10, 1  ;;  %p4303_p4 = scmp.ne.s32.totalorder (!%p324_p2), %s5394_s10, 0 }
   0x6   : > { %327 = sbr.rel (%p324_p2) target bundleno = 3610 (0xe1a), region = 56 }
   0xd   : > { %s375_s11 = scalar_select %p374_p3, %s5394_s10, 1 }
   0xe   : > { %403 = sbr.rel (%p4303_p4) target bundleno = 21 (0x15), region = 60  ;;  %v404_v0 = vld [vmem:[%s6162_s0] sm:$0xff] (!%p4303_p4)  ;;  %v405_v1 = vld [vmem:[%s6162_s0 + $0x8] sm:$0xff] (!%p4303_p4)  ;;  %v406_v2 = vld [vmem:[%s6162_s0 + $0x10] sm:$0xff] (!%p4303_p4) }
   0xf   : > { %s4811_s12 = smul.u32 768, %s375_s11  ;;  %s4731_s13 = sshll.u32 %s375_s11, 8  ;;  %408 = vst [vmem:[#allocation2] sm:$0xff] (!%p4303_p4), %v404_v0  ;;  %409 = vst [vmem:[#allocation2 + $0x8] sm:$0xff] (!%p4303_p4), %v405_v1  ;;  %v407_v3 = vld [vmem:[%s6162_s0 + $0x18] sm:$0xff] (!%p4303_p4) }
  0x10   : > { %s5403_s16 = scalar_lea.vmem %s6164_s2, %s4731_s13  ;;  %s4732_s17 = sshll.u32 %s375_s11, 10  ;;  %410 = vst [vmem:[#allocation2 + $0x10] sm:$0xff] (!%p4303_p4), %v406_v2  ;;  %411 = vst [vmem:[#allocation2 + $0x18] sm:$0xff] (!%p4303_p4), %v407_v3 }
  0x11   : > { %s5408_s20 = scalar_lea.vmem %s6163_s1, %s4811_s12  ;;  %s5413_s23 = scalar_lea.vmem %s6165_s3, %s4732_s17 }
  0x12   : > { %s5418_s26 = scalar_lea.vmem %s6166_s4, %s4732_s17  ;;  %s4734_s27 = sshll.u32 %s375_s11, 6 }
  0x13   : > { %s5423_s13 = scalar_lea.vmem %s6167_s5, %s4734_s27 }
  0x15 PF: > { %v4830_v4 = vld [vmem:[%s5408_s20 + $0x4] ss:$24 sps:$4 sm:$0xff]   ;;  %v4832_v5 = vld [vmem:[%s5408_s20] ss:$24 sps:$4 sm:$0xff]   ;;  %v4833_v6 = vld [vmem:[%s5408_s20 + $0x34] ss:$24 sps:$4 sm:$0xff]  }
  0x16   : > { %1314 = vmatprep.subr.bf16.mxu0 %v4830_v4  ;;  %v4835_v7 = vld [vmem:[%s5408_s20 + $0x30] ss:$24 sps:$4 sm:$0xff]   ;;  %v4836_v8 = vld [vmem:[%s5408_s20 + $0x64] ss:$24 sps:$4 sm:$0xff]   ;;  %v4838_v9 = vld [vmem:[%s5408_s20 + $0x60] ss:$24 sps:$4 sm:$0xff]  }
  0x17   : > { %1315 = vmatpush1.bf16.msra.mxu0 %v4832_v5  ;;  %v4839_v10 = vld [vmem:[%s5408_s20 + $0x94] ss:$24 sps:$4 sm:$0xff]   ;;  %v4841_v11 = vld [vmem:[%s5408_s20 + $0x90] ss:$24 sps:$4 sm:$0xff]   ;;  %v4842_v12 = vld [vmem:[%s5408_s20 + $0xc4] ss:$24 sps:$4 sm:$0xff]  }
  0x18   : > { %1316 = vmatprep.subr.bf16.mxu0 %v4833_v6  ;;  %v4844_v13 = vld [vmem:[%s5408_s20 + $0xc0] ss:$24 sps:$4 sm:$0xff]   ;;  %v4845_v14 = vld [vmem:[%s5408_s20 + $0xf4] ss:$24 sps:$4 sm:$0xff]   ;;  %v4847_v15 = vld [vmem:[%s5408_s20 + $0xf0] ss:$24 sps:$4 sm:$0xff]  }
  0x19   : > { %v4848_v16 = vld [vmem:[%s5408_s20 + $0x124] ss:$24 sps:$4 sm:$0xff]   ;;  %v413_v17 = vld [vmem:[#allocation2 + $0x8] sm:$0xff]  ;;  %v4850_v20 = vld [vmem:[%s5408_s20 + $0x120] ss:$24 sps:$4 sm:$0xff]   ;;  %vm5335_vm0 = vmmov 0  }
  0x1a   : > { %v415_v18 = vld [vmem:[#allocation2 + $0x18] sm:$0xff]  ;;  %v4851_v21 = vld [vmem:[%s5408_s20 + $0x154] ss:$24 sps:$4 sm:$0xff]   ;;  %v4853_v22 = vld [vmem:[%s5408_s20 + $0x150] ss:$24 sps:$4 sm:$0xff]   ;;  %vm1503_vm1 = vcmask 1043456  }
  0x1b   : > { %1317 = vmatpush1.bf16.msra.mxu0 %v4835_v7  ;;  %v5451_v19 = vpack.c.bf16 %v415_v18, %v413_v17  ;;  %v4854_v23 = vld [vmem:[%s5408_s20 + $0x184] ss:$24 sps:$4 sm:$0xff]   ;;  %v4856_v24 = vld [vmem:[%s5408_s20 + $0x180] ss:$24 sps:$4 sm:$0xff]   ;;  %v4857_v25 = vld [vmem:[%s5408_s20 + $0x1b4] ss:$24 sps:$4 sm:$0xff]  }
  0x1c   : > { %1318 = vmatprep.subr.bf16.mxu0 %v4836_v8  ;;  %v4859_v26 = vld [vmem:[%s5408_s20 + $0x1b0] ss:$24 sps:$4 sm:$0xff]   ;;  %v4860_v27 = vld [vmem:[%s5408_s20 + $0x1e4] ss:$24 sps:$4 sm:$0xff]   ;;  %v4862_v28 = vld [vmem:[%s5408_s20 + $0x1e0] ss:$24 sps:$4 sm:$0xff]  }
  0x1d   : > { %1346 = vmatprep.mubr.bf16.mxu0 %v5451_v19  ;;  %v4863_v29 = vld [vmem:[%s5408_s20 + $0x214] ss:$24 sps:$4 sm:$0xff]   ;;  %v4865_v30 = vld [vmem:[%s5408_s20 + $0x210] ss:$24 sps:$4 sm:$0xff]   ;;  %v4866_v31 = vld [vmem:[%s5408_s20 + $0x244] ss:$24 sps:$4 sm:$0xff]  }
  0x1e   : > { %v4868_v32 = vld [vmem:[%s5408_s20 + $0x240] ss:$24 sps:$4 sm:$0xff]   ;;  %v4869_v33 = vld [vmem:[%s5408_s20 + $0x274] ss:$24 sps:$4 sm:$0xff]   ;;  %v4871_v34 = vld [vmem:[%s5408_s20 + $0x270] ss:$24 sps:$4 sm:$0xff]  }
  0x1f   : > { %1319 = vmatpush1.bf16.msra.mxu0 %v4838_v9  ;;  %v4872_v35 = vld [vmem:[%s5408_s20 + $0x2a4] ss:$24 sps:$4 sm:$0xff]   ;;  %v4874_v36 = vld [vmem:[%s5408_s20 + $0x2a0] ss:$24 sps:$4 sm:$0xff]   ;;  %v4875_v37 = vld [vmem:[%s5408_s20 + $0x2d4] ss:$24 sps:$4 sm:$0xff]  }
  0x20   : > { %1320 = vmatprep.subr.bf16.mxu0 %v4839_v10  ;;  %v4877_v38 = vld [vmem:[%s5408_s20 + $0x2d0] ss:$24 sps:$4 sm:$0xff]   ;;  %v412_v39 = vld [vmem:[#allocation2] sm:$0xff]  ;;  %v4883_v44 = vld [vmem:[%s5408_s20 + $0x3c] ss:$24 sps:$4 sm:$0xff]   ;;  %vm1487_vm2 = vcmask 64512  }
  0x21   : > { %v414_v40 = vld [vmem:[#allocation2 + $0x10] sm:$0xff]  ;;  %v4880_v41 = vld [vmem:[%s5408_s20 + $0xc] ss:$24 sps:$4 sm:$0xff]   ;;  %v4878_v42 = vld [vmem:[%s5408_s20 + $0x8] ss:$24 sps:$4 sm:$0xff]   ;;  %p4692_p5 = scmp.ne.s32.totalorder %s5394_s10, 1 }
  0x22   : > { %v5475_v43 = vpack.c.bf16 %v414_v40, %v412_v39  ;;  %v4881_v45 = vld [vmem:[%s5408_s20 + $0x38] ss:$24 sps:$4 sm:$0xff]   ;;  %v4886_v46 = vld [vmem:[%s5408_s20 + $0x6c] ss:$24 sps:$4 sm:$0xff]   ;;  %v4884_v47 = vld [vmem:[%s5408_s20 + $0x68] ss:$24 sps:$4 sm:$0xff]  }
  0x23   : > { %1321 = vmatpush1.bf16.msra.mxu0 %v4841_v11  ;;  %v4889_v48 = vld [vmem:[%s5408_s20 + $0x9c] ss:$24 sps:$4 sm:$0xff]   ;;  %v4887_v49 = vld [vmem:[%s5408_s20 + $0x98] ss:$24 sps:$4 sm:$0xff]   ;;  %v4892_v50 = vld [vmem:[%s5408_s20 + $0xcc] ss:$24 sps:$4 sm:$0xff]  }
  0x24   : > { %1322 = vmatprep.subr.bf16.mxu0 %v4842_v12  ;;  %v4890_v51 = vld [vmem:[%s5408_s20 + $0xc8] ss:$24 sps:$4 sm:$0xff]   ;;  %v4895_v52 = vld [vmem:[%s5408_s20 + $0xfc] ss:$24 sps:$4 sm:$0xff]   ;;  %v4893_v53 = vld [vmem:[%s5408_s20 + $0xf8] ss:$24 sps:$4 sm:$0xff]  }
  0x25   : > { %v4898_v54 = vld [vmem:[%s5408_s20 + $0x12c] ss:$24 sps:$4 sm:$0xff]   ;;  %v4896_v55 = vld [vmem:[%s5408_s20 + $0x128] ss:$24 sps:$4 sm:$0xff]   ;;  %v4901_v56 = vld [vmem:[%s5408_s20 + $0x15c] ss:$24 sps:$4 sm:$0xff]  }
  0x26   : > { %v4899_v57 = vld [vmem:[%s5408_s20 + $0x158] ss:$24 sps:$4 sm:$0xff]   ;;  %v4904_v58 = vld [vmem:[%s5408_s20 + $0x18c] ss:$24 sps:$4 sm:$0xff]   ;;  %v4902_v59 = vld [vmem:[%s5408_s20 + $0x188] ss:$24 sps:$4 sm:$0xff]  }
  0x27   : > { %1323 = vmatpush1.bf16.msra.mxu0 %v4844_v13  ;;  %v4907_v60 = vld [vmem:[%s5408_s20 + $0x1bc] ss:$24 sps:$4 sm:$0xff]   ;;  %v4905_v61 = vld [vmem:[%s5408_s20 + $0x1b8] ss:$24 sps:$4 sm:$0xff]   ;;  %v4910_v62 = vld [vmem:[%s5408_s20 + $0x1ec] ss:$24 sps:$4 sm:$0xff]  }
  0x28   : > { %1324 = vmatprep.subr.bf16.mxu0 %v4845_v14  ;;  %v4908_v63 = vld [vmem:[%s5408_s20 + $0x1e8] ss:$24 sps:$4 sm:$0xff]   ;;  %v4913_v0 = vld [vmem:[%s5408_s20 + $0x21c] ss:$24 sps:$4 sm:$0xff]   ;;  %v4911_v1 = vld [vmem:[%s5408_s20 + $0x218] ss:$24 sps:$4 sm:$0xff]  }
  0x29   : > { %v4916_v2 = vld [vmem:[%s5408_s20 + $0x24c] ss:$24 sps:$4 sm:$0xff]   ;;  %v4914_v3 = vld [vmem:[%s5408_s20 + $0x248] ss:$24 sps:$4 sm:$0xff]   ;;  %v4919_v4 = vld [vmem:[%s5408_s20 + $0x27c] ss:$24 sps:$4 sm:$0xff]  }
  0x2a   : > { %v4917_v5 = vld [vmem:[%s5408_s20 + $0x278] ss:$24 sps:$4 sm:$0xff]   ;;  %v4922_v6 = vld [vmem:[%s5408_s20 + $0x2ac] ss:$24 sps:$4 sm:$0xff]   ;;  %v4920_v7 = vld [vmem:[%s5408_s20 + $0x2a8] ss:$24 sps:$4 sm:$0xff]  }
  0x2b   : > { %1325 = vmatpush1.bf16.msra.mxu0 %v4847_v15  ;;  %v4925_v8 = vld [vmem:[%s5408_s20 + $0x2dc] ss:$24 sps:$4 sm:$0xff]   ;;  %v4923_v9 = vld [vmem:[%s5408_s20 + $0x2d8] ss:$24 sps:$4 sm:$0xff]   ;;  %vm3892_vm3 = vcmask (!%p4692_p5), 130048  }
  0x2c   : > { %1326 = vmatprep.subr.bf16.mxu0 %v4848_v16  ;;  %v4928_v10 = vld [vmem:[%s5408_s20 + $0x14] ss:$24 sps:$4 sm:$0xff]   ;;  %v4926_v11 = vld [vmem:[%s5408_s20 + $0x10] ss:$24 sps:$4 sm:$0xff]   ;;  %v4931_v12 = vld [vmem:[%s5408_s20 + $0x44] ss:$24 sps:$4 sm:$0xff]  }
  0x2d   : > { %v4929_v13 = vld [vmem:[%s5408_s20 + $0x40] ss:$24 sps:$4 sm:$0xff]   ;;  %v4934_v14 = vld [vmem:[%s5408_s20 + $0x74] ss:$24 sps:$4 sm:$0xff]   ;;  %v4932_v15 = vld [vmem:[%s5408_s20 + $0x70] ss:$24 sps:$4 sm:$0xff]  }
  0x2e   : > { %v4937_v16 = vld [vmem:[%s5408_s20 + $0xa4] ss:$24 sps:$4 sm:$0xff]   ;;  %v4935_v17 = vld [vmem:[%s5408_s20 + $0xa0] ss:$24 sps:$4 sm:$0xff]   ;;  %v4940_v18 = vld [vmem:[%s5408_s20 + $0xd4] ss:$24 sps:$4 sm:$0xff]  }
  0x2f   : > { %1327 = vmatpush1.bf16.msra.mxu0 %v4850_v20  ;;  %v4943_v20 = vld [vmem:[%s5408_s20 + $0x104] ss:$24 sps:$4 sm:$0xff]   ;;  %v4968_v39 = vld [vmem:[%s5408_s20 + $0x2b0] ss:$24 sps:$4 sm:$0xff]  }
  0x30   : > { %1328 = vmatprep.subr.bf16.mxu0 %v4851_v21  ;;  %v4941_v21 = vld [vmem:[%s5408_s20 + $0x100] ss:$24 sps:$4 sm:$0xff]   ;;  %v4973_v40 = vld [vmem:[%s5408_s20 + $0x2e4] ss:$24 sps:$4 sm:$0xff]  }
  0x33   : > { %1329 = vmatpush1.bf16.msra.mxu0 %v4853_v22  ;;  %v4946_v22 = vld [vmem:[%s5408_s20 + $0x134] ss:$24 sps:$4 sm:$0xff]  }
  0x34   : > { %1330 = vmatprep.subr.bf16.mxu0 %v4854_v23  ;;  %v4944_v23 = vld [vmem:[%s5408_s20 + $0x130] ss:$24 sps:$4 sm:$0xff]  }
  0x37   : > { %1331 = vmatpush1.bf16.msra.mxu0 %v4856_v24  ;;  %v4949_v24 = vld [vmem:[%s5408_s20 + $0x164] ss:$24 sps:$4 sm:$0xff]  }
  0x38   : > { %1332 = vmatprep.subr.bf16.mxu0 %v4857_v25  ;;  %v4947_v25 = vld [vmem:[%s5408_s20 + $0x160] ss:$24 sps:$4 sm:$0xff]  }
  0x3b   : > { %1333 = vmatpush1.bf16.msra.mxu0 %v4859_v26  ;;  %v4952_v26 = vld [vmem:[%s5408_s20 + $0x194] ss:$24 sps:$4 sm:$0xff]  }
  0x3c   : > { %1334 = vmatprep.subr.bf16.mxu0 %v4860_v27  ;;  %v4950_v27 = vld [vmem:[%s5408_s20 + $0x190] ss:$24 sps:$4 sm:$0xff]  }
  0x3f   : > { %1335 = vmatpush1.bf16.msra.mxu0 %v4862_v28  ;;  %v4955_v28 = vld [vmem:[%s5408_s20 + $0x1c4] ss:$24 sps:$4 sm:$0xff]  }
  0x40   : > { %1336 = vmatprep.subr.bf16.mxu0 %v4863_v29  ;;  %v4953_v29 = vld [vmem:[%s5408_s20 + $0x1c0] ss:$24 sps:$4 sm:$0xff]  }
  0x43   : > { %1337 = vmatpush1.bf16.msra.mxu0 %v4865_v30  ;;  %v4958_v30 = vld [vmem:[%s5408_s20 + $0x1f4] ss:$24 sps:$4 sm:$0xff]  }
  0x44   : > { %1338 = vmatprep.subr.bf16.mxu0 %v4866_v31  ;;  %v4956_v31 = vld [vmem:[%s5408_s20 + $0x1f0] ss:$24 sps:$4 sm:$0xff]  }
  0x47   : > { %1339 = vmatpush1.bf16.msra.mxu0 %v4868_v32  ;;  %v4961_v32 = vld [vmem:[%s5408_s20 + $0x224] ss:$24 sps:$4 sm:$0xff]  }
  0x48   : > { %1340 = vmatprep.subr.bf16.mxu0 %v4869_v33  ;;  %v4959_v33 = vld [vmem:[%s5408_s20 + $0x220] ss:$24 sps:$4 sm:$0xff]  }
  0x4b   : > { %1341 = vmatpush1.bf16.msra.mxu0 %v4871_v34  ;;  %v4964_v34 = vld [vmem:[%s5408_s20 + $0x254] ss:$24 sps:$4 sm:$0xff]  }
  0x4c   : > { %1342 = vmatprep.subr.bf16.mxu0 %v4872_v35  ;;  %v4962_v35 = vld [vmem:[%s5408_s20 + $0x250] ss:$24 sps:$4 sm:$0xff]  }
  0x4f   : > { %1343 = vmatpush1.bf16.msra.mxu0 %v4874_v36  ;;  %v4967_v36 = vld [vmem:[%s5408_s20 + $0x284] ss:$24 sps:$4 sm:$0xff]  }
  0x50   : > { %1344 = vmatprep.subr.bf16.mxu0 %v4875_v37  ;;  %v4965_v37 = vld [vmem:[%s5408_s20 + $0x280] ss:$24 sps:$4 sm:$0xff]  }
  0x53   : > { %1345 = vmatpush1.bf16.msra.mxu0 %v4877_v38  ;;  %v4970_v38 = vld [vmem:[%s5408_s20 + $0x2b4] ss:$24 sps:$4 sm:$0xff]  }
  0x54   : > { %1357 = vmatprep.subr.bf16.mxu0 %v4880_v41  ;;  %v4971_v41 = vld [vmem:[%s5408_s20 + $0x2e0] ss:$24 sps:$4 sm:$0xff]  }
  0x56   : > { %1347 = vmatmul.mubr.bf16.vlgmr.msra.gmra.mrb[0].mxu0 %v5475_v43 }
  0x57   : > { %1358 = vmatpush1.bf16.msra.mxu0 %v4878_v42  ;;  %1389 = vmatprep.mubr.bf16.mxu0 %v5451_v19  ;;  %v5334_v42 = vmov 0.0  }
  0x58   : > { %1359 = vmatprep.subr.bf16.mxu0 %v4883_v44  ;;  %4775 = vmatprep.subr.bf16.mxu1 %v5334_v42 }
  0x59   : > { %4777 = vmatprep.mubr.msk.bf16.mxu1 %vm5335_vm0, %v5334_v42 }
  0x5b   : > { %1360 = vmatpush1.bf16.msra.mxu0 %v4881_v45 }
  0x5c   : > { %1361 = vmatprep.subr.bf16.mxu0 %v4886_v46 }
  0x5f   : > { %1362 = vmatpush1.bf16.msra.mxu0 %v4884_v47 }
  0x60   : > { %1363 = vmatprep.subr.bf16.mxu0 %v4889_v48 }
  0x63   : > { %1364 = vmatpush1.bf16.msra.mxu0 %v4887_v49  ;;  %v802_v49 = vld [vmem:[%s5423_s13 + $0x10] sm:$0xff] }
  0x64   : > { %1365 = vmatprep.subr.bf16.mxu0 %v4892_v50 }
  0x67   : > { %1366 = vmatpush1.bf16.msra.mxu0 %v4890_v51 }
  0x68   : > { %1367 = vmatprep.subr.bf16.mxu0 %v4895_v52  ;;  %v5562_v52 = vld [vmem:[%s5423_s13] sm:$0xff] }
  0x6b   : > { %1368 = vmatpush1.bf16.msra.mxu0 %v4893_v53 }
  0x6c   : > { %1369 = vmatprep.subr.bf16.mxu0 %v4898_v54 }
  0x6f   : > { %1370 = vmatpush1.bf16.msra.mxu0 %v4896_v55 }
  0x70   : > { %1371 = vmatprep.subr.bf16.mxu0 %v4901_v56 }
  0x73   : > { %1372 = vmatpush1.bf16.msra.mxu0 %v4899_v57 }
  0x74   : > { %1373 = vmatprep.subr.bf16.mxu0 %v4904_v58 }
  0x77   : > { %1374 = vmatpush1.bf16.msra.mxu0 %v4902_v59 }
  0x78   : > { %1375 = vmatprep.subr.bf16.mxu0 %v4907_v60 }
  0x7b   : > { %1376 = vmatpush1.bf16.msra.mxu0 %v4905_v61 }
  0x7c   : > { %1377 = vmatprep.subr.bf16.mxu0 %v4910_v62 }
  0x7f   : > { %1378 = vmatpush1.bf16.msra.mxu0 %v4908_v63 }
  0x80   : > { %1379 = vmatprep.subr.bf16.mxu0 %v4913_v0 }
  0x83   : > { %1380 = vmatpush1.bf16.msra.mxu0 %v4911_v1 }
  0x84   : > { %1381 = vmatprep.subr.bf16.mxu0 %v4916_v2  ;;  %v804_v2 = vld [vmem:[%s5423_s13 + $0x20] sm:$0xff] }
  0x87   : > { %1382 = vmatpush1.bf16.msra.mxu0 %v4914_v3  ;;  %v805_v3 = vld [vmem:[%s5423_s13 + $0x28] sm:$0xff] }
  0x88   : > { %1383 = vmatprep.subr.bf16.mxu0 %v4919_v4 }
  0x8b   : > { %1384 = vmatpush1.bf16.msra.mxu0 %v4917_v5 }
  0x8c   : > { %1385 = vmatprep.subr.bf16.mxu0 %v4922_v6 }
  0x8f   : > { %1386 = vmatpush1.bf16.msra.mxu0 %v4920_v7 }
  0x90   : > { %1387 = vmatprep.subr.bf16.mxu0 %v4925_v8 }
  0x93   : > { %1388 = vmatpush1.bf16.msra.mxu0 %v4923_v9 }
  0x94   : > { %1400 = vmatprep.subr.bf16.mxu0 %v4928_v10 }
  0x96   : > { %1390 = vmatmul.mubr.bf16.vlgmr.msra.gmra.mrb[4].mxu0 %v5475_v43 }
  0x97   : > { %1401 = vmatpush1.bf16.msra.mxu0 %v4926_v11  ;;  %1432 = vmatprep.mubr.bf16.mxu0 %v5451_v19  ;;  %v4938_v19 = vld [vmem:[%s5408_s20 + $0xd0] ss:$24 sps:$4 sm:$0xff]  }
  0x98   : > { %1402 = vmatprep.subr.bf16.mxu0 %v4931_v12 }
  0x9b   : > { %1403 = vmatpush1.bf16.msra.mxu0 %v4929_v13 }
  0x9c   : > { %1404 = vmatprep.subr.bf16.mxu0 %v4934_v14 }
  0x9f   : > { %1405 = vmatpush1.bf16.msra.mxu0 %v4932_v15 }
  0xa0   : > { %1406 = vmatprep.subr.bf16.mxu0 %v4937_v16 }
  0xa3   : > { %1407 = vmatpush1.bf16.msra.mxu0 %v4935_v17 }
  0xa4   : > { %1408 = vmatprep.subr.bf16.mxu0 %v4940_v18 }
  0xa7   : > { %1409 = vmatpush1.bf16.msra.mxu0 %v4938_v19 }
  0xa8   : > { %1410 = vmatprep.subr.bf16.mxu0 %v4943_v20 }
  0xab   : > { %1411 = vmatpush1.bf16.msra.mxu0 %v4941_v21 }
  0xac   : > { %1412 = vmatprep.subr.bf16.mxu0 %v4946_v22 }
  0xaf   : > { %1413 = vmatpush1.bf16.msra.mxu0 %v4944_v23 }
  0xb0   : > { %1414 = vmatprep.subr.bf16.mxu0 %v4949_v24 }
  0xb3   : > { %1415 = vmatpush1.bf16.msra.mxu0 %v4947_v25 }
  0xb4   : > { %1416 = vmatprep.subr.bf16.mxu0 %v4952_v26 }
  0xb7   : > { %1417 = vmatpush1.bf16.msra.mxu0 %v4950_v27 }
  0xb8   : > { %1418 = vmatprep.subr.bf16.mxu0 %v4955_v28 }
  0xbb   : > { %1419 = vmatpush1.bf16.msra.mxu0 %v4953_v29 }
  0xbc   : > { %1420 = vmatprep.subr.bf16.mxu0 %v4958_v30 }
  0xbf   : > { %1421 = vmatpush1.bf16.msra.mxu0 %v4956_v31 }
  0xc0   : > { %1422 = vmatprep.subr.bf16.mxu0 %v4961_v32 }
  0xc3   : > { %1423 = vmatpush1.bf16.msra.mxu0 %v4959_v33 }
  0xc4   : > { %1424 = vmatprep.subr.bf16.mxu0 %v4964_v34 }
  0xc7   : > { %1425 = vmatpush1.bf16.msra.mxu0 %v4962_v35 }
  0xc8   : > { %1426 = vmatprep.subr.bf16.mxu0 %v4967_v36 }
  0xcb   : > { %1427 = vmatpush1.bf16.msra.mxu0 %v4965_v37 }
  0xcc   : > { %1428 = vmatprep.subr.bf16.mxu0 %v4970_v38 }
  0xcf   : > { %1429 = vmatpush1.bf16.msra.mxu0 %v4968_v39 }
  0xd0   : > { %1430 = vmatprep.subr.bf16.mxu0 %v4973_v40 }
  0xd3   : > { %1431 = vmatpush1.bf16.msra.mxu0 %v4971_v41 }
  0xd4   : > { %4751 = vmatprep.subr.bf16.mxu0 %v5334_v42 }
  0xd6   : > { %1433 = vmatmul.mubr.bf16.vlgmr.msra.gmra.mrb[8].mxu0 %v5475_v43  ;;  %v810_v43 = vlaneseq }
  0xd7   : > { %4753 = vmatprep.mubr.msk.bf16.mxu0 %vm5335_vm0, %v5334_v42 }
  0xd8   : > { %v5554_v48 = vshrl.u32 %v810_v43, 7 }
  0xda   : > { %v5558_v50 = vsub.s32 0, %v5554_v48 }
  0xdc   : > { %v821_v51 = vrot.slane %v802_v49, %v5558_v50  ;;  %v813_v56 = vrot.slane %v5562_v52, %v5558_v50  ;;  %v829_v4 = vrot.slane %v804_v2, %v5558_v50  ;;  %v833_v5 = vrot.slane %v805_v3, %v5558_v50  ;;  %v803_v49 = vld [vmem:[%s5423_s13 + $0x18] sm:$0xff] }
 0x129   : > { %v1348_v44 = vpop.f32.mrb[0].mxu0 }
 0x12a   : > { %v5550_v45 = vpop.f32.mrb[1].mxu0  ;;  %v1349_v62 = vadd.f32 %v1348_v44, %v813_v56 }
 0x12b   : > { %v1352_v46 = vpop.f32.mrb[2].mxu0 }
 0x12c   : > { %v5552_v47 = vpop.f32.mrb[3].mxu0  ;;  %v1353_v63 = vadd.f32 %v1352_v46, %v813_v56  ;;  %v1443_v0 = vpack.c.bf16 %v1349_v62, %v1349_v62  ;;  %v5593_v56 = vld [vmem:[%s5423_s13 + $0x8] sm:$0xff] }
 0x12e   : > { %v1649_v1 = vpack.c.bf16 %v1353_v63, %v1353_v63 }
 0x169   : > { %v1391_v53 = vpop.f32.mrb[4].mxu0 }
 0x16a   : > { %v1392_v54 = vadd.f32 %v1391_v53, %v821_v51  ;;  %v5564_v55 = vpop.f32.mrb[5].mxu0  ;;  %v825_v53 = vrot.slane %v803_v49, %v5558_v50 }
 0x16b   : > { %v1395_v57 = vpop.f32.mrb[6].mxu0 }
 0x16c   : > { %v1444_v58 = vpack.c.bf16 %v1392_v54, %v1392_v54  ;;  %v1396_v59 = vadd.f32 %v1395_v57, %v821_v51  ;;  %v5568_v60 = vpop.f32.mrb[7].mxu0  ;;  %v1394_v57 = vadd.f32 %v5564_v55, %v825_v53 }
 0x16e   : > { %v1650_v61 = vpack.c.bf16 %v1396_v59, %v1396_v59  ;;  %4752 = vmatpush3.bf16.xpose.msra.mxu0 %v1444_v58  ;;  %v817_v59 = vrot.slane %v5593_v56, %v5558_v50  ;;  %v1548_v63 = vpack.c.bf16 %v1394_v57, %v1394_v57  ;;  %v4983_v57 = vld [vmem:[%s5403_s16 + $0x30] ss:$8 sps:$4 sm:$0xff]  }
 0x16f   : > { %4757 = vmatprep.subr.bf16.mxu0 %v5334_v42 }
 0x170   : > { %4776 = vmatpush3.bf16.xpose.msra.mxu1 %v1650_v61  ;;  %v1351_v2 = vadd.f32 %v5550_v45, %v817_v59 }
 0x171   : > { %4781 = vmatprep.subr.bf16.mxu1 %v5334_v42 }
 0x175   : > { %4754 = vmatmul.mubr.bf16.vlgmr.msra.gmra.mrb[12].mxu0 %v1443_v0  ;;  %v1398_v0 = vadd.f32 %v5568_v60, %v825_v53  ;;  %v1547_v60 = vpack.c.bf16 %v1351_v2, %v1351_v2  ;;  %v4980_v53 = vld [vmem:[%s5403_s16 + $0x20] ss:$8 sps:$4 sm:$0xff]   ;;  %v4995_v2 = vld [vmem:[%s5403_s16 + $0x70] ss:$8 sps:$4 sm:$0xff]  }
 0x176   : > { %4759 = vmatprep.mubr.msk.bf16.mxu0 %vm5335_vm0, %v5334_v42 }
 0x177   : > { %4778 = vmatmul.mubr.bf16.vlgmr.msra.gmra.mrb[0].mxu1 %v1649_v1  ;;  %v1752_v55 = vpack.c.bf16 %v1398_v0, %v1398_v0  ;;  %v4992_v0 = vld [vmem:[%s5403_s16 + $0x60] ss:$8 sps:$4 sm:$0xff]  }
 0x178   : > { %4783 = vmatprep.mubr.msk.bf16.mxu1 %vm5335_vm0, %v5334_v42 }
 0x1a9   : > { %v1434_v6 = vpop.f32.mrb[8].mxu0 }
 0x1aa   : > { %v1435_v7 = vadd.f32 %v1434_v6, %v829_v4  ;;  %v1436_v8 = vpop.f32.mrb[9].mxu0 }
 0x1ab   : > { %v1437_v9 = vadd.f32 %v1436_v8, %v833_v5  ;;  %v1438_v10 = vpop.f32.mrb[10].mxu0 }
 0x1ac   : > { %v1445_v11 = vpack.c.bf16 %v1435_v7, %v1435_v7  ;;  %v1439_v12 = vadd.f32 %v1438_v10, %v829_v4  ;;  %v1440_v13 = vpop.f32.mrb[11].mxu0  ;;  %v1355_v4 = vadd.f32 %v5552_v47, %v817_v59  ;;  %v4986_v59 = vld [vmem:[%s5403_s16 + $0x40] ss:$8 sps:$4 sm:$0xff]  }
 0x1ad   : > { %v1549_v14 = vpack.c.bf16 %v1437_v9, %v1437_v9  ;;  %v1441_v15 = vadd.f32 %v1440_v13, %v833_v5 }
 0x1ae   : > { %v1505_v16 = vsel %vm1503_vm1, %v1445_v11, 0  ;;  %v1651_v17 = vpack.c.bf16 %v1439_v12, %v1439_v12  ;;  %v1751_v45 = vpack.c.bf16 %v1355_v4, %v1355_v4  ;;  %v5001_v4 = vld [vmem:[%s5403_s16 + $0x90] ss:$8 sps:$4 sm:$0xff]  }
 0x1af   : > { %v5580_v18 = vsel %vm1503_vm1, %v1549_v14, 0  ;;  %v1753_v19 = vpack.c.bf16 %v1441_v15, %v1441_v15  ;;  %4758 = vmatpush3.bf16.msra.mxu0 %v1505_v16 }
 0x1b0   : > { %v1709_v20 = vsel %vm1503_vm1, %v1651_v17, 0  ;;  %4763 = vmatprep.subr.bf16.mxu0 %v5334_v42 }
 0x1b1   : > { %v5583_v21 = vsel %vm1503_vm1, %v1753_v19, 0  ;;  %4782 = vmatpush3.bf16.msra.mxu1 %v1709_v20 }
 0x1b2   : > { %4787 = vmatprep.subr.bf16.mxu1 %v5334_v42 }
 0x248   : > { %v1480_v22 = vpop.f32.mrb[12].mxu0 }
 0x249   : > { %v1486_v23 = vmul.f32 0.088388346, %v1480_v22  ;;  %v4755_v24 = vpop.f32.mrb[13].mxu0 }
 0x24a   : > { %v1483_v25 = vpop.f32.mrb[14].mxu0  ;;  %v1686_v26 = vpop.f32.mrb[0].mxu1 }
 0x24b   : > { %v1692_v27 = vmul.f32 0.088388346, %v1686_v26  ;;  %v4756_v28 = vpop.f32.mrb[15].mxu0  ;;  %v4779_v29 = vpop.f32.mrb[1].mxu1  ;;  %v1488_v30 = vsel %vm1487_vm2, %v1486_v23, -inf }
 0x24c   : > { %v1689_v31 = vpop.f32.mrb[2].mxu1  ;;  %1489 = vmax.xlane.f32.xlu0 %v1488_v30 }
 0x24d   : > { %v4780_v32 = vpop.f32.mrb[3].mxu1  ;;  %v1693_v33 = vsel %vm1487_vm2, %v1692_v27, -inf }
 0x250   : > { %1694 = vmax.xlane.f32.xlu0 %v1693_v33 }
 0x2d9   : > { %v1490_v34 = vpop.xlane.xlu0 %1489 }
 0x2da   : > { %v1491_v35 = vsub.f32 %v1486_v23, %v1490_v34  ;;  %v4976_v34 = vld [vmem:[%s5403_s16 + $0x4] ss:$8 sps:$4 sm:$0xff]  }
 0x2dc   : > { %v1492_v36 = vmul.f32 1.442695, %v1491_v35 }
 0x2dd   : > { %v1695_v37 = vpop.xlane.xlu0 %1694 }
 0x2de   : > { %5214 = vpow2.f32 %v1492_v36  ;;  %v1696_v38 = vsub.f32 %v1692_v27, %v1695_v37 }
 0x2e0   : > { %v1697_v39 = vmul.f32 1.442695, %v1696_v38 }
 0x2e2   : > { %5216 = vpow2.f32 %v1697_v39  ;;  %v4974_v39 = vld [vmem:[%s5403_s16] ss:$8 sps:$4 sm:$0xff]  }
 0x2e8   : > { %v5215_v40 = vpop.eup %5214 }
 0x2e9   : > { %v1494_v41 = vsel %vm1487_vm2, %v5215_v40, 0.0 }
 0x2ea   : > { %1495 = vadd.xlane.f32.xlu1 %v1494_v41  ;;  %v4979_v41 = vld [vmem:[%s5403_s16 + $0x14] ss:$8 sps:$4 sm:$0xff]  }
 0x2ec   : > { %v5217_v44 = vpop.eup %5216 }
 0x2ed   : > { %v1699_v46 = vsel %vm1487_vm2, %v5217_v44, 0.0 }
 0x2ee   : > { %1700 = vadd.xlane.f32.xlu1 %v1699_v46 }
 0x377   : > { %v1496_v43 = vpop.xlane.xlu1 %1495 }
 0x378   : > { %5218 = vrcp.f32 %v1496_v43  ;;  %v4977_v43 = vld [vmem:[%s5403_s16 + $0x10] ss:$8 sps:$4 sm:$0xff]  }
 0x37b   : > { %v1701_v51 = vpop.xlane.xlu1 %1700 }
 0x37c   : > { %5220 = vrcp.f32 %v1701_v51  ;;  %v4982_v51 = vld [vmem:[%s5403_s16 + $0x24] ss:$8 sps:$4 sm:$0xff]  }
 0x382   : > { %v5219_v54 = vpop.eup %5218 }
 0x383   : > { %v1498_v58 = vmul.f32 %v5219_v54, %v5215_v40  ;;  %v4985_v54 = vld [vmem:[%s5403_s16 + $0x34] ss:$8 sps:$4 sm:$0xff]  }
 0x385   : > { %v1499_v61 = vpack.c.bf16 %v1498_v58, %v1498_v58  ;;  %v4988_v58 = vld [vmem:[%s5403_s16 + $0x44] ss:$8 sps:$4 sm:$0xff]  }
 0x386   : > { %v5221_v62 = vpop.eup %5220 }
 0x387   : > { %v1703_v1 = vmul.f32 %v5221_v62, %v5217_v44  ;;  %4760 = vmatmul.mubr.msk.bf16.vlgmr.msra.gmra.mrb[16].mxu0 %vm1487_vm2, %v1499_v61  ;;  %v4991_v61 = vld [vmem:[%s5403_s16 + $0x54] ss:$8 sps:$4 sm:$0xff]   ;;  %v4989_v62 = vld [vmem:[%s5403_s16 + $0x50] ss:$8 sps:$4 sm:$0xff]  }
 0x388   : > { %4764 = vmatpush3.bf16.xpose.msra.mxu0 %v1548_v63  ;;  %4765 = vmatprep.mubr.msk.bf16.mxu0 %vm5335_vm0, %v5334_v42  ;;  %v4994_v63 = vld [vmem:[%s5403_s16 + $0x64] ss:$8 sps:$4 sm:$0xff]  }
 0x389   : > { %v1704_v3 = vpack.c.bf16 %v1703_v1, %v1703_v1  ;;  %4769 = vmatprep.subr.bf16.mxu0 %v5334_v42  ;;  %v4997_v1 = vld [vmem:[%s5403_s16 + $0x74] ss:$8 sps:$4 sm:$0xff]  }
 0x38b   : > { %4784 = vmatmul.mubr.msk.bf16.vlgmr.msra.gmra.mrb[4].mxu1 %vm1487_vm2, %v1704_v3  ;;  %v5000_v3 = vld [vmem:[%s5403_s16 + $0x84] ss:$8 sps:$4 sm:$0xff]  }
 0x38c   : > { %4788 = vmatpush3.bf16.xpose.msra.mxu1 %v1752_v55  ;;  %4789 = vmatprep.mubr.msk.bf16.mxu1 %vm5335_vm0, %v5334_v42  ;;  %v4998_v55 = vld [vmem:[%s5403_s16 + $0x80] ss:$8 sps:$4 sm:$0xff]  }
 0x38d   : > { %4793 = vmatprep.subr.bf16.mxu1 %v5334_v42 }
 0x38f   : > { %4766 = vmatmul.mubr.bf16.vlgmr.msra.gmra.mrb[20].mxu0 %v1547_v60  ;;  %v5003_v60 = vld [vmem:[%s5403_s16 + $0x94] ss:$8 sps:$4 sm:$0xff]  }
 0x390   : > { %4770 = vmatpush3.bf16.msra.mxu0 %v5580_v18  ;;  %4771 = vmatprep.mubr.msk.bf16.mxu0 %vm5335_vm0, %v5334_v42 }
 0x391   : > { %2023 = vmatprep.subr.bf16.mxu0 %v4976_v34  ;;  %v5238_v34 = vld [vmem:[#allocation2] sm:$0xff] }
 0x393   : > { %4790 = vmatmul.mubr.bf16.vlgmr.msra.gmra.mrb[8].mxu1 %v1751_v45  ;;  %v5006_v45 = vld [vmem:[%s5403_s16 + $0xa4] ss:$8 sps:$4 sm:$0xff]  }
 0x394   : > { %4794 = vmatpush3.bf16.msra.mxu1 %v5583_v21  ;;  %4795 = vmatprep.mubr.msk.bf16.mxu1 %vm5335_vm0, %v5334_v42 }
 0x45a   : > { %v5615_v5 = vpop.f32.mrb[16].mxu0 }
 0x45b   : > { %v4761_v6 = vpop.f32.mrb[17].mxu0 }
 0x45c   : > { %v1544_v7 = vpop.f32.mrb[18].mxu0  ;;  %v5004_v6 = vld [vmem:[%s5403_s16 + $0xa0] ss:$8 sps:$4 sm:$0xff]  }
 0x45d   : > { %v4762_v47 = vpop.f32.mrb[19].mxu0  ;;  %v5009_v7 = vld [vmem:[%s5403_s16 + $0xb4] ss:$8 sps:$4 sm:$0xff]  }
 0x45e   : > { %v5617_v8 = vpop.f32.mrb[4].mxu1  ;;  %v5007_v47 = vld [vmem:[%s5403_s16 + $0xb0] ss:$8 sps:$4 sm:$0xff]  }
 0x45f   : > { %v1853_v9 = vpack.c.bf16 %v5617_v8, %v5615_v5  ;;  %v4785_v10 = vpop.f32.mrb[5].mxu1  ;;  %v5239_v8 = vld [vmem:[#allocation2 + $0x8] sm:$0xff] }
 0x460   : > { %v1748_v11 = vpop.f32.mrb[6].mxu1  ;;  %v5012_v10 = vld [vmem:[%s5403_s16 + $0xc4] ss:$8 sps:$4 sm:$0xff]  }
 0x461   : > { %v4786_v12 = vpop.f32.mrb[7].mxu1  ;;  %v5010_v11 = vld [vmem:[%s5403_s16 + $0xc0] ss:$8 sps:$4 sm:$0xff]  }
 0x462   : > { %v1584_v13 = vpop.f32.mrb[20].mxu0  ;;  %v5015_v12 = vld [vmem:[%s5403_s16 + $0xd4] ss:$8 sps:$4 sm:$0xff]  }
 0x463   : > { %v1590_v14 = vmul.f32 0.088388346, %v1584_v13  ;;  %v4767_v15 = vpop.f32.mrb[21].mxu0  ;;  %v5013_v13 = vld [vmem:[%s5403_s16 + $0xd0] ss:$8 sps:$4 sm:$0xff]  }
 0x464   : > { %v1587_v16 = vpop.f32.mrb[22].mxu0  ;;  %v5016_v15 = vld [vmem:[%s5403_s16 + $0xe0] ss:$8 sps:$4 sm:$0xff]  }
 0x465   : > { %v4768_v17 = vpop.f32.mrb[23].mxu0  ;;  %v1591_v42 = vsel %vm1487_vm2, %v1590_v14, -inf  ;;  %v5021_v16 = vld [vmem:[%s5403_s16 + $0xf4] ss:$8 sps:$4 sm:$0xff]  }
 0x466   : > { %v1788_v18 = vpop.f32.mrb[8].mxu1  ;;  %1592 = vmax.xlane.f32.xlu0 %v1591_v42  ;;  %v5019_v17 = vld [vmem:[%s5403_s16 + $0xf0] ss:$8 sps:$4 sm:$0xff]  }
 0x467   : > { %v1794_v19 = vmul.f32 0.088388346, %v1788_v18  ;;  %v4791_v20 = vpop.f32.mrb[9].mxu1 }
 0x468   : > { %v1791_v21 = vpop.f32.mrb[10].mxu1 }
 0x469   : > { %v4792_v22 = vpop.f32.mrb[11].mxu1  ;;  %v1795_v23 = vsel %vm1487_vm2, %v1794_v19, -inf }
 0x46a   : > { %1796 = vmax.xlane.f32.xlu1 %v1795_v23 }
 0x4f3   : > { %v1593_v24 = vpop.xlane.xlu0 %1592 }
 0x4f4   : > { %v1594_v25 = vsub.f32 %v1590_v14, %v1593_v24  ;;  %v5018_v14 = vld [vmem:[%s5403_s16 + $0xe4] ss:$8 sps:$4 sm:$0xff]  }
 0x4f6   : > { %v1595_v26 = vmul.f32 1.442695, %v1594_v25 }
 0x4f7   : > { %v1797_v27 = vpop.xlane.xlu1 %1796 }
 0x4f8   : > { %5222 = vpow2.f32 %v1595_v26  ;;  %v1798_v28 = vsub.f32 %v1794_v19, %v1797_v27  ;;  %v1857_v26 = vsub.s32 2, %v5554_v48 }
 0x4fa   : > { %v1799_v29 = vmul.f32 1.442695, %v1798_v28  ;;  %v1858_v27 = vrot.slane %v5562_v52, %v1857_v26  ;;  %v1862_v28 = vrot.slane %v5593_v56, %v1857_v26  ;;  %v588_v26 = vld [vmem:[%s5413_s23 + $0x160] sm:$0xff] }
 0x4fc   : > { %5224 = vpow2.f32 %v1799_v29 }
 0x502   : > { %v5223_v30 = vpop.eup %5222 }
 0x503   : > { %v1597_v31 = vsel %vm1487_vm2, %v5223_v30, 0.0 }
 0x504   : > { %1598 = vadd.xlane.f32.xlu0 %v1597_v31 }
 0x506   : > { %v5225_v32 = vpop.eup %5224 }
 0x507   : > { %v1801_v33 = vsel %vm1487_vm2, %v5225_v32, 0.0 }
 0x508   : > { %1802 = vadd.xlane.f32.xlu1 %v1801_v33 }
 0x591   : > { %v1599_v35 = vpop.xlane.xlu0 %1598 }
 0x592   : > { %5226 = vrcp.f32 %v1599_v35 }
 0x595   : > { %v1803_v36 = vpop.xlane.xlu1 %1802 }
 0x596   : > { %5228 = vrcp.f32 %v1803_v36 }
 0x59c   : > { %v5227_v37 = vpop.eup %5226 }
 0x59d   : > { %v1601_v38 = vmul.f32 %v5227_v37, %v5223_v30 }
 0x59f   : > { %v1602_v40 = vpack.c.bf16 %v1601_v38, %v1601_v38  ;;  %v5240_v38 = vld [vmem:[#allocation2 + $0x10] sm:$0xff] }
 0x5a0   : > { %v5229_v44 = vpop.eup %5228 }
 0x5a1   : > { %v1805_v46 = vmul.f32 %v5229_v44, %v5225_v32  ;;  %4772 = vmatmul.mubr.msk.bf16.vlgmr.msra.gmra.mrb[24].mxu0 %vm1487_vm2, %v1602_v40  ;;  %v5241_v40 = vld [vmem:[#allocation2 + $0x18] sm:$0xff] }
 0x5a2   : > { %2024 = vmatpush1.bf16.msra.mxu0 %v4974_v39 }
 0x5a3   : > { %v1806_v49 = vpack.c.bf16 %v1805_v46, %v1805_v46  ;;  %2025 = vmatprep.subr.bf16.mxu0 %v4979_v41 }
 0x5a5   : > { %4796 = vmatmul.mubr.msk.bf16.vlgmr.msra.gmra.mrb[12].mxu1 %vm1487_vm2, %v1806_v49  ;;  %v548_v49 = vld [vmem:[%s5413_s23 + $0x20] sm:$0xff] }
 0x5a6   : > { %2026 = vmatpush1.bf16.msra.mxu0 %v4977_v43  ;;  %v544_v43 = vld [vmem:[%s5413_s23] sm:$0xff] }
 0x5a7   : > { %2027 = vmatprep.subr.bf16.mxu0 %v4982_v51  ;;  %v545_v51 = vld [vmem:[%s5413_s23 + $0x8] sm:$0xff] }
 0x5aa   : > { %2028 = vmatpush1.bf16.msra.mxu0 %v4980_v53  ;;  %v4436_v53 = vcombine.low %v544_v43, %v548_v49 }
 0x5ab   : > { %2029 = vmatprep.subr.bf16.mxu0 %v4985_v54  ;;  %v4437_v54 = vcombine.high %v544_v43, %v548_v49  ;;  %v601_v43 = vld [vmem:[%s5413_s23 + $0x1c8] sm:$0xff] }
 0x5ac   : > { %v605_v49 = vld [vmem:[%s5413_s23 + $0x1e8] sm:$0xff] }
 0x5ad   : > { %2801 = vmatprep.subr.bf16.mxu1 %v4437_v54 }
 0x5ae   : > { %2030 = vmatpush1.bf16.msra.mxu0 %v4983_v57  ;;  %v549_v57 = vld [vmem:[%s5413_s23 + $0x28] sm:$0xff]  ;;  %2802 = vmatpush1.bf16.msra.mxu1 %v4436_v53 }
 0x5af   : > { %2031 = vmatprep.subr.bf16.mxu0 %v4988_v58  ;;  %v552_v58 = vld [vmem:[%s5413_s23 + $0x40] sm:$0xff] }
 0x5b2   : > { %2032 = vmatpush1.bf16.msra.mxu0 %v4986_v59  ;;  %v556_v59 = vld [vmem:[%s5413_s23 + $0x60] sm:$0xff] }
 0x5b3   : > { %2033 = vmatprep.subr.bf16.mxu0 %v4991_v61  ;;  %v4438_v61 = vcombine.low %v545_v51, %v549_v57 }
 0x5b6   : > { %2034 = vmatpush1.bf16.msra.mxu0 %v4989_v62  ;;  %v4439_v62 = vcombine.high %v545_v51, %v549_v57  ;;  %v4495_v57 = vcombine.high %v601_v43, %v605_v49 }
 0x5b7   : > { %2035 = vmatprep.subr.bf16.mxu0 %v4994_v63  ;;  %v4445_v63 = vcombine.high %v552_v58, %v556_v59 }
 0x5b9   : > { %2803 = vmatprep.subr.bf16.mxu1 %v4445_v63 }
 0x5ba   : > { %2036 = vmatpush1.bf16.msra.mxu0 %v4992_v0  ;;  %v553_v0 = vld [vmem:[%s5413_s23 + $0x48] sm:$0xff] }
 0x5bb   : > { %2037 = vmatprep.subr.bf16.mxu0 %v4997_v1  ;;  %v557_v1 = vld [vmem:[%s5413_s23 + $0x68] sm:$0xff] }
 0x5be   : > { %2038 = vmatpush1.bf16.msra.mxu0 %v4995_v2  ;;  %v560_v2 = vld [vmem:[%s5413_s23 + $0x80] sm:$0xff] }
 0x5bf   : > { %2039 = vmatprep.subr.bf16.mxu0 %v5000_v3  ;;  %v4447_v3 = vcombine.high %v553_v0, %v557_v1 }
 0x5c2   : > { %2040 = vmatpush1.bf16.msra.mxu0 %v4998_v55  ;;  %v564_v55 = vld [vmem:[%s5413_s23 + $0xa0] sm:$0xff] }
 0x5c3   : > { %2041 = vmatprep.subr.bf16.mxu0 %v5003_v60  ;;  %v561_v60 = vld [vmem:[%s5413_s23 + $0x88] sm:$0xff] }
 0x5c6   : > { %2042 = vmatpush1.bf16.msra.mxu0 %v5001_v4  ;;  %v565_v4 = vld [vmem:[%s5413_s23 + $0xa8] sm:$0xff] }
 0x5c7   : > { %2043 = vmatprep.subr.bf16.mxu0 %v5006_v45  ;;  %v4444_v45 = vcombine.low %v552_v58, %v556_v59  ;;  %v608_v58 = vld [vmem:[%s5413_s23 + $0x200] sm:$0xff] }
 0x5c8   : > { %v612_v59 = vld [vmem:[%s5413_s23 + $0x220] sm:$0xff] }
 0x5c9   : > { %2804 = vmatpush1.bf16.msra.mxu1 %v4444_v45  ;;  %v4500_v45 = vcombine.low %v608_v58, %v612_v59 }
 0x5ca   : > { %2044 = vmatpush1.bf16.msra.mxu0 %v5004_v6  ;;  %v4446_v6 = vcombine.low %v553_v0, %v557_v1  ;;  %v4494_v0 = vcombine.low %v601_v43, %v605_v49  ;;  %v4501_v1 = vcombine.high %v608_v58, %v612_v59  ;;  %v653_v58 = vld [vmem:[%s5413_s23 + $0x368] sm:$0xff] }
 0x5cb   : > { %2045 = vmatprep.subr.bf16.mxu0 %v5009_v7  ;;  %v4453_v7 = vcombine.high %v560_v2, %v564_v55 }
 0x5cd   : > { %2805 = vmatprep.subr.bf16.mxu1 %v4453_v7 }
 0x5ce   : > { %2046 = vmatpush1.bf16.msra.mxu0 %v5007_v47  ;;  %v4455_v47 = vcombine.high %v561_v60, %v565_v4 }
 0x5cf   : > { %2047 = vmatprep.subr.bf16.mxu0 %v5012_v10  ;;  %v568_v10 = vld [vmem:[%s5413_s23 + $0xc0] sm:$0xff] }
 0x5d2   : > { %2048 = vmatpush1.bf16.msra.mxu0 %v5010_v11  ;;  %v572_v11 = vld [vmem:[%s5413_s23 + $0xe0] sm:$0xff] }
 0x5d3   : > { %2049 = vmatprep.subr.bf16.mxu0 %v5015_v12  ;;  %v569_v12 = vld [vmem:[%s5413_s23 + $0xc8] sm:$0xff] }
 0x5d6   : > { %2050 = vmatpush1.bf16.msra.mxu0 %v5013_v13  ;;  %v573_v13 = vld [vmem:[%s5413_s23 + $0xe8] sm:$0xff] }
 0x5d7   : > { %2051 = vmatprep.subr.bf16.mxu0 %v5018_v14  ;;  %v4452_v14 = vcombine.low %v560_v2, %v564_v55  ;;  %v620_v55 = vld [vmem:[%s5413_s23 + $0x260] sm:$0xff] }
 0x5d9   : > { %2806 = vmatpush1.bf16.msra.mxu1 %v4452_v14 }
 0x5da   : > { %2052 = vmatpush1.bf16.msra.mxu0 %v5016_v15  ;;  %v4454_v15 = vcombine.low %v561_v60, %v565_v4  ;;  %v617_v60 = vld [vmem:[%s5413_s23 + $0x248] sm:$0xff] }
 0x5db   : > { %2053 = vmatprep.subr.bf16.mxu0 %v5021_v16  ;;  %v4461_v16 = vcombine.high %v568_v10, %v572_v11  ;;  %v621_v4 = vld [vmem:[%s5413_s23 + $0x268] sm:$0xff] }
 0x5dd   : > { %2807 = vmatprep.subr.bf16.mxu1 %v4461_v16 }
 0x5de   : > { %2054 = vmatpush1.bf16.msra.mxu0 %v5019_v17  ;;  %v4463_v17 = vcombine.high %v569_v12, %v573_v13 }
 0x5df   : > { %2844 = vmatprep.subr.bf16.mxu0 %v4439_v62  ;;  %v613_v62 = vld [vmem:[%s5413_s23 + $0x228] sm:$0xff] }
 0x674   : > { %v1643_v42 = vpop.f32.mrb[24].mxu0 }
 0x675   : > { %v4773_v18 = vpop.f32.mrb[25].mxu0 }
 0x676   : > { %v1646_v19 = vpop.f32.mrb[26].mxu0  ;;  %v580_v18 = vld [vmem:[%s5413_s23 + $0x120] sm:$0xff] }
 0x677   : > { %v4774_v20 = vpop.f32.mrb[27].mxu0  ;;  %v577_v19 = vld [vmem:[%s5413_s23 + $0x108] sm:$0xff] }
 0x678   : > { %v1847_v21 = vpop.f32.mrb[12].mxu1  ;;  %v581_v20 = vld [vmem:[%s5413_s23 + $0x128] sm:$0xff] }
 0x679   : > { %v1854_v22 = vpack.c.bf16 %v1847_v21, %v1643_v42  ;;  %v4797_v23 = vpop.f32.mrb[13].mxu1  ;;  %v576_v42 = vld [vmem:[%s5413_s23 + $0x100] sm:$0xff]  ;;  %v4460_v21 = vcombine.low %v568_v10, %v572_v11  ;;  %v4510_v11 = vcombine.low %v617_v60, %v621_v4 }
 0x67a   : > { %v1850_v24 = vpop.f32.mrb[14].mxu1  ;;  %v4469_v23 = vcombine.high %v576_v42, %v580_v18 }
 0x67b   : > { %v4798_v25 = vpop.f32.mrb[15].mxu1  ;;  %2055 = vmatprep.mubr.bf16.mxu0 %v1854_v22  ;;  %v4462_v22 = vcombine.low %v569_v12, %v573_v13  ;;  %v4471_v24 = vcombine.high %v577_v19, %v581_v20  ;;  %2808 = vmatpush1.bf16.msra.mxu1 %v4460_v21 }
 0x67c   : > { %2056 = vmatmul.mubr.bf16.vlgmr.msra.gmra.mrb[28].mxu0 %v1853_v9  ;;  %v584_v25 = vld [vmem:[%s5413_s23 + $0x140] sm:$0xff]  ;;  %2809 = vmatprep.subr.bf16.mxu1 %v4469_v23  ;;  %v625_v23 = vld [vmem:[%s5413_s23 + $0x288] sm:$0xff] }
 0x67d   : > { %2845 = vmatpush1.bf16.msra.mxu0 %v4438_v61  ;;  %v609_v61 = vld [vmem:[%s5413_s23 + $0x208] sm:$0xff] }
 0x67e   : > { %2846 = vmatprep.subr.bf16.mxu0 %v4447_v3  ;;  %v4503_v2 = vcombine.high %v609_v61, %v613_v62  ;;  %v616_v3 = vld [vmem:[%s5413_s23 + $0x240] sm:$0xff] }
 0x67f   : > { %v4509_v7 = vcombine.high %v616_v3, %v620_v55  ;;  %v4508_v10 = vcombine.low %v616_v3, %v620_v55  ;;  %v661_v3 = vld [vmem:[%s5413_s23 + $0x3a8] sm:$0xff] }
 0x681   : > { %2847 = vmatpush1.bf16.msra.mxu0 %v4446_v6  ;;  %v4502_v6 = vcombine.low %v609_v61, %v613_v62 }
 0x682   : > { %2848 = vmatprep.subr.bf16.mxu0 %v4455_v47  ;;  %v4511_v47 = vcombine.high %v617_v60, %v621_v4 }
 0x685   : > { %2849 = vmatpush1.bf16.msra.mxu0 %v4454_v15 }
 0x686   : > { %2850 = vmatprep.subr.bf16.mxu0 %v4463_v17 }
 0x689   : > { %2851 = vmatpush1.bf16.msra.mxu0 %v4462_v22  ;;  %v628_v22 = vld [vmem:[%s5413_s23 + $0x2a0] sm:$0xff] }
 0x68a   : > { %2852 = vmatprep.subr.bf16.mxu0 %v4471_v24 }
 0x74f   : > { %v2057_v29 = vpop.f32.mrb[28].mxu0 }
 0x750   : > { %v2058_v30 = vadd.f32 %v2057_v29, %v1858_v27  ;;  %v2059_v31 = vpop.f32.mrb[29].mxu0  ;;  %v4468_v29 = vcombine.low %v576_v42, %v580_v18 }
 0x751   : > { %v2060_v32 = vadd.f32 %v2059_v31, %v1862_v28  ;;  %v2061_v33 = vpop.f32.mrb[30].mxu0  ;;  %v4477_v31 = vcombine.high %v584_v25, %v588_v26 }
 0x752   : > { %v5665_v35 = vadd.f32 %v5238_v34, %v2058_v30  ;;  %v2062_v36 = vadd.f32 %v2061_v33, %v1858_v27  ;;  %v2063_v5 = vpop.f32.mrb[31].mxu0  ;;  %v585_v27 = vld [vmem:[%s5413_s23 + $0x148] sm:$0xff]  ;;  %v4470_v30 = vcombine.low %v577_v19, %v581_v20  ;;  %v592_v33 = vld [vmem:[%s5413_s23 + $0x180] sm:$0xff]  ;;  %2810 = vmatpush1.bf16.msra.mxu1 %v4468_v29 }
 0x753   : > { %v5667_v9 = vadd.f32 %v5239_v8, %v2060_v32  ;;  %v2064_v37 = vadd.f32 %v2063_v5, %v1862_v28  ;;  %v589_v28 = vld [vmem:[%s5413_s23 + $0x168] sm:$0xff]  ;;  %v596_v34 = vld [vmem:[%s5413_s23 + $0x1a0] sm:$0xff]  ;;  %v4476_v8 = vcombine.low %v584_v25, %v588_v26  ;;  %2811 = vmatprep.subr.bf16.mxu1 %v4477_v31 }
 0x754   : > { %v5669_v39 = vadd.f32 %v5240_v38, %v2062_v36  ;;  %v4479_v32 = vcombine.high %v585_v27, %v589_v28  ;;  %v593_v36 = vld [vmem:[%s5413_s23 + $0x188] sm:$0xff]  ;;  %2853 = vmatpush1.bf16.msra.mxu0 %v4470_v30  ;;  %v4485_v38 = vcombine.high %v592_v33, %v596_v34  ;;  %v4484_v51 = vcombine.low %v592_v33, %v596_v34  ;;  %v632_v29 = vld [vmem:[%s5413_s23 + $0x2c0] sm:$0xff] }
 0x755   : > { %v5671_v41 = vadd.f32 %v5241_v40, %v2064_v37  ;;  %v2070_v44 = vadd.f32 %v5667_v9, %v5665_v35  ;;  %v597_v5 = vld [vmem:[%s5413_s23 + $0x1a8] sm:$0xff]  ;;  %v4478_v37 = vcombine.low %v585_v27, %v589_v28  ;;  %v636_v30 = vld [vmem:[%s5413_s23 + $0x2e0] sm:$0xff] }
 0x756   : > { %2854 = vmatprep.subr.bf16.mxu0 %v4479_v32  ;;  %v4487_v40 = vcombine.high %v593_v36, %v597_v5  ;;  %2812 = vmatpush1.bf16.msra.mxu1 %v4476_v8  ;;  %v4486_v53 = vcombine.low %v593_v36, %v597_v5  ;;  %v629_v25 = vld [vmem:[%s5413_s23 + $0x2a8] sm:$0xff]  ;;  %v4525_v32 = vcombine.high %v632_v29, %v636_v30  ;;  %v640_v8 = vld [vmem:[%s5413_s23 + $0x300] sm:$0xff] }
 0x757   : > { %2071 = vadd.xlane.f32.xlu0 %v2070_v44  ;;  %v2073_v46 = vadd.f32 %v5671_v41, %v5669_v39  ;;  %v600_v44 = vld [vmem:[%s5413_s23 + $0x1c0] sm:$0xff]  ;;  %2813 = vmatprep.subr.bf16.mxu1 %v4485_v38  ;;  %v4518_v27 = vcombine.low %v625_v23, %v629_v25  ;;  %v4519_v28 = vcombine.high %v625_v23, %v629_v25  ;;  %v633_v31 = vld [vmem:[%s5413_s23 + $0x2c8] sm:$0xff] }
 0x758   : > { %2855 = vmatpush1.bf16.msra.mxu0 %v4478_v37  ;;  %v637_v33 = vld [vmem:[%s5413_s23 + $0x2e8] sm:$0xff]  ;;  %v4524_v34 = vcombine.low %v632_v29, %v636_v30  ;;  %v644_v37 = vld [vmem:[%s5413_s23 + $0x320] sm:$0xff] }
 0x759   : > { %2074 = vadd.xlane.f32.xlu1 %v2073_v46  ;;  %v604_v46 = vld [vmem:[%s5413_s23 + $0x1e0] sm:$0xff]  ;;  %2856 = vmatprep.subr.bf16.mxu0 %v4487_v40  ;;  %v4526_v36 = vcombine.low %v633_v31, %v637_v33  ;;  %v4527_v5 = vcombine.high %v633_v31, %v637_v33  ;;  %v641_v38 = vld [vmem:[%s5413_s23 + $0x308] sm:$0xff]  ;;  %v4533_v40 = vcombine.high %v640_v8, %v644_v37 }
 0x75a   : > { %v4493_v54 = vcombine.high %v600_v44, %v604_v46  ;;  %2814 = vmatpush1.bf16.msra.mxu1 %v4484_v51  ;;  %v4492_v63 = vcombine.low %v600_v44, %v604_v46  ;;  %v645_v44 = vld [vmem:[%s5413_s23 + $0x328] sm:$0xff]  ;;  %v4532_v46 = vcombine.low %v640_v8, %v644_v37  ;;  %v648_v51 = vld [vmem:[%s5413_s23 + $0x340] sm:$0xff] }
 0x75b   : > { %v4534_v43 = vcombine.low %v641_v38, %v645_v44  ;;  %v4535_v49 = vcombine.high %v641_v38, %v645_v44 }
 0x75c   : > { %2857 = vmatpush1.bf16.msra.mxu0 %v4486_v53  ;;  %2815 = vmatprep.subr.bf16.mxu1 %v4493_v54  ;;  %v652_v53 = vld [vmem:[%s5413_s23 + $0x360] sm:$0xff]  ;;  %v649_v54 = vld [vmem:[%s5413_s23 + $0x348] sm:$0xff] }
 0x75d   : > { %2858 = vmatprep.subr.bf16.mxu0 %v4495_v57  ;;  %v4541_v57 = vcombine.high %v648_v51, %v652_v53  ;;  %v4540_v59 = vcombine.low %v648_v51, %v652_v53  ;;  %v4542_v61 = vcombine.low %v649_v54, %v653_v58  ;;  %v4543_v62 = vcombine.high %v649_v54, %v653_v58  ;;  %v559_v51 = vld [vmem:[%s5413_s23 + $0x78] sm:$0xff]  ;;  %v562_v54 = vld [vmem:[%s5413_s23 + $0x90] sm:$0xff] }
 0x75e   : > { %2816 = vmatpush1.bf16.msra.mxu1 %v4492_v63  ;;  %v656_v63 = vld [vmem:[%s5413_s23 + $0x380] sm:$0xff] }
 0x75f   : > { %2817 = vmatprep.subr.bf16.mxu1 %v4501_v1  ;;  %v657_v1 = vld [vmem:[%s5413_s23 + $0x388] sm:$0xff] }
 0x760   : > { %2859 = vmatpush1.bf16.msra.mxu0 %v4494_v0  ;;  %v660_v0 = vld [vmem:[%s5413_s23 + $0x3a0] sm:$0xff]  ;;  %v4550_v60 = vcombine.low %v657_v1, %v661_v3  ;;  %v4551_v4 = vcombine.high %v657_v1, %v661_v3  ;;  %v570_v3 = vld [vmem:[%s5413_s23 + $0xd0] sm:$0xff] }
 0x761   : > { %2860 = vmatprep.subr.bf16.mxu0 %v4503_v2  ;;  %v4549_v2 = vcombine.high %v656_v63, %v660_v0  ;;  %v4548_v55 = vcombine.low %v656_v63, %v660_v0 }
 0x762   : > { %2818 = vmatpush1.bf16.msra.mxu1 %v4500_v45  ;;  %v664_v45 = vld [vmem:[%s5413_s23 + $0x3c0] sm:$0xff] }
 0x763   : > { %2819 = vmatprep.subr.bf16.mxu1 %v4509_v7  ;;  %v665_v7 = vld [vmem:[%s5413_s23 + $0x3c8] sm:$0xff] }
 0x764   : > { %2861 = vmatpush1.bf16.msra.mxu0 %v4502_v6  ;;  %v668_v6 = vld [vmem:[%s5413_s23 + $0x3e0] sm:$0xff] }
 0x765   : > { %2862 = vmatprep.subr.bf16.mxu0 %v4511_v47  ;;  %v4557_v47 = vcombine.high %v664_v45, %v668_v6 }
 0x766   : > { %2820 = vmatpush1.bf16.msra.mxu1 %v4508_v10  ;;  %v669_v10 = vld [vmem:[%s5413_s23 + $0x3e8] sm:$0xff] }
 0x768   : > { %2863 = vmatpush1.bf16.msra.mxu0 %v4510_v11  ;;  %v4556_v11 = vcombine.low %v664_v45, %v668_v6 }
 0x769   : > { %2864 = vmatprep.subr.bf16.mxu0 %v4519_v28  ;;  %v2117_v28 = vsub.s32 5, %v5554_v48 }
 0x76c   : > { %2865 = vmatpush1.bf16.msra.mxu0 %v4518_v27  ;;  %v2105_v27 = vsub.s32 4, %v5554_v48 }
 0x76d   : > { %2866 = vmatprep.subr.bf16.mxu0 %v4527_v5  ;;  %v2118_v5 = vrot.slane %v5562_v52, %v2117_v28 }
 0x76e   : > { %v2110_v29 = vrot.slane %v5593_v56, %v2105_v27  ;;  %v2106_v30 = vrot.slane %v5562_v52, %v2105_v27  ;;  %v554_v52 = vld [vmem:[%s5413_s23 + $0x50] sm:$0xff]  ;;  %v595_v27 = vld [vmem:[%s5413_s23 + $0x198] sm:$0xff] }
 0x770   : > { %2867 = vmatpush1.bf16.msra.mxu0 %v4526_v36  ;;  %v2122_v36 = vrot.slane %v5593_v56, %v2117_v28  ;;  %v599_v28 = vld [vmem:[%s5413_s23 + $0x1b8] sm:$0xff] }
 0x771   : > { %2868 = vmatprep.subr.bf16.mxu0 %v4535_v49  ;;  %v555_v49 = vld [vmem:[%s5413_s23 + $0x58] sm:$0xff] }
 0x772   : > { %v4451_v58 = vcombine.high %v555_v49, %v559_v51  ;;  %v4450_v0 = vcombine.low %v555_v49, %v559_v51 }
 0x774   : > { %2869 = vmatpush1.bf16.msra.mxu0 %v4534_v43 }
 0x775   : > { %2870 = vmatprep.subr.bf16.mxu0 %v4543_v62  ;;  %v567_v62 = vld [vmem:[%s5413_s23 + $0xb8] sm:$0xff] }
 0x778   : > { %2871 = vmatpush1.bf16.msra.mxu0 %v4542_v61  ;;  %v563_v61 = vld [vmem:[%s5413_s23 + $0x98] sm:$0xff] }
 0x779   : > { %2872 = vmatprep.subr.bf16.mxu0 %v4551_v4  ;;  %v575_v4 = vld [vmem:[%s5413_s23 + $0xf8] sm:$0xff]  ;;  %v4458_v6 = vcombine.low %v563_v61, %v567_v62 }
 0x77c   : > { %2873 = vmatpush1.bf16.msra.mxu0 %v4550_v60  ;;  %v571_v60 = vld [vmem:[%s5413_s23 + $0xd8] sm:$0xff] }
 0x7e4   : > { %v2072_v12 = vpop.xlane.xlu0 %2071 }
 0x7e5   : > { %v2077_v13 = vmul.f32 0.00390625, %v2072_v12  ;;  %v4559_v12 = vcombine.high %v665_v7, %v669_v10 }
 0x7e6   : > { %v2075_v14 = vpop.xlane.xlu1 %2074 }
 0x7e7   : > { %v5718_v15 = vsub.f32 %v5665_v35, %v2077_v13  ;;  %v5721_v16 = vsub.f32 %v5667_v9, %v2077_v13  ;;  %v2078_v17 = vmul.f32 0.00390625, %v2075_v14  ;;  %v4558_v13 = vcombine.low %v665_v7, %v669_v10  ;;  %2874 = vmatprep.subr.bf16.mxu0 %v4559_v12  ;;  %v546_v14 = vld [vmem:[%s5413_s23 + $0x10] sm:$0xff]  ;;  %v579_v12 = vld [vmem:[%s5413_s23 + $0x118] sm:$0xff] }
 0x7e8   : > { %v578_v10 = vld [vmem:[%s5413_s23 + $0x110] sm:$0xff] }
 0x7e9   : > { %v5724_v42 = vsub.f32 %v5669_v39, %v2078_v17  ;;  %v5727_v18 = vsub.f32 %v5671_v41, %v2078_v17  ;;  %v2083_v19 = vmul.f32 %v5718_v15, %v5718_v15  ;;  %v2084_v20 = vmul.f32 %v5721_v16, %v5721_v16  ;;  %v624_v41 = vld [vmem:[%s5413_s23 + $0x280] sm:$0xff]  ;;  %v550_v17 = vld [vmem:[%s5413_s23 + $0x30] sm:$0xff]  ;;  %2875 = vmatpush1.bf16.msra.mxu0 %v4558_v13  ;;  %v583_v13 = vld [vmem:[%s5413_s23 + $0x138] sm:$0xff] }
 0x7ea   : > { %v4517_v24 = vcombine.high %v624_v41, %v628_v22  ;;  %v4516_v26 = vcombine.low %v624_v41, %v628_v22 }
 0x7eb   : > { %v2087_v21 = vadd.f32 %v2084_v20, %v2083_v19  ;;  %v2085_v35 = vmul.f32 %v5724_v42, %v5724_v42  ;;  %v2086_v9 = vmul.f32 %v5727_v18, %v5727_v18  ;;  %v547_v19 = vld [vmem:[%s5413_s23 + $0x18] sm:$0xff]  ;;  %v4441_v20 = vcombine.high %v546_v14, %v550_v17 }
 0x7ec   : > { %2821 = vmatprep.subr.bf16.mxu1 %v4517_v24 }
 0x7ed   : > { %2088 = vadd.xlane.f32.xlu0 %v2087_v21  ;;  %v2090_v39 = vadd.f32 %v2086_v9, %v2085_v35  ;;  %2822 = vmatpush1.bf16.msra.mxu1 %v4516_v26  ;;  %v551_v21 = vld [vmem:[%s5413_s23 + $0x38] sm:$0xff]  ;;  %v4440_v35 = vcombine.low %v546_v14, %v550_v17  ;;  %v4466_v17 = vcombine.low %v571_v60, %v575_v4 }
 0x7ee   : > { %2823 = vmatprep.subr.bf16.mxu1 %v4525_v32  ;;  %v4442_v9 = vcombine.low %v547_v19, %v551_v21 }
 0x7ef   : > { %2091 = vadd.xlane.f32.xlu1 %v2090_v39  ;;  %v4443_v39 = vcombine.high %v547_v19, %v551_v21  ;;  %v586_v21 = vld [vmem:[%s5413_s23 + $0x150] sm:$0xff] }
 0x7f1   : > { %2824 = vmatpush1.bf16.msra.mxu1 %v4524_v34  ;;  %2930 = vmatprep.subr.bf16.mxu0 %v4443_v39  ;;  %v591_v39 = vld [vmem:[%s5413_s23 + $0x178] sm:$0xff] }
 0x7f2   : > { %2825 = vmatprep.subr.bf16.mxu1 %v4533_v40 }
 0x7f5   : > { %2826 = vmatpush1.bf16.msra.mxu1 %v4532_v46 }
 0x7f6   : > { %2827 = vmatprep.subr.bf16.mxu1 %v4541_v57 }
 0x7f9   : > { %2828 = vmatpush1.bf16.msra.mxu1 %v4540_v59  ;;  %v566_v59 = vld [vmem:[%s5413_s23 + $0xb0] sm:$0xff] }
 0x7fa   : > { %2829 = vmatprep.subr.bf16.mxu1 %v4549_v2  ;;  %v4457_v1 = vcombine.high %v562_v54, %v566_v59  ;;  %v4459_v2 = vcombine.high %v563_v61, %v567_v62  ;;  %v4456_v45 = vcombine.low %v562_v54, %v566_v59  ;;  %v619_v59 = vld [vmem:[%s5413_s23 + $0x258] sm:$0xff] }
 0x7fb   : > { %v623_v61 = vld [vmem:[%s5413_s23 + $0x278] sm:$0xff] }
 0x7fd   : > { %2830 = vmatpush1.bf16.msra.mxu1 %v4548_v55  ;;  %v574_v55 = vld [vmem:[%s5413_s23 + $0xf0] sm:$0xff] }
 0x7fe   : > { %2831 = vmatprep.subr.bf16.mxu1 %v4557_v47  ;;  %v4465_v7 = vcombine.high %v570_v3, %v574_v55  ;;  %v4467_v47 = vcombine.high %v571_v60, %v575_v4  ;;  %v4464_v14 = vcombine.low %v570_v3, %v574_v55  ;;  %v630_v3 = vld [vmem:[%s5413_s23 + $0x2b0] sm:$0xff]  ;;  %v627_v55 = vld [vmem:[%s5413_s23 + $0x298] sm:$0xff] }
 0x7ff   : > { %v631_v60 = vld [vmem:[%s5413_s23 + $0x2b8] sm:$0xff] }
 0x801   : > { %2832 = vmatpush1.bf16.msra.mxu1 %v4556_v11  ;;  %v582_v11 = vld [vmem:[%s5413_s23 + $0x130] sm:$0xff] }
 0x802   : > { %2887 = vmatprep.subr.bf16.mxu1 %v4441_v20  ;;  %v4473_v19 = vcombine.high %v578_v10, %v582_v11  ;;  %v4475_v20 = vcombine.high %v579_v12, %v583_v13 }
 0x87a   : > { %v2089_v41 = vpop.xlane.xlu0 %2088 }
 0x87b   : > { %v2093_v22 = vmul.f32 0.00390625, %v2089_v41  ;;  %v4472_v41 = vcombine.low %v578_v10, %v582_v11  ;;  %v638_v10 = vld [vmem:[%s5413_s23 + $0x2f0] sm:$0xff]  ;;  %v635_v11 = vld [vmem:[%s5413_s23 + $0x2d8] sm:$0xff] }
 0x87c   : > { %v2092_v23 = vpop.xlane.xlu1 %2091 }
 0x87d   : > { %v2095_v24 = vadd.f32 1e-05, %v2093_v22  ;;  %v2094_v25 = vmul.f32 0.00390625, %v2092_v23  ;;  %v4474_v22 = vcombine.low %v579_v12, %v583_v13  ;;  %v639_v12 = vld [vmem:[%s5413_s23 + $0x2f8] sm:$0xff] }
 0x87f   : > { %5230 = vrsqrt.f32 %v2095_v24  ;;  %v2096_v26 = vadd.f32 1e-05, %v2094_v25  ;;  %v594_v25 = vld [vmem:[%s5413_s23 + $0x190] sm:$0xff] }
 0x881   : > { %5232 = vrsqrt.f32 %v2096_v26  ;;  %v598_v26 = vld [vmem:[%s5413_s23 + $0x1b0] sm:$0xff] }
 0x889   : > { %v5231_v31 = vpop.eup %5230 }
 0x88a   : > { %v2099_v32 = vmul.f32 %v5231_v31, %v5718_v15  ;;  %v2100_v33 = vmul.f32 %v5231_v31, %v5721_v16  ;;  %v4489_v31 = vcombine.high %v594_v25, %v598_v26 }
 0x88b   : > { %v5233_v34 = vpop.eup %5232 }
 0x88c   : > { %v2101_v8 = vmul.f32 %v5233_v34, %v5724_v42  ;;  %v2102_v37 = vmul.f32 %v5233_v34, %v5727_v18  ;;  %v2112_v38 = vmul.f32 %v2110_v29, %v2100_v33  ;;  %v2111_v40 = vmul.f32 %v2106_v30, %v2099_v32  ;;  %v558_v42 = vld [vmem:[%s5413_s23 + $0x70] sm:$0xff] }
 0x88d   : > { %v4449_v57 = vcombine.high %v554_v52, %v558_v42  ;;  %v4448_v63 = vcombine.low %v554_v52, %v558_v42  ;;  %v4491_v32 = vcombine.high %v595_v27, %v599_v28  ;;  %v602_v33 = vld [vmem:[%s5413_s23 + $0x1d0] sm:$0xff]  ;;  %v611_v52 = vld [vmem:[%s5413_s23 + $0x218] sm:$0xff] }
 0x88e   : > { %v2114_v44 = vmul.f32 %v2110_v29, %v2102_v37  ;;  %v2113_v46 = vmul.f32 %v2106_v30, %v2101_v8  ;;  %v5775_v15 = vadd.f32 %v2122_v36, %v2112_v38  ;;  %v5779_v43 = vadd.f32 %v2118_v5, %v2111_v40  ;;  %v606_v34 = vld [vmem:[%s5413_s23 + $0x1f0] sm:$0xff]  ;;  %v615_v42 = vld [vmem:[%s5413_s23 + $0x238] sm:$0xff] }
 0x88f   : > { %v4488_v8 = vcombine.low %v594_v25, %v598_v26  ;;  %v4490_v37 = vcombine.low %v595_v27, %v599_v28  ;;  %v4497_v38 = vcombine.high %v602_v33, %v606_v34  ;;  %v4496_v49 = vcombine.low %v602_v33, %v606_v34  ;;  %v654_v25 = vld [vmem:[%s5413_s23 + $0x370] sm:$0xff]  ;;  %v651_v26 = vld [vmem:[%s5413_s23 + $0x358] sm:$0xff] }
 0x890   : > { %v5777_v16 = vadd.f32 %v2122_v36, %v2114_v44  ;;  %v5781_v56 = vadd.f32 %v2118_v5, %v2113_v46  ;;  %v603_v36 = vld [vmem:[%s5413_s23 + $0x1d8] sm:$0xff]  ;;  %v610_v44 = vld [vmem:[%s5413_s23 + $0x210] sm:$0xff]  ;;  %v4507_v54 = vcombine.high %v611_v52, %v615_v42 }
 0x891   : > { %v607_v5 = vld [vmem:[%s5413_s23 + $0x1f8] sm:$0xff]  ;;  %v614_v46 = vld [vmem:[%s5413_s23 + $0x230] sm:$0xff] }
 0x892   : > { %v2128_v18 = vpack.c.bf16 %v5777_v16, %v5775_v15  ;;  %v5791_v53 = vpack.c.bf16 %v5781_v56, %v5779_v43  ;;  %v4499_v40 = vcombine.high %v603_v36, %v607_v5  ;;  %v4498_v51 = vcombine.low %v603_v36, %v607_v5  ;;  %v655_v27 = vld [vmem:[%s5413_s23 + $0x378] sm:$0xff]  ;;  %v662_v33 = vld [vmem:[%s5413_s23 + $0x3b0] sm:$0xff] }
 0x893   : > { %v4504_v62 = vcombine.low %v610_v44, %v614_v46  ;;  %v659_v34 = vld [vmem:[%s5413_s23 + $0x398] sm:$0xff] }
 0x894   : > { %2833 = vmatprep.mubr.bf16.mxu1 %v2128_v18  ;;  %2876 = vmatprep.mubr.bf16.mxu0 %v2128_v18  ;;  %v663_v36 = vld [vmem:[%s5413_s23 + $0x3b8] sm:$0xff] }
 0x895   : > { %2834 = vmatmul.mubr.bf16.vlgmr.msra.gmra.mrb[16].mxu1 %v5791_v53  ;;  %2877 = vmatmul.mubr.bf16.vlgmr.msra.gmra.mrb[32].mxu0 %v5791_v53 }
 0x896   : > { %2888 = vmatpush1.bf16.msra.mxu1 %v4440_v35  ;;  %2931 = vmatpush1.bf16.msra.mxu0 %v4442_v9  ;;  %v590_v35 = vld [vmem:[%s5413_s23 + $0x170] sm:$0xff]  ;;  %v587_v9 = vld [vmem:[%s5413_s23 + $0x158] sm:$0xff] }
 0x897   : > { %2919 = vmatprep.mubr.bf16.mxu1 %v2128_v18  ;;  %2962 = vmatprep.mubr.bf16.mxu0 %v2128_v18  ;;  %v4481_v23 = vcombine.high %v586_v21, %v590_v35  ;;  %v4483_v24 = vcombine.high %v587_v9, %v591_v39  ;;  %v4480_v29 = vcombine.low %v586_v21, %v590_v35  ;;  %v646_v21 = vld [vmem:[%s5413_s23 + $0x330] sm:$0xff]  ;;  %v643_v35 = vld [vmem:[%s5413_s23 + $0x318] sm:$0xff] }
 0x898   : > { %2889 = vmatprep.subr.bf16.mxu1 %v4449_v57  ;;  %2932 = vmatprep.subr.bf16.mxu0 %v4451_v58  ;;  %v4482_v30 = vcombine.low %v587_v9, %v591_v39  ;;  %v4505_v18 = vcombine.high %v610_v44, %v614_v46  ;;  %v618_v57 = vld [vmem:[%s5413_s23 + $0x250] sm:$0xff]  ;;  %v647_v9 = vld [vmem:[%s5413_s23 + $0x338] sm:$0xff] }
 0x899   : > { %v622_v58 = vld [vmem:[%s5413_s23 + $0x270] sm:$0xff]  ;;  %v667_v46 = vld [vmem:[%s5413_s23 + $0x3d8] sm:$0xff] }
 0x89a   : > { %2890 = vmatpush1.bf16.msra.mxu1 %v4448_v63  ;;  %2933 = vmatpush1.bf16.msra.mxu0 %v4450_v0  ;;  %v4506_v63 = vcombine.low %v611_v52, %v615_v42  ;;  %v4513_v0 = vcombine.high %v618_v57, %v622_v58  ;;  %v4512_v4 = vcombine.low %v618_v57, %v622_v58  ;;  %v670_v44 = vld [vmem:[%s5413_s23 + $0x3f0] sm:$0xff]  ;;  %v671_v52 = vld [vmem:[%s5413_s23 + $0x3f8] sm:$0xff]  ;;  %v5024_v58 = vld [vmem:[%s5418_s26 + $0x4] ss:$8 sps:$4 sm:$0xff]  }
 0x89b   : > { %2891 = vmatprep.subr.bf16.mxu1 %v4457_v1  ;;  %2934 = vmatprep.subr.bf16.mxu0 %v4459_v2  ;;  %v4515_v1 = vcombine.high %v619_v59, %v623_v61  ;;  %v626_v2 = vld [vmem:[%s5413_s23 + $0x290] sm:$0xff]  ;;  %v4562_v57 = vcombine.low %v667_v46, %v671_v52 }
 0x89c   : > { %v4520_v13 = vcombine.low %v626_v2, %v630_v3 }
 0x89e   : > { %2892 = vmatpush1.bf16.msra.mxu1 %v4456_v45  ;;  %2935 = vmatpush1.bf16.msra.mxu0 %v4458_v6  ;;  %v4514_v45 = vcombine.low %v619_v59, %v623_v61  ;;  %v4521_v6 = vcombine.high %v626_v2, %v630_v3  ;;  %v5022_v59 = vld [vmem:[%s5418_s26] ss:$8 sps:$4 sm:$0xff]   ;;  %v5027_v61 = vld [vmem:[%s5418_s26 + $0x14] ss:$8 sps:$4 sm:$0xff]   ;;  %v5031_v2 = vld [vmem:[%s5418_s26 + $0x30] ss:$8 sps:$4 sm:$0xff]  }
 0x89f   : > { %2893 = vmatprep.subr.bf16.mxu1 %v4465_v7  ;;  %2936 = vmatprep.subr.bf16.mxu0 %v4467_v47  ;;  %v4523_v7 = vcombine.high %v627_v55, %v631_v60  ;;  %v634_v47 = vld [vmem:[%s5413_s23 + $0x2d0] sm:$0xff]  ;;  %v5036_v3 = vld [vmem:[%s5418_s26 + $0x44] ss:$8 sps:$4 sm:$0xff]  }
 0x8a0   : > { %v4528_v39 = vcombine.low %v634_v47, %v638_v10 }
 0x8a2   : > { %2894 = vmatpush1.bf16.msra.mxu1 %v4464_v14  ;;  %2937 = vmatpush1.bf16.msra.mxu0 %v4466_v17  ;;  %v4522_v14 = vcombine.low %v627_v55, %v631_v60  ;;  %v4529_v17 = vcombine.high %v634_v47, %v638_v10  ;;  %v5039_v55 = vld [vmem:[%s5418_s26 + $0x54] ss:$8 sps:$4 sm:$0xff]   ;;  %v5037_v60 = vld [vmem:[%s5418_s26 + $0x50] ss:$8 sps:$4 sm:$0xff]   ;;  %v5048_v47 = vld [vmem:[%s5418_s26 + $0x84] ss:$8 sps:$4 sm:$0xff]  }
 0x8a3   : > { %2895 = vmatprep.subr.bf16.mxu1 %v4473_v19  ;;  %2938 = vmatprep.subr.bf16.mxu0 %v4475_v20  ;;  %v4531_v19 = vcombine.high %v635_v11, %v639_v12  ;;  %v642_v20 = vld [vmem:[%s5413_s23 + $0x310] sm:$0xff]  ;;  %v5046_v10 = vld [vmem:[%s5418_s26 + $0x80] ss:$8 sps:$4 sm:$0xff]  }
 0x8a4   : > { %v4536_v28 = vcombine.low %v642_v20, %v646_v21 }
 0x8a6   : > { %2896 = vmatpush1.bf16.msra.mxu1 %v4472_v41  ;;  %2939 = vmatpush1.bf16.msra.mxu0 %v4474_v22  ;;  %v4530_v41 = vcombine.low %v635_v11, %v639_v12  ;;  %v4537_v22 = vcombine.high %v642_v20, %v646_v21  ;;  %v5051_v11 = vld [vmem:[%s5418_s26 + $0x94] ss:$8 sps:$4 sm:$0xff]   ;;  %v5049_v12 = vld [vmem:[%s5418_s26 + $0x90] ss:$8 sps:$4 sm:$0xff]   ;;  %v5060_v20 = vld [vmem:[%s5418_s26 + $0xc4] ss:$8 sps:$4 sm:$0xff]  }
 0x8a7   : > { %2897 = vmatprep.subr.bf16.mxu1 %v4481_v23  ;;  %2940 = vmatprep.subr.bf16.mxu0 %v4483_v24  ;;  %v4539_v23 = vcombine.high %v643_v35, %v647_v9  ;;  %v650_v24 = vld [vmem:[%s5413_s23 + $0x350] sm:$0xff]  ;;  %v5058_v21 = vld [vmem:[%s5418_s26 + $0xc0] ss:$8 sps:$4 sm:$0xff]  }
 0x8a8   : > { %v4544_v5 = vcombine.low %v650_v24, %v654_v25 }
 0x8aa   : > { %2898 = vmatpush1.bf16.msra.mxu1 %v4480_v29  ;;  %2941 = vmatpush1.bf16.msra.mxu0 %v4482_v30  ;;  %v4538_v29 = vcombine.low %v643_v35, %v647_v9  ;;  %v4545_v30 = vcombine.high %v650_v24, %v654_v25  ;;  %v5063_v35 = vld [vmem:[%s5418_s26 + $0xd4] ss:$8 sps:$4 sm:$0xff]   ;;  %v5061_v9 = vld [vmem:[%s5418_s26 + $0xd0] ss:$8 sps:$4 sm:$0xff]   ;;  %v5072_v24 = vld [vmem:[%s5418_s26 + $0x104] ss:$8 sps:$4 sm:$0xff]  }
 0x8ab   : > { %2899 = vmatprep.subr.bf16.mxu1 %v4489_v31  ;;  %2942 = vmatprep.subr.bf16.mxu0 %v4491_v32  ;;  %v4547_v31 = vcombine.high %v651_v26, %v655_v27  ;;  %v658_v32 = vld [vmem:[%s5413_s23 + $0x390] sm:$0xff]  ;;  %v5887_v25 = vsub.s32 1, %v5554_v48 }
 0x8ac   : > { %v4552_v42 = vcombine.low %v658_v32, %v662_v33 }
 0x8ae   : > { %2900 = vmatpush1.bf16.msra.mxu1 %v4488_v8  ;;  %2943 = vmatpush1.bf16.msra.mxu0 %v4490_v37  ;;  %v4546_v8 = vcombine.low %v651_v26, %v655_v27  ;;  %v4553_v37 = vcombine.high %v658_v32, %v662_v33  ;;  %v5890_v26 = vld [vmem:[%s5423_s13] sm:$0xff]  ;;  %v5245_v32 = vld [vmem:[%s5423_s13 + $0x18] sm:$0xff] }
 0x8af   : > { %2901 = vmatprep.subr.bf16.mxu1 %v4497_v38  ;;  %2944 = vmatprep.subr.bf16.mxu0 %v4499_v40  ;;  %v4555_v38 = vcombine.high %v659_v34, %v663_v36  ;;  %v666_v40 = vld [vmem:[%s5413_s23 + $0x3d0] sm:$0xff]  ;;  %v2132_v27 = vrot.slane %v5890_v26, %v5887_v25  ;;  %v2144_v33 = vrot.slane %v5245_v32, %v5887_v25 }
 0x8b0   : > { %v5111_v32 = vld [vmem:[%s5418_s26 + $0x1d4] ss:$8 sps:$4 sm:$0xff]  }
 0x8b2   : > { %2902 = vmatpush1.bf16.msra.mxu1 %v4496_v49  ;;  %2945 = vmatpush1.bf16.msra.mxu0 %v4498_v51  ;;  %v4554_v49 = vcombine.low %v659_v34, %v663_v36  ;;  %v4561_v51 = vcombine.high %v666_v40, %v670_v44 }
 0x8b3   : > { %2903 = vmatprep.subr.bf16.mxu1 %v4505_v18  ;;  %2946 = vmatprep.subr.bf16.mxu0 %v4507_v54  ;;  %v4563_v18 = vcombine.high %v667_v46, %v671_v52  ;;  %v4560_v54 = vcombine.low %v666_v40, %v670_v44 }
 0x8b6   : > { %2904 = vmatpush1.bf16.msra.mxu1 %v4504_v62  ;;  %2947 = vmatpush1.bf16.msra.mxu0 %v4506_v63  ;;  %v5025_v62 = vld [vmem:[%s5418_s26 + $0x10] ss:$8 sps:$4 sm:$0xff]   ;;  %v5030_v63 = vld [vmem:[%s5418_s26 + $0x24] ss:$8 sps:$4 sm:$0xff]  }
 0x8b7   : > { %2905 = vmatprep.subr.bf16.mxu1 %v4513_v0  ;;  %2948 = vmatprep.subr.bf16.mxu0 %v4515_v1  ;;  %v5028_v0 = vld [vmem:[%s5418_s26 + $0x20] ss:$8 sps:$4 sm:$0xff]   ;;  %v5033_v1 = vld [vmem:[%s5418_s26 + $0x34] ss:$8 sps:$4 sm:$0xff]  }
 0x8ba   : > { %2906 = vmatpush1.bf16.msra.mxu1 %v4512_v4  ;;  %2949 = vmatpush1.bf16.msra.mxu0 %v4514_v45  ;;  %v5042_v4 = vld [vmem:[%s5418_s26 + $0x64] ss:$8 sps:$4 sm:$0xff]   ;;  %v5040_v45 = vld [vmem:[%s5418_s26 + $0x60] ss:$8 sps:$4 sm:$0xff]  }
 0x8bb   : > { %2907 = vmatprep.subr.bf16.mxu1 %v4521_v6  ;;  %2950 = vmatprep.subr.bf16.mxu0 %v4523_v7  ;;  %v5045_v6 = vld [vmem:[%s5418_s26 + $0x74] ss:$8 sps:$4 sm:$0xff]   ;;  %v5043_v7 = vld [vmem:[%s5418_s26 + $0x70] ss:$8 sps:$4 sm:$0xff]  }
 0x8be   : > { %2908 = vmatpush1.bf16.msra.mxu1 %v4520_v13  ;;  %2951 = vmatpush1.bf16.msra.mxu0 %v4522_v14  ;;  %v5054_v13 = vld [vmem:[%s5418_s26 + $0xa4] ss:$8 sps:$4 sm:$0xff]   ;;  %v5052_v14 = vld [vmem:[%s5418_s26 + $0xa0] ss:$8 sps:$4 sm:$0xff]  }
 0x8bf   : > { %2909 = vmatprep.subr.bf16.mxu1 %v4529_v17  ;;  %2952 = vmatprep.subr.bf16.mxu0 %v4531_v19  ;;  %v5057_v17 = vld [vmem:[%s5418_s26 + $0xb4] ss:$8 sps:$4 sm:$0xff]   ;;  %v5055_v19 = vld [vmem:[%s5418_s26 + $0xb0] ss:$8 sps:$4 sm:$0xff]  }
 0x8c2   : > { %2910 = vmatpush1.bf16.msra.mxu1 %v4528_v39  ;;  %2953 = vmatpush1.bf16.msra.mxu0 %v4530_v41  ;;  %v5066_v39 = vld [vmem:[%s5418_s26 + $0xe4] ss:$8 sps:$4 sm:$0xff]   ;;  %v5064_v41 = vld [vmem:[%s5418_s26 + $0xe0] ss:$8 sps:$4 sm:$0xff]  }
 0x8c3   : > { %2911 = vmatprep.subr.bf16.mxu1 %v4537_v22  ;;  %2954 = vmatprep.subr.bf16.mxu0 %v4539_v23  ;;  %v5069_v22 = vld [vmem:[%s5418_s26 + $0xf4] ss:$8 sps:$4 sm:$0xff]   ;;  %v5067_v23 = vld [vmem:[%s5418_s26 + $0xf0] ss:$8 sps:$4 sm:$0xff]  }
 0x8c6   : > { %2912 = vmatpush1.bf16.msra.mxu1 %v4536_v28  ;;  %2955 = vmatpush1.bf16.msra.mxu0 %v4538_v29  ;;  %v5243_v28 = vld [vmem:[%s5423_s13 + $0x10] sm:$0xff] }
 0x8c7   : > { %2913 = vmatprep.subr.bf16.mxu1 %v4545_v30  ;;  %2956 = vmatprep.subr.bf16.mxu0 %v4547_v31  ;;  %v2140_v29 = vrot.slane %v5243_v28, %v5887_v25  ;;  %v5897_v30 = vld [vmem:[%s5423_s13 + $0x8] sm:$0xff]  ;;  %v5103_v28 = vld [vmem:[%s5418_s26 + $0x1b0] ss:$8 sps:$4 sm:$0xff]  }
 0x8c8   : > { %v2136_v31 = vrot.slane %v5897_v30, %v5887_v25 }
 0x8ca   : > { %2914 = vmatpush1.bf16.msra.mxu1 %v4544_v5  ;;  %2957 = vmatpush1.bf16.msra.mxu0 %v4546_v8 }
 0x8cb   : > { %2915 = vmatprep.subr.bf16.mxu1 %v4553_v37  ;;  %2958 = vmatprep.subr.bf16.mxu0 %v4555_v38 }
 0x8ce   : > { %2916 = vmatpush1.bf16.msra.mxu1 %v4552_v42  ;;  %2959 = vmatpush1.bf16.msra.mxu0 %v4554_v49 }
 0x8cf   : > { %2917 = vmatprep.subr.bf16.mxu1 %v4561_v51  ;;  %2960 = vmatprep.subr.bf16.mxu0 %v4563_v18 }
 0x8d2   : > { %2918 = vmatpush1.bf16.msra.mxu1 %v4560_v54  ;;  %2961 = vmatpush1.bf16.msra.mxu0 %v4562_v57 }
 0x8d3   : > { %3637 = vmatprep.subr.bf16.mxu1 %v5024_v58 }
 0x8d5   : > { %2920 = vmatmul.mubr.bf16.vlgmr.msra.gmra.mrb[20].mxu1 %v5791_v53  ;;  %2963 = vmatmul.mubr.bf16.vlgmr.msra.gmra.mrb[36].mxu0 %v5791_v53  ;;  %v5034_v53 = vld [vmem:[%s5418_s26 + $0x40] ss:$8 sps:$4 sm:$0xff]  }
 0x8d6   : > { %3638 = vmatpush1.bf16.msra.mxu1 %v5022_v59 }
 0x8d7   : > { %3639 = vmatprep.subr.bf16.mxu1 %v5027_v61 }
 0x8da   : > { %3640 = vmatpush1.bf16.msra.mxu1 %v5025_v62 }
 0x8db   : > { %3641 = vmatprep.subr.bf16.mxu1 %v5030_v63 }
 0x8de   : > { %3642 = vmatpush1.bf16.msra.mxu1 %v5028_v0 }
 0x8df   : > { %3643 = vmatprep.subr.bf16.mxu1 %v5033_v1 }
 0x8e2   : > { %3644 = vmatpush1.bf16.msra.mxu1 %v5031_v2 }
 0x8e3   : > { %3645 = vmatprep.subr.bf16.mxu1 %v5036_v3 }
 0x8e6   : > { %3646 = vmatpush1.bf16.msra.mxu1 %v5034_v53 }
 0x8e7   : > { %3647 = vmatprep.subr.bf16.mxu1 %v5039_v55 }
 0x8ea   : > { %3648 = vmatpush1.bf16.msra.mxu1 %v5037_v60 }
 0x8eb   : > { %3649 = vmatprep.subr.bf16.mxu1 %v5042_v4  ;;  %v5070_v4 = vld [vmem:[%s5418_s26 + $0x100] ss:$8 sps:$4 sm:$0xff]  }
 0x8ee   : > { %3650 = vmatpush1.bf16.msra.mxu1 %v5040_v45  ;;  %v5075_v45 = vld [vmem:[%s5418_s26 + $0x114] ss:$8 sps:$4 sm:$0xff]  }
 0x8ef   : > { %3651 = vmatprep.subr.bf16.mxu1 %v5045_v6  ;;  %v5073_v6 = vld [vmem:[%s5418_s26 + $0x110] ss:$8 sps:$4 sm:$0xff]  }
 0x8f2   : > { %3652 = vmatpush1.bf16.msra.mxu1 %v5043_v7  ;;  %v5078_v7 = vld [vmem:[%s5418_s26 + $0x124] ss:$8 sps:$4 sm:$0xff]  }
 0x8f3   : > { %3653 = vmatprep.subr.bf16.mxu1 %v5048_v47  ;;  %v5076_v47 = vld [vmem:[%s5418_s26 + $0x120] ss:$8 sps:$4 sm:$0xff]  }
 0x8f6   : > { %3654 = vmatpush1.bf16.msra.mxu1 %v5046_v10  ;;  %v5081_v10 = vld [vmem:[%s5418_s26 + $0x134] ss:$8 sps:$4 sm:$0xff]  }
 0x8f7   : > { %3655 = vmatprep.subr.bf16.mxu1 %v5051_v11  ;;  %v5079_v11 = vld [vmem:[%s5418_s26 + $0x130] ss:$8 sps:$4 sm:$0xff]  }
 0x8fa   : > { %3656 = vmatpush1.bf16.msra.mxu1 %v5049_v12  ;;  %v5084_v12 = vld [vmem:[%s5418_s26 + $0x144] ss:$8 sps:$4 sm:$0xff]  }
 0x8fb   : > { %3657 = vmatprep.subr.bf16.mxu1 %v5054_v13  ;;  %v5082_v13 = vld [vmem:[%s5418_s26 + $0x140] ss:$8 sps:$4 sm:$0xff]  }
 0x8fe   : > { %3658 = vmatpush1.bf16.msra.mxu1 %v5052_v14  ;;  %v5087_v14 = vld [vmem:[%s5418_s26 + $0x154] ss:$8 sps:$4 sm:$0xff]  }
 0x8ff   : > { %3659 = vmatprep.subr.bf16.mxu1 %v5057_v17  ;;  %v5085_v17 = vld [vmem:[%s5418_s26 + $0x150] ss:$8 sps:$4 sm:$0xff]  }
 0x902   : > { %3660 = vmatpush1.bf16.msra.mxu1 %v5055_v19  ;;  %v5090_v19 = vld [vmem:[%s5418_s26 + $0x164] ss:$8 sps:$4 sm:$0xff]  }
 0x903   : > { %3661 = vmatprep.subr.bf16.mxu1 %v5060_v20  ;;  %v5088_v20 = vld [vmem:[%s5418_s26 + $0x160] ss:$8 sps:$4 sm:$0xff]  }
 0x906   : > { %3662 = vmatpush1.bf16.msra.mxu1 %v5058_v21  ;;  %v5093_v21 = vld [vmem:[%s5418_s26 + $0x174] ss:$8 sps:$4 sm:$0xff]  }
 0x907   : > { %3663 = vmatprep.subr.bf16.mxu1 %v5063_v35  ;;  %v5091_v35 = vld [vmem:[%s5418_s26 + $0x170] ss:$8 sps:$4 sm:$0xff]  }
 0x90a   : > { %3664 = vmatpush1.bf16.msra.mxu1 %v5061_v9  ;;  %v5096_v9 = vld [vmem:[%s5418_s26 + $0x184] ss:$8 sps:$4 sm:$0xff]  }
 0x90b   : > { %3665 = vmatprep.subr.bf16.mxu1 %v5066_v39  ;;  %v5094_v39 = vld [vmem:[%s5418_s26 + $0x180] ss:$8 sps:$4 sm:$0xff]  }
 0x90e   : > { %3666 = vmatpush1.bf16.msra.mxu1 %v5064_v41  ;;  %v5099_v41 = vld [vmem:[%s5418_s26 + $0x194] ss:$8 sps:$4 sm:$0xff]  }
 0x90f   : > { %3667 = vmatprep.subr.bf16.mxu1 %v5069_v22  ;;  %v5097_v22 = vld [vmem:[%s5418_s26 + $0x190] ss:$8 sps:$4 sm:$0xff]  }
 0x912   : > { %3668 = vmatpush1.bf16.msra.mxu1 %v5067_v23  ;;  %v5102_v23 = vld [vmem:[%s5418_s26 + $0x1a4] ss:$8 sps:$4 sm:$0xff]  }
 0x913   : > { %3680 = vmatprep.subr.bf16.mxu1 %v5072_v24  ;;  %v5100_v24 = vld [vmem:[%s5418_s26 + $0x1a0] ss:$8 sps:$4 sm:$0xff]  }
 0x968   : > { %v2835_v34 = vpop.f32.mrb[16].mxu1  ;;  %v2878_v36 = vpop.f32.mrb[32].mxu0 }
 0x969   : > { %v2836_v5 = vadd.f32 %v2835_v34, %v2132_v27  ;;  %v2879_v8 = vadd.f32 %v2878_v36, %v2140_v29  ;;  %v2837_v37 = vpop.f32.mrb[17].mxu1  ;;  %v2880_v38 = vpop.f32.mrb[33].mxu0  ;;  %v807_v34 = vld [vmem:[%s5423_s13 + $0x38] sm:$0xff] }
 0x96a   : > { %v2838_v40 = vadd.f32 %v2837_v37, %v2136_v31  ;;  %v2881_v44 = vadd.f32 %v2880_v38, %v2144_v33  ;;  %v2839_v46 = vpop.f32.mrb[18].mxu1  ;;  %v2882_v52 = vpop.f32.mrb[34].mxu0  ;;  %v5109_v36 = vld [vmem:[%s5418_s26 + $0x1d0] ss:$8 sps:$4 sm:$0xff]   ;;  %v5114_v38 = vld [vmem:[%s5418_s26 + $0x1e4] ss:$8 sps:$4 sm:$0xff]  }
 0x96b   : > { %v2840_v42 = vadd.f32 %v2839_v46, %v2132_v27  ;;  %v2883_v49 = vadd.f32 %v2882_v52, %v2140_v29  ;;  %v2841_v51 = vpop.f32.mrb[19].mxu1  ;;  %v2884_v18 = vpop.f32.mrb[35].mxu0  ;;  %v2973_v58 = vmax.f32 %v2836_v5, 0.0  ;;  %v2975_v59 = vmax.f32 %v2879_v8, 0.0  ;;  %v5105_v27 = vld [vmem:[%s5418_s26 + $0x1b4] ss:$8 sps:$4 sm:$0xff]  }
 0x96c   : > { %v2842_v54 = vadd.f32 %v2841_v51, %v2136_v31  ;;  %v2885_v57 = vadd.f32 %v2884_v18, %v2144_v33  ;;  %v2974_v63 = vmax.f32 %v2838_v40, 0.0  ;;  %v2976_v0 = vmax.f32 %v2881_v44, 0.0  ;;  %v5108_v29 = vld [vmem:[%s5418_s26 + $0x1c4] ss:$8 sps:$4 sm:$0xff]   ;;  %v5106_v31 = vld [vmem:[%s5418_s26 + $0x1c0] ss:$8 sps:$4 sm:$0xff]  }
 0x96d   : > { %v2981_v61 = vmax.f32 %v2840_v42, 0.0  ;;  %v2983_v62 = vmax.f32 %v2883_v49, 0.0  ;;  %v806_v33 = vld [vmem:[%s5423_s13 + $0x30] sm:$0xff]  ;;  %v5246_v5 = vld [vmem:[%s5423_s13 + $0x20] sm:$0xff]  ;;  %v5247_v40 = vld [vmem:[%s5423_s13 + $0x28] sm:$0xff]  ;;  %v2160_v46 = vrot.slane %v807_v34, %v5887_v25 }
 0x96e   : > { %v2982_v1 = vmax.f32 %v2842_v54, 0.0  ;;  %v2984_v2 = vmax.f32 %v2885_v57, 0.0  ;;  %v2148_v8 = vrot.slane %v5246_v5, %v5887_v25  ;;  %v2156_v37 = vrot.slane %v806_v33, %v5887_v25  ;;  %v5112_v49 = vld [vmem:[%s5418_s26 + $0x1e0] ss:$8 sps:$4 sm:$0xff]   ;;  %v5141_v33 = vld [vmem:[%s5418_s26 + $0x274] ss:$8 sps:$4 sm:$0xff]  }
 0x96f   : > { %v2989_v3 = vpack.c.bf16 %v2981_v61, %v2973_v58  ;;  %v5903_v53 = vpack.c.bf16 %v2983_v62, %v2975_v59  ;;  %v2152_v44 = vrot.slane %v5247_v40, %v5887_v25  ;;  %v5117_v58 = vld [vmem:[%s5418_s26 + $0x1f4] ss:$8 sps:$4 sm:$0xff]   ;;  %v5139_v34 = vld [vmem:[%s5418_s26 + $0x270] ss:$8 sps:$4 sm:$0xff]   ;;  %v5142_v5 = vld [vmem:[%s5418_s26 + $0x280] ss:$8 sps:$4 sm:$0xff]  }
 0x970   : > { %v2990_v55 = vpack.c.bf16 %v2982_v1, %v2974_v63  ;;  %v2992_v60 = vpack.c.bf16 %v2984_v2, %v2976_v0  ;;  %v5148_v40 = vld [vmem:[%s5418_s26 + $0x2a0] ss:$8 sps:$4 sm:$0xff]  }
 0x972   : > { %3669 = vmatprep.mubr.bf16.mxu1 %v2990_v55 }
 0x973   : > { %3670 = vmatmul.mubr.bf16.vlgmr.msra.gmra.mrb[24].mxu1 %v2989_v3 }
 0x974   : > { %3681 = vmatpush1.bf16.msra.mxu1 %v5070_v4  ;;  %3712 = vmatprep.mubr.bf16.mxu1 %v2992_v60  ;;  %v5115_v4 = vld [vmem:[%s5418_s26 + $0x1f0] ss:$8 sps:$4 sm:$0xff]  }
 0x975   : > { %3682 = vmatprep.subr.bf16.mxu1 %v5075_v45 }
 0x978   : > { %3683 = vmatpush1.bf16.msra.mxu1 %v5073_v6 }
 0x979   : > { %3684 = vmatprep.subr.bf16.mxu1 %v5078_v7 }
 0x97c   : > { %3685 = vmatpush1.bf16.msra.mxu1 %v5076_v47 }
 0x97d   : > { %3686 = vmatprep.subr.bf16.mxu1 %v5081_v10  ;;  %v5120_v10 = vld [vmem:[%s5418_s26 + $0x204] ss:$8 sps:$4 sm:$0xff]  }
 0x980   : > { %3687 = vmatpush1.bf16.msra.mxu1 %v5079_v11 }
 0x981   : > { %3688 = vmatprep.subr.bf16.mxu1 %v5084_v12 }
 0x984   : > { %3689 = vmatpush1.bf16.msra.mxu1 %v5082_v13 }
 0x985   : > { %3690 = vmatprep.subr.bf16.mxu1 %v5087_v14 }
 0x988   : > { %3691 = vmatpush1.bf16.msra.mxu1 %v5085_v17 }
 0x989   : > { %3692 = vmatprep.subr.bf16.mxu1 %v5090_v19 }
 0x98c   : > { %3693 = vmatpush1.bf16.msra.mxu1 %v5088_v20 }
 0x98d   : > { %3694 = vmatprep.subr.bf16.mxu1 %v5093_v21 }
 0x990   : > { %3695 = vmatpush1.bf16.msra.mxu1 %v5091_v35  ;;  %v5118_v35 = vld [vmem:[%s5418_s26 + $0x200] ss:$8 sps:$4 sm:$0xff]  }
 0x991   : > { %3696 = vmatprep.subr.bf16.mxu1 %v5096_v9  ;;  %v5123_v9 = vld [vmem:[%s5418_s26 + $0x214] ss:$8 sps:$4 sm:$0xff]  }
 0x994   : > { %3697 = vmatpush1.bf16.msra.mxu1 %v5094_v39  ;;  %v5121_v39 = vld [vmem:[%s5418_s26 + $0x210] ss:$8 sps:$4 sm:$0xff]  }
 0x995   : > { %3698 = vmatprep.subr.bf16.mxu1 %v5099_v41  ;;  %v5126_v41 = vld [vmem:[%s5418_s26 + $0x224] ss:$8 sps:$4 sm:$0xff]  }
 0x998   : > { %3699 = vmatpush1.bf16.msra.mxu1 %v5097_v22  ;;  %v5124_v22 = vld [vmem:[%s5418_s26 + $0x220] ss:$8 sps:$4 sm:$0xff]  }
 0x999   : > { %3700 = vmatprep.subr.bf16.mxu1 %v5102_v23  ;;  %v5129_v23 = vld [vmem:[%s5418_s26 + $0x234] ss:$8 sps:$4 sm:$0xff]  }
 0x99c   : > { %3701 = vmatpush1.bf16.msra.mxu1 %v5100_v24  ;;  %v5127_v24 = vld [vmem:[%s5418_s26 + $0x230] ss:$8 sps:$4 sm:$0xff]  }
 0x99d   : > { %3702 = vmatprep.subr.bf16.mxu1 %v5105_v27  ;;  %v5132_v27 = vld [vmem:[%s5418_s26 + $0x244] ss:$8 sps:$4 sm:$0xff]  }
 0x9a0   : > { %3703 = vmatpush1.bf16.msra.mxu1 %v5103_v28  ;;  %v5135_v28 = vld [vmem:[%s5418_s26 + $0x254] ss:$8 sps:$4 sm:$0xff]  }
 0x9a1   : > { %3704 = vmatprep.subr.bf16.mxu1 %v5108_v29  ;;  %v5133_v29 = vld [vmem:[%s5418_s26 + $0x250] ss:$8 sps:$4 sm:$0xff]  }
 0x9a4   : > { %3705 = vmatpush1.bf16.msra.mxu1 %v5106_v31  ;;  %v5138_v31 = vld [vmem:[%s5418_s26 + $0x264] ss:$8 sps:$4 sm:$0xff]  }
 0x9a5   : > { %3706 = vmatprep.subr.bf16.mxu1 %v5111_v32  ;;  %v5136_v32 = vld [vmem:[%s5418_s26 + $0x260] ss:$8 sps:$4 sm:$0xff]  }
 0x9a8   : > { %v2921_v52 = vpop.f32.mrb[20].mxu1  ;;  %v2964_v42 = vpop.f32.mrb[36].mxu0  ;;  %3707 = vmatpush1.bf16.msra.mxu1 %v5109_v36  ;;  %v5144_v36 = vld [vmem:[%s5418_s26 + $0x284] ss:$8 sps:$4 sm:$0xff]  }
 0x9a9   : > { %v2922_v51 = vadd.f32 %v2921_v52, %v2148_v8  ;;  %v2965_v18 = vadd.f32 %v2964_v42, %v2156_v37  ;;  %v2923_v54 = vpop.f32.mrb[21].mxu1  ;;  %v2966_v57 = vpop.f32.mrb[37].mxu0  ;;  %3708 = vmatprep.subr.bf16.mxu1 %v5114_v38  ;;  %v5150_v38 = vld [vmem:[%s5418_s26 + $0x2a4] ss:$8 sps:$4 sm:$0xff]   ;;  %v5154_v42 = vld [vmem:[%s5418_s26 + $0x2c0] ss:$8 sps:$4 sm:$0xff]  }
 0x9aa   : > { %v2924_v59 = vadd.f32 %v2923_v54, %v2152_v44  ;;  %v2967_v61 = vadd.f32 %v2966_v57, %v2160_v46  ;;  %v2925_v62 = vpop.f32.mrb[22].mxu1  ;;  %v2968_v63 = vpop.f32.mrb[38].mxu0  ;;  %v5156_v52 = vld [vmem:[%s5418_s26 + $0x2c4] ss:$8 sps:$4 sm:$0xff]   ;;  %v5160_v54 = vld [vmem:[%s5418_s26 + $0x2e0] ss:$8 sps:$4 sm:$0xff]  }
 0x9ab   : > { %v2926_v0 = vadd.f32 %v2925_v62, %v2148_v8  ;;  %v2969_v1 = vadd.f32 %v2968_v63, %v2156_v37  ;;  %v2927_v2 = vpop.f32.mrb[23].mxu1  ;;  %v2970_v3 = vpop.f32.mrb[39].mxu0  ;;  %v2977_v45 = vmax.f32 %v2922_v51, 0.0  ;;  %v2979_v6 = vmax.f32 %v2965_v18, 0.0  ;;  %v5147_v8 = vld [vmem:[%s5418_s26 + $0x294] ss:$8 sps:$4 sm:$0xff]  }
 0x9ac   : > { %v2928_v55 = vadd.f32 %v2927_v2, %v2152_v44  ;;  %v2971_v60 = vadd.f32 %v2970_v3, %v2160_v46  ;;  %3709 = vmatpush1.bf16.msra.mxu1 %v5112_v49  ;;  %v2978_v11 = vmax.f32 %v2924_v59, 0.0  ;;  %v2980_v12 = vmax.f32 %v2967_v61, 0.0  ;;  %v5145_v37 = vld [vmem:[%s5418_s26 + $0x290] ss:$8 sps:$4 sm:$0xff]   ;;  %v5153_v44 = vld [vmem:[%s5418_s26 + $0x2b4] ss:$8 sps:$4 sm:$0xff]  }
 0x9ad   : > { %v2985_v7 = vmax.f32 %v2926_v0, 0.0  ;;  %v2987_v47 = vmax.f32 %v2969_v1, 0.0  ;;  %3710 = vmatprep.subr.bf16.mxu1 %v5117_v58  ;;  %v5151_v46 = vld [vmem:[%s5418_s26 + $0x2b0] ss:$8 sps:$4 sm:$0xff]   ;;  %v5159_v49 = vld [vmem:[%s5418_s26 + $0x2d4] ss:$8 sps:$4 sm:$0xff]  }
 0x9ae   : > { %v2986_v13 = vmax.f32 %v2928_v55, 0.0  ;;  %v2988_v14 = vmax.f32 %v2971_v60, 0.0  ;;  %v5157_v51 = vld [vmem:[%s5418_s26 + $0x2d0] ss:$8 sps:$4 sm:$0xff]   ;;  %v5162_v18 = vld [vmem:[%s5418_s26 + $0x2e4] ss:$8 sps:$4 sm:$0xff]  }
 0x9af   : > { %v5945_v17 = vpack.c.bf16 %v2985_v7, %v2977_v45  ;;  %v5947_v19 = vpack.c.bf16 %v2987_v47, %v2979_v6  ;;  %v5165_v57 = vld [vmem:[%s5418_s26 + $0x2f4] ss:$8 sps:$4 sm:$0xff]   ;;  %v5163_v58 = vld [vmem:[%s5418_s26 + $0x2f0] ss:$8 sps:$4 sm:$0xff]   ;;  %v5168_v59 = vld [vmem:[%s5418_s26 + $0x304] ss:$8 sps:$4 sm:$0xff]  }
 0x9b0   : > { %v2994_v20 = vpack.c.bf16 %v2986_v13, %v2978_v11  ;;  %v5949_v21 = vpack.c.bf16 %v2988_v14, %v2980_v12  ;;  %3711 = vmatpush1.bf16.msra.mxu1 %v5115_v4  ;;  %v5166_v61 = vld [vmem:[%s5418_s26 + $0x300] ss:$8 sps:$4 sm:$0xff]   ;;  %v5171_v62 = vld [vmem:[%s5418_s26 + $0x314] ss:$8 sps:$4 sm:$0xff]   ;;  %v5169_v63 = vld [vmem:[%s5418_s26 + $0x310] ss:$8 sps:$4 sm:$0xff]  }
 0x9b1   : > { %3723 = vmatprep.subr.bf16.mxu1 %v5120_v10  ;;  %v5174_v0 = vld [vmem:[%s5418_s26 + $0x324] ss:$8 sps:$4 sm:$0xff]   ;;  %v5172_v1 = vld [vmem:[%s5418_s26 + $0x320] ss:$8 sps:$4 sm:$0xff]   ;;  %v5177_v2 = vld [vmem:[%s5418_s26 + $0x334] ss:$8 sps:$4 sm:$0xff]  }
 0x9b2   : > { %v5175_v3 = vld [vmem:[%s5418_s26 + $0x330] ss:$8 sps:$4 sm:$0xff]   ;;  %v5180_v55 = vld [vmem:[%s5418_s26 + $0x344] ss:$8 sps:$4 sm:$0xff]   ;;  %v5178_v60 = vld [vmem:[%s5418_s26 + $0x340] ss:$8 sps:$4 sm:$0xff]  }
 0x9b3   : > { %3713 = vmatmul.mubr.bf16.vlgmr.msra.gmra.mrb[24].mxu1 %v5903_v53  ;;  %v5130_v53 = vld [vmem:[%s5418_s26 + $0x240] ss:$8 sps:$4 sm:$0xff]   ;;  %v5183_v4 = vld [vmem:[%s5418_s26 + $0x354] ss:$8 sps:$4 sm:$0xff]   ;;  %v5181_v45 = vld [vmem:[%s5418_s26 + $0x350] ss:$8 sps:$4 sm:$0xff]  }
 0x9b4   : > { %3724 = vmatpush1.bf16.msra.mxu1 %v5118_v35  ;;  %3755 = vmatprep.mubr.bf16.mxu1 %v2994_v20  ;;  %v5186_v6 = vld [vmem:[%s5418_s26 + $0x364] ss:$8 sps:$4 sm:$0xff]   ;;  %v5184_v7 = vld [vmem:[%s5418_s26 + $0x360] ss:$8 sps:$4 sm:$0xff]   ;;  %v5189_v47 = vld [vmem:[%s5418_s26 + $0x374] ss:$8 sps:$4 sm:$0xff]  }
 0x9b5   : > { %3725 = vmatprep.subr.bf16.mxu1 %v5123_v9  ;;  %v5187_v10 = vld [vmem:[%s5418_s26 + $0x370] ss:$8 sps:$4 sm:$0xff]   ;;  %v5192_v11 = vld [vmem:[%s5418_s26 + $0x384] ss:$8 sps:$4 sm:$0xff]   ;;  %v5190_v12 = vld [vmem:[%s5418_s26 + $0x380] ss:$8 sps:$4 sm:$0xff]  }
 0x9b6   : > { %v5195_v13 = vld [vmem:[%s5418_s26 + $0x394] ss:$8 sps:$4 sm:$0xff]   ;;  %v5193_v14 = vld [vmem:[%s5418_s26 + $0x390] ss:$8 sps:$4 sm:$0xff]   ;;  %v5196_v20 = vld [vmem:[%s5418_s26 + $0x3a0] ss:$8 sps:$4 sm:$0xff]  }
 0x9b7   : > { %v5199_v35 = vld [vmem:[%s5418_s26 + $0x3b0] ss:$8 sps:$4 sm:$0xff]   ;;  %v5204_v9 = vld [vmem:[%s5418_s26 + $0x3c4] ss:$8 sps:$4 sm:$0xff]  }
 0x9b8   : > { %3726 = vmatpush1.bf16.msra.mxu1 %v5121_v39  ;;  %v5202_v39 = vld [vmem:[%s5418_s26 + $0x3c0] ss:$8 sps:$4 sm:$0xff]  }
 0x9b9   : > { %3727 = vmatprep.subr.bf16.mxu1 %v5126_v41  ;;  %v5207_v41 = vld [vmem:[%s5418_s26 + $0x3d4] ss:$8 sps:$4 sm:$0xff]  }
 0x9bc   : > { %3728 = vmatpush1.bf16.msra.mxu1 %v5124_v22  ;;  %v5205_v22 = vld [vmem:[%s5418_s26 + $0x3d0] ss:$8 sps:$4 sm:$0xff]  }
 0x9bd   : > { %3729 = vmatprep.subr.bf16.mxu1 %v5129_v23  ;;  %v5210_v23 = vld [vmem:[%s5418_s26 + $0x3e4] ss:$8 sps:$4 sm:$0xff]  }
 0x9c0   : > { %3730 = vmatpush1.bf16.msra.mxu1 %v5127_v24  ;;  %v5208_v24 = vld [vmem:[%s5418_s26 + $0x3e0] ss:$8 sps:$4 sm:$0xff]  }
 0x9c1   : > { %3731 = vmatprep.subr.bf16.mxu1 %v5132_v27  ;;  %v5213_v27 = vld [vmem:[%s5418_s26 + $0x3f4] ss:$8 sps:$4 sm:$0xff]  }
 0x9c4   : > { %3732 = vmatpush1.bf16.msra.mxu1 %v5130_v53  ;;  %v5211_v53 = vld [vmem:[%s5418_s26 + $0x3f0] ss:$8 sps:$4 sm:$0xff]  }
 0x9c5   : > { %3733 = vmatprep.subr.bf16.mxu1 %v5135_v28  ;;  %v3815_v28 = vsub.s32 3, %v5554_v48 }
 0x9c8   : > { %3734 = vmatpush1.bf16.msra.mxu1 %v5133_v29  ;;  %v3816_v29 = vrot.slane %v5890_v26, %v3815_v28 }
 0x9c9   : > { %3735 = vmatprep.subr.bf16.mxu1 %v5138_v31 }
 0x9cc   : > { %3736 = vmatpush1.bf16.msra.mxu1 %v5136_v32  ;;  %v3820_v32 = vrot.slane %v5897_v30, %v3815_v28  ;;  %v5251_v28 = vld [vmem:[%s6169_s7 + $0x14] ss:$8 sps:$4 sm:$0xff] (!%p4692_p5)  }
 0x9cd   : > { %3737 = vmatprep.subr.bf16.mxu1 %v5141_v33 }
 0x9d0   : > { %3738 = vmatpush1.bf16.msra.mxu1 %v5139_v34 }
 0x9d1   : > { %3739 = vmatprep.subr.bf16.mxu1 %v5144_v36 }
 0x9d4   : > { %3740 = vmatpush1.bf16.msra.mxu1 %v5142_v5 }
 0x9d5   : > { %3741 = vmatprep.subr.bf16.mxu1 %v5147_v8 }
 0x9d8   : > { %3742 = vmatpush1.bf16.msra.mxu1 %v5145_v37 }
 0x9d9   : > { %3743 = vmatprep.subr.bf16.mxu1 %v5150_v38 }
 0x9dc   : > { %3744 = vmatpush1.bf16.msra.mxu1 %v5148_v40 }
 0x9dd   : > { %3745 = vmatprep.subr.bf16.mxu1 %v5153_v44 }
 0x9e0   : > { %3746 = vmatpush1.bf16.msra.mxu1 %v5151_v46 }
 0x9e1   : > { %3747 = vmatprep.subr.bf16.mxu1 %v5156_v52 }
 0x9e4   : > { %3748 = vmatpush1.bf16.msra.mxu1 %v5154_v42 }
 0x9e5   : > { %3749 = vmatprep.subr.bf16.mxu1 %v5159_v49 }
 0x9e8   : > { %3750 = vmatpush1.bf16.msra.mxu1 %v5157_v51 }
 0x9e9   : > { %3751 = vmatprep.subr.bf16.mxu1 %v5162_v18 }
 0x9ec   : > { %3752 = vmatpush1.bf16.msra.mxu1 %v5160_v54 }
 0x9ed   : > { %3753 = vmatprep.subr.bf16.mxu1 %v5165_v57 }
 0x9f0   : > { %3754 = vmatpush1.bf16.msra.mxu1 %v5163_v58 }
 0x9f1   : > { %3766 = vmatprep.subr.bf16.mxu1 %v5168_v59 }
 0x9f3   : > { %3756 = vmatmul.mubr.bf16.vlgmr.msra.gmra.mrb[24].mxu1 %v5945_v17  ;;  %v5198_v17 = vld [vmem:[%s5418_s26 + $0x3a4] ss:$8 sps:$4 sm:$0xff]  }
 0x9f4   : > { %3767 = vmatpush1.bf16.msra.mxu1 %v5166_v61  ;;  %3798 = vmatprep.mubr.bf16.mxu1 %v5949_v21  ;;  %v5201_v21 = vld [vmem:[%s5418_s26 + $0x3b4] ss:$8 sps:$4 sm:$0xff]  }
 0x9f5   : > { %3768 = vmatprep.subr.bf16.mxu1 %v5171_v62 }
 0x9f8   : > { %3769 = vmatpush1.bf16.msra.mxu1 %v5169_v63 }
 0x9f9   : > { %3770 = vmatprep.subr.bf16.mxu1 %v5174_v0 }
 0x9fc   : > { %3771 = vmatpush1.bf16.msra.mxu1 %v5172_v1 }
 0x9fd   : > { %3772 = vmatprep.subr.bf16.mxu1 %v5177_v2 }
 0xa00   : > { %3773 = vmatpush1.bf16.msra.mxu1 %v5175_v3 }
 0xa01   : > { %3774 = vmatprep.subr.bf16.mxu1 %v5180_v55 }
 0xa04   : > { %3775 = vmatpush1.bf16.msra.mxu1 %v5178_v60 }
 0xa05   : > { %3776 = vmatprep.subr.bf16.mxu1 %v5183_v4  ;;  %v3859_v4 = vsub.s32 6, %v5554_v48 }
 0xa08   : > { %3777 = vmatpush1.bf16.msra.mxu1 %v5181_v45  ;;  %v3871_v45 = vsub.s32 7, %v5554_v48 }
 0xa09   : > { %3778 = vmatprep.subr.bf16.mxu1 %v5186_v6  ;;  %v3860_v6 = vrot.slane %v5890_v26, %v3859_v4 }
 0xa0c   : > { %3779 = vmatpush1.bf16.msra.mxu1 %v5184_v7  ;;  %v3864_v7 = vrot.slane %v5897_v30, %v3859_v4  ;;  %v3971_v4 = vld [vmem:[%s6170_s8] sm:$0x3] (!%p4692_p5) }
 0xa0d   : > { %3780 = vmatprep.subr.bf16.mxu1 %v5189_v47 }
 0xa10   : > { %3781 = vmatpush1.bf16.msra.mxu1 %v5187_v10  ;;  %v3872_v10 = vrot.slane %v5890_v26, %v3871_v45 }
 0xa11   : > { %3782 = vmatprep.subr.bf16.mxu1 %v5192_v11  ;;  %v3876_v11 = vrot.slane %v5897_v30, %v3871_v45  ;;  %v3976_v45 = vrot.slane (!%p4692_p5), %v3971_v4, %v5558_v50 }
 0xa14   : > { %3783 = vmatpush1.bf16.msra.mxu1 %v5190_v12 }
 0xa15   : > { %3784 = vmatprep.subr.bf16.mxu1 %v5195_v13 }
 0xa18   : > { %3785 = vmatpush1.bf16.msra.mxu1 %v5193_v14 }
 0xa19   : > { %3786 = vmatprep.subr.bf16.mxu1 %v5198_v17 }
 0xa1c   : > { %3787 = vmatpush1.bf16.msra.mxu1 %v5196_v20 }
 0xa1d   : > { %3788 = vmatprep.subr.bf16.mxu1 %v5201_v21 }
 0xa20   : > { %3789 = vmatpush1.bf16.msra.mxu1 %v5199_v35 }
 0xa21   : > { %3790 = vmatprep.subr.bf16.mxu1 %v5204_v9 }
 0xa24   : > { %3791 = vmatpush1.bf16.msra.mxu1 %v5202_v39 }
 0xa25   : > { %3792 = vmatprep.subr.bf16.mxu1 %v5207_v41 }
 0xa28   : > { %3793 = vmatpush1.bf16.msra.mxu1 %v5205_v22 }
 0xa29   : > { %3794 = vmatprep.subr.bf16.mxu1 %v5210_v23 }
 0xa2c   : > { %3795 = vmatpush1.bf16.msra.mxu1 %v5208_v24  ;;  %v5336_v24 = vmov (!%p4692_p5), 0  }
 0xa2d   : > { %3796 = vmatprep.subr.bf16.mxu1 %v5213_v27  ;;  %3928 = vmatprep.mubr.bf16.mxu0 (!%p4692_p5), %v5336_v24  ;;  %v5248_v27 = vld [vmem:[%s6169_s7 + $0x4] ss:$8 sps:$4 sm:$0xff] (!%p4692_p5)  }
 0xa30   : > { %3797 = vmatpush1.bf16.msra.mxu1 %v5211_v53  ;;  %v5250_v53 = vld [vmem:[%s6169_s7] ss:$8 sps:$4 sm:$0xff] (!%p4692_p5)  }
 0xa31   : > { %4143 = vmatprep.subr.bf16.mxu1 (!%p4692_p5), %v5248_v27 }
 0xa33   : > { %3799 = vmatmul.mubr.bf16.vlgmr.msra.gmra.mrb[24].mxu1 %v5947_v19 }
 0xa34   : > { %4144 = vmatpush1.bf16.msra.mxu1 (!%p4692_p5), %v5250_v53 }
 0xa35   : > { %4145 = vmatprep.subr.bf16.mxu1 (!%p4692_p5), %v5251_v28 }
 0xb06   : > { %v3800_v31 = vpop.f32.mrb[24].mxu1 }
 0xb07   : > { %v3809_v33 = vadd.f32 %v3800_v31, %v5779_v43  ;;  %v3802_v34 = vpop.f32.mrb[25].mxu1  ;;  %v5253_v31 = vld [vmem:[%s6169_s7 + $0x10] ss:$8 sps:$4 sm:$0xff] (!%p4692_p5)  }
 0xb08   : > { %v3810_v36 = vadd.f32 %v3802_v34, %v5775_v15  ;;  %v3804_v5 = vpop.f32.mrb[26].mxu1  ;;  %4146 = vmatpush1.bf16.msra.mxu1 (!%p4692_p5), %v5253_v31  ;;  %v5257_v34 = vld [vmem:[%s6169_s7 + $0x34] ss:$8 sps:$4 sm:$0xff] (!%p4692_p5)  }
 0xb09   : > { %v3821_v8 = vadd.f32 %v3816_v29, %v3809_v33  ;;  %v3811_v37 = vadd.f32 %v3804_v5, %v5781_v56  ;;  %v3806_v38 = vpop.f32.mrb[27].mxu1  ;;  %v5256_v33 = vld [vmem:[%s6169_s7 + $0x20] ss:$8 sps:$4 sm:$0xff] (!%p4692_p5)   ;;  %v5260_v5 = vld [vmem:[%s6169_s7 + $0x44] ss:$8 sps:$4 sm:$0xff] (!%p4692_p5)  }
 0xb0a   : > { %v3822_v40 = vadd.f32 %v3820_v32, %v3810_v36  ;;  %v3812_v19 = vadd.f32 %v3806_v38, %v5777_v16  ;;  %v5259_v36 = vld [vmem:[%s6169_s7 + $0x30] ss:$8 sps:$4 sm:$0xff] (!%p4692_p5)  }
 0xb0b   : > { %v3823_v44 = vadd.f32 %v3816_v29, %v3811_v37  ;;  %v3889_v29 = vld [vmem:[%s6168_s6] sm:$0x1] (!%p4692_p5)  ;;  %v5263_v37 = vld [vmem:[%s6169_s7 + $0x54] ss:$8 sps:$4 sm:$0xff] (!%p4692_p5)   ;;  %v5265_v38 = vld [vmem:[%s6169_s7 + $0x50] ss:$8 sps:$4 sm:$0xff] (!%p4692_p5)  }
 0xb0c   : > { %v3824_v46 = vadd.f32 %v3820_v32, %v3812_v19  ;;  %v3825_v52 = vadd.f32 %v3822_v40, %v3821_v8  ;;  %v5254_v32 = vld [vmem:[%s6169_s7 + $0x24] ss:$8 sps:$4 sm:$0xff] (!%p4692_p5)   ;;  %v5268_v19 = vld [vmem:[%s6169_s7 + $0x60] ss:$8 sps:$4 sm:$0xff] (!%p4692_p5)  }
 0xb0d   : > { %4147 = vmatprep.subr.bf16.mxu1 (!%p4692_p5), %v5254_v32 }
 0xb0e   : > { %3826 = vadd.xlane.f32.xlu0 %v3825_v52  ;;  %v3828_v42 = vadd.f32 %v3824_v46, %v3823_v44  ;;  %4148 = vmatpush1.bf16.msra.mxu1 (!%p4692_p5), %v5256_v33  ;;  %v5272_v52 = vld [vmem:[%s6169_s7 + $0x84] ss:$8 sps:$4 sm:$0xff] (!%p4692_p5)  }
 0xb0f   : > { %4149 = vmatprep.subr.bf16.mxu1 (!%p4692_p5), %v5257_v34 }
 0xb10   : > { %3829 = vadd.xlane.f32.xlu1 %v3828_v42  ;;  %v5274_v42 = vld [vmem:[%s6169_s7 + $0x80] ss:$8 sps:$4 sm:$0xff] (!%p4692_p5)  }
 0xb12   : > { %4150 = vmatpush1.bf16.msra.mxu1 (!%p4692_p5), %v5259_v36 }
 0xb13   : > { %4151 = vmatprep.subr.bf16.mxu1 (!%p4692_p5), %v5260_v5 }
 0xb9b   : > { %v3827_v49 = vpop.xlane.xlu0 %3826 }
 0xb9c   : > { %v3831_v51 = vmul.f32 0.00390625, %v3827_v49  ;;  %v5275_v49 = vld [vmem:[%s6169_s7 + $0x94] ss:$8 sps:$4 sm:$0xff] (!%p4692_p5)  }
 0xb9d   : > { %v3830_v43 = vpop.xlane.xlu1 %3829 }
 0xb9e   : > { %v3833_v18 = vsub.f32 %v3821_v8, %v3831_v51  ;;  %v3834_v54 = vsub.f32 %v3822_v40, %v3831_v51  ;;  %v3832_v15 = vmul.f32 0.00390625, %v3830_v43  ;;  %v5262_v8 = vld [vmem:[%s6169_s7 + $0x40] ss:$8 sps:$4 sm:$0xff] (!%p4692_p5)   ;;  %v5266_v40 = vld [vmem:[%s6169_s7 + $0x64] ss:$8 sps:$4 sm:$0xff] (!%p4692_p5)  }
 0xb9f   : > { %4152 = vmatpush1.bf16.msra.mxu1 (!%p4692_p5), %v5262_v8  ;;  %v5277_v51 = vld [vmem:[%s6169_s7 + $0x90] ss:$8 sps:$4 sm:$0xff] (!%p4692_p5)   ;;  %v5278_v43 = vld [vmem:[%s6169_s7 + $0xa4] ss:$8 sps:$4 sm:$0xff] (!%p4692_p5)  }
 0xba0   : > { %v3835_v57 = vsub.f32 %v3823_v44, %v3832_v15  ;;  %v3836_v58 = vsub.f32 %v3824_v46, %v3832_v15  ;;  %v3837_v59 = vmul.f32 %v3833_v18, %v3833_v18  ;;  %v3838_v56 = vmul.f32 %v3834_v54, %v3834_v54  ;;  %4153 = vmatprep.subr.bf16.mxu1 (!%p4692_p5), %v5263_v37  ;;  %v5269_v44 = vld [vmem:[%s6169_s7 + $0x74] ss:$8 sps:$4 sm:$0xff] (!%p4692_p5)   ;;  %v5271_v46 = vld [vmem:[%s6169_s7 + $0x70] ss:$8 sps:$4 sm:$0xff] (!%p4692_p5)  }
 0xba1   : > { %v5283_v15 = vld [vmem:[%s6169_s7 + $0xb0] ss:$8 sps:$4 sm:$0xff] (!%p4692_p5)  }
 0xba2   : > { %v3841_v61 = vadd.f32 %v3838_v56, %v3837_v59  ;;  %v3839_v62 = vmul.f32 %v3835_v57, %v3835_v57  ;;  %v3840_v63 = vmul.f32 %v3836_v58, %v3836_v58  ;;  %v5287_v59 = vld [vmem:[%s6169_s7 + $0xd4] ss:$8 sps:$4 sm:$0xff] (!%p4692_p5)   ;;  %v5289_v56 = vld [vmem:[%s6169_s7 + $0xd0] ss:$8 sps:$4 sm:$0xff] (!%p4692_p5)  }
 0xba3   : > { %4154 = vmatpush1.bf16.msra.mxu1 (!%p4692_p5), %v5265_v38 }
 0xba4   : > { %3842 = vadd.xlane.f32.xlu0 %v3841_v61  ;;  %v3844_v16 = vadd.f32 %v3840_v63, %v3839_v62  ;;  %4155 = vmatprep.subr.bf16.mxu1 (!%p4692_p5), %v5266_v40  ;;  %v5290_v61 = vld [vmem:[%s6169_s7 + $0xe4] ss:$8 sps:$4 sm:$0xff] (!%p4692_p5)   ;;  %v5292_v62 = vld [vmem:[%s6169_s7 + $0xe0] ss:$8 sps:$4 sm:$0xff] (!%p4692_p5)   ;;  %v5293_v63 = vld [vmem:[%s6169_s7 + $0xf4] ss:$8 sps:$4 sm:$0xff] (!%p4692_p5)  }
 0xba6   : > { %3845 = vadd.xlane.f32.xlu1 %v3844_v16  ;;  %v5295_v16 = vld [vmem:[%s6169_s7 + $0xf0] ss:$8 sps:$4 sm:$0xff] (!%p4692_p5)  }
 0xba7   : > { %4156 = vmatpush1.bf16.msra.mxu1 (!%p4692_p5), %v5268_v19 }
 0xba8   : > { %4157 = vmatprep.subr.bf16.mxu1 (!%p4692_p5), %v5269_v44 }
 0xbab   : > { %4158 = vmatpush1.bf16.msra.mxu1 (!%p4692_p5), %v5271_v46 }
 0xbac   : > { %4159 = vmatprep.subr.bf16.mxu1 (!%p4692_p5), %v5272_v52 }
 0xbaf   : > { %4160 = vmatpush1.bf16.msra.mxu1 (!%p4692_p5), %v5274_v42 }
 0xbb0   : > { %4161 = vmatprep.subr.bf16.mxu1 (!%p4692_p5), %v5275_v49 }
 0xbb3   : > { %4162 = vmatpush1.bf16.msra.mxu1 (!%p4692_p5), %v5277_v51 }
 0xbb4   : > { %4163 = vmatprep.subr.bf16.mxu1 (!%p4692_p5), %v5278_v43 }
 0xc31   : > { %v3843_v0 = vpop.xlane.xlu0 %3842 }
 0xc32   : > { %v3847_v1 = vmul.f32 0.00390625, %v3843_v0 }
 0xc33   : > { %v3846_v2 = vpop.xlane.xlu1 %3845 }
 0xc34   : > { %v3849_v3 = vadd.f32 1e-05, %v3847_v1  ;;  %v3848_v55 = vmul.f32 0.00390625, %v3846_v2 }
 0xc36   : > { %5234 = vrsqrt.f32 %v3849_v3  ;;  %v3850_v60 = vadd.f32 1e-05, %v3848_v55 }
 0xc38   : > { %5236 = vrsqrt.f32 %v3850_v60 }
 0xc40   : > { %v5235_v47 = vpop.eup %5234 }
 0xc41   : > { %v3853_v12 = vmul.f32 %v5235_v47, %v3833_v18  ;;  %v3854_v13 = vmul.f32 %v5235_v47, %v3834_v54  ;;  %v5280_v18 = vld [vmem:[%s6169_s7 + $0xa0] ss:$8 sps:$4 sm:$0xff] (!%p4692_p5)   ;;  %v5281_v54 = vld [vmem:[%s6169_s7 + $0xb4] ss:$8 sps:$4 sm:$0xff] (!%p4692_p5)  }
 0xc42   : > { %v5237_v14 = vpop.eup %5236  ;;  %4164 = vmatpush1.bf16.msra.mxu1 (!%p4692_p5), %v5280_v18 }
 0xc43   : > { %v3865_v17 = vmul.f32 %v3860_v6, %v3853_v12  ;;  %v3866_v20 = vmul.f32 %v3864_v7, %v3854_v13  ;;  %v3855_v21 = vmul.f32 %v5237_v14, %v3835_v57  ;;  %v3856_v35 = vmul.f32 %v5237_v14, %v3836_v58  ;;  %3888 = sbr.rel (%p4692_p5) target bundleno = 3585 (0xe01), region = 64  ;;  %4165 = vmatprep.subr.bf16.mxu1 (!%p4692_p5), %v5281_v54  ;;  %v5284_v57 = vld [vmem:[%s6169_s7 + $0xc4] ss:$8 sps:$4 sm:$0xff] (!%p4692_p5)   ;;  %v5286_v58 = vld [vmem:[%s6169_s7 + $0xc0] ss:$8 sps:$4 sm:$0xff] (!%p4692_p5)  }
 0xc45   : > { %v3877_v9 = vadd.f32 %v3872_v10, %v3865_v17  ;;  %v3878_v39 = vadd.f32 %v3876_v11, %v3866_v20  ;;  %v3867_v41 = vmul.f32 %v3860_v6, %v3855_v21  ;;  %v3868_v48 = vmul.f32 %v3864_v7, %v3856_v35 }
 0xc46   : > { %4166 = vmatpush1.bf16.msra.mxu1 (!%p4692_p5), %v5283_v15  ;;  %v3980_v6 = vrot.slane (!%p4692_p5), %v3971_v4, %v5887_v25 }
 0xc47   : > { %3881 = vst [vmem:[#allocation2] sm:$0xff] %v3877_v9  ;;  %3882 = vst [vmem:[#allocation2 + $0x8] sm:$0xff] %v3878_v39  ;;  %v3879_v22 = vadd.f32 %v3872_v10, %v3867_v41  ;;  %v3880_v23 = vadd.f32 %v3876_v11, %v3868_v48  ;;  %4167 = vmatprep.subr.bf16.mxu1 (!%p4692_p5), %v5284_v57 }
 0xc49   : > { %3883 = vst [vmem:[#allocation2 + $0x10] sm:$0xff] %v3879_v22  ;;  %3884 = vst [vmem:[#allocation2 + $0x18] sm:$0xff] %v3880_v23  ;;  %v3891_v26 = vpack.c.bf16 (!%p4692_p5), %v3880_v23, %v3878_v39  ;;  %v3890_v30 = vpack.c.bf16 (!%p4692_p5), %v3879_v22, %v3877_v9 }
 0xc4a   : > { %4168 = vmatpush1.bf16.msra.mxu1 %v5286_v58 }
 0xc4b   : > { %3896 = vmatprep.subr.bf16.mxu0 %v3891_v26  ;;  %4169 = vmatprep.subr.bf16.mxu1 %v5287_v59 }
 0xc4c   : > { %3897 = vmatpush1.bf16.msra.mxu0 %v3890_v30 }
 0xc4e   : > { %4170 = vmatpush1.bf16.msra.mxu1 %v5289_v56 }
 0xc4f   : > { %4693 = vmatmul.mubr.msk.bf16.vlgmr.msra.gmra.mrb[0].mxu0 %vm3892_vm3, %v3889_v29  ;;  %4171 = vmatprep.subr.bf16.mxu1 %v5290_v61 }
 0xc52   : > { %4172 = vmatpush1.bf16.msra.mxu1 %v5292_v62 }
 0xc53   : > { %4173 = vmatprep.subr.bf16.mxu1 %v5293_v63 }
 0xc56   : > { %4174 = vmatpush1.bf16.msra.mxu1 %v5295_v16 }
 0xd22   : > { %v3930_v0 = vpop.f32.mrb[0].mxu0 }
 0xd23   : > { %v3932_v1 = vpop.f32.mrb[1].mxu0  ;;  %v3969_v55 = vpack.c.bf16 %v3930_v0, %v3930_v0 }
 0xd24   : > { %v3934_v2 = vpop.f32.mrb[2].mxu0  ;;  %v3970_v3 = vpack.c.bf16 %v3932_v1, %v3932_v1 }
 0xd25   : > { %v3935_v60 = vpop.f32.mrb[3].mxu0 }
 0xd26   : > { %4175 = vmatprep.mubr.bf16.mxu1 %v3970_v3 }
 0xd27   : > { %4176 = vmatmul.mubr.bf16.vlgmr.msra.gmra.mrb[0].mxu1 %v3969_v55 }
 0xdfa   : > { %v4177_v7 = vpop.f32.mrb[0].mxu1 }
 0xdfb   : > { %v4178_v47 = vadd.f32 %v4177_v7, %v3976_v45  ;;  %v4179_v10 = vpop.f32.mrb[1].mxu1 }
 0xdfc   : > { %v4180_v11 = vadd.f32 %v4179_v10, %v3980_v6  ;;  %v4181_v12 = vpop.f32.mrb[2].mxu1 }
 0xdfd   : > { %v4182_v13 = vpop.f32.mrb[3].mxu1 }
 0xdfe   : > { %v4186_v14 = vcombine.low %v4178_v47, %v4180_v11 }
 0xe00   : > { %4726 = vst.sshfl [vmem:[#allocation3] sm:$0x33 pattern:$0x76325410] %v4186_v14 }
 0xe01 PF: > { %p4816_p6 = scmp.eq.s32.totalorder %s5394_s10, 1  ;;  %s5337_s12 = smov [#allocation3]  }
 0xe02   : > { %s4203_s14 = sshll.u32 %s5337_s12, 4  ;;  %s4204_s14 = int_to_ptr.vmem [resolvable:$true] %s4203_s14 }
 0xe03   : > { %s5296_s15 = scalar_lea.vmem %s4204_s14, 64  ;;  %p5303_p10 = scmp.lt.s32.totalorder %s4204_s14, %s4204_s14 }
 0xe04   : > { %p5297_p7 = scmp.ne.s32.totalorder %s4204_s14, %s5296_s15  ;;  %p5304_p11 = scmp.lt.s32.totalorder %s5296_s15, %s5296_s15 }
 0xe06   : > { %p5298_p8 = pnand %p5297_p7, %p4816_p6  ;;  %p5305_p12 = por %p5304_p11, %p5303_p10 }
 0xe08   : > { %p5299_p9 = pneg %p5298_p8 }
 0xe0a   : > { %p5306_p13 = pnand %p5305_p12, %p5299_p9 }
 0xe0c   : > { %5309 = shalt.err (!%p5306_p13)
}
 0xe0d   : > { %s5310_s17 = scalar_lea.hbm %s6171_s9, 64 }
 0xe0e   : > { %p5311_p0 = scmp.ne.s32.totalorder %s6171_s9, %s5310_s17  ;;  %p5316_p3 = scmp.lt.u32.totalorder %s5310_s17, %s6171_s9 }
 0xe10   : > { %p5312_p1 = pnand %p5311_p0, %p4816_p6 }
 0xe12   : > { %p5313_p2 = pneg %p5312_p1 }
 0xe14   : > { %p5318_p4 = pnand %p5316_p3, %p5313_p2 }
 0xe16   : > { %5321 = shalt.err (!%p5318_p4)
}
 0xe17   : > { %4813 = dma.vmem_to_hbm [thread:$0]  (%p4816_p6), %s4204_s14, 64, %s6171_s9, [#allocation4]  }
 0xe18   : > { %5327 = dma.done.wait (%p4816_p6), [#allocation4], 64  }
 0xe19   : > { %5329 = vsyncadd (%p4816_p6), [#allocation4], 4294967232 }
 0xe1a PF: > { %s20_s30 = sadd.s32 1, %s5332_s30  }
 0xe1b   : > { %p17_p5 = scmp.ge.s32.totalorder %s20_s30, 4  }
 0xe1d   :  { %19 = sbr.rel (!%p17_p5) target bundleno = 1 (0x1), region = 103 }
 0xe24   :  { %4216 = vsyncpa [#allocation4], 1 }
 0xe25   :  { %4218 = vsyncpa [#allocation4 + $0x1], 1 }

// kernel: _lambda_.2
= control target key start
LH: loop header
LB: loop body
LE: loop exit
PB: predicated region body
PF: predicated region fallthrough
CT: control target
= control target key end

     0   :  { %s8649_s0 = inlined_call_operand.vmem [shape: f32[8,768], index: 0, kind: input, shape index: {}]   ;;  %s8650_s1 = inlined_call_operand.hbm [shape: bf16[768,256], index: 1, kind: input, shape index: {}]   ;;  %s8651_s2 = inlined_call_operand.vmem [shape: f32[1,256], index: 2, kind: input, shape index: {}]   ;;  %s8652_s3 = inlined_call_operand.vmem [shape: bf16[16,8], index: 3, kind: input, shape index: {}]   ;;  %s8653_s4 = inlined_call_operand.vmem [shape: f32[16,256], index: 4, kind: input, shape index: {}]   ;;  %s8654_s5 = inlined_call_operand.vmem [shape: bf16[2,256,768], index: 5, kind: input, shape index: {}]   ;;  %s8655_s6 = inlined_call_operand.hbm [shape: bf16[2,256,256], index: 6, kind: input, shape index: {}]   ;;  %s8656_s7 = inlined_call_operand.vmem [shape: bf16[2,256,1024], index: 7, kind: input, shape index: {}]   ;;  %s8657_s8 = inlined_call_operand.hbm [shape: bf16[2,1024,256], index: 8, kind: input, shape index: {}]   ;;  %s8658_s9 = inlined_call_operand.vmem [shape: f32[2,8,1024], index: 9, kind: input, shape index: {}]   ;;  %s8659_s10 = inlined_call_operand.vmem [shape: bf16[2,16], index: 10, kind: input, shape index: {}]   ;;  %s8660_s11 = inlined_call_operand.vmem [shape: bf16[256,256], index: 11, kind: input, shape index: {}]   ;;  %s8661_s12 = inlined_call_operand.vmem [shape: f32[1,256], index: 12, kind: input, shape index: {}]   ;;  %s8662_s13 = inlined_call_operand.hbm [shape: f32[2,256], index: 13, kind: output, shape index: {}]  }
   0x1   :  { %8673 = sst [smem:[#allocation16_spill]] %s8655_s6 }
   0x2   :  { %8674 = sst [smem:[#allocation17_spill]] %s8657_s8 }
   0x3   :  { %18 = vsyncpa [#allocation4], 0 }
   0x4   :  { %19 = vsyncpa [#allocation7], 0 }
   0x5   :  { %21 = vsyncpa [#allocation7 + $0x1], 0 }
   0x6   :  { %22 = vsyncpa [#allocation5], 0  ;;  %s7313_s25 = smov 0   ;;  %s7315_s26 = smov 0  }
   0x7   :  { %s7317_s27 = smov 0   ;;  %s7319_s28 = smov 0  }
   0x8 LB: > { %8675 = sst [smem:[#allocation13_spill]] %s7225_s27  ;;  %s7334_s29 = sadd.s32 1, %s7229_s28   ;;  %s7229_s28 = sphi %s7319_s28, %s8691_s28   ;;  %s7225_s27 = sphi %s7317_s27, %s8693_s27   ;;  %s7221_s26 = sphi %s7315_s26, %s8695_s26   ;;  %s7217_s25 = sphi %s7313_s25, %s8694_s25  }
   0x9   : > { %8676 = sst [smem:[#allocation14_spill]] %s7334_s29  ;;  %s166_s30 = sadd.s32 1, %s7225_s27 }
   0xa   : > { %s163_s14 = ssub.s32 %s7229_s28, %s7334_s29  ;;  %p173_p0 = scmp.ne.s32.totalorder %s7225_s27, %s7221_s26 }
   0xb   : > { %p164_p1 = scmp.eq.s32.totalorder %s163_s14, 0  ;;  %p174_p2 = scmp.eq.s32.totalorder %s7229_s28, 0 }
   0xc   : > { %p6350_p4 = scmp.lt.s32.totalorder %s7229_s28, 2  ;;  %s407_s16 = sand.u32 1, %s7229_s28  }
   0xd   : > { %s7343_s15 = scalar_select %p164_p1, %s7225_s27, %s166_s30  }
   0xe   : > { %p175_p3 = por %p174_p2, %p173_p0  ;;  %s409_s17 = sand.u32 1, %s7225_s27  }
   0xf   : > { %8677 = sst [smem:[#allocation15_spill]] %s7343_s15  ;;  %s5695_s18 = sshll.u32 %s409_s17, 8 }
  0x10   : > { %s6237_s19 = sshll.u32 %s7229_s28, 12  ;;  %s8678_s6 = sld [smem:[#allocation16_spill]] }
  0x11   : > { %s411_s23 = scalar_lea.vmem [#allocation6], %s5695_s18  ;;  %p7354_p5 = pnand %p6350_p4, %p175_p3 }
  0x12   : > { %s418_s24 = sshll.u32 %s411_s23, 4  ;;  %s7360_s14 = sshll.u32 %s409_s17, 10  ;;  %s7358_s24 = int_to_ptr.vmem [resolvable:$true] %s418_s24 }
  0x13   : > { %s7362_s15 = scalar_lea.sflag [#allocation7], %s407_s16  ;;  %p7075_p7 = pneg %p7354_p5 }
  0x16   : > { %s7352_s22 = scalar_lea.hbm %s8678_s6, %s6237_s19  ;;  %s7078_s21 = scalar_lea.hbm %s8678_s6, 8192 }
  0x17   : > { %s7073_s19 = scalar_lea.hbm %s7352_s22, 4096  ;;  %p7079_p10 = scmp.lt.u32.totalorder %s7352_s22, %s8678_s6 }
  0x18   : > { %p7074_p6 = scmp.ne.s32.totalorder %s7352_s22, %s7073_s19  ;;  %p7080_p11 = scmp.lt.u32.totalorder %s7078_s21, %s7073_s19 }
  0x19   : > { %p7082_p13 = scmp.lt.u32.totalorder %s7073_s19, %s7352_s22 }
  0x1a   : > { %p7076_p8 = pnand %p7075_p7, %p7074_p6  ;;  %p7081_p12 = por %p7080_p11, %p7079_p10 }
  0x1c   : > { %p7077_p9 = pneg %p7076_p8  ;;  %p7083_p0 = por %p7082_p13, %p7081_p12 }
  0x1e   : > { %p7084_p1 = pnand %p7083_p0, %p7077_p9 }
  0x20   : > { %7087 = shalt.err (!%p7084_p1)
}
  0x21   : > { %s7088_s16 = scalar_lea.vmem %s7358_s24, 4096  ;;  %s7231_s17 = smov [#allocation6]  }
  0x22   : > { %p7089_p2 = scmp.ne.s32.totalorder %s7358_s24, %s7088_s16  ;;  %s7093_s18 = sshll.u32 %s7231_s17, 4  ;;  %s7094_s18 = int_to_ptr.vmem [resolvable:$false] %s7093_s18 }
  0x23   : > { %s7095_s27 = scalar_lea.vmem %s7094_s18, 8192  ;;  %p7096_p6 = scmp.lt.s32.totalorder %s7358_s24, %s7094_s18 }
  0x24   : > { %p7091_p3 = pnand %p7089_p2, %p7075_p7  ;;  %p7097_p8 = scmp.lt.s32.totalorder %s7095_s27, %s7088_s16 }
  0x26   : > { %p7092_p4 = pneg %p7091_p3  ;;  %p7098_p10 = por %p7097_p8, %p7096_p6 }
  0x28   : > { %p7099_p11 = pnand %p7098_p10, %p7092_p4 }
  0x2a   : > { %7102 = shalt.err (!%p7099_p11)
}
  0x2b   : > { %s8664_s19 = smov 128   ;;  %s8666_s20 = smov 8  }
  0x2c   : > { %6345 = dma.hbm_to_vmem [thread:$0]  (!%p7354_p5), %s7352_s22, 4096, %s7358_s24, %s7362_s15, %s8664_s19, %s8664_s19, %s8666_s20  }
  0x2d   : > { %s440_s21 = scalar_lea.vmem [#allocation8], %s7360_s14  ;;  %s7395_s16 = sadd.s32 4294967295, %s7229_s28  }
  0x2e   : > { %s447_s23 = sshll.u32 %s440_s21, 4  ;;  %p179_p9 = scmp.ne.s32.totalorder %s7221_s26, %s7217_s25  ;;  %s7421_s23 = int_to_ptr.vmem [resolvable:$true] %s447_s23 }
  0x2f   : > { %p8668_p12 = scmp.eq.s32.totalorder %s7395_s16, 0  ;;  %p5692_p13 = scmp.ge.s32.totalorder %s7229_s28, 1 }
  0x30   : > { %p352_p0 = scmp.lt.s32.totalorder %s7229_s28, 3  ;;  %s7234_s24 = smov [#allocation3]  }
  0x31   : > { %p7404_p1 = por %p8668_p12, %p179_p9  ;;  %s367_s14 = sshll.u32 %s7234_s24, 4  ;;  %s7423_s14 = int_to_ptr.vmem [resolvable:$true] %s367_s14 }
  0x32   : > { %p7409_p3 = pnand %p5692_p13, %p352_p0  ;;  %s6238_s18 = sshll.u32 %s7229_s28, 14 }
  0x33   : > { %s8680_s17 = scalar_select %p7404_p1, 1, 0 }
  0x34   : > { %s8681_s22 = scalar_select %p7409_p3, 1, 0 }
  0x35   : > { %p6338_p4 = pneg %p7409_p3  ;;  %s8682_s8 = sld [smem:[#allocation17_spill]] }
  0x37   : > { %p7427_p6 = pnand %p6338_p4, %p8668_p12 }
  0x3b   : > { %s7419_s21 = scalar_lea.hbm %s8682_s8, %s6238_s18  ;;  %s7108_s25 = scalar_lea.hbm %s8682_s8, 32768 }
  0x3c   : > { %s7103_s28 = scalar_lea.hbm %s7419_s21, 16384  ;;  %p7109_p9 = scmp.lt.u32.totalorder %s7419_s21, %s8682_s8 }
  0x3d   : > { %p7104_p8 = scmp.ne.s32.totalorder %s7419_s21, %s7103_s28  ;;  %p7110_p13 = scmp.lt.u32.totalorder %s7108_s25, %s7103_s28 }
  0x3e   : > { %p7112_p4 = scmp.lt.u32.totalorder %s7103_s28, %s7419_s21 }
  0x3f   : > { %p7106_p10 = pnand %p7104_p8, %p7075_p7  ;;  %p7111_p0 = por %p7110_p13, %p7109_p9 }
  0x41   : > { %p7107_p11 = pneg %p7106_p10  ;;  %p7113_p2 = por %p7112_p4, %p7111_p0 }
  0x43   : > { %p7114_p12 = pnand %p7113_p2, %p7107_p11 }
  0x45   : > { %7117 = shalt.err (!%p7114_p12)
}
  0x46   : > { %s7118_s6 = scalar_lea.vmem %s7421_s23, 16384  ;;  %s7235_s24 = smov [#allocation8]  }
  0x47   : > { %p7119_p8 = scmp.ne.s32.totalorder %s7421_s23, %s7118_s6  ;;  %s7123_s18 = sshll.u32 %s7235_s24, 4  ;;  %s7124_s18 = int_to_ptr.vmem [resolvable:$false] %s7123_s18 }
  0x48   : > { %s7125_s20 = scalar_lea.vmem %s7124_s18, 32768  ;;  %p7126_p3 = scmp.lt.s32.totalorder %s7421_s23, %s7124_s18 }
  0x49   : > { %p7121_p10 = pnand %p7119_p8, %p7075_p7  ;;  %p7127_p9 = scmp.lt.s32.totalorder %s7125_s20, %s7118_s6 }
  0x4b   : > { %p7122_p1 = pneg %p7121_p10  ;;  %p7128_p13 = por %p7127_p9, %p7126_p3 }
  0x4d   : > { %p7129_p0 = pnand %p7128_p13, %p7122_p1 }
  0x4f   : > { %7132 = shalt.err (!%p7129_p0)
}
  0x50   : > { %s8684_s28 = smov 8   ;;  %s8685_s25 = smov 128  }
  0x51   : > { %6348 = dma.hbm_to_vmem [thread:$0]  (!%p7354_p5), %s7419_s21, 16384, %s7421_s23, %s7362_s15, %s8685_s25, %s8685_s25, %s8684_s28  }
  0x52   : > { %s7133_s24 = scalar_lea.hbm %s8650_s1, 12288  ;;  %p7135_p12 = pneg %p7427_p6 }
  0x53   : > { %p7134_p7 = scmp.ne.s32.totalorder %s8650_s1, %s7133_s24  ;;  %p7140_p3 = scmp.lt.u32.totalorder %s7133_s24, %s8650_s1 }
  0x55   : > { %p7136_p1 = pnand %p7135_p12, %p7134_p7 }
  0x57   : > { %p7137_p2 = pneg %p7136_p1 }
  0x59   : > { %p7142_p11 = pnand %p7140_p3, %p7137_p2 }
  0x5b   : > { %7145 = shalt.err (!%p7142_p11)
}
  0x5c   : > { %s7146_s15 = scalar_lea.vmem %s7423_s14, 12288  ;;  %p7154_p10 = scmp.lt.s32.totalorder %s7423_s14, %s7423_s14 }
  0x5d   : > { %p7147_p5 = scmp.ne.s32.totalorder %s7423_s14, %s7146_s15  ;;  %p7155_p9 = scmp.lt.s32.totalorder %s7146_s15, %s7146_s15 }
  0x5f   : > { %p7149_p4 = pnand %p7147_p5, %p7135_p12  ;;  %p7156_p13 = por %p7155_p9, %p7154_p10 }
  0x61   : > { %p7150_p8 = pneg %p7149_p4 }
  0x63   : > { %p7157_p0 = pnand %p7156_p13, %p7150_p8 }
  0x65   : > { %7160 = shalt.err (!%p7157_p0)
}
  0x66   : > { %6341 = dma.hbm_to_vmem [thread:$0]  (!%p7427_p6), %s8650_s1, 12288, %s7423_s14, [#allocation4], %s8685_s25, %s8685_s25, %s8684_s28  }
  0x67   : > { %p8686_p7 = scmp.ne.s32.totalorder %s8681_s22, 0 }
  0x68   : > { %p8687_p12 = scmp.eq.s32.totalorder (!%p8686_p7), %s7395_s16, 0 }
  0x69   : > { %467 = sbr.rel (%p8686_p7) target bundleno = 4281 (0x10b9), region = 72 }
  0x70   : > { %7204 = dma.done.wait (%p8687_p12), [#allocation4], 12288   ;;  %p8688_p1 = pmov %p8687_p12 }
  0x71   : > { %s473_s19 = sand.u32 1, %s7395_s16   ;;  %s475_s23 = sand.u32 1, %s7221_s26  }
  0x72   : > { %7206 = vsyncadd (%p8688_p1), [#allocation4], 4294955008  ;;  %s5703_s21 = sshll.u32 %s475_s23, 8  ;;  %s474_s20 = scalar_lea.sflag [#allocation7], %s473_s19 }
  0x73   : > { %s7490_s27 = scalar_lea.vmem [#allocation6], %s5703_s21  ;;  %p8689_p2 = scmp.ne.s32.totalorder %s8680_s17, 0 }
  0x75   : > { %7208 = dma.done.wait (%p8689_p2), %s474_s20, 20480  }
  0x76   : > { %7210 = vsyncadd (%p8689_p2), %s474_s20, 4294946816  ;;  %s5704_s22 = sshll.u32 %s475_s23, 10  ;;  %p544_p6 = scmp.lt.s32.totalorder %s7395_s16, 1 }
  0x77   : > { %s7513_s23 = scalar_lea.vmem [#allocation8], %s5704_s22  ;;  %p8690_p3 = scmp.ne.s32.totalorder %s7395_s16, 0 }
  0x78   : > { %s545_s14 = scalar_select %p544_p6, %s7395_s16, 1 }
  0x79   : > { %563 = sbr.rel (%p8690_p3) target bundleno = 689 (0x2b1), region = 88  ;;  %v6396_v0 = vld [vmem:[#allocation3 + $0x104] ss:$8 sps:$4 sm:$0xff] (!%p8690_p3)   ;;  %v6398_v1 = vld [vmem:[#allocation3 + $0x100] ss:$8 sps:$4 sm:$0xff] (!%p8690_p3)   ;;  %v567_v19 = vld [vmem:[%s8649_s0 + $0x18] sm:$0xff] (!%p8690_p3) }
  0x7a   : > { %s6325_s28 = smul.u32 768, %s545_s14  ;;  %s6239_s25 = sshll.u32 %s545_s14, 10  ;;  %1205 = vmatprep.subr.bf16.mxu0 (!%p8690_p3), %v6396_v0  ;;  %v6399_v2 = vld [vmem:[#allocation3 + $0x114] ss:$8 sps:$4 sm:$0xff] (!%p8690_p3)   ;;  %v6401_v3 = vld [vmem:[#allocation3 + $0x110] ss:$8 sps:$4 sm:$0xff] (!%p8690_p3)   ;;  %v669_v21 = vpack.c.bf16 (!%p8690_p3), %v567_v19, %v567_v19 }
  0x7b   : > { %s7501_s6 = scalar_lea.vmem %s8656_s7, %s6239_s25  ;;  %s6240_s30 = sshll.u32 %s545_s14, 6  ;;  %1206 = vmatpush1.bf16.msra.mxu0 (!%p8690_p3), %v6398_v1  ;;  %v6402_v4 = vld [vmem:[#allocation3 + $0x124] ss:$8 sps:$4 sm:$0xff] (!%p8690_p3)   ;;  %v6404_v5 = vld [vmem:[#allocation3 + $0x120] ss:$8 sps:$4 sm:$0xff] (!%p8690_p3)   ;;  %v566_v55 = vld [vmem:[%s8649_s0 + $0x10] sm:$0xff] (!%p8690_p3) }
  0x7c   : > { %s7506_s29 = scalar_lea.vmem %s8654_s5, %s6325_s28  ;;  %s7511_s21 = scalar_lea.vmem %s8658_s9, %s6240_s30  ;;  %1207 = vmatprep.subr.bf16.mxu0 (!%p8690_p3), %v6399_v2  ;;  %v6405_v6 = vld [vmem:[#allocation3 + $0x134] ss:$8 sps:$4 sm:$0xff] (!%p8690_p3)   ;;  %v6407_v7 = vld [vmem:[#allocation3 + $0x130] ss:$8 sps:$4 sm:$0xff] (!%p8690_p3)   ;;  %v6408_v8 = vld [vmem:[#allocation3 + $0x144] ss:$8 sps:$4 sm:$0xff] (!%p8690_p3)   ;;  %1237 = vmatprep.mubr.bf16.mxu0 (!%p8690_p3), %v669_v21  ;;  %v668_v60 = vpack.c.bf16 (!%p8690_p3), %v566_v55, %v566_v55 }
  0x7d   : > { %v6410_v9 = vld [vmem:[#allocation3 + $0x140] ss:$8 sps:$4 sm:$0xff] (!%p8690_p3)   ;;  %v6411_v10 = vld [vmem:[#allocation3 + $0x154] ss:$8 sps:$4 sm:$0xff] (!%p8690_p3)   ;;  %v6413_v11 = vld [vmem:[#allocation3 + $0x150] ss:$8 sps:$4 sm:$0xff] (!%p8690_p3)  }
  0x7e   : > { %v6414_v12 = vld [vmem:[#allocation3 + $0x164] ss:$8 sps:$4 sm:$0xff] (!%p8690_p3)   ;;  %v6443_v14 = vld [vmem:[#allocation3] ss:$8 sps:$4 sm:$0xff] (!%p8690_p3)   ;;  %v6417_v16 = vld [vmem:[#allocation3 + $0x174] ss:$8 sps:$4 sm:$0xff] (!%p8690_p3)  }
  0x7f   : > { %1208 = vmatpush1.bf16.msra.mxu0 (!%p8690_p3), %v6401_v3  ;;  %v6441_v13 = vld [vmem:[#allocation3 + $0x4] ss:$8 sps:$4 sm:$0xff] (!%p8690_p3)   ;;  %v6416_v15 = vld [vmem:[#allocation3 + $0x160] ss:$8 sps:$4 sm:$0xff] (!%p8690_p3)   ;;  %v6447_v17 = vld [vmem:[#allocation3 + $0x14] ss:$8 sps:$4 sm:$0xff] (!%p8690_p3)  }
  0x80   : > { %1209 = vmatprep.subr.bf16.mxu0 %v6402_v4  ;;  %1164 = vmatprep.subr.bf16.mxu1 %v6441_v13  ;;  %v6449_v18 = vld [vmem:[#allocation3 + $0x10] ss:$8 sps:$4 sm:$0xff]   ;;  %v6453_v22 = vld [vmem:[#allocation3 + $0x24] ss:$8 sps:$4 sm:$0xff]   ;;  %v6455_v23 = vld [vmem:[#allocation3 + $0x20] ss:$8 sps:$4 sm:$0xff]  }
  0x81   : > { %1165 = vmatpush1.bf16.msra.mxu1 %v6443_v14  ;;  %v6419_v20 = vld [vmem:[#allocation3 + $0x170] ss:$8 sps:$4 sm:$0xff]   ;;  %v6420_v24 = vld [vmem:[#allocation3 + $0x184] ss:$8 sps:$4 sm:$0xff]   ;;  %v6459_v25 = vld [vmem:[#allocation3 + $0x34] ss:$8 sps:$4 sm:$0xff]  }
  0x82   : > { %1166 = vmatprep.subr.bf16.mxu1 %v6447_v17  ;;  %v6422_v26 = vld [vmem:[#allocation3 + $0x180] ss:$8 sps:$4 sm:$0xff]   ;;  %v6461_v27 = vld [vmem:[#allocation3 + $0x30] ss:$8 sps:$4 sm:$0xff]   ;;  %v6423_v28 = vld [vmem:[#allocation3 + $0x194] ss:$8 sps:$4 sm:$0xff]  }
  0x83   : > { %1210 = vmatpush1.bf16.msra.mxu0 %v6404_v5  ;;  %v6465_v29 = vld [vmem:[#allocation3 + $0x44] ss:$8 sps:$4 sm:$0xff]   ;;  %v6425_v30 = vld [vmem:[#allocation3 + $0x190] ss:$8 sps:$4 sm:$0xff]   ;;  %v6467_v31 = vld [vmem:[#allocation3 + $0x40] ss:$8 sps:$4 sm:$0xff]  }
  0x84   : > { %1211 = vmatprep.subr.bf16.mxu0 %v6405_v6  ;;  %v6426_v32 = vld [vmem:[#allocation3 + $0x1a4] ss:$8 sps:$4 sm:$0xff]   ;;  %v6471_v33 = vld [vmem:[#allocation3 + $0x54] ss:$8 sps:$4 sm:$0xff]   ;;  %v6428_v34 = vld [vmem:[#allocation3 + $0x1a0] ss:$8 sps:$4 sm:$0xff]  }
  0x85   : > { %1167 = vmatpush1.bf16.msra.mxu1 %v6449_v18  ;;  %v6473_v35 = vld [vmem:[#allocation3 + $0x50] ss:$8 sps:$4 sm:$0xff]   ;;  %v6429_v36 = vld [vmem:[#allocation3 + $0x1b4] ss:$8 sps:$4 sm:$0xff]   ;;  %v6477_v37 = vld [vmem:[#allocation3 + $0x64] ss:$8 sps:$4 sm:$0xff]  }
  0x86   : > { %1168 = vmatprep.subr.bf16.mxu1 %v6453_v22  ;;  %v6431_v38 = vld [vmem:[#allocation3 + $0x1b0] ss:$8 sps:$4 sm:$0xff]   ;;  %v6479_v39 = vld [vmem:[#allocation3 + $0x60] ss:$8 sps:$4 sm:$0xff]   ;;  %v6432_v40 = vld [vmem:[#allocation3 + $0x1c4] ss:$8 sps:$4 sm:$0xff]  }
  0x87   : > { %1212 = vmatpush1.bf16.msra.mxu0 %v6407_v7  ;;  %v6483_v41 = vld [vmem:[#allocation3 + $0x74] ss:$8 sps:$4 sm:$0xff]   ;;  %v6434_v42 = vld [vmem:[#allocation3 + $0x1c0] ss:$8 sps:$4 sm:$0xff]   ;;  %v6485_v43 = vld [vmem:[#allocation3 + $0x70] ss:$8 sps:$4 sm:$0xff]  }
  0x88   : > { %1213 = vmatprep.subr.bf16.mxu0 %v6408_v8  ;;  %v6435_v44 = vld [vmem:[#allocation3 + $0x1d4] ss:$8 sps:$4 sm:$0xff]   ;;  %v6489_v45 = vld [vmem:[#allocation3 + $0x84] ss:$8 sps:$4 sm:$0xff]   ;;  %v6437_v46 = vld [vmem:[#allocation3 + $0x1d0] ss:$8 sps:$4 sm:$0xff]  }
  0x89   : > { %1169 = vmatpush1.bf16.msra.mxu1 %v6455_v23  ;;  %v6491_v47 = vld [vmem:[#allocation3 + $0x80] ss:$8 sps:$4 sm:$0xff]   ;;  %v6438_v48 = vld [vmem:[#allocation3 + $0x1e4] ss:$8 sps:$4 sm:$0xff]   ;;  %v6495_v49 = vld [vmem:[#allocation3 + $0x94] ss:$8 sps:$4 sm:$0xff]  }
  0x8a   : > { %1170 = vmatprep.subr.bf16.mxu1 %v6459_v25  ;;  %v6440_v50 = vld [vmem:[#allocation3 + $0x1e0] ss:$8 sps:$4 sm:$0xff]   ;;  %v6497_v51 = vld [vmem:[#allocation3 + $0x90] ss:$8 sps:$4 sm:$0xff]   ;;  %v6444_v52 = vld [vmem:[#allocation3 + $0x1f4] ss:$8 sps:$4 sm:$0xff]  }
  0x8b   : > { %1214 = vmatpush1.bf16.msra.mxu0 %v6410_v9  ;;  %v6501_v53 = vld [vmem:[#allocation3 + $0xa4] ss:$8 sps:$4 sm:$0xff]   ;;  %v6446_v54 = vld [vmem:[#allocation3 + $0x1f0] ss:$8 sps:$4 sm:$0xff]   ;;  %v6503_v56 = vld [vmem:[#allocation3 + $0xa0] ss:$8 sps:$4 sm:$0xff]  }
  0x8c   : > { %1215 = vmatprep.subr.bf16.mxu0 %v6411_v10  ;;  %v6452_v57 = vld [vmem:[#allocation3 + $0x204] ss:$8 sps:$4 sm:$0xff]   ;;  %v6507_v58 = vld [vmem:[#allocation3 + $0xb4] ss:$8 sps:$4 sm:$0xff]   ;;  %v6450_v59 = vld [vmem:[#allocation3 + $0x200] ss:$8 sps:$4 sm:$0xff]  }
  0x8d   : > { %1171 = vmatpush1.bf16.msra.mxu1 %v6461_v27  ;;  %v6458_v61 = vld [vmem:[#allocation3 + $0x214] ss:$8 sps:$4 sm:$0xff]   ;;  %v6509_v62 = vld [vmem:[#allocation3 + $0xb0] ss:$8 sps:$4 sm:$0xff]   ;;  %v565_v63 = vld [vmem:[%s8649_s0 + $0x8] sm:$0xff]  ;;  %vm1304_vm0 = vcmask 1043456  }
  0x8e   : > { %1172 = vmatprep.subr.bf16.mxu1 %v6465_v29  ;;  %v6513_v0 = vld [vmem:[#allocation3 + $0xc4] ss:$8 sps:$4 sm:$0xff]   ;;  %v667_v1 = vpack.c.bf16 %v565_v63, %v565_v63  ;;  %v6456_v4 = vld [vmem:[#allocation3 + $0x210] ss:$8 sps:$4 sm:$0xff]   ;;  %v6515_v5 = vld [vmem:[#allocation3 + $0xc0] ss:$8 sps:$4 sm:$0xff]  }
  0x8f   : > { %1216 = vmatpush1.bf16.msra.mxu0 %v6413_v11  ;;  %v569_v2 = vld [vmem:[%s8649_s0 + $0x28] sm:$0xff]  ;;  %v6519_v7 = vld [vmem:[#allocation3 + $0xd4] ss:$8 sps:$4 sm:$0xff]   ;;  %v6521_v9 = vld [vmem:[#allocation3 + $0xd0] ss:$8 sps:$4 sm:$0xff]   ;;  %vm1300_vm1 = vcmask 64512  }
  0x90   : > { %1217 = vmatprep.subr.bf16.mxu0 %v6414_v12  ;;  %1196 = vmatprep.mubr.bf16.mxu1 %v667_v1  ;;  %v671_v3 = vpack.c.bf16 %v569_v2, %v569_v2  ;;  %v6464_v6 = vld [vmem:[#allocation3 + $0x224] ss:$8 sps:$4 sm:$0xff]   ;;  %v6462_v8 = vld [vmem:[#allocation3 + $0x220] ss:$8 sps:$4 sm:$0xff]   ;;  %v6470_v10 = vld [vmem:[#allocation3 + $0x234] ss:$8 sps:$4 sm:$0xff]  }
  0x91   : > { %1173 = vmatpush1.bf16.msra.mxu1 %v6467_v31  ;;  %v6525_v11 = vld [vmem:[#allocation3 + $0xe4] ss:$8 sps:$4 sm:$0xff]   ;;  %v6468_v12 = vld [vmem:[#allocation3 + $0x230] ss:$8 sps:$4 sm:$0xff]   ;;  %v6527_v13 = vld [vmem:[#allocation3 + $0xe0] ss:$8 sps:$4 sm:$0xff]  }
  0x92   : > { %1174 = vmatprep.subr.bf16.mxu1 %v6471_v33  ;;  %v6476_v14 = vld [vmem:[#allocation3 + $0x244] ss:$8 sps:$4 sm:$0xff]   ;;  %v6533_v17 = vld [vmem:[#allocation3 + $0xf0] ss:$8 sps:$4 sm:$0xff]   ;;  %v6482_v19 = vld [vmem:[#allocation3 + $0x254] ss:$8 sps:$4 sm:$0xff]  }
  0x93   : > { %1218 = vmatpush1.bf16.msra.mxu0 %v6416_v15  ;;  %v6531_v15 = vld [vmem:[#allocation3 + $0xf4] ss:$8 sps:$4 sm:$0xff]   ;;  %v564_v18 = vld [vmem:[%s8649_s0] sm:$0xff]  ;;  %v6480_v21 = vld [vmem:[#allocation3 + $0x250] ss:$8 sps:$4 sm:$0xff]  }
  0x94   : > { %1219 = vmatprep.subr.bf16.mxu0 %v6417_v16  ;;  %v6474_v16 = vld [vmem:[#allocation3 + $0x240] ss:$8 sps:$4 sm:$0xff]   ;;  %v6488_v22 = vld [vmem:[#allocation3 + $0x264] ss:$8 sps:$4 sm:$0xff]   ;;  %v6492_v25 = vld [vmem:[#allocation3 + $0x270] ss:$8 sps:$4 sm:$0xff]  }
  0x95   : > { %1175 = vmatpush1.bf16.msra.mxu1 %v6473_v35  ;;  %v6486_v23 = vld [vmem:[#allocation3 + $0x260] ss:$8 sps:$4 sm:$0xff]   ;;  %v6504_v29 = vld [vmem:[#allocation3 + $0x290] ss:$8 sps:$4 sm:$0xff]  }
  0x96   : > { %1176 = vmatprep.subr.bf16.mxu1 %v6477_v37  ;;  %v6498_v27 = vld [vmem:[#allocation3 + $0x280] ss:$8 sps:$4 sm:$0xff]   ;;  %v6516_v33 = vld [vmem:[#allocation3 + $0x2b0] ss:$8 sps:$4 sm:$0xff]  }
  0x97   : > { %1220 = vmatpush1.bf16.msra.mxu0 %v6419_v20  ;;  %v666_v20 = vpack.c.bf16 %v564_v18, %v564_v18  ;;  %v6510_v31 = vld [vmem:[#allocation3 + $0x2a0] ss:$8 sps:$4 sm:$0xff]   ;;  %v6528_v37 = vld [vmem:[#allocation3 + $0x2d0] ss:$8 sps:$4 sm:$0xff]  }
  0x98   : > { %1221 = vmatprep.subr.bf16.mxu0 %v6420_v24  ;;  %v6494_v24 = vld [vmem:[#allocation3 + $0x274] ss:$8 sps:$4 sm:$0xff]   ;;  %v6522_v35 = vld [vmem:[#allocation3 + $0x2c0] ss:$8 sps:$4 sm:$0xff]  }
  0x99   : > { %1177 = vmatpush1.bf16.msra.mxu1 %v6479_v39  ;;  %v6534_v39 = vld [vmem:[#allocation3 + $0x2e0] ss:$8 sps:$4 sm:$0xff]  }
  0x9a   : > { %1178 = vmatprep.subr.bf16.mxu1 %v6483_v41  ;;  %v6537_v41 = vld [vmem:[#allocation3 + $0x2f0] ss:$8 sps:$4 sm:$0xff]  }
  0x9b   : > { %1222 = vmatpush1.bf16.msra.mxu0 %v6422_v26  ;;  %v6500_v26 = vld [vmem:[#allocation3 + $0x284] ss:$8 sps:$4 sm:$0xff]  }
  0x9c   : > { %1223 = vmatprep.subr.bf16.mxu0 %v6423_v28  ;;  %v6506_v28 = vld [vmem:[#allocation3 + $0x294] ss:$8 sps:$4 sm:$0xff]  }
  0x9d   : > { %1179 = vmatpush1.bf16.msra.mxu1 %v6485_v43 }
  0x9e   : > { %1180 = vmatprep.subr.bf16.mxu1 %v6489_v45 }
  0x9f   : > { %1224 = vmatpush1.bf16.msra.mxu0 %v6425_v30  ;;  %v6512_v30 = vld [vmem:[#allocation3 + $0x2a4] ss:$8 sps:$4 sm:$0xff]  }
  0xa0   : > { %1225 = vmatprep.subr.bf16.mxu0 %v6426_v32  ;;  %v6518_v32 = vld [vmem:[#allocation3 + $0x2b4] ss:$8 sps:$4 sm:$0xff]  }
  0xa1   : > { %1181 = vmatpush1.bf16.msra.mxu1 %v6491_v47 }
  0xa2   : > { %1182 = vmatprep.subr.bf16.mxu1 %v6495_v49  ;;  %v674_v49 = vlaneseq }
  0xa3   : > { %1226 = vmatpush1.bf16.msra.mxu0 %v6428_v34  ;;  %v6524_v34 = vld [vmem:[#allocation3 + $0x2c4] ss:$8 sps:$4 sm:$0xff]  }
  0xa4   : > { %1227 = vmatprep.subr.bf16.mxu0 %v6429_v36  ;;  %v6530_v36 = vld [vmem:[#allocation3 + $0x2d4] ss:$8 sps:$4 sm:$0xff]  }
  0xa5   : > { %1183 = vmatpush1.bf16.msra.mxu1 %v6497_v51 }
  0xa6   : > { %1184 = vmatprep.subr.bf16.mxu1 %v6501_v53 }
  0xa7   : > { %1228 = vmatpush1.bf16.msra.mxu0 %v6431_v38  ;;  %v6536_v38 = vld [vmem:[#allocation3 + $0x2e4] ss:$8 sps:$4 sm:$0xff]  }
  0xa8   : > { %1229 = vmatprep.subr.bf16.mxu0 %v6432_v40  ;;  %v6539_v40 = vld [vmem:[#allocation3 + $0x2f4] ss:$8 sps:$4 sm:$0xff]  }
  0xa9   : > { %1185 = vmatpush1.bf16.msra.mxu1 %v6503_v56 }
  0xaa   : > { %1186 = vmatprep.subr.bf16.mxu1 %v6507_v58 }
  0xab   : > { %1230 = vmatpush1.bf16.msra.mxu0 %v6434_v42  ;;  %v568_v42 = vld [vmem:[%s8649_s0 + $0x20] sm:$0xff] }
  0xac   : > { %1231 = vmatprep.subr.bf16.mxu0 %v6435_v44  ;;  %v670_v43 = vpack.c.bf16 %v568_v42, %v568_v42  ;;  %v7236_v44 = vmov 0  }
  0xad   : > { %1187 = vmatpush1.bf16.msra.mxu1 %v6509_v62 }
  0xae   : > { %1188 = vmatprep.subr.bf16.mxu1 %v6513_v0 }
  0xaf   : > { %1232 = vmatpush1.bf16.msra.mxu0 %v6437_v46 }
  0xb0   : > { %1233 = vmatprep.subr.bf16.mxu0 %v6438_v48 }
  0xb1   : > { %1189 = vmatpush1.bf16.msra.mxu1 %v6515_v5  ;;  %v1292_v5 = vld [vmem:[%s8653_s4 + $0x8] sm:$0xff] }
  0xb2   : > { %1190 = vmatprep.subr.bf16.mxu1 %v6519_v7  ;;  %v1293_v7 = vld [vmem:[%s8653_s4 + $0x10] sm:$0xff] }
  0xb3   : > { %1234 = vmatpush1.bf16.msra.mxu0 %v6440_v50  ;;  %v675_v50 = vshrl.u32 %v674_v49, 7 }
  0xb4   : > { %1235 = vmatprep.subr.bf16.mxu0 %v6444_v52  ;;  %v672_v52 = vld [vmem:[%s8651_s2] sm:$0x3] }
  0xb5   : > { %1191 = vmatpush1.bf16.msra.mxu1 %v6521_v9  ;;  %v676_v51 = vsub.s32 0, %v675_v50  ;;  %v680_v53 = vsub.s32 1, %v675_v50 }
  0xb6   : > { %1192 = vmatprep.subr.bf16.mxu1 %v6525_v11 }
  0xb7   : > { %1236 = vmatpush1.bf16.msra.mxu0 %v6446_v54  ;;  %v677_v54 = vrot.slane %v672_v52, %v676_v51  ;;  %v681_v55 = vrot.slane %v672_v52, %v680_v53 }
  0xb8   : > { %1246 = vmatprep.subr.bf16.mxu0 %v6452_v57 }
  0xb9   : > { %1193 = vmatpush1.bf16.msra.mxu1 %v6527_v13 }
  0xba   : > { %1238 = vmatmul.mubr.bf16.vlgmr.msra.gmra.mrb[0].mxu0 %v668_v60  ;;  %1194 = vmatprep.subr.bf16.mxu1 %v6531_v15 }
  0xbb   : > { %1247 = vmatpush1.bf16.msra.mxu0 %v6450_v59  ;;  %1278 = vmatprep.mubr.bf16.mxu0 %v671_v3  ;;  %v6540_v3 = vld [vmem:[%s8652_s3] sm:$0xff]  }
  0xbc   : > { %1248 = vmatprep.subr.bf16.mxu0 %v6458_v61 }
  0xbd   : > { %1195 = vmatpush1.bf16.msra.mxu1 %v6533_v17 }
  0xbf   : > { %1249 = vmatpush1.bf16.msra.mxu0 %v6456_v4  ;;  %v1291_v4 = vld [vmem:[%s8653_s4] sm:$0xff] }
  0xc0   : > { %1250 = vmatprep.subr.bf16.mxu0 %v6464_v6  ;;  %1197 = vmatmul.mubr.bf16.vlgmr.msra.gmra.mrb[0].mxu1 %v666_v20 }
  0xc1   : > { %1343 = vmatprep.mubr.bf16.mxu1 %v7236_v44 }
  0xc3   : > { %1251 = vmatpush1.bf16.msra.mxu0 %v6462_v8 }
  0xc4   : > { %1252 = vmatprep.subr.bf16.mxu0 %v6470_v10  ;;  %v1294_v10 = vld [vmem:[%s8653_s4 + $0x18] sm:$0xff] }
  0xc7   : > { %1253 = vmatpush1.bf16.msra.mxu0 %v6468_v12 }
  0xc8   : > { %1254 = vmatprep.subr.bf16.mxu0 %v6476_v14 }
  0xcb   : > { %1255 = vmatpush1.bf16.msra.mxu0 %v6474_v16 }
  0xcc   : > { %1256 = vmatprep.subr.bf16.mxu0 %v6482_v19 }
  0xcf   : > { %1257 = vmatpush1.bf16.msra.mxu0 %v6480_v21 }
  0xd0   : > { %1258 = vmatprep.subr.bf16.mxu0 %v6488_v22 }
  0xd3   : > { %1259 = vmatpush1.bf16.msra.mxu0 %v6486_v23 }
  0xd4   : > { %1260 = vmatprep.subr.bf16.mxu0 %v6494_v24 }
  0xd7   : > { %1261 = vmatpush1.bf16.msra.mxu0 %v6492_v25 }
  0xd8   : > { %1262 = vmatprep.subr.bf16.mxu0 %v6500_v26 }
  0xdb   : > { %1263 = vmatpush1.bf16.msra.mxu0 %v6498_v27 }
  0xdc   : > { %1264 = vmatprep.subr.bf16.mxu0 %v6506_v28 }
  0xdf   : > { %1265 = vmatpush1.bf16.msra.mxu0 %v6504_v29 }
  0xe0   : > { %1266 = vmatprep.subr.bf16.mxu0 %v6512_v30 }
  0xe3   : > { %1267 = vmatpush1.bf16.msra.mxu0 %v6510_v31 }
  0xe4   : > { %1268 = vmatprep.subr.bf16.mxu0 %v6518_v32 }
  0xe7   : > { %1269 = vmatpush1.bf16.msra.mxu0 %v6516_v33 }
  0xe8   : > { %1270 = vmatprep.subr.bf16.mxu0 %v6524_v34 }
  0xeb   : > { %1271 = vmatpush1.bf16.msra.mxu0 %v6522_v35 }
  0xec   : > { %1272 = vmatprep.subr.bf16.mxu0 %v6530_v36 }
  0xef   : > { %1273 = vmatpush1.bf16.msra.mxu0 %v6528_v37 }
  0xf0   : > { %1274 = vmatprep.subr.bf16.mxu0 %v6536_v38 }
  0xf3   : > { %1275 = vmatpush1.bf16.msra.mxu0 %v6534_v39 }
  0xf4   : > { %1276 = vmatprep.subr.bf16.mxu0 %v6539_v40 }
  0xf7   : > { %1277 = vmatpush1.bf16.msra.mxu0 %v6537_v41 }
  0xfa   : > { %1279 = vmatmul.mubr.bf16.vlgmr.msra.gmra.mrb[0].mxu0 %v670_v43 }
 0x193   : > { %v1198_v45 = vpop.f32.mrb[0].mxu1 }
 0x194   : > { %v1200_v46 = vpop.f32.mrb[1].mxu1  ;;  %v1199_v56 = vadd.f32 %v1198_v45, %v677_v54 }
 0x195   : > { %v1202_v47 = vpop.f32.mrb[2].mxu1  ;;  %v1201_v57 = vadd.f32 %v1200_v46, %v681_v55 }
 0x196   : > { %v1203_v48 = vpop.f32.mrb[3].mxu1 }
 0x1cd   : > { %v1280_v58 = vpop.f32.mrb[0].mxu0 }
 0x1ce   : > { %v6306_v59 = vadd.f32 %v1280_v58, %v1199_v56  ;;  %v1282_v60 = vpop.f32.mrb[1].mxu0 }
 0x1cf   : > { %v6308_v61 = vadd.f32 %v1282_v60, %v1201_v57  ;;  %v1284_v62 = vpop.f32.mrb[2].mxu0 }
 0x1d0   : > { %v1289_v63 = vpack.c.bf16 %v6306_v59, %v6306_v59  ;;  %v1285_v0 = vpop.f32.mrb[3].mxu0 }
 0x1d1   : > { %v1290_v1 = vpack.c.bf16 %v6308_v61, %v6308_v61 }
 0x1d2   : > { %v1306_v2 = vsel %vm1304_vm0, %v1289_v63, 0 }
 0x1d3   : > { %5808 = vmatprep.subr.msk.bf16.mxu1 %vm1304_vm0, %v1290_v1 }
 0x1d4   : > { %1312 = vmatpush1.bf16.msra.mxu1 %v1306_v2 }
 0x1d7   : > { %5809 = vmatmul.mubr.msk.bf16.vlgmr.msra.gmra.mrb[4].mxu1 %vm1300_vm1, %v6540_v3 }
 0x2aa   : > { %v1345_v6 = vpop.f32.mrb[4].mxu1 }
 0x2ab   : > { %v1346_v8 = vadd.f32 %v1345_v6, %v1291_v4  ;;  %v1347_v9 = vpop.f32.mrb[5].mxu1 }
 0x2ac   : > { %v1348_v11 = vadd.f32 %v1347_v9, %v1292_v5  ;;  %v1349_v12 = vpop.f32.mrb[6].mxu1 }
 0x2ad   : > { %1354 = vst [vmem:[#allocation2] sm:$0xff] %v1346_v8  ;;  %v1350_v13 = vadd.f32 %v1349_v12, %v1293_v7  ;;  %v1351_v14 = vpop.f32.mrb[7].mxu1 }
 0x2ae   : > { %1355 = vst [vmem:[#allocation2 + $0x8] sm:$0xff] %v1348_v11  ;;  %v1352_v15 = vadd.f32 %v1351_v14, %v1294_v10 }
 0x2af   : > { %1356 = vst [vmem:[#allocation2 + $0x10] sm:$0xff] %v1350_v13 }
 0x2b0   : > { %1357 = vst [vmem:[#allocation2 + $0x18] sm:$0xff] %v1352_v15 }
 0x2b1 PF: > { %v6541_v22 = vld [vmem:[%s7506_s29 + $0x4] ss:$24 sps:$4 sm:$0xff]   ;;  %v6543_v23 = vld [vmem:[%s7506_s29] ss:$24 sps:$4 sm:$0xff]   ;;  %v6544_v24 = vld [vmem:[%s7506_s29 + $0x34] ss:$24 sps:$4 sm:$0xff]   ;;  %v1787_v9 = vlaneseq }
 0x2b2   : > { %2317 = vmatprep.subr.bf16.mxu0 %v6541_v22  ;;  %v6546_v25 = vld [vmem:[%s7506_s29 + $0x30] ss:$24 sps:$4 sm:$0xff]   ;;  %v6547_v26 = vld [vmem:[%s7506_s29 + $0x64] ss:$24 sps:$4 sm:$0xff]   ;;  %v6549_v27 = vld [vmem:[%s7506_s29 + $0x60] ss:$24 sps:$4 sm:$0xff]  }
 0x2b3   : > { %2318 = vmatpush1.bf16.msra.mxu0 %v6543_v23  ;;  %v6550_v28 = vld [vmem:[%s7506_s29 + $0x94] ss:$24 sps:$4 sm:$0xff]   ;;  %v6552_v29 = vld [vmem:[%s7506_s29 + $0x90] ss:$24 sps:$4 sm:$0xff]   ;;  %v6553_v30 = vld [vmem:[%s7506_s29 + $0xc4] ss:$24 sps:$4 sm:$0xff]  }
 0x2b4   : > { %v1358_v16 = vld [vmem:[#allocation2] sm:$0xff]  ;;  %2319 = vmatprep.subr.bf16.mxu0 %v6544_v24  ;;  %v6556_v32 = vld [vmem:[%s7506_s29 + $0xf4] ss:$24 sps:$4 sm:$0xff]   ;;  %v6558_v33 = vld [vmem:[%s7506_s29 + $0xf0] ss:$24 sps:$4 sm:$0xff]   ;;  %v7587_v12 = vshrl.u32 %v1787_v9, 7 }
 0x2b5   : > { %v1359_v17 = vld [vmem:[#allocation2 + $0x8] sm:$0xff]  ;;  %v6555_v31 = vld [vmem:[%s7506_s29 + $0xc0] ss:$24 sps:$4 sm:$0xff]   ;;  %v6559_v34 = vld [vmem:[%s7506_s29 + $0x124] ss:$24 sps:$4 sm:$0xff]   ;;  %vm7238_vm2 = vmmov 0  }
 0x2b6   : > { %v1360_v18 = vld [vmem:[#allocation2 + $0x10] sm:$0xff]  ;;  %v1754_v19 = vadd.f32 %v1359_v17, %v1358_v16  ;;  %v6561_v35 = vld [vmem:[%s7506_s29 + $0x120] ss:$24 sps:$4 sm:$0xff]   ;;  %v6565_v38 = vld [vmem:[%s7506_s29 + $0x184] ss:$24 sps:$4 sm:$0xff]   ;;  %v1789_v13 = vsub.s32 4, %v7587_v12 }
 0x2b7   : > { %v1361_v20 = vld [vmem:[#allocation2 + $0x18] sm:$0xff]  ;;  %2320 = vmatpush1.bf16.msra.mxu0 %v6546_v25  ;;  %v6562_v36 = vld [vmem:[%s7506_s29 + $0x154] ss:$24 sps:$4 sm:$0xff]   ;;  %v6564_v37 = vld [vmem:[%s7506_s29 + $0x150] ss:$24 sps:$4 sm:$0xff]   ;;  %vm2511_vm3 = vcmask 1043456  }
 0x2b8   : > { %1755 = vadd.xlane.f32.xlu0 %v1754_v19  ;;  %v1757_v21 = vadd.f32 %v1361_v20, %v1360_v18  ;;  %2321 = vmatprep.subr.bf16.mxu0 %v6547_v26  ;;  %v6567_v39 = vld [vmem:[%s7506_s29 + $0x180] ss:$24 sps:$4 sm:$0xff]   ;;  %v6568_v40 = vld [vmem:[%s7506_s29 + $0x1b4] ss:$24 sps:$4 sm:$0xff]   ;;  %v6570_v55 = vld [vmem:[%s7506_s29 + $0x1b0] ss:$24 sps:$4 sm:$0xff]  }
 0x2b9   : > { %v6571_v56 = vld [vmem:[%s7506_s29 + $0x1e4] ss:$24 sps:$4 sm:$0xff]   ;;  %v6573_v57 = vld [vmem:[%s7506_s29 + $0x1e0] ss:$24 sps:$4 sm:$0xff]   ;;  %v6574_v58 = vld [vmem:[%s7506_s29 + $0x214] ss:$24 sps:$4 sm:$0xff]  }
 0x2ba   : > { %v6576_v59 = vld [vmem:[%s7506_s29 + $0x210] ss:$24 sps:$4 sm:$0xff]   ;;  %v6577_v60 = vld [vmem:[%s7506_s29 + $0x244] ss:$24 sps:$4 sm:$0xff]   ;;  %v6579_v61 = vld [vmem:[%s7506_s29 + $0x240] ss:$24 sps:$4 sm:$0xff]  }
 0x2bb   : > { %2322 = vmatpush1.bf16.msra.mxu0 %v6549_v27  ;;  %v6580_v62 = vld [vmem:[%s7506_s29 + $0x274] ss:$24 sps:$4 sm:$0xff]   ;;  %v6582_v63 = vld [vmem:[%s7506_s29 + $0x270] ss:$24 sps:$4 sm:$0xff]   ;;  %v6583_v0 = vld [vmem:[%s7506_s29 + $0x2a4] ss:$24 sps:$4 sm:$0xff]  }
 0x2bc   : > { %1758 = vadd.xlane.f32.xlu0 %v1757_v21  ;;  %2323 = vmatprep.subr.bf16.mxu0 %v6550_v28  ;;  %v6585_v1 = vld [vmem:[%s7506_s29 + $0x2a0] ss:$24 sps:$4 sm:$0xff]   ;;  %v6586_v2 = vld [vmem:[%s7506_s29 + $0x2d4] ss:$24 sps:$4 sm:$0xff]   ;;  %v6588_v3 = vld [vmem:[%s7506_s29 + $0x2d0] ss:$24 sps:$4 sm:$0xff]  }
 0x2bd   : > { %v6591_v4 = vld [vmem:[%s7506_s29 + $0xc] ss:$24 sps:$4 sm:$0xff]   ;;  %vm2495_vm5 = vcmask 64512   ;;  %p6198_p11 = scmp.ne.s32.totalorder %s7395_s16, 1 }
 0x2be   : > { %v7591_v14 = vld [vmem:[%s7511_s21 + $0x8] sm:$0xff]  ;;  %v7594_v15 = vld [vmem:[%s7511_s21] sm:$0xff] }
 0x2bf   : > { %2324 = vmatpush1.bf16.msra.mxu0 %v6552_v29  ;;  %v1794_v19 = vrot.slane %v7591_v14, %v1789_v13  ;;  %v1790_v21 = vrot.slane %v7594_v15, %v1789_v13  ;;  %v6646_v13 = vld [vmem:[%s7506_s29 + $0xa0] ss:$24 sps:$4 sm:$0xff]  }
 0x2c0   : > { %2325 = vmatprep.subr.bf16.mxu0 %v6553_v30 }
 0x2c3   : > { %2326 = vmatpush1.bf16.msra.mxu0 %v6555_v31 }
 0x2c4   : > { %2327 = vmatprep.subr.bf16.mxu0 %v6556_v32 }
 0x2c7   : > { %2328 = vmatpush1.bf16.msra.mxu0 %v6558_v33 }
 0x2c8   : > { %2329 = vmatprep.subr.bf16.mxu0 %v6559_v34 }
 0x2cb   : > { %2330 = vmatpush1.bf16.msra.mxu0 %v6561_v35 }
 0x2cc   : > { %2331 = vmatprep.subr.bf16.mxu0 %v6562_v36  ;;  %v6589_v36 = vld [vmem:[%s7506_s29 + $0x8] ss:$24 sps:$4 sm:$0xff]  }
 0x2cf   : > { %2332 = vmatpush1.bf16.msra.mxu0 %v6564_v37 }
 0x2d0   : > { %2333 = vmatprep.subr.bf16.mxu0 %v6565_v38  ;;  %v6594_v38 = vld [vmem:[%s7506_s29 + $0x3c] ss:$24 sps:$4 sm:$0xff]  }
 0x2d3   : > { %2334 = vmatpush1.bf16.msra.mxu0 %v6567_v39  ;;  %v6592_v39 = vld [vmem:[%s7506_s29 + $0x38] ss:$24 sps:$4 sm:$0xff]  }
 0x2d4   : > { %2335 = vmatprep.subr.bf16.mxu0 %v6568_v40  ;;  %v6597_v40 = vld [vmem:[%s7506_s29 + $0x6c] ss:$24 sps:$4 sm:$0xff]  }
 0x2d7   : > { %2336 = vmatpush1.bf16.msra.mxu0 %v6570_v55  ;;  %v6616_v55 = vld [vmem:[%s7506_s29 + $0x1b8] ss:$24 sps:$4 sm:$0xff]  }
 0x2d8   : > { %2337 = vmatprep.subr.bf16.mxu0 %v6571_v56  ;;  %v6621_v56 = vld [vmem:[%s7506_s29 + $0x1ec] ss:$24 sps:$4 sm:$0xff]  }
 0x2db   : > { %2338 = vmatpush1.bf16.msra.mxu0 %v6573_v57  ;;  %v6619_v57 = vld [vmem:[%s7506_s29 + $0x1e8] ss:$24 sps:$4 sm:$0xff]  }
 0x2dc   : > { %2339 = vmatprep.subr.bf16.mxu0 %v6574_v58  ;;  %v6624_v58 = vld [vmem:[%s7506_s29 + $0x21c] ss:$24 sps:$4 sm:$0xff]  }
 0x2df   : > { %2340 = vmatpush1.bf16.msra.mxu0 %v6576_v59  ;;  %v6622_v59 = vld [vmem:[%s7506_s29 + $0x218] ss:$24 sps:$4 sm:$0xff]  }
 0x2e0   : > { %2341 = vmatprep.subr.bf16.mxu0 %v6577_v60  ;;  %v6627_v60 = vld [vmem:[%s7506_s29 + $0x24c] ss:$24 sps:$4 sm:$0xff]  }
 0x2e3   : > { %2342 = vmatpush1.bf16.msra.mxu0 %v6579_v61  ;;  %v6625_v61 = vld [vmem:[%s7506_s29 + $0x248] ss:$24 sps:$4 sm:$0xff]  }
 0x2e4   : > { %2343 = vmatprep.subr.bf16.mxu0 %v6580_v62  ;;  %v6630_v62 = vld [vmem:[%s7506_s29 + $0x27c] ss:$24 sps:$4 sm:$0xff]  }
 0x2e7   : > { %2344 = vmatpush1.bf16.msra.mxu0 %v6582_v63  ;;  %v6628_v63 = vld [vmem:[%s7506_s29 + $0x278] ss:$24 sps:$4 sm:$0xff]  }
 0x2e8   : > { %2345 = vmatprep.subr.bf16.mxu0 %v6583_v0  ;;  %v6633_v0 = vld [vmem:[%s7506_s29 + $0x2ac] ss:$24 sps:$4 sm:$0xff]  }
 0x2eb   : > { %2346 = vmatpush1.bf16.msra.mxu0 %v6585_v1  ;;  %v6631_v1 = vld [vmem:[%s7506_s29 + $0x2a8] ss:$24 sps:$4 sm:$0xff]  }
 0x2ec   : > { %2347 = vmatprep.subr.bf16.mxu0 %v6586_v2  ;;  %v6636_v2 = vld [vmem:[%s7506_s29 + $0x2dc] ss:$24 sps:$4 sm:$0xff]  }
 0x2ef   : > { %2348 = vmatpush1.bf16.msra.mxu0 %v6588_v3  ;;  %v6634_v3 = vld [vmem:[%s7506_s29 + $0x2d8] ss:$24 sps:$4 sm:$0xff]  }
 0x2f0   : > { %2360 = vmatprep.subr.bf16.mxu0 %v6591_v4  ;;  %v6639_v4 = vld [vmem:[%s7506_s29 + $0x14] ss:$24 sps:$4 sm:$0xff]  }
 0x345   : > { %v1756_v41 = vpop.xlane.xlu0 %1755 }
 0x346   : > { %v1761_v42 = vmul.f32 0.00390625, %v1756_v41  ;;  %v6595_v41 = vld [vmem:[%s7506_s29 + $0x68] ss:$24 sps:$4 sm:$0xff]  }
 0x348   : > { %v1763_v43 = vsub.f32 %v1358_v16, %v1761_v42  ;;  %v1764_v44 = vsub.f32 %v1359_v17, %v1761_v42  ;;  %v1801_v17 = vsub.s32 5, %v7587_v12  ;;  %v6600_v42 = vld [vmem:[%s7506_s29 + $0x9c] ss:$24 sps:$4 sm:$0xff]  }
 0x349   : > { %v1759_v45 = vpop.xlane.xlu0 %1758 }
 0x34a   : > { %v1762_v46 = vmul.f32 0.00390625, %v1759_v45  ;;  %v1767_v47 = vmul.f32 %v1763_v43, %v1763_v43  ;;  %v1768_v48 = vmul.f32 %v1764_v44, %v1764_v44  ;;  %v1806_v23 = vrot.slane %v7591_v14, %v1801_v17  ;;  %v6601_v45 = vld [vmem:[%s7506_s29 + $0xc8] ss:$24 sps:$4 sm:$0xff]  }
 0x34b   : > { %v1802_v24 = vrot.slane %v7594_v15, %v1801_v17  ;;  %v6649_v17 = vld [vmem:[%s7506_s29 + $0xd0] ss:$24 sps:$4 sm:$0xff]  }
 0x34c   : > { %v1765_v49 = vsub.f32 %v1360_v18, %v1762_v46  ;;  %v1766_v50 = vsub.f32 %v1361_v20, %v1762_v46  ;;  %v1771_v51 = vadd.f32 %v1768_v48, %v1767_v47  ;;  %v6606_v46 = vld [vmem:[%s7506_s29 + $0xfc] ss:$24 sps:$4 sm:$0xff]   ;;  %v6604_v47 = vld [vmem:[%s7506_s29 + $0xf8] ss:$24 sps:$4 sm:$0xff]   ;;  %v6609_v48 = vld [vmem:[%s7506_s29 + $0x12c] ss:$24 sps:$4 sm:$0xff]  }
 0x34e   : > { %1772 = vadd.xlane.f32.xlu1 %v1771_v51  ;;  %v1769_v52 = vmul.f32 %v1765_v49, %v1765_v49  ;;  %v1770_v53 = vmul.f32 %v1766_v50, %v1766_v50  ;;  %v6610_v51 = vld [vmem:[%s7506_s29 + $0x158] ss:$24 sps:$4 sm:$0xff]  }
 0x350   : > { %v1774_v54 = vadd.f32 %v1770_v53, %v1769_v52  ;;  %v6615_v52 = vld [vmem:[%s7506_s29 + $0x18c] ss:$24 sps:$4 sm:$0xff]   ;;  %v6613_v53 = vld [vmem:[%s7506_s29 + $0x188] ss:$24 sps:$4 sm:$0xff]  }
 0x352   : > { %1775 = vadd.xlane.f32.xlu1 %v1774_v54  ;;  %v6618_v54 = vld [vmem:[%s7506_s29 + $0x1bc] ss:$24 sps:$4 sm:$0xff]  }
 0x3db   : > { %v1773_v5 = vpop.xlane.xlu1 %1772 }
 0x3dc   : > { %v1777_v6 = vmul.f32 0.00390625, %v1773_v5  ;;  %v6637_v5 = vld [vmem:[%s7506_s29 + $0x10] ss:$24 sps:$4 sm:$0xff]  }
 0x3de   : > { %v1779_v7 = vadd.f32 1e-05, %v1777_v6  ;;  %v6642_v6 = vld [vmem:[%s7506_s29 + $0x44] ss:$24 sps:$4 sm:$0xff]  }
 0x3df   : > { %v1776_v8 = vpop.xlane.xlu1 %1775 }
 0x3e0   : > { %6925 = vrsqrt.f32 %v1779_v7  ;;  %v1778_v10 = vmul.f32 0.00390625, %v1776_v8  ;;  %v6640_v7 = vld [vmem:[%s7506_s29 + $0x40] ss:$24 sps:$4 sm:$0xff]   ;;  %v6645_v8 = vld [vmem:[%s7506_s29 + $0x74] ss:$24 sps:$4 sm:$0xff]  }
 0x3e2   : > { %v1780_v11 = vadd.f32 1e-05, %v1778_v10  ;;  %v6643_v10 = vld [vmem:[%s7506_s29 + $0x70] ss:$24 sps:$4 sm:$0xff]  }
 0x3e4   : > { %6927 = vrsqrt.f32 %v1780_v11  ;;  %v6648_v11 = vld [vmem:[%s7506_s29 + $0xa4] ss:$24 sps:$4 sm:$0xff]  }
 0x3ea   : > { %v6926_v16 = vpop.eup %6925 }
 0x3eb   : > { %v1784_v18 = vmul.f32 %v6926_v16, %v1764_v44  ;;  %v1783_v20 = vmul.f32 %v6926_v16, %v1763_v43  ;;  %v6598_v43 = vld [vmem:[%s7506_s29 + $0x98] ss:$24 sps:$4 sm:$0xff]   ;;  %v6603_v44 = vld [vmem:[%s7506_s29 + $0xcc] ss:$24 sps:$4 sm:$0xff]  }
 0x3ec   : > { %v6651_v16 = vld [vmem:[%s7506_s29 + $0xd4] ss:$24 sps:$4 sm:$0xff]  }
 0x3ed   : > { %v1796_v26 = vmul.f32 %v1794_v19, %v1784_v18  ;;  %v1795_v28 = vmul.f32 %v1790_v21, %v1783_v20  ;;  %v6654_v18 = vld [vmem:[%s7506_s29 + $0x104] ss:$24 sps:$4 sm:$0xff]   ;;  %v6657_v20 = vld [vmem:[%s7506_s29 + $0x134] ss:$24 sps:$4 sm:$0xff]  }
 0x3ee   : > { %v6928_v22 = vpop.eup %6927 }
 0x3ef   : > { %v1786_v25 = vmul.f32 %v6928_v22, %v1766_v50  ;;  %v1785_v27 = vmul.f32 %v6928_v22, %v1765_v49  ;;  %v1808_v31 = vadd.f32 %v1806_v23, %v1796_v26  ;;  %v1807_v33 = vadd.f32 %v1802_v24, %v1795_v28  ;;  %v6607_v49 = vld [vmem:[%s7506_s29 + $0x128] ss:$24 sps:$4 sm:$0xff]   ;;  %v6612_v50 = vld [vmem:[%s7506_s29 + $0x15c] ss:$24 sps:$4 sm:$0xff]  }
 0x3f0   : > { %v6660_v22 = vld [vmem:[%s7506_s29 + $0x164] ss:$24 sps:$4 sm:$0xff]   ;;  %v6669_v28 = vld [vmem:[%s7506_s29 + $0x1f4] ss:$24 sps:$4 sm:$0xff]  }
 0x3f1   : > { %v1798_v29 = vmul.f32 %v1794_v19, %v1786_v25  ;;  %v1797_v30 = vmul.f32 %v1790_v21, %v1785_v27  ;;  %v6652_v19 = vld [vmem:[%s7506_s29 + $0x100] ss:$24 sps:$4 sm:$0xff]   ;;  %v6655_v21 = vld [vmem:[%s7506_s29 + $0x130] ss:$24 sps:$4 sm:$0xff]   ;;  %v6666_v26 = vld [vmem:[%s7506_s29 + $0x1c4] ss:$24 sps:$4 sm:$0xff]  }
 0x3f2   : > { %v6661_v25 = vld [vmem:[%s7506_s29 + $0x190] ss:$24 sps:$4 sm:$0xff]   ;;  %v6664_v27 = vld [vmem:[%s7506_s29 + $0x1c0] ss:$24 sps:$4 sm:$0xff]  }
 0x3f3   : > { %v1810_v32 = vadd.f32 %v1806_v23, %v1798_v29  ;;  %v1809_v34 = vadd.f32 %v1802_v24, %v1797_v30  ;;  %v6658_v23 = vld [vmem:[%s7506_s29 + $0x160] ss:$24 sps:$4 sm:$0xff]   ;;  %v6663_v24 = vld [vmem:[%s7506_s29 + $0x194] ss:$24 sps:$4 sm:$0xff]   ;;  %v6667_v29 = vld [vmem:[%s7506_s29 + $0x1f0] ss:$24 sps:$4 sm:$0xff]  }
 0x3f4   : > { %v6672_v30 = vld [vmem:[%s7506_s29 + $0x224] ss:$24 sps:$4 sm:$0xff]  }
 0x3f5   : > { %v7601_v35 = vpack.c.bf16 %v1810_v32, %v1808_v31  ;;  %v7604_v37 = vpack.c.bf16 %v1809_v34, %v1807_v33  ;;  %v6670_v31 = vld [vmem:[%s7506_s29 + $0x220] ss:$24 sps:$4 sm:$0xff]   ;;  %v6675_v32 = vld [vmem:[%s7506_s29 + $0x254] ss:$24 sps:$4 sm:$0xff]   ;;  %v6673_v33 = vld [vmem:[%s7506_s29 + $0x250] ss:$24 sps:$4 sm:$0xff]  }
 0x3f6   : > { %v6678_v34 = vld [vmem:[%s7506_s29 + $0x284] ss:$24 sps:$4 sm:$0xff]  }
 0x3f7   : > { %2349 = vmatprep.mubr.bf16.mxu0 %v7601_v35 }
 0x3f8   : > { %2350 = vmatmul.mubr.bf16.vlgmr.msra.gmra.mrb[0].mxu0 %v7604_v37 }
 0x3f9   : > { %2361 = vmatpush1.bf16.msra.mxu0 %v6589_v36  ;;  %2392 = vmatprep.mubr.bf16.mxu0 %v7601_v35  ;;  %v6681_v36 = vld [vmem:[%s7506_s29 + $0x2b4] ss:$24 sps:$4 sm:$0xff]  }
 0x3fa   : > { %2362 = vmatprep.subr.bf16.mxu0 %v6594_v38  ;;  %v6679_v38 = vld [vmem:[%s7506_s29 + $0x2b0] ss:$24 sps:$4 sm:$0xff]  }
 0x3fd   : > { %2363 = vmatpush1.bf16.msra.mxu0 %v6592_v39  ;;  %v6684_v39 = vld [vmem:[%s7506_s29 + $0x2e4] ss:$24 sps:$4 sm:$0xff]  }
 0x3fe   : > { %2364 = vmatprep.subr.bf16.mxu0 %v6597_v40  ;;  %v6682_v40 = vld [vmem:[%s7506_s29 + $0x2e0] ss:$24 sps:$4 sm:$0xff]  }
 0x401   : > { %2365 = vmatpush1.bf16.msra.mxu0 %v6595_v41  ;;  %v7237_v41 = vmov 0.0  }
 0x402   : > { %2366 = vmatprep.subr.bf16.mxu0 %v6600_v42  ;;  %6281 = vmatprep.subr.bf16.mxu1 %v7237_v41 }
 0x403   : > { %6283 = vmatprep.mubr.msk.bf16.mxu1 %vm7238_vm2, %v7237_v41 }
 0x405   : > { %2367 = vmatpush1.bf16.msra.mxu0 %v6598_v43 }
 0x406   : > { %2368 = vmatprep.subr.bf16.mxu0 %v6603_v44 }
 0x409   : > { %2369 = vmatpush1.bf16.msra.mxu0 %v6601_v45 }
 0x40a   : > { %2370 = vmatprep.subr.bf16.mxu0 %v6606_v46  ;;  %v1748_v46 = vld [vmem:[%s7511_s21 + $0x10] sm:$0xff] }
 0x40d   : > { %2371 = vmatpush1.bf16.msra.mxu0 %v6604_v47 }
 0x40e   : > { %2372 = vmatprep.subr.bf16.mxu0 %v6609_v48 }
 0x411   : > { %2373 = vmatpush1.bf16.msra.mxu0 %v6607_v49 }
 0x412   : > { %2374 = vmatprep.subr.bf16.mxu0 %v6612_v50 }
 0x415   : > { %2375 = vmatpush1.bf16.msra.mxu0 %v6610_v51 }
 0x416   : > { %2376 = vmatprep.subr.bf16.mxu0 %v6615_v52 }
 0x419   : > { %2377 = vmatpush1.bf16.msra.mxu0 %v6613_v53 }
 0x41a   : > { %2378 = vmatprep.subr.bf16.mxu0 %v6618_v54 }
 0x41d   : > { %2379 = vmatpush1.bf16.msra.mxu0 %v6616_v55 }
 0x41e   : > { %2380 = vmatprep.subr.bf16.mxu0 %v6621_v56 }
 0x421   : > { %2381 = vmatpush1.bf16.msra.mxu0 %v6619_v57 }
 0x422   : > { %2382 = vmatprep.subr.bf16.mxu0 %v6624_v58 }
 0x425   : > { %2383 = vmatpush1.bf16.msra.mxu0 %v6622_v59 }
 0x426   : > { %2384 = vmatprep.subr.bf16.mxu0 %v6627_v60 }
 0x429   : > { %2385 = vmatpush1.bf16.msra.mxu0 %v6625_v61  ;;  %v1750_v61 = vld [vmem:[%s7511_s21 + $0x20] sm:$0xff] }
 0x42a   : > { %2386 = vmatprep.subr.bf16.mxu0 %v6630_v62  ;;  %v1751_v62 = vld [vmem:[%s7511_s21 + $0x28] sm:$0xff] }
 0x42d   : > { %2387 = vmatpush1.bf16.msra.mxu0 %v6628_v63 }
 0x42e   : > { %2388 = vmatprep.subr.bf16.mxu0 %v6633_v0 }
 0x431   : > { %2389 = vmatpush1.bf16.msra.mxu0 %v6631_v1 }
 0x432   : > { %2390 = vmatprep.subr.bf16.mxu0 %v6636_v2 }
 0x435   : > { %2391 = vmatpush1.bf16.msra.mxu0 %v6634_v3 }
 0x436   : > { %2403 = vmatprep.subr.bf16.mxu0 %v6639_v4 }
 0x438   : > { %2393 = vmatmul.mubr.bf16.vlgmr.msra.gmra.mrb[4].mxu0 %v7604_v37 }
 0x439   : > { %2404 = vmatpush1.bf16.msra.mxu0 %v6637_v5  ;;  %2435 = vmatprep.mubr.bf16.mxu0 %v7601_v35  ;;  %v6676_v35 = vld [vmem:[%s7506_s29 + $0x280] ss:$24 sps:$4 sm:$0xff]  }
 0x43a   : > { %2405 = vmatprep.subr.bf16.mxu0 %v6642_v6 }
 0x43d   : > { %2406 = vmatpush1.bf16.msra.mxu0 %v6640_v7 }
 0x43e   : > { %2407 = vmatprep.subr.bf16.mxu0 %v6645_v8 }
 0x441   : > { %2408 = vmatpush1.bf16.msra.mxu0 %v6643_v10 }
 0x442   : > { %2409 = vmatprep.subr.bf16.mxu0 %v6648_v11 }
 0x445   : > { %2410 = vmatpush1.bf16.msra.mxu0 %v6646_v13 }
 0x446   : > { %2411 = vmatprep.subr.bf16.mxu0 %v6651_v16 }
 0x449   : > { %2412 = vmatpush1.bf16.msra.mxu0 %v6649_v17 }
 0x44a   : > { %2413 = vmatprep.subr.bf16.mxu0 %v6654_v18 }
 0x44d   : > { %2414 = vmatpush1.bf16.msra.mxu0 %v6652_v19 }
 0x44e   : > { %2415 = vmatprep.subr.bf16.mxu0 %v6657_v20 }
 0x451   : > { %2416 = vmatpush1.bf16.msra.mxu0 %v6655_v21  ;;  %v2447_v21 = vand.u32 127, %v1787_v9 }
 0x452   : > { %2417 = vmatprep.subr.bf16.mxu0 %v6660_v22 }
 0x453   : > { %vm2448_vm4 = vcmp.lt.s32.totalorder %v2447_v21, 5 }
 0x455   : > { %2418 = vmatpush1.bf16.msra.mxu0 %v6658_v23  ;;  %v7239_v23 = vmov -1e+30  }
 0x456   : > { %2419 = vmatprep.subr.bf16.mxu0 %v6663_v24  ;;  %v7712_v24 = vsel %vm2448_vm4, 0.0, %v7239_v23 }
 0x459   : > { %2420 = vmatpush1.bf16.msra.mxu0 %v6661_v25 }
 0x45a   : > { %2421 = vmatprep.subr.bf16.mxu0 %v6666_v26 }
 0x45d   : > { %2422 = vmatpush1.bf16.msra.mxu0 %v6664_v27 }
 0x45e   : > { %2423 = vmatprep.subr.bf16.mxu0 %v6669_v28 }
 0x461   : > { %2424 = vmatpush1.bf16.msra.mxu0 %v6667_v29 }
 0x462   : > { %2425 = vmatprep.subr.bf16.mxu0 %v6672_v30 }
 0x465   : > { %2426 = vmatpush1.bf16.msra.mxu0 %v6670_v31 }
 0x466   : > { %2427 = vmatprep.subr.bf16.mxu0 %v6675_v32 }
 0x469   : > { %2428 = vmatpush1.bf16.msra.mxu0 %v6673_v33 }
 0x46a   : > { %2429 = vmatprep.subr.bf16.mxu0 %v6678_v34 }
 0x46d   : > { %2430 = vmatpush1.bf16.msra.mxu0 %v6676_v35 }
 0x46e   : > { %2431 = vmatprep.subr.bf16.mxu0 %v6681_v36 }
 0x471   : > { %2432 = vmatpush1.bf16.msra.mxu0 %v6679_v38 }
 0x472   : > { %2433 = vmatprep.subr.bf16.mxu0 %v6684_v39 }
 0x475   : > { %2434 = vmatpush1.bf16.msra.mxu0 %v6682_v40 }
 0x476   : > { %6257 = vmatprep.subr.bf16.mxu0 %v7237_v41 }
 0x478   : > { %2436 = vmatmul.mubr.bf16.vlgmr.msra.gmra.mrb[8].mxu0 %v7604_v37  ;;  %v7686_v37 = vsub.s32 0, %v7587_v12 }
 0x479   : > { %6259 = vmatprep.mubr.msk.bf16.mxu0 %vm7238_vm2, %v7237_v41 }
 0x47a   : > { %v1824_v47 = vrot.slane %v1748_v46, %v7686_v37  ;;  %v1816_v51 = vrot.slane %v7594_v15, %v7686_v37  ;;  %v1832_v63 = vrot.slane %v1750_v61, %v7686_v37  ;;  %v1836_v0 = vrot.slane %v1751_v62, %v7686_v37 }
 0x47b   : > { %v1820_v62 = vrot.slane %v7591_v14, %v7686_v37 }
 0x4cb   : > { %v2351_v42 = vpop.f32.mrb[0].mxu0 }
 0x4cc   : > { %v7680_v43 = vpop.f32.mrb[1].mxu0  ;;  %v2352_v57 = vadd.f32 %v2351_v42, %v1816_v51 }
 0x4cd   : > { %v2355_v44 = vpop.f32.mrb[2].mxu0 }
 0x4ce   : > { %v7682_v45 = vpop.f32.mrb[3].mxu0  ;;  %v2356_v58 = vadd.f32 %v2355_v44, %v1816_v51  ;;  %v2450_v59 = vpack.c.bf16 %v2352_v57, %v2352_v57 }
 0x4d0   : > { %v2658_v60 = vpack.c.bf16 %v2356_v58, %v2356_v58 }
 0x50b   : > { %v2394_v48 = vpop.f32.mrb[4].mxu0 }
 0x50c   : > { %v2395_v49 = vadd.f32 %v2394_v48, %v1824_v47  ;;  %v7689_v50 = vpop.f32.mrb[5].mxu0 }
 0x50d   : > { %v2398_v52 = vpop.f32.mrb[6].mxu0 }
 0x50e   : > { %v2451_v53 = vpack.c.bf16 %v2395_v49, %v2395_v49  ;;  %v2399_v54 = vadd.f32 %v2398_v52, %v1824_v47  ;;  %v7693_v55 = vpop.f32.mrb[7].mxu0 }
 0x510   : > { %v2659_v56 = vpack.c.bf16 %v2399_v54, %v2399_v54  ;;  %6258 = vmatpush3.bf16.xpose.msra.mxu0 %v2451_v53  ;;  %v1749_v54 = vld [vmem:[%s7511_s21 + $0x18] sm:$0xff] }
 0x511   : > { %6263 = vmatprep.subr.bf16.mxu0 %v7237_v41 }
 0x512   : > { %6282 = vmatpush3.bf16.xpose.msra.mxu1 %v2659_v56  ;;  %v1828_v56 = vrot.slane %v1749_v54, %v7686_v37 }
 0x513   : > { %6287 = vmatprep.subr.bf16.mxu1 %v7237_v41 }
 0x514   : > { %v2397_v58 = vadd.f32 %v7689_v50, %v1828_v56  ;;  %v2401_v61 = vadd.f32 %v7693_v55, %v1828_v56  ;;  %v2354_v50 = vadd.f32 %v7680_v43, %v1820_v62  ;;  %v2358_v55 = vadd.f32 %v7682_v45, %v1820_v62  ;;  %v6688_v56 = vld [vmem:[%s7490_s27 + $0x10] ss:$8 sps:$4 sm:$0xff]   ;;  %v6697_v62 = vld [vmem:[%s7490_s27 + $0x40] ss:$8 sps:$4 sm:$0xff]  }
 0x517   : > { %6260 = vmatmul.mubr.bf16.vlgmr.msra.gmra.mrb[12].mxu0 %v2450_v59 }
 0x518   : > { %6265 = vmatprep.mubr.msk.bf16.mxu0 %vm7238_vm2, %v7237_v41 }
 0x519   : > { %6284 = vmatmul.mubr.bf16.vlgmr.msra.gmra.mrb[0].mxu1 %v2658_v60 }
 0x51a   : > { %6289 = vmatprep.mubr.msk.bf16.mxu1 %vm7238_vm2, %v7237_v41 }
 0x54b   : > { %v2437_v1 = vpop.f32.mrb[8].mxu0 }
 0x54c   : > { %v2438_v2 = vadd.f32 %v2437_v1, %v1832_v63  ;;  %v2439_v3 = vpop.f32.mrb[9].mxu0  ;;  %v2556_v1 = vpack.c.bf16 %v2397_v58, %v2397_v58  ;;  %v6691_v58 = vld [vmem:[%s7490_s27 + $0x20] ss:$8 sps:$4 sm:$0xff]  }
 0x54d   : > { %v2440_v4 = vadd.f32 %v2439_v3, %v1836_v0  ;;  %v2441_v5 = vpop.f32.mrb[10].mxu0  ;;  %v2762_v3 = vpack.c.bf16 %v2401_v61, %v2401_v61  ;;  %v6699_v61 = vld [vmem:[%s7490_s27 + $0x44] ss:$8 sps:$4 sm:$0xff]  }
 0x54e   : > { %v2452_v6 = vpack.c.bf16 %v2438_v2, %v2438_v2  ;;  %v2442_v7 = vadd.f32 %v2441_v5, %v1832_v63  ;;  %v2443_v8 = vpop.f32.mrb[11].mxu0  ;;  %v2761_v5 = vpack.c.bf16 %v2358_v55, %v2358_v55  ;;  %v6711_v55 = vld [vmem:[%s7490_s27 + $0x84] ss:$8 sps:$4 sm:$0xff]  }
 0x54f   : > { %v2557_v10 = vpack.c.bf16 %v2440_v4, %v2440_v4  ;;  %v2444_v11 = vadd.f32 %v2443_v8, %v1836_v0  ;;  %v2555_v4 = vpack.c.bf16 %v2354_v50, %v2354_v50  ;;  %v6706_v50 = vld [vmem:[%s7490_s27 + $0x70] ss:$8 sps:$4 sm:$0xff]  }
 0x550   : > { %v2513_v13 = vsel %vm2511_vm3, %v2452_v6, 0  ;;  %v2660_v16 = vpack.c.bf16 %v2442_v7, %v2442_v7 }
 0x551   : > { %v7705_v17 = vsel %vm2511_vm3, %v2557_v10, 0  ;;  %v2763_v18 = vpack.c.bf16 %v2444_v11, %v2444_v11  ;;  %6264 = vmatpush3.bf16.msra.mxu0 %v2513_v13 }
 0x552   : > { %v2719_v19 = vsel %vm2511_vm3, %v2660_v16, 0  ;;  %6269 = vmatprep.subr.bf16.mxu0 %v7237_v41 }
 0x553   : > { %v7708_v20 = vsel %vm2511_vm3, %v2763_v18, 0  ;;  %6288 = vmatpush3.bf16.msra.mxu1 %v2719_v19 }
 0x554   : > { %6293 = vmatprep.subr.bf16.mxu1 %v7237_v41 }
 0x5ea   : > { %v2487_v22 = vpop.f32.mrb[12].mxu0 }
 0x5eb   : > { %v2493_v25 = vmul.f32 0.088388346, %v2487_v22  ;;  %v6261_v26 = vpop.f32.mrb[13].mxu0 }
 0x5ec   : > { %v2490_v27 = vpop.f32.mrb[14].mxu0  ;;  %v2695_v28 = vpop.f32.mrb[0].mxu1 }
 0x5ed   : > { %v2701_v29 = vmul.f32 0.088388346, %v2695_v28  ;;  %v6262_v30 = vpop.f32.mrb[15].mxu0  ;;  %v6285_v31 = vpop.f32.mrb[1].mxu1  ;;  %v2494_v32 = vadd.f32 %v2493_v25, %v7712_v24 }
 0x5ee   : > { %v2698_v33 = vpop.f32.mrb[2].mxu1 }
 0x5ef   : > { %v6286_v34 = vpop.f32.mrb[3].mxu1  ;;  %v2496_v35 = vsel %vm2495_vm5, %v2494_v32, -inf  ;;  %v2702_v9 = vadd.f32 %v2701_v29, %v7712_v24 }
 0x5f0   : > { %2497 = vmax.xlane.f32.xlu0 %v2496_v35 }
 0x5f1   : > { %v2703_v36 = vsel %vm2495_vm5, %v2702_v9, -inf }
 0x5f2   : > { %2704 = vmax.xlane.f32.xlu1 %v2703_v36 }
 0x67d   : > { %v2498_v38 = vpop.xlane.xlu0 %2497 }
 0x67e   : > { %v2499_v39 = vsub.f32 %v2494_v32, %v2498_v38 }
 0x67f   : > { %v2705_v40 = vpop.xlane.xlu1 %2704 }
 0x680   : > { %v2500_v42 = vmul.f32 1.442695, %v2499_v39  ;;  %v2706_v44 = vsub.f32 %v2702_v9, %v2705_v40  ;;  %v6687_v40 = vld [vmem:[%s7490_s27 + $0x4] ss:$8 sps:$4 sm:$0xff]  }
 0x682   : > { %6929 = vpow2.f32 %v2500_v42  ;;  %v2707_v46 = vmul.f32 1.442695, %v2706_v44 }
 0x684   : > { %6931 = vpow2.f32 %v2707_v46 }
 0x68c   : > { %v6930_v47 = vpop.eup %6929 }
 0x68d   : > { %v2502_v48 = vsel %vm2495_vm5, %v6930_v47, 0.0 }
 0x68e   : > { %v6932_v49 = vpop.eup %6931  ;;  %2503 = vadd.xlane.f32.xlu0 %v2502_v48 }
 0x68f   : > { %v2709_v51 = vsel %vm2495_vm5, %v6932_v49, 0.0 }
 0x690   : > { %2710 = vadd.xlane.f32.xlu1 %v2709_v51 }
 0x71b   : > { %v2504_v52 = vpop.xlane.xlu0 %2503 }
 0x71c   : > { %6933 = vrcp.f32 %v2504_v52 }
 0x71d   : > { %v2711_v53 = vpop.xlane.xlu1 %2710 }
 0x71e   : > { %6935 = vrcp.f32 %v2711_v53  ;;  %v6690_v53 = vld [vmem:[%s7490_s27 + $0x14] ss:$8 sps:$4 sm:$0xff]  }
 0x726   : > { %v6934_v57 = vpop.eup %6933 }
 0x727   : > { %v2506_v59 = vmul.f32 %v6934_v57, %v6930_v47  ;;  %v6693_v57 = vld [vmem:[%s7490_s27 + $0x24] ss:$8 sps:$4 sm:$0xff]  }
 0x728   : > { %v6936_v60 = vpop.eup %6935 }
 0x729   : > { %v2713_v63 = vmul.f32 %v6936_v60, %v6932_v49  ;;  %v2507_v0 = vpack.c.bf16 %v2506_v59, %v2506_v59  ;;  %v6685_v49 = vld [vmem:[%s7490_s27] ss:$8 sps:$4 sm:$0xff]   ;;  %v6696_v59 = vld [vmem:[%s7490_s27 + $0x34] ss:$8 sps:$4 sm:$0xff]   ;;  %v6694_v60 = vld [vmem:[%s7490_s27 + $0x30] ss:$8 sps:$4 sm:$0xff]  }
 0x72b   : > { %6266 = vmatmul.mubr.msk.bf16.vlgmr.msra.gmra.mrb[16].mxu0 %vm2495_vm5, %v2507_v0  ;;  %v2714_v2 = vpack.c.bf16 %v2713_v63, %v2713_v63  ;;  %v6702_v63 = vld [vmem:[%s7490_s27 + $0x54] ss:$8 sps:$4 sm:$0xff]   ;;  %v6700_v0 = vld [vmem:[%s7490_s27 + $0x50] ss:$8 sps:$4 sm:$0xff]  }
 0x72c   : > { %6270 = vmatpush3.bf16.xpose.msra.mxu0 %v2556_v1  ;;  %6271 = vmatprep.mubr.msk.bf16.mxu0 %vm7238_vm2, %v7237_v41  ;;  %v6705_v1 = vld [vmem:[%s7490_s27 + $0x64] ss:$8 sps:$4 sm:$0xff]  }
 0x72d   : > { %6290 = vmatmul.mubr.msk.bf16.vlgmr.msra.gmra.mrb[4].mxu1 %vm2495_vm5, %v2714_v2  ;;  %6275 = vmatprep.subr.bf16.mxu0 %v7237_v41  ;;  %v6703_v2 = vld [vmem:[%s7490_s27 + $0x60] ss:$8 sps:$4 sm:$0xff]  }
 0x72e   : > { %6294 = vmatpush3.bf16.xpose.msra.mxu1 %v2762_v3  ;;  %6295 = vmatprep.mubr.msk.bf16.mxu1 %vm7238_vm2, %v7237_v41  ;;  %v6708_v3 = vld [vmem:[%s7490_s27 + $0x74] ss:$8 sps:$4 sm:$0xff]  }
 0x72f   : > { %6299 = vmatprep.subr.bf16.mxu1 %v7237_v41 }
 0x733   : > { %6272 = vmatmul.mubr.bf16.vlgmr.msra.gmra.mrb[20].mxu0 %v2555_v4  ;;  %v6709_v4 = vld [vmem:[%s7490_s27 + $0x80] ss:$8 sps:$4 sm:$0xff]  }
 0x734   : > { %6276 = vmatpush3.bf16.msra.mxu0 %v7705_v17  ;;  %6277 = vmatprep.mubr.msk.bf16.mxu0 %vm7238_vm2, %v7237_v41 }
 0x735   : > { %6296 = vmatmul.mubr.bf16.vlgmr.msra.gmra.mrb[8].mxu1 %v2761_v5  ;;  %3034 = vmatprep.subr.bf16.mxu0 %v6687_v40  ;;  %v6714_v5 = vld [vmem:[%s7490_s27 + $0x94] ss:$8 sps:$4 sm:$0xff]   ;;  %v7013_v40 = vld [vmem:[#allocation2] sm:$0xff] }
 0x736   : > { %6300 = vmatpush3.bf16.msra.mxu1 %v7708_v20  ;;  %6301 = vmatprep.mubr.msk.bf16.mxu1 %vm7238_vm2, %v7237_v41 }
 0x7fe   : > { %v7742_v43 = vpop.f32.mrb[16].mxu0 }
 0x7ff   : > { %v6267_v6 = vpop.f32.mrb[17].mxu0 }
 0x800   : > { %v2552_v45 = vpop.f32.mrb[18].mxu0  ;;  %v7744_v7 = vpop.f32.mrb[4].mxu1  ;;  %v6712_v6 = vld [vmem:[%s7490_s27 + $0x90] ss:$8 sps:$4 sm:$0xff]  }
 0x801   : > { %v2864_v8 = vpack.c.bf16 %v7744_v7, %v7742_v43  ;;  %v6268_v10 = vpop.f32.mrb[19].mxu0  ;;  %v6291_v11 = vpop.f32.mrb[5].mxu1  ;;  %v6717_v45 = vld [vmem:[%s7490_s27 + $0xa4] ss:$8 sps:$4 sm:$0xff]  }
 0x802   : > { %v2758_v13 = vpop.f32.mrb[6].mxu1  ;;  %v6715_v10 = vld [vmem:[%s7490_s27 + $0xa0] ss:$8 sps:$4 sm:$0xff]   ;;  %v6720_v11 = vld [vmem:[%s7490_s27 + $0xb4] ss:$8 sps:$4 sm:$0xff]  }
 0x803   : > { %v6292_v16 = vpop.f32.mrb[7].mxu1  ;;  %v6718_v13 = vld [vmem:[%s7490_s27 + $0xb0] ss:$8 sps:$4 sm:$0xff]   ;;  %v7014_v7 = vld [vmem:[#allocation2 + $0x8] sm:$0xff] }
 0x804   : > { %v6723_v16 = vld [vmem:[%s7490_s27 + $0xc4] ss:$8 sps:$4 sm:$0xff]  }
 0x806   : > { %v2592_v17 = vpop.f32.mrb[20].mxu0 }
 0x807   : > { %v2598_v18 = vmul.f32 0.088388346, %v2592_v17  ;;  %v6273_v19 = vpop.f32.mrb[21].mxu0  ;;  %v6721_v17 = vld [vmem:[%s7490_s27 + $0xc0] ss:$8 sps:$4 sm:$0xff]  }
 0x808   : > { %v2595_v20 = vpop.f32.mrb[22].mxu0  ;;  %v2798_v21 = vpop.f32.mrb[8].mxu1  ;;  %v6724_v19 = vld [vmem:[%s7490_s27 + $0xd0] ss:$8 sps:$4 sm:$0xff]  }
 0x809   : > { %v2804_v22 = vmul.f32 0.088388346, %v2798_v21  ;;  %v6274_v41 = vpop.f32.mrb[23].mxu0  ;;  %v6297_v23 = vpop.f32.mrb[9].mxu1  ;;  %v2599_v25 = vadd.f32 %v2598_v18, %v7712_v24  ;;  %v6726_v18 = vld [vmem:[%s7490_s27 + $0xd4] ss:$8 sps:$4 sm:$0xff]  }
 0x80a   : > { %v2801_v26 = vpop.f32.mrb[10].mxu1  ;;  %v6729_v20 = vld [vmem:[%s7490_s27 + $0xe4] ss:$8 sps:$4 sm:$0xff]   ;;  %v6727_v21 = vld [vmem:[%s7490_s27 + $0xe0] ss:$8 sps:$4 sm:$0xff]  }
 0x80b   : > { %v6298_v27 = vpop.f32.mrb[11].mxu1  ;;  %v2600_v28 = vsel %vm2495_vm5, %v2599_v25, -inf  ;;  %v2805_v29 = vadd.f32 %v2804_v22, %v7712_v24  ;;  %v6732_v22 = vld [vmem:[%s7490_s27 + $0xf4] ss:$8 sps:$4 sm:$0xff]   ;;  %v6730_v41 = vld [vmem:[%s7490_s27 + $0xf0] ss:$8 sps:$4 sm:$0xff]  }
 0x80c   : > { %2601 = vmax.xlane.f32.xlu0 %v2600_v28 }
 0x80d   : > { %v2806_v30 = vsel %vm2495_vm5, %v2805_v29, -inf }
 0x80e   : > { %2807 = vmax.xlane.f32.xlu1 %v2806_v30 }
 0x899   : > { %v2602_v31 = vpop.xlane.xlu0 %2601 }
 0x89a   : > { %v2603_v32 = vsub.f32 %v2599_v25, %v2602_v31 }
 0x89b   : > { %v2808_v33 = vpop.xlane.xlu1 %2807 }
 0x89c   : > { %v2604_v34 = vmul.f32 1.442695, %v2603_v32  ;;  %v2809_v35 = vsub.f32 %v2805_v29, %v2808_v33  ;;  %v2868_v33 = vsub.s32 2, %v7587_v12 }
 0x89e   : > { %6937 = vpow2.f32 %v2604_v34  ;;  %v2810_v9 = vmul.f32 1.442695, %v2809_v35  ;;  %v2869_v34 = vrot.slane %v7594_v15, %v2868_v33  ;;  %v2873_v35 = vrot.slane %v7591_v14, %v2868_v33  ;;  %v7015_v14 = vld [vmem:[#allocation2 + $0x10] sm:$0xff]  ;;  %v1535_v33 = vld [vmem:[%s7501_s6 + $0x168] sm:$0xff] }
 0x8a0   : > { %6939 = vpow2.f32 %v2810_v9 }
 0x8a8   : > { %v6938_v36 = vpop.eup %6937 }
 0x8a9   : > { %v2606_v38 = vsel %vm2495_vm5, %v6938_v36, 0.0 }
 0x8aa   : > { %v6940_v39 = vpop.eup %6939  ;;  %2607 = vadd.xlane.f32.xlu0 %v2606_v38 }
 0x8ab   : > { %v2812_v24 = vsel %vm2495_vm5, %v6940_v39, 0.0 }
 0x8ac   : > { %2813 = vadd.xlane.f32.xlu1 %v2812_v24 }
 0x937   : > { %v2608_v42 = vpop.xlane.xlu0 %2607 }
 0x938   : > { %6941 = vrcp.f32 %v2608_v42 }
 0x939   : > { %v2814_v44 = vpop.xlane.xlu1 %2813 }
 0x93a   : > { %6943 = vrcp.f32 %v2814_v44 }
 0x942   : > { %v6942_v46 = vpop.eup %6941 }
 0x943   : > { %v2610_v47 = vmul.f32 %v6942_v46, %v6938_v36 }
 0x944   : > { %v6944_v48 = vpop.eup %6943 }
 0x945   : > { %v2816_v51 = vmul.f32 %v6944_v48, %v6940_v39  ;;  %v2611_v52 = vpack.c.bf16 %v2610_v47, %v2610_v47  ;;  %v7016_v47 = vld [vmem:[#allocation2 + $0x18] sm:$0xff] }
 0x947   : > { %6278 = vmatmul.mubr.msk.bf16.vlgmr.msra.gmra.mrb[24].mxu0 %vm2495_vm5, %v2611_v52  ;;  %v2817_v54 = vpack.c.bf16 %v2816_v51, %v2816_v51  ;;  %v1490_v52 = vld [vmem:[%s7501_s6] sm:$0xff] }
 0x948   : > { %3035 = vmatpush1.bf16.msra.mxu0 %v6685_v49 }
 0x949   : > { %6302 = vmatmul.mubr.msk.bf16.vlgmr.msra.gmra.mrb[12].mxu1 %vm2495_vm5, %v2817_v54  ;;  %3036 = vmatprep.subr.bf16.mxu0 %v6690_v53  ;;  %v1494_v53 = vld [vmem:[%s7501_s6 + $0x20] sm:$0xff]  ;;  %v1491_v54 = vld [vmem:[%s7501_s6 + $0x8] sm:$0xff] }
 0x94c   : > { %3037 = vmatpush1.bf16.msra.mxu0 %v6688_v56  ;;  %v5942_v56 = vcombine.low %v1490_v52, %v1494_v53 }
 0x94d   : > { %3038 = vmatprep.subr.bf16.mxu0 %v6693_v57  ;;  %v5943_v57 = vcombine.high %v1490_v52, %v1494_v53 }
 0x94f   : > { %3811 = vmatprep.subr.bf16.mxu1 %v5943_v57  ;;  %v1554_v57 = vld [vmem:[%s7501_s6 + $0x200] sm:$0xff] }
 0x950   : > { %3039 = vmatpush1.bf16.msra.mxu0 %v6691_v58  ;;  %v1495_v58 = vld [vmem:[%s7501_s6 + $0x28] sm:$0xff]  ;;  %3812 = vmatpush1.bf16.msra.mxu1 %v5942_v56 }
 0x951   : > { %3040 = vmatprep.subr.bf16.mxu0 %v6696_v59  ;;  %v1498_v59 = vld [vmem:[%s7501_s6 + $0x40] sm:$0xff] }
 0x954   : > { %3041 = vmatpush1.bf16.msra.mxu0 %v6694_v60  ;;  %v1502_v60 = vld [vmem:[%s7501_s6 + $0x60] sm:$0xff] }
 0x955   : > { %3042 = vmatprep.subr.bf16.mxu0 %v6699_v61  ;;  %v5944_v61 = vcombine.low %v1491_v54, %v1495_v58 }
 0x958   : > { %3043 = vmatpush1.bf16.msra.mxu0 %v6697_v62  ;;  %v5945_v62 = vcombine.high %v1491_v54, %v1495_v58  ;;  %v1558_v58 = vld [vmem:[%s7501_s6 + $0x220] sm:$0xff] }
 0x959   : > { %3044 = vmatprep.subr.bf16.mxu0 %v6702_v63  ;;  %v5951_v63 = vcombine.high %v1498_v59, %v1502_v60 }
 0x95b   : > { %3813 = vmatprep.subr.bf16.mxu1 %v5951_v63  ;;  %v6007_v63 = vcombine.high %v1554_v57, %v1558_v58 }
 0x95c   : > { %3045 = vmatpush1.bf16.msra.mxu0 %v6700_v0  ;;  %v1499_v0 = vld [vmem:[%s7501_s6 + $0x48] sm:$0xff] }
 0x95d   : > { %3046 = vmatprep.subr.bf16.mxu0 %v6705_v1  ;;  %v1503_v1 = vld [vmem:[%s7501_s6 + $0x68] sm:$0xff] }
 0x960   : > { %3047 = vmatpush1.bf16.msra.mxu0 %v6703_v2  ;;  %v1506_v2 = vld [vmem:[%s7501_s6 + $0x80] sm:$0xff] }
 0x961   : > { %3048 = vmatprep.subr.bf16.mxu0 %v6708_v3  ;;  %v5953_v3 = vcombine.high %v1499_v0, %v1503_v1 }
 0x964   : > { %3049 = vmatpush1.bf16.msra.mxu0 %v6706_v50  ;;  %v1510_v50 = vld [vmem:[%s7501_s6 + $0xa0] sm:$0xff] }
 0x965   : > { %3050 = vmatprep.subr.bf16.mxu0 %v6711_v55  ;;  %v1507_v55 = vld [vmem:[%s7501_s6 + $0x88] sm:$0xff] }
 0x968   : > { %3051 = vmatpush1.bf16.msra.mxu0 %v6709_v4  ;;  %v1511_v4 = vld [vmem:[%s7501_s6 + $0xa8] sm:$0xff] }
 0x969   : > { %3052 = vmatprep.subr.bf16.mxu0 %v6714_v5  ;;  %v5950_v5 = vcombine.low %v1498_v59, %v1502_v60  ;;  %v1555_v59 = vld [vmem:[%s7501_s6 + $0x208] sm:$0xff] }
 0x96a   : > { %v1559_v60 = vld [vmem:[%s7501_s6 + $0x228] sm:$0xff] }
 0x96b   : > { %3814 = vmatpush1.bf16.msra.mxu1 %v5950_v5 }
 0x96c   : > { %3053 = vmatpush1.bf16.msra.mxu0 %v6712_v6  ;;  %v5952_v6 = vcombine.low %v1499_v0, %v1503_v1  ;;  %v6009_v0 = vcombine.high %v1555_v59, %v1559_v60  ;;  %v1562_v1 = vld [vmem:[%s7501_s6 + $0x240] sm:$0xff] }
 0x96d   : > { %3054 = vmatprep.subr.bf16.mxu0 %v6717_v45  ;;  %v5959_v45 = vcombine.high %v1506_v2, %v1510_v50 }
 0x96f   : > { %3815 = vmatprep.subr.bf16.mxu1 %v5959_v45 }
 0x970   : > { %3055 = vmatpush1.bf16.msra.mxu0 %v6715_v10  ;;  %v5961_v10 = vcombine.high %v1507_v55, %v1511_v4 }
 0x971   : > { %3056 = vmatprep.subr.bf16.mxu0 %v6720_v11  ;;  %v1514_v11 = vld [vmem:[%s7501_s6 + $0xc0] sm:$0xff] }
 0x974   : > { %3057 = vmatpush1.bf16.msra.mxu0 %v6718_v13  ;;  %v1518_v13 = vld [vmem:[%s7501_s6 + $0xe0] sm:$0xff] }
 0x975   : > { %3058 = vmatprep.subr.bf16.mxu0 %v6723_v16  ;;  %v1515_v16 = vld [vmem:[%s7501_s6 + $0xc8] sm:$0xff] }
 0x978   : > { %3059 = vmatpush1.bf16.msra.mxu0 %v6721_v17  ;;  %v1519_v17 = vld [vmem:[%s7501_s6 + $0xe8] sm:$0xff] }
 0x979   : > { %3060 = vmatprep.subr.bf16.mxu0 %v6726_v18  ;;  %v5958_v18 = vcombine.low %v1506_v2, %v1510_v50  ;;  %v1566_v2 = vld [vmem:[%s7501_s6 + $0x260] sm:$0xff]  ;;  %v1567_v50 = vld [vmem:[%s7501_s6 + $0x268] sm:$0xff] }
 0x97a   : > { %v6015_v5 = vcombine.high %v1562_v1, %v1566_v2  ;;  %v6014_v45 = vcombine.low %v1562_v1, %v1566_v2  ;;  %v1603_v1 = vld [vmem:[%s7501_s6 + $0x388] sm:$0xff] }
 0x97b   : > { %3816 = vmatpush1.bf16.msra.mxu1 %v5958_v18 }
 0x97c   : > { %3061 = vmatpush1.bf16.msra.mxu0 %v6724_v19  ;;  %v5960_v19 = vcombine.low %v1507_v55, %v1511_v4  ;;  %v6006_v55 = vcombine.low %v1554_v57, %v1558_v58  ;;  %v6008_v4 = vcombine.low %v1555_v59, %v1559_v60  ;;  %v1595_v57 = vld [vmem:[%s7501_s6 + $0x348] sm:$0xff] }
 0x97d   : > { %3062 = vmatprep.subr.bf16.mxu0 %v6729_v20  ;;  %v5967_v20 = vcombine.high %v1514_v11, %v1518_v13  ;;  %v1599_v59 = vld [vmem:[%s7501_s6 + $0x368] sm:$0xff] }
 0x97f   : > { %3817 = vmatprep.subr.bf16.mxu1 %v5967_v20 }
 0x980   : > { %3063 = vmatpush1.bf16.msra.mxu0 %v6727_v21  ;;  %v5969_v21 = vcombine.high %v1515_v16, %v1519_v17 }
 0x981   : > { %3064 = vmatprep.subr.bf16.mxu0 %v6732_v22  ;;  %v1522_v22 = vld [vmem:[%s7501_s6 + $0x100] sm:$0xff] }
 0x984   : > { %3065 = vmatpush1.bf16.msra.mxu0 %v6730_v41  ;;  %v1526_v41 = vld [vmem:[%s7501_s6 + $0x120] sm:$0xff] }
 0x985   : > { %3854 = vmatprep.subr.bf16.mxu0 %v5945_v62 }
 0xa1a   : > { %v2652_v23 = vpop.f32.mrb[24].mxu0 }
 0xa1b   : > { %v6279_v25 = vpop.f32.mrb[25].mxu0 }
 0xa1c   : > { %v2655_v26 = vpop.f32.mrb[26].mxu0  ;;  %v2858_v27 = vpop.f32.mrb[12].mxu1  ;;  %v1527_v25 = vld [vmem:[%s7501_s6 + $0x128] sm:$0xff] }
 0xa1d   : > { %v2865_v28 = vpack.c.bf16 %v2858_v27, %v2652_v23  ;;  %v6280_v29 = vpop.f32.mrb[27].mxu0  ;;  %v6303_v30 = vpop.f32.mrb[13].mxu1  ;;  %v1523_v23 = vld [vmem:[%s7501_s6 + $0x108] sm:$0xff]  ;;  %v5966_v26 = vcombine.low %v1514_v11, %v1518_v13  ;;  %v5968_v27 = vcombine.low %v1515_v16, %v1519_v17 }
 0xa1e   : > { %v2861_v31 = vpop.f32.mrb[14].mxu1  ;;  %v5977_v29 = vcombine.high %v1523_v23, %v1527_v25  ;;  %v1530_v30 = vld [vmem:[%s7501_s6 + $0x140] sm:$0xff] }
 0xa1f   : > { %v6304_v32 = vpop.f32.mrb[15].mxu1  ;;  %3066 = vmatprep.mubr.bf16.mxu0 %v2865_v28  ;;  %v5975_v28 = vcombine.high %v1522_v22, %v1526_v41  ;;  %v1534_v31 = vld [vmem:[%s7501_s6 + $0x160] sm:$0xff]  ;;  %3818 = vmatpush1.bf16.msra.mxu1 %v5966_v26 }
 0xa20   : > { %3067 = vmatmul.mubr.bf16.vlgmr.msra.gmra.mrb[28].mxu0 %v2864_v8  ;;  %v1531_v32 = vld [vmem:[%s7501_s6 + $0x148] sm:$0xff] }
 0xa21   : > { %3855 = vmatpush1.bf16.msra.mxu0 %v5944_v61  ;;  %3819 = vmatprep.subr.bf16.mxu1 %v5975_v28  ;;  %v1570_v28 = vld [vmem:[%s7501_s6 + $0x280] sm:$0xff] }
 0xa22   : > { %3856 = vmatprep.subr.bf16.mxu0 %v5953_v3  ;;  %v1563_v3 = vld [vmem:[%s7501_s6 + $0x248] sm:$0xff] }
 0xa25   : > { %3857 = vmatpush1.bf16.msra.mxu0 %v5952_v6  ;;  %v6017_v6 = vcombine.high %v1563_v3, %v1567_v50 }
 0xa26   : > { %3858 = vmatprep.subr.bf16.mxu0 %v5961_v10  ;;  %v6016_v10 = vcombine.low %v1563_v3, %v1567_v50  ;;  %v1607_v3 = vld [vmem:[%s7501_s6 + $0x3a8] sm:$0xff] }
 0xa29   : > { %3859 = vmatpush1.bf16.msra.mxu0 %v5960_v19 }
 0xa2a   : > { %3860 = vmatprep.subr.bf16.mxu0 %v5969_v21 }
 0xa2d   : > { %3861 = vmatpush1.bf16.msra.mxu0 %v5968_v27 }
 0xa2e   : > { %3862 = vmatprep.subr.bf16.mxu0 %v5977_v29  ;;  %v1574_v29 = vld [vmem:[%s7501_s6 + $0x2a0] sm:$0xff] }
 0xaf3   : > { %v3068_v9 = vpop.f32.mrb[28].mxu0 }
 0xaf4   : > { %v3069_v36 = vadd.f32 %v3068_v9, %v2869_v34  ;;  %v3070_v38 = vpop.f32.mrb[29].mxu0  ;;  %v5983_v9 = vcombine.high %v1530_v30, %v1534_v31 }
 0xaf5   : > { %v3071_v39 = vadd.f32 %v3070_v38, %v2873_v35  ;;  %v3072_v24 = vpop.f32.mrb[30].mxu0  ;;  %v1538_v38 = vld [vmem:[%s7501_s6 + $0x180] sm:$0xff] }
 0xaf6   : > { %v7794_v42 = vadd.f32 %v7013_v40, %v3069_v36  ;;  %v3073_v44 = vadd.f32 %v3072_v24, %v2869_v34  ;;  %v3074_v43 = vpop.f32.mrb[31].mxu0  ;;  %v5974_v34 = vcombine.low %v1522_v22, %v1526_v41  ;;  %v5985_v36 = vcombine.high %v1531_v32, %v1535_v33  ;;  %v1539_v24 = vld [vmem:[%s7501_s6 + $0x188] sm:$0xff] }
 0xaf7   : > { %v7796_v8 = vadd.f32 %v7014_v7, %v3071_v39  ;;  %v3075_v15 = vadd.f32 %v3074_v43, %v2873_v35  ;;  %v5976_v35 = vcombine.low %v1523_v23, %v1527_v25  ;;  %v1542_v39 = vld [vmem:[%s7501_s6 + $0x1a0] sm:$0xff]  ;;  %v1543_v40 = vld [vmem:[%s7501_s6 + $0x1a8] sm:$0xff]  ;;  %v5984_v43 = vcombine.low %v1531_v32, %v1535_v33 }
 0xaf8   : > { %v7798_v46 = vadd.f32 %v7015_v14, %v3073_v44  ;;  %3820 = vmatpush1.bf16.msra.mxu1 %v5974_v34  ;;  %v5982_v44 = vcombine.low %v1530_v30, %v1534_v31  ;;  %v5991_v7 = vcombine.high %v1538_v38, %v1542_v39  ;;  %v1546_v14 = vld [vmem:[%s7501_s6 + $0x1c0] sm:$0xff]  ;;  %v5990_v52 = vcombine.low %v1538_v38, %v1542_v39  ;;  %v1571_v30 = vld [vmem:[%s7501_s6 + $0x288] sm:$0xff] }
 0xaf9   : > { %v7800_v48 = vadd.f32 %v7016_v47, %v3075_v15  ;;  %v3081_v49 = vadd.f32 %v7796_v8, %v7794_v42  ;;  %3863 = vmatpush1.bf16.msra.mxu0 %v5976_v35  ;;  %3821 = vmatprep.subr.bf16.mxu1 %v5983_v9  ;;  %v5993_v15 = vcombine.high %v1539_v24, %v1543_v40  ;;  %v1550_v47 = vld [vmem:[%s7501_s6 + $0x1e0] sm:$0xff]  ;;  %v1575_v32 = vld [vmem:[%s7501_s6 + $0x2a8] sm:$0xff] }
 0xafa   : > { %3864 = vmatprep.subr.bf16.mxu0 %v5985_v36  ;;  %v5992_v53 = vcombine.low %v1539_v24, %v1543_v40  ;;  %v5999_v54 = vcombine.high %v1546_v14, %v1550_v47  ;;  %v5998_v61 = vcombine.low %v1546_v14, %v1550_v47  ;;  %v6023_v31 = vcombine.high %v1570_v28, %v1574_v29  ;;  %v1578_v9 = vld [vmem:[%s7501_s6 + $0x2c0] sm:$0xff]  ;;  %v1579_v38 = vld [vmem:[%s7501_s6 + $0x2c8] sm:$0xff] }
 0xafb   : > { %3082 = vadd.xlane.f32.xlu0 %v3081_v49  ;;  %v3084_v51 = vadd.f32 %v7800_v48, %v7798_v46  ;;  %v1547_v49 = vld [vmem:[%s7501_s6 + $0x1c8] sm:$0xff]  ;;  %v6022_v33 = vcombine.low %v1570_v28, %v1574_v29  ;;  %v6024_v34 = vcombine.low %v1571_v30, %v1575_v32  ;;  %v6025_v35 = vcombine.high %v1571_v30, %v1575_v32  ;;  %v1582_v36 = vld [vmem:[%s7501_s6 + $0x2e0] sm:$0xff] }
 0xafc   : > { %3822 = vmatpush1.bf16.msra.mxu1 %v5982_v44  ;;  %v6031_v39 = vcombine.high %v1578_v9, %v1582_v36  ;;  %v1583_v24 = vld [vmem:[%s7501_s6 + $0x2e8] sm:$0xff]  ;;  %v6030_v40 = vcombine.low %v1578_v9, %v1582_v36  ;;  %v3115_v9 = vsub.s32 6, %v7587_v12  ;;  %v3127_v36 = vsub.s32 7, %v7587_v12 }
 0xafd   : > { %3085 = vadd.xlane.f32.xlu1 %v3084_v51  ;;  %v1551_v51 = vld [vmem:[%s7501_s6 + $0x1e8] sm:$0xff]  ;;  %3865 = vmatpush1.bf16.msra.mxu0 %v5984_v43  ;;  %v6032_v44 = vcombine.low %v1579_v38, %v1583_v24  ;;  %v6033_v43 = vcombine.high %v1579_v38, %v1583_v24  ;;  %v7901_v24 = vld [vmem:[%s7511_s21] sm:$0xff] }
 0xafe   : > { %3823 = vmatprep.subr.bf16.mxu1 %v5991_v7  ;;  %3866 = vmatprep.subr.bf16.mxu0 %v5993_v15  ;;  %v6001_v56 = vcombine.high %v1547_v49, %v1551_v51  ;;  %v6000_v62 = vcombine.low %v1547_v49, %v1551_v51  ;;  %v1586_v7 = vld [vmem:[%s7501_s6 + $0x300] sm:$0xff]  ;;  %v1587_v14 = vld [vmem:[%s7501_s6 + $0x308] sm:$0xff] }
 0xaff   : > { %v1590_v15 = vld [vmem:[%s7501_s6 + $0x320] sm:$0xff]  ;;  %v1591_v49 = vld [vmem:[%s7501_s6 + $0x328] sm:$0xff] }
 0xb00   : > { %3824 = vmatpush1.bf16.msra.mxu1 %v5990_v52  ;;  %v6039_v47 = vcombine.high %v1586_v7, %v1590_v15  ;;  %v6038_v51 = vcombine.low %v1586_v7, %v1590_v15  ;;  %v6040_v52 = vcombine.low %v1587_v14, %v1591_v49  ;;  %v7897_v38 = vld [vmem:[%s7511_s21 + $0x8] sm:$0xff] }
 0xb01   : > { %3867 = vmatpush1.bf16.msra.mxu0 %v5992_v53  ;;  %3825 = vmatprep.subr.bf16.mxu1 %v5999_v54  ;;  %v6041_v53 = vcombine.high %v1587_v14, %v1591_v49  ;;  %v1594_v54 = vld [vmem:[%s7501_s6 + $0x340] sm:$0xff]  ;;  %v3132_v14 = vrot.slane %v7897_v38, %v3127_v36 }
 0xb02   : > { %3868 = vmatprep.subr.bf16.mxu0 %v6001_v56  ;;  %v1598_v56 = vld [vmem:[%s7501_s6 + $0x360] sm:$0xff] }
 0xb03   : > { %v6047_v58 = vcombine.high %v1594_v54, %v1598_v56  ;;  %v6046_v60 = vcombine.low %v1594_v54, %v1598_v56 }
 0xb04   : > { %3826 = vmatpush1.bf16.msra.mxu1 %v5998_v61  ;;  %v6048_v61 = vcombine.low %v1595_v57, %v1599_v59 }
 0xb05   : > { %3869 = vmatpush1.bf16.msra.mxu0 %v6000_v62  ;;  %3827 = vmatprep.subr.bf16.mxu1 %v6007_v63  ;;  %v6049_v62 = vcombine.high %v1595_v57, %v1599_v59  ;;  %v1602_v63 = vld [vmem:[%s7501_s6 + $0x380] sm:$0xff]  ;;  %v1500_v59 = vld [vmem:[%s7501_s6 + $0x50] sm:$0xff] }
 0xb06   : > { %3870 = vmatprep.subr.bf16.mxu0 %v6009_v0  ;;  %v1606_v0 = vld [vmem:[%s7501_s6 + $0x3a0] sm:$0xff] }
 0xb07   : > { %v6055_v2 = vcombine.high %v1602_v63, %v1606_v0  ;;  %v6054_v50 = vcombine.low %v1602_v63, %v1606_v0  ;;  %v1508_v0 = vld [vmem:[%s7501_s6 + $0x90] sm:$0xff] }
 0xb08   : > { %3828 = vmatpush1.bf16.msra.mxu1 %v6006_v55  ;;  %v6056_v55 = vcombine.low %v1603_v1, %v1607_v3 }
 0xb09   : > { %3871 = vmatpush1.bf16.msra.mxu0 %v6008_v4  ;;  %3829 = vmatprep.subr.bf16.mxu1 %v6015_v5  ;;  %v6057_v4 = vcombine.high %v1603_v1, %v1607_v3  ;;  %v1610_v5 = vld [vmem:[%s7501_s6 + $0x3c0] sm:$0xff]  ;;  %v1509_v3 = vld [vmem:[%s7501_s6 + $0x98] sm:$0xff] }
 0xb0a   : > { %3872 = vmatprep.subr.bf16.mxu0 %v6017_v6  ;;  %v1614_v6 = vld [vmem:[%s7501_s6 + $0x3e0] sm:$0xff] }
 0xb0c   : > { %3830 = vmatpush1.bf16.msra.mxu1 %v6014_v45  ;;  %v1611_v45 = vld [vmem:[%s7501_s6 + $0x3c8] sm:$0xff] }
 0xb0d   : > { %3873 = vmatpush1.bf16.msra.mxu0 %v6016_v10  ;;  %3831 = vmatprep.subr.bf16.mxu1 %v6023_v31  ;;  %v6063_v10 = vcombine.high %v1610_v5, %v1614_v6 }
 0xb0e   : > { %3874 = vmatprep.subr.bf16.mxu0 %v6025_v35 }
 0xb10   : > { %3832 = vmatpush1.bf16.msra.mxu1 %v6022_v33 }
 0xb11   : > { %3875 = vmatpush1.bf16.msra.mxu0 %v6024_v34  ;;  %3833 = vmatprep.subr.bf16.mxu1 %v6031_v39  ;;  %v3120_v39 = vrot.slane %v7897_v38, %v3115_v9 }
 0xb12   : > { %3876 = vmatprep.subr.bf16.mxu0 %v6033_v43 }
 0xb14   : > { %3834 = vmatpush1.bf16.msra.mxu1 %v6030_v40  ;;  %v3116_v40 = vrot.slane %v7901_v24, %v3115_v9 }
 0xb15   : > { %3877 = vmatpush1.bf16.msra.mxu0 %v6032_v44  ;;  %3835 = vmatprep.subr.bf16.mxu1 %v6039_v47  ;;  %v3128_v47 = vrot.slane %v7901_v24, %v3127_v36 }
 0xb16   : > { %3878 = vmatprep.subr.bf16.mxu0 %v6041_v53 }
 0xb18   : > { %3836 = vmatpush1.bf16.msra.mxu1 %v6038_v51 }
 0xb19   : > { %3879 = vmatpush1.bf16.msra.mxu0 %v6040_v52  ;;  %3837 = vmatprep.subr.bf16.mxu1 %v6047_v58 }
 0xb1a   : > { %3880 = vmatprep.subr.bf16.mxu0 %v6049_v62  ;;  %v1505_v62 = vld [vmem:[%s7501_s6 + $0x78] sm:$0xff] }
 0xb1c   : > { %3838 = vmatpush1.bf16.msra.mxu1 %v6046_v60  ;;  %v1504_v60 = vld [vmem:[%s7501_s6 + $0x70] sm:$0xff] }
 0xb1d   : > { %3881 = vmatpush1.bf16.msra.mxu0 %v6048_v61  ;;  %3839 = vmatprep.subr.bf16.mxu1 %v6055_v2  ;;  %v1501_v61 = vld [vmem:[%s7501_s6 + $0x58] sm:$0xff]  ;;  %v1512_v2 = vld [vmem:[%s7501_s6 + $0xb0] sm:$0xff] }
 0xb1e   : > { %3882 = vmatprep.subr.bf16.mxu0 %v6057_v4  ;;  %v5957_v1 = vcombine.high %v1501_v61, %v1505_v62  ;;  %v5956_v4 = vcombine.low %v1501_v61, %v1505_v62  ;;  %v1557_v61 = vld [vmem:[%s7501_s6 + $0x218] sm:$0xff] }
 0xb1f   : > { %v1561_v62 = vld [vmem:[%s7501_s6 + $0x238] sm:$0xff] }
 0xb20   : > { %3840 = vmatpush1.bf16.msra.mxu1 %v6054_v50  ;;  %v1513_v50 = vld [vmem:[%s7501_s6 + $0xb8] sm:$0xff] }
 0xb21   : > { %3883 = vmatpush1.bf16.msra.mxu0 %v6056_v55  ;;  %3841 = vmatprep.subr.bf16.mxu1 %v6063_v10  ;;  %v5954_v55 = vcombine.low %v1500_v59, %v1504_v60  ;;  %v1520_v10 = vld [vmem:[%s7501_s6 + $0xf0] sm:$0xff] }
 0xb88   : > { %v3083_v11 = vpop.xlane.xlu0 %3082 }
 0xb89   : > { %v3087_v13 = vmul.f32 0.00390625, %v3083_v11  ;;  %v1615_v11 = vld [vmem:[%s7501_s6 + $0x3e8] sm:$0xff] }
 0xb8a   : > { %v3086_v16 = vpop.xlane.xlu1 %3085 }
 0xb8b   : > { %v7847_v17 = vsub.f32 %v7794_v42, %v3087_v13  ;;  %v7850_v18 = vsub.f32 %v7796_v8, %v3087_v13  ;;  %v3088_v19 = vmul.f32 0.00390625, %v3086_v16  ;;  %v6062_v13 = vcombine.low %v1610_v5, %v1614_v6 }
 0xb8c   : > { %v6065_v16 = vcombine.high %v1611_v45, %v1615_v11  ;;  %v5963_v5 = vcombine.high %v1508_v0, %v1512_v2  ;;  %v5965_v6 = vcombine.high %v1509_v3, %v1513_v50 }
 0xb8d   : > { %v7853_v20 = vsub.f32 %v7798_v46, %v3088_v19  ;;  %v7856_v21 = vsub.f32 %v7800_v48, %v3088_v19  ;;  %v3093_v22 = vmul.f32 %v7847_v17, %v7847_v17  ;;  %v3094_v41 = vmul.f32 %v7850_v18, %v7850_v18  ;;  %3842 = vmatpush1.bf16.msra.mxu1 %v6062_v13  ;;  %v1521_v13 = vld [vmem:[%s7501_s6 + $0xf8] sm:$0xff] }
 0xb8e   : > { %v6064_v19 = vcombine.low %v1611_v45, %v1615_v11  ;;  %3884 = vmatprep.subr.bf16.mxu0 %v6065_v16  ;;  %v1516_v45 = vld [vmem:[%s7501_s6 + $0xd0] sm:$0xff]  ;;  %v1517_v11 = vld [vmem:[%s7501_s6 + $0xd8] sm:$0xff]  ;;  %v5962_v16 = vcombine.low %v1508_v0, %v1512_v2 }
 0xb8f   : > { %v3097_v23 = vadd.f32 %v3094_v41, %v3093_v22  ;;  %v3095_v25 = vmul.f32 %v7853_v20, %v7853_v20  ;;  %v3096_v26 = vmul.f32 %v7856_v21, %v7856_v21  ;;  %v1492_v22 = vld [vmem:[%s7501_s6 + $0x10] sm:$0xff] }
 0xb90   : > { %v1496_v41 = vld [vmem:[%s7501_s6 + $0x30] sm:$0xff]  ;;  %3885 = vmatpush1.bf16.msra.mxu0 %v6064_v19  ;;  %v5964_v19 = vcombine.low %v1509_v3, %v1513_v50  ;;  %v1565_v50 = vld [vmem:[%s7501_s6 + $0x258] sm:$0xff] }
 0xb91   : > { %3098 = vadd.xlane.f32.xlu0 %v3097_v23  ;;  %v3100_v27 = vadd.f32 %v3096_v26, %v3095_v25  ;;  %v1493_v23 = vld [vmem:[%s7501_s6 + $0x18] sm:$0xff]  ;;  %v5947_v25 = vcombine.high %v1492_v22, %v1496_v41  ;;  %v1564_v2 = vld [vmem:[%s7501_s6 + $0x250] sm:$0xff] }
 0xb92   : > { %v1497_v26 = vld [vmem:[%s7501_s6 + $0x38] sm:$0xff]  ;;  %v1568_v3 = vld [vmem:[%s7501_s6 + $0x270] sm:$0xff] }
 0xb93   : > { %3101 = vadd.xlane.f32.xlu1 %v3100_v27  ;;  %v5946_v27 = vcombine.low %v1492_v22, %v1496_v41  ;;  %v5948_v28 = vcombine.low %v1493_v23, %v1497_v26  ;;  %v5949_v29 = vcombine.high %v1493_v23, %v1497_v26  ;;  %3897 = vmatprep.subr.bf16.mxu1 %v5947_v25  ;;  %v1524_v23 = vld [vmem:[%s7501_s6 + $0x110] sm:$0xff]  ;;  %v1525_v26 = vld [vmem:[%s7501_s6 + $0x118] sm:$0xff] }
 0xb94   : > { %v5971_v22 = vcombine.high %v1516_v45, %v1520_v10  ;;  %v5973_v41 = vcombine.high %v1517_v11, %v1521_v13  ;;  %v1528_v25 = vld [vmem:[%s7501_s6 + $0x130] sm:$0xff] }
 0xb95   : > { %3940 = vmatprep.subr.bf16.mxu0 %v5949_v29  ;;  %v5972_v29 = vcombine.low %v1517_v11, %v1521_v13  ;;  %v5978_v9 = vcombine.low %v1524_v23, %v1528_v25  ;;  %v1576_v11 = vld [vmem:[%s7501_s6 + $0x2b0] sm:$0xff]  ;;  %v1573_v13 = vld [vmem:[%s7501_s6 + $0x298] sm:$0xff] }
 0xc1e   : > { %v3099_v30 = vpop.xlane.xlu0 %3098 }
 0xc1f   : > { %v3103_v31 = vmul.f32 0.00390625, %v3099_v30  ;;  %v5979_v30 = vcombine.high %v1524_v23, %v1528_v25  ;;  %v1580_v25 = vld [vmem:[%s7501_s6 + $0x2d0] sm:$0xff] }
 0xc20   : > { %v3102_v32 = vpop.xlane.xlu1 %3101 }
 0xc21   : > { %v3105_v33 = vadd.f32 1e-05, %v3103_v31  ;;  %v3104_v34 = vmul.f32 0.00390625, %v3102_v32  ;;  %v1532_v32 = vld [vmem:[%s7501_s6 + $0x150] sm:$0xff] }
 0xc23   : > { %6945 = vrsqrt.f32 %v3105_v33  ;;  %v3106_v35 = vadd.f32 1e-05, %v3104_v34  ;;  %v1536_v33 = vld [vmem:[%s7501_s6 + $0x170] sm:$0xff]  ;;  %v1533_v34 = vld [vmem:[%s7501_s6 + $0x158] sm:$0xff] }
 0xc25   : > { %6947 = vrsqrt.f32 %v3106_v35  ;;  %v1537_v35 = vld [vmem:[%s7501_s6 + $0x178] sm:$0xff] }
 0xc2d   : > { %v6946_v44 = vpop.eup %6945 }
 0xc2e   : > { %v3109_v43 = vmul.f32 %v6946_v44, %v7847_v17  ;;  %v3110_v7 = vmul.f32 %v6946_v44, %v7850_v18  ;;  %v1540_v44 = vld [vmem:[%s7501_s6 + $0x190] sm:$0xff] }
 0xc2f   : > { %v6948_v15 = vpop.eup %6947 }
 0xc30   : > { %v3111_v49 = vmul.f32 %v6948_v15, %v7853_v20  ;;  %v3112_v51 = vmul.f32 %v6948_v15, %v7856_v21  ;;  %v3122_v52 = vmul.f32 %v3120_v39, %v3110_v7  ;;  %v3121_v53 = vmul.f32 %v3116_v40, %v3109_v43  ;;  %v1544_v43 = vld [vmem:[%s7501_s6 + $0x1b0] sm:$0xff]  ;;  %v1541_v7 = vld [vmem:[%s7501_s6 + $0x198] sm:$0xff] }
 0xc31   : > { %v5955_v21 = vcombine.high %v1500_v59, %v1504_v60  ;;  %v1545_v15 = vld [vmem:[%s7501_s6 + $0x1b8] sm:$0xff]  ;;  %v1556_v59 = vld [vmem:[%s7501_s6 + $0x210] sm:$0xff] }
 0xc32   : > { %v3124_v54 = vmul.f32 %v3120_v39, %v3112_v51  ;;  %v3123_v56 = vmul.f32 %v3116_v40, %v3111_v49  ;;  %v3134_v17 = vadd.f32 %v3132_v14, %v3122_v52  ;;  %v3133_v57 = vadd.f32 %v3128_v47, %v3121_v53  ;;  %v1548_v52 = vld [vmem:[%s7501_s6 + $0x1d0] sm:$0xff] }
 0xc33   : > { %v5987_v39 = vcombine.high %v1532_v32, %v1536_v33  ;;  %v5989_v40 = vcombine.high %v1533_v34, %v1537_v35  ;;  %v5995_v49 = vcombine.high %v1540_v44, %v1544_v43  ;;  %v5997_v51 = vcombine.high %v1541_v7, %v1545_v15  ;;  %v1552_v53 = vld [vmem:[%s7501_s6 + $0x1f0] sm:$0xff] }
 0xc34   : > { %v3136_v18 = vadd.f32 %v3132_v14, %v3124_v54  ;;  %v3135_v58 = vadd.f32 %v3128_v47, %v3123_v56  ;;  %v5986_v14 = vcombine.low %v1532_v32, %v1536_v33  ;;  %v5988_v47 = vcombine.low %v1533_v34, %v1537_v35  ;;  %v1549_v54 = vld [vmem:[%s7501_s6 + $0x1d8] sm:$0xff]  ;;  %v1560_v60 = vld [vmem:[%s7501_s6 + $0x230] sm:$0xff] }
 0xc35   : > { %v1553_v56 = vld [vmem:[%s7501_s6 + $0x1f8] sm:$0xff]  ;;  %v1588_v33 = vld [vmem:[%s7501_s6 + $0x310] sm:$0xff] }
 0xc36   : > { %v3138_v63 = vpack.c.bf16 %v3136_v18, %v3134_v17  ;;  %v7914_v20 = vpack.c.bf16 %v3135_v58, %v3133_v57  ;;  %v5994_v17 = vcombine.low %v1540_v44, %v1544_v43  ;;  %v5996_v18 = vcombine.low %v1541_v7, %v1545_v15  ;;  %v1592_v34 = vld [vmem:[%s7501_s6 + $0x330] sm:$0xff]  ;;  %v1589_v35 = vld [vmem:[%s7501_s6 + $0x318] sm:$0xff] }
 0xc37   : > { %v6003_v57 = vcombine.high %v1548_v52, %v1552_v53  ;;  %v6005_v58 = vcombine.high %v1549_v54, %v1553_v56  ;;  %v6004_v0 = vcombine.low %v1549_v54, %v1553_v56  ;;  %v1596_v43 = vld [vmem:[%s7501_s6 + $0x350] sm:$0xff]  ;;  %v1597_v15 = vld [vmem:[%s7501_s6 + $0x358] sm:$0xff] }
 0xc38   : > { %3843 = vmatprep.mubr.bf16.mxu1 %v3138_v63  ;;  %3886 = vmatprep.mubr.bf16.mxu0 %v3138_v63  ;;  %v1600_v7 = vld [vmem:[%s7501_s6 + $0x370] sm:$0xff]  ;;  %v1605_v56 = vld [vmem:[%s7501_s6 + $0x398] sm:$0xff] }
 0xc39   : > { %3844 = vmatmul.mubr.bf16.vlgmr.msra.gmra.mrb[16].mxu1 %v7914_v20  ;;  %3887 = vmatmul.mubr.bf16.vlgmr.msra.gmra.mrb[32].mxu0 %v7914_v20  ;;  %v1608_v54 = vld [vmem:[%s7501_s6 + $0x3b0] sm:$0xff] }
 0xc3a   : > { %3898 = vmatpush1.bf16.msra.mxu1 %v5946_v27  ;;  %3941 = vmatpush1.bf16.msra.mxu0 %v5948_v28  ;;  %v1529_v27 = vld [vmem:[%s7501_s6 + $0x138] sm:$0xff]  ;;  %v5970_v28 = vcombine.low %v1516_v45, %v1520_v10  ;;  %v1572_v10 = vld [vmem:[%s7501_s6 + $0x290] sm:$0xff] }
 0xc3b   : > { %3929 = vmatprep.mubr.bf16.mxu1 %v3138_v63  ;;  %3972 = vmatprep.mubr.bf16.mxu0 %v3138_v63  ;;  %v5981_v31 = vcombine.high %v1525_v26, %v1529_v27  ;;  %v5980_v36 = vcombine.low %v1525_v26, %v1529_v27  ;;  %v6002_v63 = vcombine.low %v1548_v52, %v1552_v53  ;;  %v1584_v26 = vld [vmem:[%s7501_s6 + $0x2f0] sm:$0xff]  ;;  %v1581_v27 = vld [vmem:[%s7501_s6 + $0x2d8] sm:$0xff] }
 0xc3c   : > { %3899 = vmatprep.subr.bf16.mxu1 %v5955_v21  ;;  %3942 = vmatprep.subr.bf16.mxu0 %v5957_v1  ;;  %v6011_v21 = vcombine.high %v1556_v59, %v1560_v60  ;;  %v6013_v1 = vcombine.high %v1557_v61, %v1561_v62  ;;  %v1604_v53 = vld [vmem:[%s7501_s6 + $0x390] sm:$0xff] }
 0xc3e   : > { %3900 = vmatpush1.bf16.msra.mxu1 %v5954_v55  ;;  %3943 = vmatpush1.bf16.msra.mxu0 %v5956_v4  ;;  %v1569_v55 = vld [vmem:[%s7501_s6 + $0x278] sm:$0xff]  ;;  %v6010_v4 = vcombine.low %v1556_v59, %v1560_v60  ;;  %v1612_v60 = vld [vmem:[%s7501_s6 + $0x3d0] sm:$0xff] }
 0xc3f   : > { %3901 = vmatprep.subr.bf16.mxu1 %v5963_v5  ;;  %3944 = vmatprep.subr.bf16.mxu0 %v5965_v6  ;;  %v6012_v5 = vcombine.low %v1557_v61, %v1561_v62  ;;  %v6019_v6 = vcombine.high %v1564_v2, %v1568_v3  ;;  %v6021_v45 = vcombine.high %v1565_v50, %v1569_v55  ;;  %v1616_v61 = vld [vmem:[%s7501_s6 + $0x3f0] sm:$0xff]  ;;  %v1613_v62 = vld [vmem:[%s7501_s6 + $0x3d8] sm:$0xff] }
 0xc42   : > { %3902 = vmatpush1.bf16.msra.mxu1 %v5962_v16  ;;  %3945 = vmatpush1.bf16.msra.mxu0 %v5964_v19  ;;  %v1577_v16 = vld [vmem:[%s7501_s6 + $0x2b8] sm:$0xff]  ;;  %v6018_v19 = vcombine.low %v1564_v2, %v1568_v3  ;;  %v6066_v3 = vcombine.low %v1612_v60, %v1616_v61 }
 0xc43   : > { %3903 = vmatprep.subr.bf16.mxu1 %v5971_v22  ;;  %3946 = vmatprep.subr.bf16.mxu0 %v5973_v41  ;;  %v6020_v22 = vcombine.low %v1565_v50, %v1569_v55  ;;  %v6027_v41 = vcombine.high %v1572_v10, %v1576_v11  ;;  %v6029_v23 = vcombine.high %v1573_v13, %v1577_v16  ;;  %v6735_v55 = vld [vmem:[%s7513_s23 + $0x4] ss:$8 sps:$4 sm:$0xff]  }
 0xc46   : > { %3904 = vmatpush1.bf16.msra.mxu1 %v5970_v28  ;;  %3947 = vmatpush1.bf16.msra.mxu0 %v5972_v29  ;;  %v1585_v28 = vld [vmem:[%s7501_s6 + $0x2f8] sm:$0xff]  ;;  %v6026_v29 = vcombine.low %v1572_v10, %v1576_v11  ;;  %v6739_v10 = vld [vmem:[%s7513_s23 + $0x20] ss:$8 sps:$4 sm:$0xff]  }
 0xc47   : > { %3905 = vmatprep.subr.bf16.mxu1 %v5979_v30  ;;  %3948 = vmatprep.subr.bf16.mxu0 %v5981_v31  ;;  %v6028_v30 = vcombine.low %v1573_v13, %v1577_v16  ;;  %v6035_v31 = vcombine.high %v1580_v25, %v1584_v26  ;;  %v6037_v32 = vcombine.high %v1581_v27, %v1585_v28  ;;  %v6744_v11 = vld [vmem:[%s7513_s23 + $0x34] ss:$8 sps:$4 sm:$0xff]   ;;  %v6742_v13 = vld [vmem:[%s7513_s23 + $0x30] ss:$8 sps:$4 sm:$0xff]   ;;  %v6747_v16 = vld [vmem:[%s7513_s23 + $0x44] ss:$8 sps:$4 sm:$0xff]  }
 0xc4a   : > { %3906 = vmatpush1.bf16.msra.mxu1 %v5978_v9  ;;  %3949 = vmatpush1.bf16.msra.mxu0 %v5980_v36  ;;  %v1593_v9 = vld [vmem:[%s7501_s6 + $0x338] sm:$0xff]  ;;  %v6034_v36 = vcombine.low %v1580_v25, %v1584_v26 }
 0xc4b   : > { %3907 = vmatprep.subr.bf16.mxu1 %v5987_v39  ;;  %3950 = vmatprep.subr.bf16.mxu0 %v5989_v40  ;;  %v6036_v39 = vcombine.low %v1581_v27, %v1585_v28  ;;  %v6043_v40 = vcombine.high %v1588_v33, %v1592_v34  ;;  %v6045_v44 = vcombine.high %v1589_v35, %v1593_v9  ;;  %v6756_v25 = vld [vmem:[%s7513_s23 + $0x74] ss:$8 sps:$4 sm:$0xff]   ;;  %v6754_v26 = vld [vmem:[%s7513_s23 + $0x70] ss:$8 sps:$4 sm:$0xff]   ;;  %v6759_v27 = vld [vmem:[%s7513_s23 + $0x84] ss:$8 sps:$4 sm:$0xff]  }
 0xc4c   : > { %v6757_v28 = vld [vmem:[%s7513_s23 + $0x80] ss:$8 sps:$4 sm:$0xff]  }
 0xc4e   : > { %3908 = vmatpush1.bf16.msra.mxu1 %v5986_v14  ;;  %3951 = vmatpush1.bf16.msra.mxu0 %v5988_v47  ;;  %v1601_v14 = vld [vmem:[%s7501_s6 + $0x378] sm:$0xff]  ;;  %v6042_v47 = vcombine.low %v1588_v33, %v1592_v34 }
 0xc4f   : > { %3909 = vmatprep.subr.bf16.mxu1 %v5995_v49  ;;  %3952 = vmatprep.subr.bf16.mxu0 %v5997_v51  ;;  %v6044_v49 = vcombine.low %v1589_v35, %v1593_v9  ;;  %v6051_v51 = vcombine.high %v1596_v43, %v1600_v7  ;;  %v6053_v52 = vcombine.high %v1597_v15, %v1601_v14  ;;  %v6768_v33 = vld [vmem:[%s7513_s23 + $0xb4] ss:$8 sps:$4 sm:$0xff]   ;;  %v6766_v34 = vld [vmem:[%s7513_s23 + $0xb0] ss:$8 sps:$4 sm:$0xff]   ;;  %v6771_v35 = vld [vmem:[%s7513_s23 + $0xc4] ss:$8 sps:$4 sm:$0xff]  }
 0xc50   : > { %v6769_v9 = vld [vmem:[%s7513_s23 + $0xc0] ss:$8 sps:$4 sm:$0xff]  }
 0xc52   : > { %3910 = vmatpush1.bf16.msra.mxu1 %v5994_v17  ;;  %3953 = vmatpush1.bf16.msra.mxu0 %v5996_v18  ;;  %v1609_v17 = vld [vmem:[%s7501_s6 + $0x3b8] sm:$0xff]  ;;  %v6050_v18 = vcombine.low %v1596_v43, %v1600_v7 }
 0xc53   : > { %3911 = vmatprep.subr.bf16.mxu1 %v6003_v57  ;;  %3954 = vmatprep.subr.bf16.mxu0 %v6005_v58  ;;  %v6052_v57 = vcombine.low %v1597_v15, %v1601_v14  ;;  %v6059_v58 = vcombine.high %v1604_v53, %v1608_v54  ;;  %v6061_v59 = vcombine.high %v1605_v56, %v1609_v17  ;;  %v6780_v43 = vld [vmem:[%s7513_s23 + $0xf4] ss:$8 sps:$4 sm:$0xff]   ;;  %v6778_v7 = vld [vmem:[%s7513_s23 + $0xf0] ss:$8 sps:$4 sm:$0xff]   ;;  %v6783_v15 = vld [vmem:[%s7513_s23 + $0x104] ss:$8 sps:$4 sm:$0xff]  }
 0xc54   : > { %v8010_v14 = vsub.s32 1, %v7587_v12 }
 0xc56   : > { %3912 = vmatpush1.bf16.msra.mxu1 %v6002_v63  ;;  %3955 = vmatpush1.bf16.msra.mxu0 %v6004_v0  ;;  %v1617_v63 = vld [vmem:[%s7501_s6 + $0x3f8] sm:$0xff]  ;;  %v6058_v0 = vcombine.low %v1604_v53, %v1608_v54 }
 0xc57   : > { %3913 = vmatprep.subr.bf16.mxu1 %v6011_v21  ;;  %3956 = vmatprep.subr.bf16.mxu0 %v6013_v1  ;;  %v6060_v21 = vcombine.low %v1605_v56, %v1609_v17  ;;  %v6067_v1 = vcombine.high %v1612_v60, %v1616_v61  ;;  %v6069_v2 = vcombine.high %v1613_v62, %v1617_v63  ;;  %v7020_v53 = vld [vmem:[%s7511_s21 + $0x18] sm:$0xff] }
 0xc58   : > { %v6068_v50 = vcombine.low %v1613_v62, %v1617_v63  ;;  %v3154_v54 = vrot.slane %v7020_v53, %v8010_v14 }
 0xc5a   : > { %3914 = vmatpush1.bf16.msra.mxu1 %v6010_v4  ;;  %3957 = vmatpush1.bf16.msra.mxu0 %v6012_v5  ;;  %v6733_v4 = vld [vmem:[%s7513_s23] ss:$8 sps:$4 sm:$0xff]   ;;  %v6738_v5 = vld [vmem:[%s7513_s23 + $0x14] ss:$8 sps:$4 sm:$0xff]  }
 0xc5b   : > { %3915 = vmatprep.subr.bf16.mxu1 %v6019_v6  ;;  %3958 = vmatprep.subr.bf16.mxu0 %v6021_v45  ;;  %v6736_v6 = vld [vmem:[%s7513_s23 + $0x10] ss:$8 sps:$4 sm:$0xff]   ;;  %v6741_v45 = vld [vmem:[%s7513_s23 + $0x24] ss:$8 sps:$4 sm:$0xff]  }
 0xc5e   : > { %3916 = vmatpush1.bf16.msra.mxu1 %v6018_v19  ;;  %3959 = vmatpush1.bf16.msra.mxu0 %v6020_v22  ;;  %v6750_v19 = vld [vmem:[%s7513_s23 + $0x54] ss:$8 sps:$4 sm:$0xff]   ;;  %v6748_v22 = vld [vmem:[%s7513_s23 + $0x50] ss:$8 sps:$4 sm:$0xff]  }
 0xc5f   : > { %3917 = vmatprep.subr.bf16.mxu1 %v6027_v41  ;;  %3960 = vmatprep.subr.bf16.mxu0 %v6029_v23  ;;  %v6753_v41 = vld [vmem:[%s7513_s23 + $0x64] ss:$8 sps:$4 sm:$0xff]   ;;  %v6751_v23 = vld [vmem:[%s7513_s23 + $0x60] ss:$8 sps:$4 sm:$0xff]  }
 0xc62   : > { %3918 = vmatpush1.bf16.msra.mxu1 %v6026_v29  ;;  %3961 = vmatpush1.bf16.msra.mxu0 %v6028_v30  ;;  %v6762_v29 = vld [vmem:[%s7513_s23 + $0x94] ss:$8 sps:$4 sm:$0xff]   ;;  %v6760_v30 = vld [vmem:[%s7513_s23 + $0x90] ss:$8 sps:$4 sm:$0xff]  }
 0xc63   : > { %3919 = vmatprep.subr.bf16.mxu1 %v6035_v31  ;;  %3962 = vmatprep.subr.bf16.mxu0 %v6037_v32  ;;  %v6765_v31 = vld [vmem:[%s7513_s23 + $0xa4] ss:$8 sps:$4 sm:$0xff]   ;;  %v6763_v32 = vld [vmem:[%s7513_s23 + $0xa0] ss:$8 sps:$4 sm:$0xff]  }
 0xc66   : > { %3920 = vmatpush1.bf16.msra.mxu1 %v6034_v36  ;;  %3963 = vmatpush1.bf16.msra.mxu0 %v6036_v39  ;;  %v6774_v36 = vld [vmem:[%s7513_s23 + $0xd4] ss:$8 sps:$4 sm:$0xff]   ;;  %v6772_v39 = vld [vmem:[%s7513_s23 + $0xd0] ss:$8 sps:$4 sm:$0xff]  }
 0xc67   : > { %3921 = vmatprep.subr.bf16.mxu1 %v6043_v40  ;;  %3964 = vmatprep.subr.bf16.mxu0 %v6045_v44  ;;  %v6777_v40 = vld [vmem:[%s7513_s23 + $0xe4] ss:$8 sps:$4 sm:$0xff]   ;;  %v6775_v44 = vld [vmem:[%s7513_s23 + $0xe0] ss:$8 sps:$4 sm:$0xff]  }
 0xc6a   : > { %3922 = vmatpush1.bf16.msra.mxu1 %v6042_v47  ;;  %3965 = vmatpush1.bf16.msra.mxu0 %v6044_v49  ;;  %v3142_v47 = vrot.slane %v7901_v24, %v8010_v14  ;;  %v7019_v49 = vld [vmem:[%s7511_s21 + $0x10] sm:$0xff] }
 0xc6b   : > { %3923 = vmatprep.subr.bf16.mxu1 %v6051_v51  ;;  %3966 = vmatprep.subr.bf16.mxu0 %v6053_v52  ;;  %v3150_v51 = vrot.slane %v7019_v49, %v8010_v14  ;;  %v3146_v52 = vrot.slane %v7897_v38, %v8010_v14 }
 0xc6e   : > { %3924 = vmatpush1.bf16.msra.mxu1 %v6050_v18  ;;  %3967 = vmatpush1.bf16.msra.mxu0 %v6052_v57 }
 0xc6f   : > { %3925 = vmatprep.subr.bf16.mxu1 %v6059_v58  ;;  %3968 = vmatprep.subr.bf16.mxu0 %v6061_v59 }
 0xc72   : > { %3926 = vmatpush1.bf16.msra.mxu1 %v6058_v0  ;;  %3969 = vmatpush1.bf16.msra.mxu0 %v6060_v21 }
 0xc73   : > { %3927 = vmatprep.subr.bf16.mxu1 %v6067_v1  ;;  %3970 = vmatprep.subr.bf16.mxu0 %v6069_v2 }
 0xc76   : > { %3928 = vmatpush1.bf16.msra.mxu1 %v6066_v3  ;;  %3971 = vmatpush1.bf16.msra.mxu0 %v6068_v50 }
 0xc77   : > { %5063 = vmatprep.subr.bf16.mxu1 %v6735_v55 }
 0xc79   : > { %3930 = vmatmul.mubr.bf16.vlgmr.msra.gmra.mrb[20].mxu1 %v7914_v20  ;;  %3973 = vmatmul.mubr.bf16.vlgmr.msra.gmra.mrb[36].mxu0 %v7914_v20  ;;  %v6745_v20 = vld [vmem:[%s7513_s23 + $0x40] ss:$8 sps:$4 sm:$0xff]  }
 0xc7a   : > { %5064 = vmatpush1.bf16.msra.mxu1 %v6733_v4 }
 0xc7b   : > { %5065 = vmatprep.subr.bf16.mxu1 %v6738_v5 }
 0xc7e   : > { %5066 = vmatpush1.bf16.msra.mxu1 %v6736_v6 }
 0xc7f   : > { %5067 = vmatprep.subr.bf16.mxu1 %v6741_v45 }
 0xc82   : > { %5068 = vmatpush1.bf16.msra.mxu1 %v6739_v10 }
 0xc83   : > { %5069 = vmatprep.subr.bf16.mxu1 %v6744_v11 }
 0xc86   : > { %5070 = vmatpush1.bf16.msra.mxu1 %v6742_v13 }
 0xc87   : > { %5071 = vmatprep.subr.bf16.mxu1 %v6747_v16 }
 0xc8a   : > { %5072 = vmatpush1.bf16.msra.mxu1 %v6745_v20 }
 0xc8b   : > { %5073 = vmatprep.subr.bf16.mxu1 %v6750_v19 }
 0xc8e   : > { %5074 = vmatpush1.bf16.msra.mxu1 %v6748_v22 }
 0xc8f   : > { %5075 = vmatprep.subr.bf16.mxu1 %v6753_v41 }
 0xc92   : > { %5076 = vmatpush1.bf16.msra.mxu1 %v6751_v23 }
 0xc93   : > { %5077 = vmatprep.subr.bf16.mxu1 %v6756_v25 }
 0xc96   : > { %5078 = vmatpush1.bf16.msra.mxu1 %v6754_v26 }
 0xc97   : > { %5079 = vmatprep.subr.bf16.mxu1 %v6759_v27 }
 0xc9a   : > { %5080 = vmatpush1.bf16.msra.mxu1 %v6757_v28 }
 0xc9b   : > { %5081 = vmatprep.subr.bf16.mxu1 %v6762_v29 }
 0xc9e   : > { %5082 = vmatpush1.bf16.msra.mxu1 %v6760_v30 }
 0xc9f   : > { %5083 = vmatprep.subr.bf16.mxu1 %v6765_v31 }
 0xca2   : > { %5084 = vmatpush1.bf16.msra.mxu1 %v6763_v32 }
 0xca3   : > { %5085 = vmatprep.subr.bf16.mxu1 %v6768_v33 }
 0xca6   : > { %5086 = vmatpush1.bf16.msra.mxu1 %v6766_v34 }
 0xca7   : > { %5087 = vmatprep.subr.bf16.mxu1 %v6771_v35 }
 0xcaa   : > { %5088 = vmatpush1.bf16.msra.mxu1 %v6769_v9 }
 0xcab   : > { %5089 = vmatprep.subr.bf16.mxu1 %v6774_v36 }
 0xcae   : > { %5090 = vmatpush1.bf16.msra.mxu1 %v6772_v39 }
 0xcaf   : > { %5091 = vmatprep.subr.bf16.mxu1 %v6777_v40 }
 0xcb2   : > { %5092 = vmatpush1.bf16.msra.mxu1 %v6775_v44 }
 0xcb3   : > { %5093 = vmatprep.subr.bf16.mxu1 %v6780_v43 }
 0xcb6   : > { %5094 = vmatpush1.bf16.msra.mxu1 %v6778_v7 }
 0xcb7   : > { %5106 = vmatprep.subr.bf16.mxu1 %v6783_v15 }
 0xd0c   : > { %v3845_v56 = vpop.f32.mrb[16].mxu1  ;;  %v3888_v17 = vpop.f32.mrb[32].mxu0 }
 0xd0d   : > { %v3846_v18 = vadd.f32 %v3845_v56, %v3142_v47  ;;  %v3889_v57 = vadd.f32 %v3888_v17, %v3150_v51  ;;  %v3847_v58 = vpop.f32.mrb[17].mxu1  ;;  %v3890_v59 = vpop.f32.mrb[33].mxu0 }
 0xd0e   : > { %v8020_v60 = vadd.f32 %v3847_v58, %v3146_v52  ;;  %v8022_v61 = vadd.f32 %v3890_v59, %v3154_v54  ;;  %v3849_v24 = vpop.f32.mrb[18].mxu1  ;;  %v3892_v62 = vpop.f32.mrb[34].mxu0 }
 0xd0f   : > { %v8024_v63 = vmul.f32 0.70710677, %v3846_v18  ;;  %v8026_v0 = vmul.f32 0.70710677, %v3889_v57  ;;  %v3851_v50 = vpop.f32.mrb[19].mxu1  ;;  %v3894_v6 = vpop.f32.mrb[35].mxu0  ;;  %v8038_v16 = vadd.f32 %v3849_v24, %v3142_v47  ;;  %v8043_v22 = vadd.f32 %v3892_v62, %v3150_v51 }
 0xd10   : > { %v8029_v38 = vmul.f32 0.70710677, %v8020_v60  ;;  %v8035_v3 = vmul.f32 0.70710677, %v8022_v61  ;;  %v8045_v23 = vadd.f32 %v3851_v50, %v3146_v52  ;;  %v8055_v34 = vadd.f32 %v3894_v6, %v3154_v54 }
 0xd11   : > { %v4047_v21 = vand.u32 2147483647, %v8024_v63  ;;  %v4049_v1 = vand.u32 2147483647, %v8026_v0  ;;  %v8041_v19 = vmul.f32 0.70710677, %v8038_v16 }
 0xd12   : > { %v4048_v2 = vand.u32 2147483647, %v8029_v38  ;;  %v4050_v11 = vand.u32 2147483647, %v8035_v3  ;;  %v8049_v27 = vmul.f32 0.70710677, %v8043_v22 }
 0xd13   : > { %v4063_v55 = vmul.f32 0.3275911, %v4047_v21  ;;  %v4065_v4 = vmul.f32 0.3275911, %v4049_v1  ;;  %v4055_v25 = vand.u32 2147483647, %v8041_v19 }
 0xd14   : > { %v4064_v5 = vmul.f32 0.3275911, %v4048_v2  ;;  %v4066_v20 = vmul.f32 0.3275911, %v4050_v11  ;;  %v4271_v26 = vsub.f32 0.0, %v4047_v21  ;;  %v4273_v28 = vsub.f32 0.0, %v4049_v1 }
 0xd15   : > { %v4079_v45 = vadd.f32 1.0, %v4063_v55  ;;  %v4081_v10 = vadd.f32 1.0, %v4065_v4  ;;  %v4071_v29 = vmul.f32 0.3275911, %v4055_v25  ;;  %v4272_v30 = vsub.f32 0.0, %v4048_v2 }
 0xd16   : > { %v4080_v13 = vadd.f32 1.0, %v4064_v5  ;;  %v4082_v41 = vadd.f32 1.0, %v4066_v20  ;;  %v4057_v31 = vand.u32 2147483647, %v8049_v27  ;;  %v8053_v32 = vmul.f32 0.70710677, %v8045_v23 }
 0xd17   : > { %6949 = vrcp.f32 %v4079_v45  ;;  %v4087_v33 = vadd.f32 1.0, %v4071_v29  ;;  %v4287_v35 = vmul.f32 %v4271_v26, %v4047_v21  ;;  %v4289_v40 = vmul.f32 %v4273_v28, %v4049_v1 }
 0xd18   : > { %6951 = vrcp.f32 %v4081_v10  ;;  %v4073_v9 = vmul.f32 0.3275911, %v4057_v31  ;;  %v8058_v36 = vand.u32 2147483647, %v8053_v32  ;;  %v4274_v44 = vsub.f32 0.0, %v4050_v11 }
 0xd19   : > { %6953 = vrcp.f32 %v4080_v13  ;;  %v4288_v15 = vmul.f32 %v4272_v30, %v4048_v2  ;;  %v8066_v51 = vmul.f32 0.5, %v3846_v18  ;;  %v8068_v52 = vmul.f32 0.5, %v3889_v57 }
 0xd1a   : > { %6955 = vrcp.f32 %v4082_v41  ;;  %v4089_v47 = vadd.f32 1.0, %v4073_v9  ;;  %v4072_v49 = vmul.f32 0.3275911, %v8058_v36  ;;  %v8072_v54 = vmul.f32 0.70710677, %v8055_v34 }
 0xd1b   : > { %6957 = vrcp.f32 %v4087_v33  ;;  %v4303_v17 = vmul.f32 1.442695, %v4287_v35  ;;  %v4307_v62 = vmul.f32 1.442695, %v4289_v40  ;;  %v4290_v21 = vmul.f32 %v4274_v44, %v4050_v11 }
 0xd1c   : > { %6959 = vrcp.f32 %v4089_v47  ;;  %v4088_v58 = vadd.f32 1.0, %v4072_v49  ;;  %v8077_v1 = vand.u32 2147483647, %v8072_v54  ;;  %v4305_v2 = vmul.f32 1.442695, %v4288_v15 }
 0xd1d   : > { %v4279_v50 = vsub.f32 0.0, %v4055_v25  ;;  %v4281_v5 = vsub.f32 0.0, %v4057_v31  ;;  %vm4015_vm6 = vcmp.ge.f32.partialorder %v8024_v63, 0.0  ;;  %v4309_v20 = vmul.f32 1.442695, %v4290_v21 }
 0xd1e   : > { %6961 = vrcp.f32 %v4088_v58  ;;  %v4074_v6 = vmul.f32 0.3275911, %v8077_v1  ;;  %vm4017_vm7 = vcmp.ge.f32.partialorder %v8026_v0, 0.0  ;;  %v4280_v49 = vsub.f32 0.0, %v8058_v36 }
 0xd1f   : > { %6963 = vpow2.f32 %v4303_v17  ;;  %v4295_v35 = vmul.f32 %v4279_v50, %v4055_v25  ;;  %v4297_v9 = vmul.f32 %v4281_v5, %v4057_v31  ;;  %vm4016_vm8 = vcmp.ge.f32.partialorder %v8029_v38, 0.0 }
 0xd20   : > { %6965 = vpow2.f32 %v4307_v62  ;;  %v4090_v41 = vadd.f32 1.0, %v4074_v6  ;;  %vm4023_vm9 = vcmp.ge.f32.partialorder %v8041_v19, 0.0  ;;  %vm4025_vm10 = vcmp.ge.f32.partialorder %v8049_v27, 0.0 }
 0xd21   : > { %v8060_v39 = vpop.eup %6949  ;;  %6967 = vpow2.f32 %v4305_v2  ;;  %v4323_v21 = vmul.f32 1.442695, %v4297_v9  ;;  %vm4018_vm11 = vcmp.ge.f32.partialorder %v8035_v3, 0.0  ;;  %v3991_v19 = vmul.f32 0.5, %v8038_v16 }
 0xd22   : > { %v8062_v43 = vpop.eup %6951  ;;  %v4127_v7 = vmul.f32 1.0614054, %v8060_v39  ;;  %6969 = vrcp.f32 %v4090_v41  ;;  %vm4024_vm12 = vcmp.ge.f32.partialorder %v8053_v32, 0.0  ;;  %vm4026_vm13 = vcmp.ge.f32.partialorder %v8072_v54, 0.0 }
 0xd23   : > { %v4129_v53 = vmul.f32 1.0614054, %v8062_v43  ;;  %v8074_v59 = vpop.eup %6953  ;;  %6971 = vpow2.f32 %v4309_v20 }
 0xd24   : > { %v4143_v56 = vadd.f32 -1.4531521, %v4127_v7  ;;  %v4128_v57 = vmul.f32 1.0614054, %v8074_v59  ;;  %v8081_v55 = vpop.eup %6955 }
 0xd25   : > { %v4145_v24 = vadd.f32 -1.4531521, %v4129_v53  ;;  %v4130_v11 = vmul.f32 1.0614054, %v8081_v55  ;;  %v8089_v30 = vpop.eup %6957 }
 0xd26   : > { %v4159_v18 = vmul.f32 %v8060_v39, %v4143_v56  ;;  %v4144_v10 = vadd.f32 -1.4531521, %v4128_v57  ;;  %v4135_v15 = vmul.f32 1.0614054, %v8089_v30  ;;  %v8096_v53 = vpop.eup %6959 }
 0xd27   : > { %v4161_v4 = vmul.f32 %v8062_v43, %v4145_v24  ;;  %v4146_v29 = vadd.f32 -1.4531521, %v4130_v11  ;;  %v4319_v24 = vmul.f32 1.442695, %v4295_v35  ;;  %v4137_v62 = vmul.f32 1.0614054, %v8096_v53 }
 0xd28   : > { %v4175_v45 = vadd.f32 1.4214138, %v4159_v18  ;;  %v4160_v28 = vmul.f32 %v8074_v59, %v4144_v10  ;;  %v4151_v17 = vadd.f32 -1.4531521, %v4135_v15  ;;  %v4282_v10 = vsub.f32 0.0, %v8077_v1 }
 0xd29   : > { %v4177_v13 = vadd.f32 1.4214138, %v4161_v4  ;;  %v4162_v7 = vmul.f32 %v8081_v55, %v4146_v29  ;;  %v8104_v4 = vpop.eup %6961  ;;  %v4153_v6 = vadd.f32 -1.4531521, %v4137_v62  ;;  %v7240_v29 = vmov -1.0  }
 0xd2a   : > { %v4191_v26 = vmul.f32 %v8060_v39, %v4175_v45  ;;  %v4176_v44 = vadd.f32 1.4214138, %v4160_v28  ;;  %v4167_v50 = vmul.f32 %v8089_v30, %v4151_v17  ;;  %v4296_v45 = vmul.f32 %v4280_v49, %v8058_v36  ;;  %v6964_v11 = vpop.eup %6963 }
 0xd2b   : > { %v4193_v33 = vmul.f32 %v8062_v43, %v4177_v13  ;;  %v4178_v31 = vadd.f32 1.4214138, %v4162_v7  ;;  %v6966_v28 = vpop.eup %6965  ;;  %6973 = vpow2.f32 %v4319_v24  ;;  %v4169_v35 = vmul.f32 %v8096_v53, %v4153_v6 }
 0xd2c   : > { %v4207_v40 = vadd.f32 -0.28449672, %v4191_v26  ;;  %v4192_v25 = vmul.f32 %v8074_v59, %v4176_v44  ;;  %v4183_v26 = vadd.f32 1.4214138, %v4167_v50  ;;  %v4136_v36 = vmul.f32 1.0614054, %v8104_v4  ;;  %v6968_v9 = vpop.eup %6967 }
 0xd2d   : > { %v4209_v47 = vadd.f32 -0.28449672, %v4193_v33  ;;  %v4194_v2 = vmul.f32 %v8081_v55, %v4178_v31  ;;  %v4031_v33 = vsel %vm4015_vm6, 1.0, %v7240_v29  ;;  %v8118_v15 = vpop.eup %6969  ;;  %v4033_v63 = vsel %vm4017_vm7, 1.0, %v7240_v29 }
 0xd2e   : > { %v4223_v56 = vmul.f32 %v8060_v39, %v4207_v40  ;;  %v4208_v57 = vadd.f32 -0.28449672, %v4192_v25  ;;  %v4199_v7 = vmul.f32 %v8089_v30, %v4183_v26  ;;  %6975 = vpow2.f32 %v4323_v21  ;;  %v6972_v17 = vpop.eup %6971 }
 0xd2f   : > { %v4225_v58 = vmul.f32 %v8062_v43, %v4209_v47  ;;  %v4210_v41 = vadd.f32 -0.28449672, %v4194_v2  ;;  %v4185_v47 = vadd.f32 1.4214138, %v4169_v35  ;;  %v4152_v49 = vadd.f32 -1.4531521, %v4136_v36 }
 0xd30   : > { %v4239_v18 = vadd.f32 0.2548296, %v4223_v56  ;;  %v4224_v20 = vmul.f32 %v8074_v59, %v4208_v57  ;;  %v4215_v25 = vadd.f32 -0.28449672, %v4199_v7  ;;  %v4321_v31 = vmul.f32 1.442695, %v4296_v45 }
 0xd31   : > { %v4241_v5 = vadd.f32 0.2548296, %v4225_v58  ;;  %v4201_v58 = vmul.f32 %v8096_v53, %v4185_v47  ;;  %v4168_v24 = vmul.f32 %v8104_v4, %v4152_v49  ;;  %v4138_v0 = vmul.f32 1.0614054, %v8118_v15 }
 0xd32   : > { %v4255_v13 = vmul.f32 %v8060_v39, %v4239_v18  ;;  %v4240_v44 = vadd.f32 0.2548296, %v4224_v20  ;;  %v4226_v39 = vmul.f32 %v8081_v55, %v4210_v41  ;;  %v4231_v57 = vmul.f32 %v8089_v30, %v4215_v25 }
 0xd33   : > { %v4257_v40 = vmul.f32 %v8062_v43, %v4241_v5  ;;  %v4298_v43 = vmul.f32 %v4282_v10, %v8077_v1  ;;  %v4217_v2 = vadd.f32 -0.28449672, %v4201_v58  ;;  %v4184_v50 = vadd.f32 1.4214138, %v4168_v24  ;;  %v7021_v1 = vld [vmem:[%s7511_s21 + $0x20] sm:$0xff] }
 0xd34   : > { %v4335_v56 = vmul.f32 %v6964_v11, %v4255_v13  ;;  %v4256_v21 = vmul.f32 %v8074_v59, %v4240_v44  ;;  %v4242_v18 = vadd.f32 0.2548296, %v4226_v39  ;;  %v4154_v5 = vadd.f32 -1.4531521, %v4138_v0  ;;  %v1752_v13 = vld [vmem:[%s7511_s21 + $0x30] sm:$0xff] }
 0xd35   : > { %v4337_v62 = vmul.f32 %v6966_v28, %v4257_v40  ;;  %v8132_v6 = vrot.slane %v7021_v1, %v8010_v14  ;;  %v4247_v10 = vadd.f32 0.2548296, %v4231_v57  ;;  %6977 = vpow2.f32 %v4321_v31  ;;  %v6974_v40 = vpop.eup %6973 }
 0xd36   : > { %v4351_v45 = vsub.f32 1.0, %v4335_v56  ;;  %v4325_v11 = vmul.f32 1.442695, %v4298_v43  ;;  %v4233_v20 = vmul.f32 %v8096_v53, %v4217_v2  ;;  %v4200_v59 = vmul.f32 %v8104_v4, %v4184_v50 }
 0xd37   : > { %v4170_v41 = vmul.f32 %v8118_v15, %v4154_v5  ;;  %v4353_v26 = vsub.f32 1.0, %v4337_v62  ;;  %v4336_v28 = vmul.f32 %v6968_v9, %v4256_v21  ;;  %v4258_v35 = vmul.f32 %v8081_v55, %v4242_v18 }
 0xd38   : > { %v4263_v36 = vmul.f32 %v8089_v30, %v4247_v10  ;;  %v4249_v44 = vadd.f32 0.2548296, %v4233_v20  ;;  %v4216_v39 = vadd.f32 -0.28449672, %v4200_v59  ;;  %v8142_v47 = vrot.slane %v1752_v13, %v8010_v14  ;;  %v6976_v31 = vpop.eup %6975 }
 0xd39   : > { %v4186_v7 = vadd.f32 1.4214138, %v4170_v41  ;;  %v4367_v49 = vmul.f32 %v4351_v45, %v4031_v33  ;;  %v4032_v56 = vsel %vm4016_vm8, 1.0, %v7240_v29  ;;  %6979 = vpow2.f32 %v4325_v11 }
 0xd3a   : > { %v4343_v25 = vmul.f32 %v6974_v40, %v4263_v36  ;;  %v4039_v55 = vsel %vm4023_vm9, 1.0, %v7240_v29  ;;  %v4265_v30 = vmul.f32 %v8096_v53, %v4249_v44  ;;  %v4232_v9 = vmul.f32 %v8104_v4, %v4216_v39 }
 0xd3b   : > { %v4202_v43 = vmul.f32 %v8118_v15, %v4186_v7  ;;  %v4352_v58 = vsub.f32 1.0, %v4336_v28  ;;  %v4338_v24 = vmul.f32 %v6972_v17, %v4258_v35  ;;  %v4369_v38 = vmul.f32 %v4353_v26, %v4033_v63  ;;  %v1753_v7 = vld [vmem:[%s7511_s21 + $0x38] sm:$0xff] }
 0xd3c   : > { %v4359_v33 = vsub.f32 1.0, %v4343_v25  ;;  %v4345_v0 = vmul.f32 %v6976_v31, %v4265_v30  ;;  %v4248_v62 = vadd.f32 0.2548296, %v4232_v9  ;;  %v4383_v18 = vadd.f32 1.0, %v4367_v49 }
 0xd3d   : > { %v4218_v21 = vadd.f32 -0.28449672, %v4202_v43  ;;  %v4041_v53 = vsel %vm4025_vm10, 1.0, %v7240_v29  ;;  %v4368_v1 = vmul.f32 %v4352_v58, %v4032_v56  ;;  %v4354_v27 = vsub.f32 1.0, %v4338_v24  ;;  %v7022_v56 = vld [vmem:[%s7511_s21 + $0x28] sm:$0xff] }
 0xd3e   : > { %v4375_v57 = vmul.f32 %v4359_v33, %v4039_v55  ;;  %v4361_v2 = vsub.f32 1.0, %v4345_v0  ;;  %v4264_v50 = vmul.f32 %v8104_v4, %v4248_v62  ;;  %v4385_v45 = vadd.f32 1.0, %v4369_v38 }
 0xd3f   : > { %v4234_v17 = vmul.f32 %v8118_v15, %v4218_v21  ;;  %v6978_v5 = vpop.eup %6977  ;;  %v4399_v16 = vmul.f32 %v4383_v18, %v8066_v51  ;;  %v4034_v20 = vsel %vm4018_vm11, 1.0, %v7240_v29  ;;  %v3993_v59 = vmul.f32 0.5, %v8043_v22  ;;  %v6781_v18 = vld [vmem:[%s7513_s23 + $0x100] ss:$8 sps:$4 sm:$0xff]  }
 0xd40   : > { %v4391_v63 = vadd.f32 1.0, %v4375_v57  ;;  %v4377_v10 = vmul.f32 %v4361_v2, %v4041_v53  ;;  %v4344_v11 = vmul.f32 %v6978_v5, %v4264_v50  ;;  %v4040_v26 = vsel %vm4024_vm12, 1.0, %v7240_v29 }
 0xd41   : > { %v4250_v13 = vadd.f32 0.2548296, %v4234_v17  ;;  %v4384_v36 = vadd.f32 1.0, %v4368_v1  ;;  %v4370_v40 = vmul.f32 %v4354_v27, %v4034_v20  ;;  %v8169_v3 = vmul.f32 %v4385_v45, %v8068_v52 }
 0xd42   : > { %v4407_v4 = vmul.f32 %v4391_v63, %v3991_v19  ;;  %v4393_v41 = vadd.f32 1.0, %v4377_v10  ;;  %v4360_v28 = vsub.f32 1.0, %v4344_v11  ;;  %v3984_v49 = vmul.f32 0.5, %v8020_v60  ;;  %v6786_v63 = vld [vmem:[%s7513_s23 + $0x114] ss:$8 sps:$4 sm:$0xff]  }
 0xd43   : > { %v4266_v32 = vmul.f32 %v8118_v15, %v4250_v13  ;;  %v6980_v35 = vpop.eup %6979  ;;  %v8177_v25 = vrot.slane %v7022_v56, %v8010_v14  ;;  %v3992_v31 = vmul.f32 0.5, %v8045_v23  ;;  %v4386_v30 = vadd.f32 1.0, %v4370_v40 }
 0xd44   : > { %v4415_v44 = vpack.c.bf16 %v4407_v4, %v4399_v16  ;;  %v8171_v51 = vmul.f32 %v4393_v41, %v3993_v59  ;;  %v4376_v39 = vmul.f32 %v4360_v28, %v4040_v26  ;;  %v4400_v55 = vmul.f32 %v4384_v36, %v3984_v49  ;;  %v6784_v4 = vld [vmem:[%s7513_s23 + $0x110] ss:$8 sps:$4 sm:$0xff]   ;;  %v6789_v26 = vld [vmem:[%s7513_s23 + $0x124] ss:$8 sps:$4 sm:$0xff]   ;;  %v6792_v49 = vld [vmem:[%s7513_s23 + $0x134] ss:$8 sps:$4 sm:$0xff]  }
 0xd45   : > { %v4346_v22 = vmul.f32 %v6980_v35, %v4266_v32  ;;  %v4042_v9 = vsel %vm4026_vm13, 1.0, %v7240_v29  ;;  %v8184_v60 = vrot.slane %v1753_v7, %v8010_v14  ;;  %v3986_v21 = vmul.f32 0.5, %v8022_v61 }
 0xd46   : > { %v4417_v15 = vpack.c.bf16 %v8171_v51, %v8169_v3  ;;  %v4392_v54 = vadd.f32 1.0, %v4376_v39  ;;  %v3994_v2 = vmul.f32 0.5, %v8055_v34  ;;  %v6787_v39 = vld [vmem:[%s7513_s23 + $0x120] ss:$8 sps:$4 sm:$0xff]   ;;  %vm5262_vm6 = vcmask (!%p6198_p11), 130048  }
 0xd47   : > { %v4362_v52 = vsub.f32 1.0, %v4346_v22  ;;  %v4402_v10 = vmul.f32 %v4386_v30, %v3986_v21  ;;  %v6835_v51 = vld [vmem:[%s7513_s23 + $0x220] ss:$8 sps:$4 sm:$0xff]  }
 0xd48   : > { %v4408_v24 = vmul.f32 %v4392_v54, %v3992_v31 }
 0xd49   : > { %v4378_v33 = vmul.f32 %v4362_v52, %v4042_v9  ;;  %v6790_v52 = vld [vmem:[%s7513_s23 + $0x130] ss:$8 sps:$4 sm:$0xff]   ;;  %v6795_v9 = vld [vmem:[%s7513_s23 + $0x144] ss:$8 sps:$4 sm:$0xff]  }
 0xd4a   : > { %v4416_v17 = vpack.c.bf16 %v4408_v24, %v4400_v55 }
 0xd4b   : > { %v4394_v50 = vadd.f32 1.0, %v4378_v33  ;;  %v6793_v33 = vld [vmem:[%s7513_s23 + $0x140] ss:$8 sps:$4 sm:$0xff]  }
 0xd4c   : > { %v3931_v43 = vpop.f32.mrb[20].mxu1  ;;  %v3974_v58 = vpop.f32.mrb[36].mxu0  ;;  %5095 = vmatprep.mubr.bf16.mxu1 %v4416_v17 }
 0xd4d   : > { %v8187_v38 = vadd.f32 %v3931_v43, %v8132_v6  ;;  %v8190_v23 = vadd.f32 %v3974_v58, %v8142_v47  ;;  %v3933_v0 = vpop.f32.mrb[21].mxu1  ;;  %v3976_v62 = vpop.f32.mrb[37].mxu0  ;;  %v4410_v11 = vmul.f32 %v4394_v50, %v3994_v2  ;;  %5096 = vmatmul.mubr.bf16.vlgmr.msra.gmra.mrb[24].mxu1 %v4415_v44 }
 0xd4e   : > { %v8195_v19 = vadd.f32 %v3933_v0, %v8177_v25  ;;  %v3935_v57 = vpop.f32.mrb[22].mxu1  ;;  %v3978_v53 = vpop.f32.mrb[38].mxu0  ;;  %v8212_v13 = vadd.f32 %v3976_v62, %v8184_v60  ;;  %5107 = vmatpush1.bf16.msra.mxu1 %v6781_v18 }
 0xd4f   : > { %v8199_v5 = vmul.f32 0.70710677, %v8187_v38  ;;  %v3937_v1 = vpop.f32.mrb[23].mxu1  ;;  %v8201_v27 = vpop.f32.mrb[39].mxu0  ;;  %v8205_v61 = vmul.f32 0.70710677, %v8190_v23  ;;  %v4418_v20 = vpack.c.bf16 %v4410_v11, %v4402_v10  ;;  %5108 = vmatprep.subr.bf16.mxu1 %v6786_v63  ;;  %v8228_v44 = vadd.f32 %v3935_v57, %v8132_v6 }
 0xd50   : > { %v8208_v45 = vmul.f32 0.70710677, %v8195_v19  ;;  %v8224_v35 = vmul.f32 0.70710677, %v8212_v13  ;;  %v8240_v54 = vadd.f32 %v3978_v53, %v8142_v47  ;;  %v8247_v30 = vadd.f32 %v3937_v1, %v8177_v25  ;;  %v6798_v25 = vld [vmem:[%s7513_s23 + $0x154] ss:$8 sps:$4 sm:$0xff]  }
 0xd51   : > { %v4051_v34 = vand.u32 2147483647, %v8199_v5  ;;  %v8215_v16 = vand.u32 2147483647, %v8205_v61  ;;  %5138 = vmatprep.mubr.bf16.mxu1 %v4418_v20  ;;  %v8237_v31 = vmul.f32 0.70710677, %v8228_v44  ;;  %v8274_v1 = vadd.f32 %v8201_v27, %v8184_v60 }
 0xd52   : > { %v8221_v28 = vand.u32 2147483647, %v8208_v45  ;;  %5109 = vmatpush1.bf16.msra.mxu1 %v6784_v4  ;;  %v8232_v22 = vand.u32 2147483647, %v8224_v35  ;;  %v8252_v24 = vmul.f32 0.70710677, %v8240_v54 }
 0xd53   : > { %v4067_v59 = vmul.f32 0.3275911, %v4051_v34  ;;  %v4069_v41 = vmul.f32 0.3275911, %v8215_v16  ;;  %5110 = vmatprep.subr.bf16.mxu1 %v6789_v26  ;;  %v8244_v55 = vand.u32 2147483647, %v8237_v31 }
 0xd54   : > { %v4068_v40 = vmul.f32 0.3275911, %v8221_v28  ;;  %v4070_v56 = vmul.f32 0.3275911, %v8232_v22  ;;  %v4275_v43 = vsub.f32 0.0, %v4051_v34  ;;  %v4277_v57 = vsub.f32 0.0, %v8215_v16 }
 0xd55   : > { %v4083_v32 = vadd.f32 1.0, %v4067_v59  ;;  %v4085_v36 = vadd.f32 1.0, %v4069_v41  ;;  %v4075_v58 = vmul.f32 0.3275911, %v8244_v55  ;;  %v8255_v47 = vmul.f32 0.70710677, %v8247_v30 }
 0xd56   : > { %v4084_v7 = vadd.f32 1.0, %v4068_v40  ;;  %v4086_v6 = vadd.f32 1.0, %v4070_v56  ;;  %5111 = vmatpush1.bf16.msra.mxu1 %v6787_v39  ;;  %v8259_v62 = vand.u32 2147483647, %v8252_v24  ;;  %v4291_v18 = vmul.f32 %v4275_v43, %v4051_v34  ;;  %v6796_v63 = vld [vmem:[%s7513_s23 + $0x150] ss:$8 sps:$4 sm:$0xff]  }
 0xd57   : > { %6981 = vrcp.f32 %v4083_v32  ;;  %5112 = vmatprep.subr.bf16.mxu1 %v6792_v49  ;;  %v4091_v0 = vadd.f32 1.0, %v4075_v58  ;;  %v8266_v53 = vand.u32 2147483647, %v8255_v47  ;;  %v4276_v11 = vsub.f32 0.0, %v8221_v28  ;;  %v6801_v59 = vld [vmem:[%s7513_s23 + $0x164] ss:$8 sps:$4 sm:$0xff]  }
 0xd58   : > { %6983 = vrcp.f32 %v4085_v36  ;;  %v4077_v17 = vmul.f32 0.3275911, %v8259_v62  ;;  %v4311_v26 = vmul.f32 1.442695, %v4291_v18  ;;  %v4293_v60 = vmul.f32 %v4277_v57, %v8215_v16  ;;  %v6799_v16 = vld [vmem:[%s7513_s23 + $0x160] ss:$8 sps:$4 sm:$0xff]  }
 0xd59   : > { %6985 = vrcp.f32 %v4084_v7  ;;  %v4076_v34 = vmul.f32 0.3275911, %v8266_v53  ;;  %v8287_v39 = vmul.f32 0.70710677, %v8274_v1  ;;  %v4292_v56 = vmul.f32 %v4276_v11, %v8221_v28 }
 0xd5a   : > { %6987 = vrcp.f32 %v4086_v6  ;;  %5113 = vmatpush1.bf16.msra.mxu1 %v6790_v52  ;;  %v4093_v4 = vadd.f32 1.0, %v4077_v17  ;;  %v4283_v6 = vsub.f32 0.0, %v8244_v55  ;;  %v6804_v52 = vld [vmem:[%s7513_s23 + $0x174] ss:$8 sps:$4 sm:$0xff]   ;;  %vm4019_vm14 = vcmp.ge.f32.partialorder %v8199_v5, 0.0 }
 0xd5b   : > { %5114 = vmatprep.subr.bf16.mxu1 %v6795_v9  ;;  %6989 = vrcp.f32 %v4091_v0  ;;  %v4092_v27 = vadd.f32 1.0, %v4076_v34  ;;  %v4315_v0 = vmul.f32 1.442695, %v4293_v60  ;;  %v8300_v57 = vand.u32 2147483647, %v8287_v39 }
 0xd5c   : > { %6991 = vrcp.f32 %v4093_v4  ;;  %v4285_v11 = vsub.f32 0.0, %v8259_v62  ;;  %v6807_v34 = vld [vmem:[%s7513_s23 + $0x184] ss:$8 sps:$4 sm:$0xff]   ;;  %vm4021_vm15 = vcmp.ge.f32.partialorder %v8205_v61, 0.0  ;;  %vm4020_vm0 = vcmp.ge.f32.partialorder %v8208_v45, 0.0 }
 0xd5d   : > { %6993 = vrcp.f32 %v4092_v27  ;;  %v4278_v27 = vsub.f32 0.0, %v8232_v22  ;;  %v4286_v5 = vsub.f32 0.0, %v8300_v57  ;;  %vm4027_vm1 = vcmp.ge.f32.partialorder %v8237_v31, 0.0 }
 0xd5e   : > { %5115 = vmatpush1.bf16.msra.mxu1 %v6793_v33  ;;  %6995 = vpow2.f32 %v4311_v26  ;;  %v4036_v61 = vsel %vm4020_vm0, 1.0, %v7240_v29  ;;  %vm4029_vm2 = vcmp.ge.f32.partialorder %v8252_v24, 0.0  ;;  %vm4028_vm3 = vcmp.ge.f32.partialorder %v8255_v47, 0.0  ;;  %v6823_v24 = vld [vmem:[%s7513_s23 + $0x1e0] ss:$8 sps:$4 sm:$0xff]  }
 0xd5f   : > { %5116 = vmatprep.subr.bf16.mxu1 %v6798_v25  ;;  %6997 = vpow2.f32 %v4315_v0  ;;  %vm4022_vm4 = vcmp.ge.f32.partialorder %v8224_v35, 0.0  ;;  %vm4030_vm5 = vcmp.ge.f32.partialorder %v8287_v39, 0.0  ;;  %v6832_v39 = vld [vmem:[%s7513_s23 + $0x210] ss:$8 sps:$4 sm:$0xff]  }
 0xd61   : > { %v8262_v21 = vpop.eup %6981 }
 0xd62   : > { %v8268_v2 = vpop.eup %6983  ;;  %v4131_v50 = vmul.f32 1.0614054, %v8262_v21  ;;  %5117 = vmatpush1.bf16.msra.mxu1 %v6796_v63  ;;  %v4313_v63 = vmul.f32 1.442695, %v4292_v56 }
 0xd63   : > { %v4133_v10 = vmul.f32 1.0614054, %v8268_v2  ;;  %v8281_v41 = vpop.eup %6985  ;;  %5118 = vmatprep.subr.bf16.mxu1 %v6801_v59 }
 0xd64   : > { %v4147_v20 = vadd.f32 -1.4531521, %v4131_v50  ;;  %v4132_v40 = vmul.f32 1.0614054, %v8281_v41  ;;  %v8289_v7 = vpop.eup %6987  ;;  %v6802_v50 = vld [vmem:[%s7513_s23 + $0x170] ss:$8 sps:$4 sm:$0xff]  }
 0xd65   : > { %v4149_v32 = vadd.f32 -1.4531521, %v4133_v10  ;;  %v4134_v58 = vmul.f32 1.0614054, %v8289_v7  ;;  %v4299_v10 = vmul.f32 %v4283_v6, %v8244_v55  ;;  %v4284_v55 = vsub.f32 0.0, %v8266_v53 }
 0xd66   : > { %v4163_v36 = vmul.f32 %v8262_v21, %v4147_v20  ;;  %v4148_v43 = vadd.f32 -1.4531521, %v4132_v40  ;;  %5119 = vmatpush1.bf16.msra.mxu1 %v6799_v16  ;;  %v8308_v20 = vpop.eup %6989 }
 0xd67   : > { %v4165_v49 = vmul.f32 %v8268_v2, %v4149_v32  ;;  %v4150_v18 = vadd.f32 -1.4531521, %v4134_v58  ;;  %v4078_v32 = vmul.f32 0.3275911, %v8300_v57  ;;  %5120 = vmatprep.subr.bf16.mxu1 %v6804_v52  ;;  %v6805_v52 = vld [vmem:[%s7513_s23 + $0x180] ss:$8 sps:$4 sm:$0xff]   ;;  %v8319_v58 = vpop.eup %6991 }
 0xd68   : > { %v4179_v9 = vadd.f32 1.4214138, %v4163_v36  ;;  %v4164_v28 = vmul.f32 %v8281_v41, %v4148_v43  ;;  %v4139_v36 = vmul.f32 1.0614054, %v8308_v20  ;;  %v4327_v43 = vmul.f32 1.442695, %v4299_v10 }
 0xd69   : > { %v4181_v33 = vadd.f32 1.4214138, %v4165_v49  ;;  %v4166_v26 = vmul.f32 %v8289_v7, %v4150_v18  ;;  %v4094_v6 = vadd.f32 1.0, %v4078_v32  ;;  %v6810_v18 = vld [vmem:[%s7513_s23 + $0x194] ss:$8 sps:$4 sm:$0xff]  }
 0xd6a   : > { %v4195_v25 = vmul.f32 %v8262_v21, %v4179_v9  ;;  %v4180_v59 = vadd.f32 1.4214138, %v4164_v28  ;;  %v4155_v9 = vadd.f32 -1.4531521, %v4139_v36  ;;  %5121 = vmatpush1.bf16.msra.mxu1 %v6802_v50  ;;  %v4301_v28 = vmul.f32 %v4285_v11, %v8259_v62  ;;  %v6808_v11 = vld [vmem:[%s7513_s23 + $0x190] ss:$8 sps:$4 sm:$0xff]  }
 0xd6b   : > { %v4197_v17 = vmul.f32 %v8268_v2, %v4181_v33  ;;  %v4182_v56 = vadd.f32 1.4214138, %v4166_v26  ;;  %6999 = vrcp.f32 %v4094_v6  ;;  %5122 = vmatprep.subr.bf16.mxu1 %v6807_v34  ;;  %v4141_v10 = vmul.f32 1.0614054, %v8319_v58 }
 0xd6c   : > { %v4211_v4 = vadd.f32 -0.28449672, %v4195_v25  ;;  %v4196_v49 = vmul.f32 %v8281_v41, %v4180_v59  ;;  %7001 = vpow2.f32 %v4313_v63  ;;  %v4171_v0 = vmul.f32 %v8308_v20, %v4155_v9 }
 0xd6d   : > { %v4213_v60 = vadd.f32 -0.28449672, %v4197_v17  ;;  %v8323_v17 = vpop.eup %6993  ;;  %v4300_v50 = vmul.f32 %v4284_v55, %v8266_v53  ;;  %v4198_v26 = vmul.f32 %v8289_v7, %v4182_v56  ;;  %v4157_v36 = vadd.f32 -1.4531521, %v4141_v10  ;;  %v6816_v10 = vld [vmem:[%s7513_s23 + $0x1b4] ss:$8 sps:$4 sm:$0xff]  }
 0xd6e   : > { %v4227_v40 = vmul.f32 %v8262_v21, %v4211_v4  ;;  %v4212_v25 = vadd.f32 -0.28449672, %v4196_v49  ;;  %v4140_v62 = vmul.f32 1.0614054, %v8323_v17  ;;  %v6996_v34 = vpop.eup %6995  ;;  %v4187_v63 = vadd.f32 1.4214138, %v4171_v0  ;;  %5123 = vmatpush1.bf16.msra.mxu1 %v6805_v52 }
 0xd6f   : > { %v4229_v16 = vmul.f32 %v8268_v2, %v4213_v60  ;;  %v4294_v60 = vmul.f32 %v4278_v27, %v8232_v22  ;;  %7003 = vpow2.f32 %v4327_v43  ;;  %v4331_v53 = vmul.f32 1.442695, %v4301_v28  ;;  %5124 = vmatprep.subr.bf16.mxu1 %v6810_v18  ;;  %v6811_v52 = vld [vmem:[%s7513_s23 + $0x1a0] ss:$8 sps:$4 sm:$0xff]  }
 0xd70   : > { %v4243_v33 = vadd.f32 0.2548296, %v4227_v40  ;;  %v4228_v59 = vmul.f32 %v8281_v41, %v4212_v25  ;;  %v6813_v40 = vld [vmem:[%s7513_s23 + $0x1a4] ss:$8 sps:$4 sm:$0xff]   ;;  %v4156_v55 = vadd.f32 -1.4531521, %v4140_v62  ;;  %v4203_v6 = vmul.f32 %v8308_v20, %v4187_v63 }
 0xd71   : > { %v4245_v4 = vadd.f32 0.2548296, %v4229_v16  ;;  %v8336_v56 = vmul.f32 0.5, %v8187_v38  ;;  %v4173_v16 = vmul.f32 %v8319_v58, %v4157_v36  ;;  %v4035_v22 = vsel %vm4019_vm14, 1.0, %v7240_v29 }
 0xd72   : > { %v4259_v32 = vmul.f32 %v8262_v21, %v4243_v33  ;;  %v4244_v49 = vadd.f32 0.2548296, %v4228_v59  ;;  %v4329_v21 = vmul.f32 1.442695, %v4300_v50  ;;  %v4214_v9 = vadd.f32 -0.28449672, %v4198_v26  ;;  %5125 = vmatpush1.bf16.msra.mxu1 %v6808_v11  ;;  %v6998_v50 = vpop.eup %6997 }
 0xd73   : > { %v4261_v27 = vmul.f32 %v8268_v2, %v4245_v4  ;;  %v4172_v43 = vmul.f32 %v8323_v17, %v4156_v55  ;;  %v4317_v25 = vmul.f32 1.442695, %v4294_v60  ;;  %v4219_v38 = vadd.f32 -0.28449672, %v4203_v6  ;;  %5126 = vmatprep.subr.bf16.mxu1 %v6813_v40  ;;  %v6814_v11 = vld [vmem:[%s7513_s23 + $0x1b0] ss:$8 sps:$4 sm:$0xff]  }
 0xd74   : > { %v4339_v33 = vmul.f32 %v6996_v34, %v4259_v32  ;;  %v4189_v28 = vadd.f32 1.4214138, %v4173_v16  ;;  %v4260_v18 = vmul.f32 %v8281_v41, %v4244_v49  ;;  %7005 = vpow2.f32 %v4331_v53  ;;  %v6819_v55 = vld [vmem:[%s7513_s23 + $0x1c4] ss:$8 sps:$4 sm:$0xff]  }
 0xd75   : > { %v4188_v0 = vadd.f32 1.4214138, %v4172_v43  ;;  %v4235_v2 = vmul.f32 %v8308_v20, %v4219_v38  ;;  %7007 = vpow2.f32 %v4329_v21  ;;  %v8352_v59 = vpop.eup %6999  ;;  %v4341_v26 = vmul.f32 %v6998_v50, %v4261_v27 }
 0xd76   : > { %v4205_v4 = vmul.f32 %v8319_v58, %v4189_v28  ;;  %v4230_v41 = vmul.f32 %v8289_v7, %v4214_v9  ;;  %v7002_v34 = vpop.eup %7001  ;;  %v4355_v32 = vsub.f32 1.0, %v4339_v33  ;;  %7009 = vpow2.f32 %v4317_v25  ;;  %5127 = vmatpush1.bf16.msra.mxu1 %v6811_v52  ;;  %v6817_v52 = vld [vmem:[%s7513_s23 + $0x1c0] ss:$8 sps:$4 sm:$0xff]  }
 0xd77   : > { %v4204_v62 = vmul.f32 %v8323_v17, %v4188_v0  ;;  %v4251_v60 = vadd.f32 0.2548296, %v4235_v2  ;;  %v4037_v36 = vsel %vm4021_vm15, 1.0, %v7240_v29  ;;  %v4340_v40 = vmul.f32 %v7002_v34, %v4260_v18  ;;  %5128 = vmatprep.subr.bf16.mxu1 %v6816_v10 }
 0xd78   : > { %v4221_v63 = vadd.f32 -0.28449672, %v4205_v4  ;;  %v4302_v53 = vmul.f32 %v4286_v5, %v8300_v57  ;;  %v4142_v21 = vmul.f32 1.0614054, %v8352_v59  ;;  %v4357_v9 = vsub.f32 1.0, %v4341_v26 }
 0xd79   : > { %v4220_v49 = vadd.f32 -0.28449672, %v4204_v62  ;;  %v4267_v6 = vmul.f32 %v8308_v20, %v4251_v60  ;;  %v7004_v27 = vpop.eup %7003  ;;  %v4246_v43 = vadd.f32 0.2548296, %v4230_v41  ;;  %v4371_v33 = vmul.f32 %v4355_v32, %v4035_v22  ;;  %v6822_v20 = vld [vmem:[%s7513_s23 + $0x1d4] ss:$8 sps:$4 sm:$0xff]  }
 0xd7a   : > { %v4237_v16 = vmul.f32 %v8319_v58, %v4221_v63  ;;  %v4158_v28 = vadd.f32 -1.4531521, %v4142_v21  ;;  %5129 = vmatpush1.bf16.msra.mxu1 %v6814_v11  ;;  %v4356_v18 = vsub.f32 1.0, %v4340_v40  ;;  %v4043_v0 = vsel %vm4027_vm1, 1.0, %v7240_v29  ;;  %v6820_v60 = vld [vmem:[%s7513_s23 + $0x1d0] ss:$8 sps:$4 sm:$0xff]  }
 0xd7b   : > { %v4236_v57 = vmul.f32 %v8323_v17, %v4220_v49  ;;  %v4347_v25 = vmul.f32 %v7004_v27, %v4267_v6  ;;  %v4333_v10 = vmul.f32 1.442695, %v4302_v53  ;;  %5130 = vmatprep.subr.bf16.mxu1 %v6819_v55  ;;  %v4373_v4 = vmul.f32 %v4357_v9, %v4037_v36  ;;  %v6825_v36 = vld [vmem:[%s7513_s23 + $0x1e4] ss:$8 sps:$4 sm:$0xff]  }
 0xd7c   : > { %v4253_v38 = vadd.f32 0.2548296, %v4237_v16  ;;  %v4174_v22 = vmul.f32 %v8352_v59, %v4158_v28  ;;  %v4262_v26 = vmul.f32 %v8289_v7, %v4246_v43  ;;  %v4387_v62 = vadd.f32 1.0, %v4371_v33 }
 0xd7d   : > { %v4252_v5 = vadd.f32 0.2548296, %v4236_v57  ;;  %v4363_v45 = vsub.f32 1.0, %v4347_v25  ;;  %v4372_v63 = vmul.f32 %v4356_v18, %v4036_v61  ;;  %7011 = vpow2.f32 %v4333_v10  ;;  %v6828_v25 = vld [vmem:[%s7513_s23 + $0x1f4] ss:$8 sps:$4 sm:$0xff]  }
 0xd7e   : > { %v4269_v50 = vmul.f32 %v8319_v58, %v4253_v38  ;;  %v7006_v2 = vpop.eup %7005  ;;  %v4190_v32 = vadd.f32 1.4214138, %v4174_v22  ;;  %5131 = vmatpush1.bf16.msra.mxu1 %v6817_v52  ;;  %v3995_v58 = vmul.f32 0.5, %v8228_v44  ;;  %v4389_v6 = vadd.f32 1.0, %v4373_v4 }
 0xd7f   : > { %v4268_v31 = vmul.f32 %v8323_v17, %v4252_v5  ;;  %v7008_v41 = vpop.eup %7007  ;;  %v4379_v11 = vmul.f32 %v4363_v45, %v4043_v0  ;;  %5132 = vmatprep.subr.bf16.mxu1 %v6822_v20  ;;  %v4045_v17 = vsel %vm4029_vm2, 1.0, %v7240_v29  ;;  %v4044_v44 = vsel %vm4028_vm3, 1.0, %v7240_v29 }
 0xd80   : > { %v4349_v34 = vmul.f32 %v7006_v2, %v4269_v50  ;;  %v7010_v7 = vpop.eup %7009  ;;  %v4206_v55 = vmul.f32 %v8352_v59, %v4190_v32  ;;  %v8393_v27 = vmul.f32 %v4387_v62, %v8336_v56  ;;  %v3989_v57 = vmul.f32 0.5, %v8190_v23  ;;  %v6831_v2 = vld [vmem:[%s7513_s23 + $0x204] ss:$8 sps:$4 sm:$0xff]  }
 0xd81   : > { %v4348_v40 = vmul.f32 %v7008_v41, %v4268_v31  ;;  %v4395_v49 = vadd.f32 1.0, %v4379_v11  ;;  %v4342_v16 = vmul.f32 %v7010_v7, %v4262_v26  ;;  %v4388_v52 = vadd.f32 1.0, %v4372_v63  ;;  %v6829_v11 = vld [vmem:[%s7513_s23 + $0x200] ss:$8 sps:$4 sm:$0xff]   ;;  %v6837_v63 = vld [vmem:[%s7513_s23 + $0x224] ss:$8 sps:$4 sm:$0xff]  }
 0xd82   : > { %v4365_v53 = vsub.f32 1.0, %v4349_v34  ;;  %v4222_v43 = vadd.f32 -0.28449672, %v4206_v55  ;;  %5133 = vmatpush1.bf16.msra.mxu1 %v6820_v60  ;;  %v3997_v38 = vmul.f32 0.5, %v8240_v54  ;;  %v3988_v20 = vmul.f32 0.5, %v8195_v19 }
 0xd83   : > { %v4364_v21 = vsub.f32 1.0, %v4348_v40  ;;  %v8395_v9 = vmul.f32 %v4395_v49, %v3995_v58  ;;  %5134 = vmatprep.subr.bf16.mxu1 %v6825_v36  ;;  %v3996_v23 = vmul.f32 0.5, %v8247_v30  ;;  %v8407_v0 = vmul.f32 %v4389_v6, %v3989_v57  ;;  %v6826_v54 = vld [vmem:[%s7513_s23 + $0x1f0] ss:$8 sps:$4 sm:$0xff]   ;;  %v6834_v34 = vld [vmem:[%s7513_s23 + $0x214] ss:$8 sps:$4 sm:$0xff]  }
 0xd84   : > { %v4381_v61 = vmul.f32 %v4365_v53, %v4045_v17  ;;  %v4238_v28 = vmul.f32 %v8352_v59, %v4222_v43  ;;  %v4358_v5 = vsub.f32 1.0, %v4342_v16  ;;  %v4404_v50 = vmul.f32 %v4388_v52, %v3988_v20  ;;  %v6841_v49 = vld [vmem:[%s7513_s23 + $0x240] ss:$8 sps:$4 sm:$0xff]   ;;  %v6846_v17 = vld [vmem:[%s7513_s23 + $0x254] ss:$8 sps:$4 sm:$0xff]  }
 0xd85   : > { %v4380_v33 = vmul.f32 %v4364_v21, %v4044_v44  ;;  %v4419_v47 = vpack.c.bf16 %v8395_v9, %v8393_v27  ;;  %v4038_v26 = vsel %vm4022_vm4, 1.0, %v7240_v29  ;;  %v3990_v58 = vmul.f32 0.5, %v8212_v13  ;;  %v6838_v13 = vld [vmem:[%s7513_s23 + $0x230] ss:$8 sps:$4 sm:$0xff]   ;;  %v6849_v55 = vld [vmem:[%s7513_s23 + $0x264] ss:$8 sps:$4 sm:$0xff]  }
 0xd86   : > { %v4397_v56 = vadd.f32 1.0, %v4381_v61  ;;  %v4254_v45 = vadd.f32 0.2548296, %v4238_v28  ;;  %5135 = vmatpush1.bf16.msra.mxu1 %v6823_v24  ;;  %v4374_v41 = vmul.f32 %v4358_v5, %v4038_v26  ;;  %v3998_v40 = vmul.f32 0.5, %v8274_v1  ;;  %v6843_v1 = vld [vmem:[%s7513_s23 + $0x244] ss:$8 sps:$4 sm:$0xff]  }
 0xd87   : > { %v4396_v18 = vadd.f32 1.0, %v4380_v33  ;;  %5136 = vmatprep.subr.bf16.mxu1 %v6828_v25  ;;  %v7012_v4 = vpop.eup %7011  ;;  %v6844_v53 = vld [vmem:[%s7513_s23 + $0x250] ss:$8 sps:$4 sm:$0xff]   ;;  %v6847_v6 = vld [vmem:[%s7513_s23 + $0x260] ss:$8 sps:$4 sm:$0xff]  }
 0xd88   : > { %v8409_v10 = vmul.f32 %v4397_v56, %v3997_v38  ;;  %v4270_v30 = vmul.f32 %v8352_v59, %v4254_v45  ;;  %v4046_v59 = vsel %vm4030_vm5, 1.0, %v7240_v29  ;;  %v4390_v35 = vadd.f32 1.0, %v4374_v41  ;;  %v6852_v16 = vld [vmem:[%s7513_s23 + $0x274] ss:$8 sps:$4 sm:$0xff]   ;;  %v6850_v44 = vld [vmem:[%s7513_s23 + $0x270] ss:$8 sps:$4 sm:$0xff]  }
 0xd89   : > { %v4412_v22 = vmul.f32 %v4396_v18, %v3996_v23  ;;  %v6855_v21 = vld [vmem:[%s7513_s23 + $0x284] ss:$8 sps:$4 sm:$0xff]   ;;  %v6853_v61 = vld [vmem:[%s7513_s23 + $0x280] ss:$8 sps:$4 sm:$0xff]   ;;  %v6858_v43 = vld [vmem:[%s7513_s23 + $0x294] ss:$8 sps:$4 sm:$0xff]  }
 0xd8a   : > { %v4421_v19 = vpack.c.bf16 %v8409_v10, %v8407_v0  ;;  %v4350_v62 = vmul.f32 %v7012_v4, %v4270_v30  ;;  %5137 = vmatpush1.bf16.msra.mxu1 %v6826_v54  ;;  %v8430_v36 = vmul.f32 %v4390_v35, %v3990_v58  ;;  %v6856_v24 = vld [vmem:[%s7513_s23 + $0x290] ss:$8 sps:$4 sm:$0xff]   ;;  %v6861_v57 = vld [vmem:[%s7513_s23 + $0x2a4] ss:$8 sps:$4 sm:$0xff]   ;;  %v6859_v52 = vld [vmem:[%s7513_s23 + $0x2a0] ss:$8 sps:$4 sm:$0xff]  }
 0xd8b   : > { %v4420_v31 = vpack.c.bf16 %v4412_v22, %v4404_v50  ;;  %5149 = vmatprep.subr.bf16.mxu1 %v6831_v2  ;;  %v6864_v33 = vld [vmem:[%s7513_s23 + $0x2b4] ss:$8 sps:$4 sm:$0xff]   ;;  %v6862_v25 = vld [vmem:[%s7513_s23 + $0x2b0] ss:$8 sps:$4 sm:$0xff]   ;;  %v6867_v38 = vld [vmem:[%s7513_s23 + $0x2c4] ss:$8 sps:$4 sm:$0xff]  }
 0xd8c   : > { %v4366_v32 = vsub.f32 1.0, %v4350_v62  ;;  %v6865_v56 = vld [vmem:[%s7513_s23 + $0x2c0] ss:$8 sps:$4 sm:$0xff]   ;;  %v6870_v28 = vld [vmem:[%s7513_s23 + $0x2d4] ss:$8 sps:$4 sm:$0xff]  }
 0xd8d   : > { %5139 = vmatmul.mubr.bf16.vlgmr.msra.gmra.mrb[24].mxu1 %v4417_v15  ;;  %v6840_v15 = vld [vmem:[%s7513_s23 + $0x234] ss:$8 sps:$4 sm:$0xff]   ;;  %v6868_v20 = vld [vmem:[%s7513_s23 + $0x2d0] ss:$8 sps:$4 sm:$0xff]   ;;  %v6873_v23 = vld [vmem:[%s7513_s23 + $0x2e4] ss:$8 sps:$4 sm:$0xff]  }
 0xd8e   : > { %v4382_v60 = vmul.f32 %v4366_v32, %v4046_v59  ;;  %5150 = vmatpush1.bf16.msra.mxu1 %v6829_v11  ;;  %5181 = vmatprep.mubr.bf16.mxu1 %v4420_v31  ;;  %v6871_v18 = vld [vmem:[%s7513_s23 + $0x2e0] ss:$8 sps:$4 sm:$0xff]   ;;  %v6876_v5 = vld [vmem:[%s7513_s23 + $0x2f4] ss:$8 sps:$4 sm:$0xff]   ;;  %v6874_v45 = vld [vmem:[%s7513_s23 + $0x2f0] ss:$8 sps:$4 sm:$0xff]  }
 0xd8f   : > { %5151 = vmatprep.subr.bf16.mxu1 %v6834_v34  ;;  %v6879_v54 = vld [vmem:[%s7513_s23 + $0x304] ss:$8 sps:$4 sm:$0xff]   ;;  %v6877_v50 = vld [vmem:[%s7513_s23 + $0x300] ss:$8 sps:$4 sm:$0xff]   ;;  %v6882_v22 = vld [vmem:[%s7513_s23 + $0x314] ss:$8 sps:$4 sm:$0xff]  }
 0xd90   : > { %v4398_v29 = vadd.f32 1.0, %v4382_v60  ;;  %v6880_v2 = vld [vmem:[%s7513_s23 + $0x310] ss:$8 sps:$4 sm:$0xff]   ;;  %v6885_v30 = vld [vmem:[%s7513_s23 + $0x324] ss:$8 sps:$4 sm:$0xff]  }
 0xd91   : > { %v6883_v4 = vld [vmem:[%s7513_s23 + $0x320] ss:$8 sps:$4 sm:$0xff]   ;;  %v6888_v26 = vld [vmem:[%s7513_s23 + $0x334] ss:$8 sps:$4 sm:$0xff]   ;;  %v6886_v31 = vld [vmem:[%s7513_s23 + $0x330] ss:$8 sps:$4 sm:$0xff]  }
 0xd92   : > { %v8432_v3 = vmul.f32 %v4398_v29, %v3998_v40  ;;  %5152 = vmatpush1.bf16.msra.mxu1 %v6832_v39  ;;  %v6891_v27 = vld [vmem:[%s7513_s23 + $0x344] ss:$8 sps:$4 sm:$0xff]   ;;  %v6889_v9 = vld [vmem:[%s7513_s23 + $0x340] ss:$8 sps:$4 sm:$0xff]   ;;  %v6892_v41 = vld [vmem:[%s7513_s23 + $0x350] ss:$8 sps:$4 sm:$0xff]  }
 0xd93   : > { %5153 = vmatprep.subr.bf16.mxu1 %v6837_v63  ;;  %v6897_v62 = vld [vmem:[%s7513_s23 + $0x364] ss:$8 sps:$4 sm:$0xff]   ;;  %v6895_v11 = vld [vmem:[%s7513_s23 + $0x360] ss:$8 sps:$4 sm:$0xff]   ;;  %v6900_v34 = vld [vmem:[%s7513_s23 + $0x374] ss:$8 sps:$4 sm:$0xff]  }
 0xd94   : > { %v4422_v7 = vpack.c.bf16 %v8432_v3, %v8430_v36  ;;  %v6898_v32 = vld [vmem:[%s7513_s23 + $0x370] ss:$8 sps:$4 sm:$0xff]   ;;  %v6903_v59 = vld [vmem:[%s7513_s23 + $0x384] ss:$8 sps:$4 sm:$0xff]   ;;  %v6901_v35 = vld [vmem:[%s7513_s23 + $0x380] ss:$8 sps:$4 sm:$0xff]  }
 0xd95   : > { %v6906_v60 = vld [vmem:[%s7513_s23 + $0x394] ss:$8 sps:$4 sm:$0xff]   ;;  %v6904_v39 = vld [vmem:[%s7513_s23 + $0x390] ss:$8 sps:$4 sm:$0xff]   ;;  %v6909_v63 = vld [vmem:[%s7513_s23 + $0x3a4] ss:$8 sps:$4 sm:$0xff]  }
 0xd96   : > { %5154 = vmatpush1.bf16.msra.mxu1 %v6835_v51  ;;  %v6907_v58 = vld [vmem:[%s7513_s23 + $0x3a0] ss:$8 sps:$4 sm:$0xff]   ;;  %v6912_v40 = vld [vmem:[%s7513_s23 + $0x3b4] ss:$8 sps:$4 sm:$0xff]   ;;  %v6910_v29 = vld [vmem:[%s7513_s23 + $0x3b0] ss:$8 sps:$4 sm:$0xff]  }
 0xd97   : > { %5155 = vmatprep.subr.bf16.mxu1 %v6840_v15  ;;  %v6915_v36 = vld [vmem:[%s7513_s23 + $0x3c4] ss:$8 sps:$4 sm:$0xff]   ;;  %v6913_v3 = vld [vmem:[%s7513_s23 + $0x3c0] ss:$8 sps:$4 sm:$0xff]   ;;  %v6918_v51 = vld [vmem:[%s7513_s23 + $0x3d4] ss:$8 sps:$4 sm:$0xff]  }
 0xd98   : > { %v6916_v15 = vld [vmem:[%s7513_s23 + $0x3d0] ss:$8 sps:$4 sm:$0xff]  }
 0xd9a   : > { %5156 = vmatpush1.bf16.msra.mxu1 %v6838_v13  ;;  %v6919_v13 = vld [vmem:[%s7513_s23 + $0x3e0] ss:$8 sps:$4 sm:$0xff]  }
 0xd9b   : > { %5157 = vmatprep.subr.bf16.mxu1 %v6843_v1  ;;  %v6924_v1 = vld [vmem:[%s7513_s23 + $0x3f4] ss:$8 sps:$4 sm:$0xff]  }
 0xd9e   : > { %5158 = vmatpush1.bf16.msra.mxu1 %v6841_v49  ;;  %v6922_v49 = vld [vmem:[%s7513_s23 + $0x3f0] ss:$8 sps:$4 sm:$0xff]  }
 0xd9f   : > { %5159 = vmatprep.subr.bf16.mxu1 %v6846_v17  ;;  %v5241_v17 = vsub.s32 3, %v7587_v12 }
 0xda2   : > { %5160 = vmatpush1.bf16.msra.mxu1 %v6844_v53  ;;  %v7023_v53 = vld [vmem:[%s7511_s21] sm:$0xff] }
 0xda3   : > { %5161 = vmatprep.subr.bf16.mxu1 %v6849_v55  ;;  %v5242_v55 = vrot.slane %v7023_v53, %v5241_v17 }
 0xda6   : > { %5162 = vmatpush1.bf16.msra.mxu1 %v6847_v6 }
 0xda7   : > { %5163 = vmatprep.subr.bf16.mxu1 %v6852_v16  ;;  %v7024_v16 = vld [vmem:[%s7511_s21 + $0x8] sm:$0xff] }
 0xdaa   : > { %5164 = vmatpush1.bf16.msra.mxu1 %v6850_v44  ;;  %v5246_v44 = vrot.slane %v7024_v16, %v5241_v17 }
 0xdab   : > { %5165 = vmatprep.subr.bf16.mxu1 %v6855_v21 }
 0xdae   : > { %5166 = vmatpush1.bf16.msra.mxu1 %v6853_v61 }
 0xdaf   : > { %5167 = vmatprep.subr.bf16.mxu1 %v6858_v43 }
 0xdb2   : > { %5168 = vmatpush1.bf16.msra.mxu1 %v6856_v24 }
 0xdb3   : > { %5169 = vmatprep.subr.bf16.mxu1 %v6861_v57 }
 0xdb6   : > { %5170 = vmatpush1.bf16.msra.mxu1 %v6859_v52 }
 0xdb7   : > { %5171 = vmatprep.subr.bf16.mxu1 %v6864_v33 }
 0xdba   : > { %5172 = vmatpush1.bf16.msra.mxu1 %v6862_v25 }
 0xdbb   : > { %5173 = vmatprep.subr.bf16.mxu1 %v6867_v38  ;;  %v7028_v38 = vld [vmem:[%s8660_s11 + $0x14] ss:$8 sps:$4 sm:$0xff] (!%p6198_p11)  }
 0xdbe   : > { %5174 = vmatpush1.bf16.msra.mxu1 %v6865_v56  ;;  %v5259_v56 = vld [vmem:[%s8659_s10] sm:$0x1] (!%p6198_p11) }
 0xdbf   : > { %5175 = vmatprep.subr.bf16.mxu1 %v6870_v28  ;;  %v7030_v28 = vld [vmem:[%s8660_s11 + $0x10] ss:$8 sps:$4 sm:$0xff] (!%p6198_p11)  }
 0xdc2   : > { %5176 = vmatpush1.bf16.msra.mxu1 %v6868_v20  ;;  %v7031_v20 = vld [vmem:[%s8660_s11 + $0x24] ss:$8 sps:$4 sm:$0xff] (!%p6198_p11)  }
 0xdc3   : > { %5177 = vmatprep.subr.bf16.mxu1 %v6873_v23  ;;  %v7033_v23 = vld [vmem:[%s8660_s11 + $0x20] ss:$8 sps:$4 sm:$0xff] (!%p6198_p11)  }
 0xdc6   : > { %5178 = vmatpush1.bf16.msra.mxu1 %v6871_v18  ;;  %v7034_v18 = vld [vmem:[%s8660_s11 + $0x34] ss:$8 sps:$4 sm:$0xff] (!%p6198_p11)  }
 0xdc7   : > { %5179 = vmatprep.subr.bf16.mxu1 %v6876_v5  ;;  %v7036_v5 = vld [vmem:[%s8660_s11 + $0x30] ss:$8 sps:$4 sm:$0xff] (!%p6198_p11)  }
 0xdca   : > { %5180 = vmatpush1.bf16.msra.mxu1 %v6874_v45  ;;  %v7037_v45 = vld [vmem:[%s8660_s11 + $0x44] ss:$8 sps:$4 sm:$0xff] (!%p6198_p11)  }
 0xdcb   : > { %5192 = vmatprep.subr.bf16.mxu1 %v6879_v54  ;;  %v7039_v54 = vld [vmem:[%s8660_s11 + $0x40] ss:$8 sps:$4 sm:$0xff] (!%p6198_p11)  }
 0xdcd   : > { %5182 = vmatmul.mubr.bf16.vlgmr.msra.gmra.mrb[24].mxu1 %v4419_v47  ;;  %v6894_v47 = vld [vmem:[%s7513_s23 + $0x354] ss:$8 sps:$4 sm:$0xff]  }
 0xdce   : > { %5193 = vmatpush1.bf16.msra.mxu1 %v6877_v50  ;;  %5224 = vmatprep.mubr.bf16.mxu1 %v4422_v7  ;;  %v6921_v7 = vld [vmem:[%s7513_s23 + $0x3e4] ss:$8 sps:$4 sm:$0xff]   ;;  %v7040_v50 = vld [vmem:[%s8660_s11 + $0x54] ss:$8 sps:$4 sm:$0xff] (!%p6198_p11)  }
 0xdcf   : > { %5194 = vmatprep.subr.bf16.mxu1 %v6882_v22  ;;  %v7042_v22 = vld [vmem:[%s8660_s11 + $0x50] ss:$8 sps:$4 sm:$0xff] (!%p6198_p11)  }
 0xdd2   : > { %5195 = vmatpush1.bf16.msra.mxu1 %v6880_v2  ;;  %v7043_v2 = vld [vmem:[%s8660_s11 + $0x64] ss:$8 sps:$4 sm:$0xff] (!%p6198_p11)  }
 0xdd3   : > { %5196 = vmatprep.subr.bf16.mxu1 %v6885_v30  ;;  %v7045_v30 = vld [vmem:[%s8660_s11 + $0x60] ss:$8 sps:$4 sm:$0xff] (!%p6198_p11)  }
 0xdd6   : > { %5197 = vmatpush1.bf16.msra.mxu1 %v6883_v4  ;;  %v7046_v4 = vld [vmem:[%s8660_s11 + $0x74] ss:$8 sps:$4 sm:$0xff] (!%p6198_p11)  }
 0xdd7   : > { %5198 = vmatprep.subr.bf16.mxu1 %v6888_v26  ;;  %v7048_v26 = vld [vmem:[%s8660_s11 + $0x70] ss:$8 sps:$4 sm:$0xff] (!%p6198_p11)  }
 0xdda   : > { %5199 = vmatpush1.bf16.msra.mxu1 %v6886_v31  ;;  %v7049_v31 = vld [vmem:[%s8660_s11 + $0x84] ss:$8 sps:$4 sm:$0xff] (!%p6198_p11)  }
 0xddb   : > { %5200 = vmatprep.subr.bf16.mxu1 %v6891_v27  ;;  %v7051_v27 = vld [vmem:[%s8660_s11 + $0x80] ss:$8 sps:$4 sm:$0xff] (!%p6198_p11)  }
 0xdde   : > { %5201 = vmatpush1.bf16.msra.mxu1 %v6889_v9  ;;  %v7052_v9 = vld [vmem:[%s8660_s11 + $0x94] ss:$8 sps:$4 sm:$0xff] (!%p6198_p11)  }
 0xddf   : > { %5202 = vmatprep.subr.bf16.mxu1 %v6894_v47  ;;  %v7054_v47 = vld [vmem:[%s8660_s11 + $0x90] ss:$8 sps:$4 sm:$0xff] (!%p6198_p11)  }
 0xde2   : > { %5203 = vmatpush1.bf16.msra.mxu1 %v6892_v41  ;;  %v7055_v41 = vld [vmem:[%s8660_s11 + $0xa4] ss:$8 sps:$4 sm:$0xff] (!%p6198_p11)  }
 0xde3   : > { %5204 = vmatprep.subr.bf16.mxu1 %v6897_v62  ;;  %v7057_v62 = vld [vmem:[%s8660_s11 + $0xa0] ss:$8 sps:$4 sm:$0xff] (!%p6198_p11)  }
 0xde6   : > { %5205 = vmatpush1.bf16.msra.mxu1 %v6895_v11  ;;  %v7058_v11 = vld [vmem:[%s8660_s11 + $0xb4] ss:$8 sps:$4 sm:$0xff] (!%p6198_p11)  }
 0xde7   : > { %5206 = vmatprep.subr.bf16.mxu1 %v6900_v34  ;;  %v7060_v34 = vld [vmem:[%s8660_s11 + $0xb0] ss:$8 sps:$4 sm:$0xff] (!%p6198_p11)  }
 0xdea   : > { %5207 = vmatpush1.bf16.msra.mxu1 %v6898_v32  ;;  %v7061_v32 = vld [vmem:[%s8660_s11 + $0xc4] ss:$8 sps:$4 sm:$0xff] (!%p6198_p11)  }
 0xdeb   : > { %5208 = vmatprep.subr.bf16.mxu1 %v6903_v59  ;;  %v7063_v59 = vld [vmem:[%s8660_s11 + $0xc0] ss:$8 sps:$4 sm:$0xff] (!%p6198_p11)  }
 0xdee   : > { %5209 = vmatpush1.bf16.msra.mxu1 %v6901_v35  ;;  %v7064_v35 = vld [vmem:[%s8660_s11 + $0xd4] ss:$8 sps:$4 sm:$0xff] (!%p6198_p11)  }
 0xdef   : > { %5210 = vmatprep.subr.bf16.mxu1 %v6906_v60  ;;  %v7066_v60 = vld [vmem:[%s8660_s11 + $0xd0] ss:$8 sps:$4 sm:$0xff] (!%p6198_p11)  }
 0xdf2   : > { %5211 = vmatpush1.bf16.msra.mxu1 %v6904_v39  ;;  %v7067_v39 = vld [vmem:[%s8660_s11 + $0xe4] ss:$8 sps:$4 sm:$0xff] (!%p6198_p11)  }
 0xdf3   : > { %5212 = vmatprep.subr.bf16.mxu1 %v6909_v63  ;;  %v7069_v63 = vld [vmem:[%s8660_s11 + $0xe0] ss:$8 sps:$4 sm:$0xff] (!%p6198_p11)  }
 0xdf6   : > { %5213 = vmatpush1.bf16.msra.mxu1 %v6907_v58  ;;  %v7070_v58 = vld [vmem:[%s8660_s11 + $0xf4] ss:$8 sps:$4 sm:$0xff] (!%p6198_p11)  }
 0xdf7   : > { %5214 = vmatprep.subr.bf16.mxu1 %v6912_v40  ;;  %v7072_v40 = vld [vmem:[%s8660_s11 + $0xf0] ss:$8 sps:$4 sm:$0xff] (!%p6198_p11)  }
 0xdfa   : > { %5215 = vmatpush1.bf16.msra.mxu1 %v6910_v29 }
 0xdfb   : > { %5216 = vmatprep.subr.bf16.mxu1 %v6915_v36 }
 0xdfe   : > { %5217 = vmatpush1.bf16.msra.mxu1 %v6913_v3 }
 0xdff   : > { %5218 = vmatprep.subr.bf16.mxu1 %v6918_v51 }
 0xe02   : > { %5219 = vmatpush1.bf16.msra.mxu1 %v6916_v15 }
 0xe03   : > { %5220 = vmatprep.subr.bf16.mxu1 %v6921_v7 }
 0xe06   : > { %5221 = vmatpush1.bf16.msra.mxu1 %v6919_v13  ;;  %v5341_v13 = vld [vmem:[%s8661_s12] sm:$0x3] (!%p6198_p11) }
 0xe07   : > { %5222 = vmatprep.subr.bf16.mxu1 %v6924_v1  ;;  %v5346_v1 = vrot.slane (!%p6198_p11), %v5341_v13, %v7686_v37 }
 0xe0a   : > { %5223 = vmatpush1.bf16.msra.mxu1 %v6922_v49  ;;  %v5350_v49 = vrot.slane (!%p6198_p11), %v5341_v13, %v8010_v14 }
 0xe0d   : > { %5225 = vmatmul.mubr.bf16.vlgmr.msra.gmra.mrb[24].mxu1 %v4421_v19 }
 0xee0   : > { %v5226_v6 = vpop.f32.mrb[24].mxu1 }
 0xee1   : > { %v5235_v21 = vadd.f32 %v5226_v6, %v7794_v42  ;;  %v5228_v61 = vpop.f32.mrb[25].mxu1 }
 0xee2   : > { %v5236_v43 = vadd.f32 %v5228_v61, %v7796_v8  ;;  %v5230_v24 = vpop.f32.mrb[26].mxu1  ;;  %5258 = sbr.rel (%p6198_p11) target bundleno = 4256 (0x10a0), region = 92  ;;  %v7241_v8 = vmov (!%p6198_p11), 0  }
 0xee3   : > { %v5247_v57 = vadd.f32 %v5242_v55, %v5235_v21  ;;  %v5237_v52 = vadd.f32 %v5230_v24, %v7798_v46  ;;  %v5232_v33 = vpop.f32.mrb[27].mxu1  ;;  %5298 = vmatprep.mubr.bf16.mxu0 (!%p6198_p11), %v7241_v8  ;;  %v7025_v46 = vld [vmem:[%s8660_s11 + $0x4] ss:$8 sps:$4 sm:$0xff] (!%p6198_p11)  }
 0xee4   : > { %v5248_v25 = vadd.f32 %v5246_v44, %v5236_v43  ;;  %v5238_v0 = vadd.f32 %v5232_v33, %v7800_v48  ;;  %v7027_v48 = vld [vmem:[%s8660_s11] ss:$8 sps:$4 sm:$0xff] (!%p6198_p11)   ;;  %5513 = vmatprep.subr.bf16.mxu1 (!%p6198_p11), %v7025_v46 }
 0xee5   : > { %5251 = vst [vmem:[#allocation2] sm:$0xff] %v5247_v57  ;;  %v5249_v12 = vadd.f32 %v5242_v55, %v5237_v52  ;;  %5514 = vmatpush1.bf16.msra.mxu1 (!%p6198_p11), %v7027_v48 }
 0xee6   : > { %5252 = vst [vmem:[#allocation2 + $0x8] sm:$0xff] %v5248_v25  ;;  %v5250_v10 = vadd.f32 %v5246_v44, %v5238_v0  ;;  %5515 = vmatprep.subr.bf16.mxu1 (!%p6198_p11), %v7028_v38 }
 0xee7   : > { %5253 = vst [vmem:[#allocation2 + $0x10] sm:$0xff] %v5249_v12  ;;  %v5260_v19 = vpack.c.bf16 (!%p6198_p11), %v5249_v12, %v5247_v57 }
 0xee8   : > { %5254 = vst [vmem:[#allocation2 + $0x18] sm:$0xff] %v5250_v10  ;;  %v5261_v42 = vpack.c.bf16 (!%p6198_p11), %v5250_v10, %v5248_v25 }
 0xee9   : > { %5516 = vmatpush1.bf16.msra.mxu1 %v7030_v28 }
 0xeea   : > { %5266 = vmatprep.subr.bf16.mxu0 %v5261_v42  ;;  %5517 = vmatprep.subr.bf16.mxu1 %v7031_v20 }
 0xeeb   : > { %5267 = vmatpush1.bf16.msra.mxu0 %v5260_v19 }
 0xeed   : > { %5518 = vmatpush1.bf16.msra.mxu1 %v7033_v23 }
 0xeee   : > { %6199 = vmatmul.mubr.msk.bf16.vlgmr.msra.gmra.mrb[0].mxu0 %vm5262_vm6, %v5259_v56  ;;  %5519 = vmatprep.subr.bf16.mxu1 %v7034_v18 }
 0xef1   : > { %5520 = vmatpush1.bf16.msra.mxu1 %v7036_v5 }
 0xef2   : > { %5521 = vmatprep.subr.bf16.mxu1 %v7037_v45 }
 0xef5   : > { %5522 = vmatpush1.bf16.msra.mxu1 %v7039_v54 }
 0xef6   : > { %5523 = vmatprep.subr.bf16.mxu1 %v7040_v50 }
 0xef9   : > { %5524 = vmatpush1.bf16.msra.mxu1 %v7042_v22 }
 0xefa   : > { %5525 = vmatprep.subr.bf16.mxu1 %v7043_v2 }
 0xefd   : > { %5526 = vmatpush1.bf16.msra.mxu1 %v7045_v30 }
 0xefe   : > { %5527 = vmatprep.subr.bf16.mxu1 %v7046_v4 }
 0xf01   : > { %5528 = vmatpush1.bf16.msra.mxu1 %v7048_v26 }
 0xf02   : > { %5529 = vmatprep.subr.bf16.mxu1 %v7049_v31 }
 0xf05   : > { %5530 = vmatpush1.bf16.msra.mxu1 %v7051_v27 }
 0xf06   : > { %5531 = vmatprep.subr.bf16.mxu1 %v7052_v9 }
 0xf09   : > { %5532 = vmatpush1.bf16.msra.mxu1 %v7054_v47 }
 0xf0a   : > { %5533 = vmatprep.subr.bf16.mxu1 %v7055_v41 }
 0xf0d   : > { %5534 = vmatpush1.bf16.msra.mxu1 %v7057_v62 }
 0xf0e   : > { %5535 = vmatprep.subr.bf16.mxu1 %v7058_v11 }
 0xf11   : > { %5536 = vmatpush1.bf16.msra.mxu1 %v7060_v34 }
 0xf12   : > { %5537 = vmatprep.subr.bf16.mxu1 %v7061_v32 }
 0xf15   : > { %5538 = vmatpush1.bf16.msra.mxu1 %v7063_v59 }
 0xf16   : > { %5539 = vmatprep.subr.bf16.mxu1 %v7064_v35 }
 0xf19   : > { %5540 = vmatpush1.bf16.msra.mxu1 %v7066_v60 }
 0xf1a   : > { %5541 = vmatprep.subr.bf16.mxu1 %v7067_v39 }
 0xf1d   : > { %5542 = vmatpush1.bf16.msra.mxu1 %v7069_v63 }
 0xf1e   : > { %5543 = vmatprep.subr.bf16.mxu1 %v7070_v58 }
 0xf21   : > { %5544 = vmatpush1.bf16.msra.mxu1 %v7072_v40 }
 0xfc1   : > { %v5300_v29 = vpop.f32.mrb[0].mxu0 }
 0xfc2   : > { %v5302_v36 = vpop.f32.mrb[1].mxu0  ;;  %v5339_v15 = vpack.c.bf16 %v5300_v29, %v5300_v29 }
 0xfc3   : > { %v5304_v3 = vpop.f32.mrb[2].mxu0  ;;  %v5340_v51 = vpack.c.bf16 %v5302_v36, %v5302_v36 }
 0xfc4   : > { %v5305_v7 = vpop.f32.mrb[3].mxu0 }
 0xfc5   : > { %5545 = vmatprep.mubr.bf16.mxu1 %v5340_v51 }
 0xfc6   : > { %5546 = vmatmul.mubr.bf16.vlgmr.msra.gmra.mrb[0].mxu1 %v5339_v15 }
0x1099   : > { %v5547_v17 = vpop.f32.mrb[0].mxu1 }
0x109a   : > { %v5548_v53 = vadd.f32 %v5547_v17, %v5346_v1  ;;  %v5549_v55 = vpop.f32.mrb[1].mxu1 }
0x109b   : > { %v5550_v6 = vadd.f32 %v5549_v55, %v5350_v49  ;;  %v5551_v16 = vpop.f32.mrb[2].mxu1 }
0x109c   : > { %v5552_v44 = vpop.f32.mrb[3].mxu1 }
0x109d   : > { %v5556_v21 = vcombine.low %v5548_v53, %v5550_v6 }
0x109f   : > { %6232 = vst.sshfl [vmem:[#allocation9] sm:$0x33 pattern:$0x76325410] %v5556_v21 }
0x10a0 PF: > { %p6352_p5 = scmp.eq.s32.totalorder %s7395_s16, 1  ;;  %s7242_s27 = smov [#allocation9]  }
0x10a1   : > { %s5573_s6 = sshll.u32 %s7242_s27, 4  ;;  %s5574_s6 = int_to_ptr.vmem [resolvable:$true] %s5573_s6 }
0x10a2   : > { %s7161_s29 = scalar_lea.vmem %s5574_s6, 64  ;;  %p7168_p9 = scmp.lt.s32.totalorder %s5574_s6, %s5574_s6 }
0x10a3   : > { %p7162_p4 = scmp.ne.s32.totalorder %s5574_s6, %s7161_s29  ;;  %p7169_p13 = scmp.lt.s32.totalorder %s7161_s29, %s7161_s29 }
0x10a5   : > { %p7163_p8 = pnand %p7162_p4, %p6352_p5  ;;  %p7170_p0 = por %p7169_p13, %p7168_p9 }
0x10a7   : > { %p7164_p10 = pneg %p7163_p8 }
0x10a9   : > { %p7171_p7 = pnand %p7170_p0, %p7164_p10 }
0x10ab   : > { %7174 = shalt.err (!%p7171_p7)
}
0x10ac   : > { %s7175_s20 = scalar_lea.hbm %s8662_s13, 64 }
0x10ad   : > { %p7176_p12 = scmp.ne.s32.totalorder %s8662_s13, %s7175_s20  ;;  %p7181_p6 = scmp.lt.u32.totalorder %s7175_s20, %s8662_s13 }
0x10af   : > { %p7177_p1 = pnand %p7176_p12, %p6352_p5 }
0x10b1   : > { %p7178_p2 = pneg %p7177_p1 }
0x10b3   : > { %p7183_p3 = pnand %p7181_p6, %p7178_p2 }
0x10b5   : > { %7186 = shalt.err (!%p7183_p3)
}
0x10b6   : > { %6335 = dma.vmem_to_hbm [thread:$0]  (%p6352_p5), %s5574_s6, 64, %s8662_s13, [#allocation5]  }
0x10b7   : > { %7212 = dma.done.wait (%p6352_p5), [#allocation5], 64  }
0x10b8   : > { %7214 = vsyncadd (%p6352_p5), [#allocation5], 4294967232 }
0x10b9 PF: > { %s8691_s28 = sld [smem:[#allocation14_spill]]  ;;  %s8692_s30 = sld [smem:[#allocation13_spill]] }
0x10ba   : > { %s8693_s27 = sld [smem:[#allocation15_spill]]  ;;  %s8694_s25 = smov %s7221_s26 }
0x10bf   : > { %p25_p11 = scmp.ge.s32.totalorder %s8691_s28, 4   ;;  %s8695_s26 = smov %s8692_s30 }
0x10c1   :  { %27 = sbr.rel (!%p25_p11) target bundleno = 8 (0x8), region = 142 }
0x10c8   :  { %5586 = vsyncpa [#allocation4], 1 }
0x10c9   :  { %5588 = vsyncpa [#allocation4 + $0x1], 1 }
0x10ca   :  { %5589 = vsyncpa [#allocation7], 1 }
0x10cb   :  { %5591 = vsyncpa [#allocation7 + $0x1], 1 }
0x10cc   :  { %5592 = vsyncpa [#allocation5], 1 }
0x10cd   :  { %5594 = vsyncpa [#allocation5 + $0x1], 1 }

</bundles_post_ra>
